<compile_context>
chip_gen: v7x
topology: tpu7x:2x2x1
jax: 0.10.0
libtpu: 0.0.40
codegen_flags: <defaults>
</compile_context>

<pallas_src>
import jax
import jax.numpy as jnp
from jax.experimental import pallas as pl
from jax.experimental.pallas import tpu as pltpu

NEG_SLOPE = 0.2        # LeakyReLU slope `l`
D_IN = 4 * 64 * 64     # 16384
D_H1 = 1024
D_H2 = 256
D_OUT = 1
TK = 4096              # K-tile of the first (large) matmul: 4 K-steps
N_SPLIT = 2            # split of the layer-1 output columns (parallel axis)
D_H1_HALF = D_H1 // N_SPLIT


def _leaky_relu(x, slope):
    return jnp.where(x > 0, x, slope * x)


def mlp_kernel(x_ref, w1_ref, b1_ref, w2_ref, o_ref, acc_ref):
    """Layer 1 (K-tiled, column-split) + partial layer 2.

    Grid: (p, k) with p in {0, 1} splitting the 1024 hidden units into halves
    ("parallel" -> one half per TensorCore on v7x) and k iterating K-tiles of
    the big matmul ("arbitrary" reduction).  The (B_pad, 512) f32 accumulator
    lives in VMEM scratch; b1 is folded into its init.  On the last K step we
    apply LeakyReLU and emit the partial layer-2 product for this half.
    """
    k = pl.program_id(1)

    @pl.when(k == 0)
    def _():
        # Fold b1 into the accumulator init.
        acc_ref[...] = jnp.broadcast_to(b1_ref[...], acc_ref.shape)

    # Layer 1 partial: (B_pad, TK) bf16 @ (TK, 512) bf16 -> f32 accumulate.
    acc_ref[...] += jnp.dot(x_ref[...], w1_ref[...],
                            preferred_element_type=jnp.float32)

    @pl.when(k == pl.num_programs(1) - 1)
    def _():
        h1_half = _leaky_relu(acc_ref[...], NEG_SLOPE)            # (B_pad, 512)
        # Partial layer 2: (B_pad, 512) @ (512, 256) -> this half's h2 term.
        o_ref[...] = jnp.dot(h1_half, w2_ref[...],
                             preferred_element_type=jnp.float32)[None]


@jax.jit
def energy_function(x, w1, b1, w2, b2, w3, b3):
    """x: (B, 4, 64, 64) float32 -> energies, shape (B,) (torch .squeeze())."""
    B = x.shape[0]
    # Pad batch to a multiple of 8 (sublane).  Larger real batches amortize
    # the W1 HBM stream at near-constant latency.
    B_pad = max(8, ((B + 7) // 8) * 8)

    x_flat = x.reshape(B, -1)                                   # NCHW flatten
    x_pad = (jnp.zeros((B_pad, D_IN), jnp.bfloat16)
             .at[:B].set(x_flat.astype(jnp.bfloat16)))
    w1_bf = w1.astype(jnp.bfloat16)                             # stream bf16
    b1_2d = b1.reshape(1, D_H1).astype(jnp.float32)
    w2_f32 = w2.astype(jnp.float32)

    n_k = D_IN // TK

    partial_h2 = pl.pallas_call(
        mlp_kernel,
        out_shape=jax.ShapeDtypeStruct((N_SPLIT, B_pad, D_H2), jnp.float32),
        grid_spec=pltpu.PrefetchScalarGridSpec(
            num_scalar_prefetch=0,
            grid=(N_SPLIT, n_k),
            in_specs=[
                pl.BlockSpec((B_pad, TK), lambda p, k: (0, k)),        # x tile
                pl.BlockSpec((TK, D_H1_HALF), lambda p, k: (k, p)),    # W1 tile
                pl.BlockSpec((1, D_H1_HALF), lambda p, k: (0, p)),     # b1 half
                pl.BlockSpec((D_H1_HALF, D_H2), lambda p, k: (p, 0)),  # W2 rows
            ],
            out_specs=pl.BlockSpec((1, B_pad, D_H2), lambda p, k: (p, 0, 0)),
            scratch_shapes=[pltpu.VMEM((B_pad, D_H1_HALF), jnp.float32)],
        ),
        compiler_params=pltpu.CompilerParams(
            dimension_semantics=("parallel", "arbitrary"),
            vmem_limit_bytes=32 << 20,
        ),
    )(x_pad, w1_bf, b1_2d, w2_f32)

    # Tiny epilogue in plain XLA: combine halves, bias+LeakyReLU, layer 3.
    h2 = _leaky_relu(partial_h2.sum(axis=0) + b2.reshape(1, D_H2), NEG_SLOPE)
    out = jnp.dot(h2, w3, preferred_element_type=jnp.float32) + b3.reshape(1, D_OUT)
    return jnp.squeeze(out[:B, :])                # matches torch .squeeze()


def init_params(key):
    """PyTorch nn.Linear default init, weights stored (in, out)."""
    ks = jax.random.split(key, 6)

    def lin(kw, kb, fan_in, fan_out):
        bound = 1.0 / jnp.sqrt(fan_in)
        w = jax.random.uniform(kw, (fan_in, fan_out), jnp.float32, -bound, bound)
        b = jax.random.uniform(kb, (fan_out,), jnp.float32, -bound, bound)
        return w, b

    w1, b1 = lin(ks[0], ks[1], D_IN, D_H1)
    w2, b2 = lin(ks[2], ks[3], D_H1, D_H2)
    w3, b3 = lin(ks[4], ks[5], D_H2, D_OUT)
    return w1, b1, w2, b2, w3, b3


def reference(x, w1, b1, w2, b2, w3, b3):
    hp = jax.lax.Precision.HIGHEST
    h = x.reshape(x.shape[0], -1)
    h = jnp.dot(h, w1, precision=hp) + b1
    h = jnp.where(h > 0, h, NEG_SLOPE * h)
    h = jnp.dot(h, w2, precision=hp) + b2
    h = jnp.where(h > 0, h, NEG_SLOPE * h)
    h = jnp.dot(h, w3, precision=hp) + b3
    return jnp.squeeze(h)


if __name__ == "__main__":
    key = jax.random.PRNGKey(0)
    kx, kp = jax.random.split(key)

    # Module dictates the feature shape: (B, 4, 64, 64). Small batch = 2.
    x = jax.random.normal(kx, (2, 4, 64, 64), jnp.float32)
    params = init_params(kp)

    out = energy_function(x, *params)
    out = jax.block_until_ready(out)

    ref = reference(x, *params)
    assert out.shape == ref.shape == (2,), (out.shape, ref.shape)
    # bf16-streamed W1/x with f32 accumulation: comfortably within 2e-2.
    assert jnp.allclose(out, ref, rtol=2e-2, atol=2e-2), (out, ref)

    print("KERNEL_OK")
</pallas_src>

<mosaic_0001>
module attributes {stable_mosaic.version = 11 : i64} {
  func.func @mlp_kernel(%arg0: i32, %arg1: i32, %arg2: memref<8x4096xbf16, #tpu.memory_space<vmem>>, %arg3: memref<4096x512xbf16, #tpu.memory_space<vmem>>, %arg4: memref<1x512xf32, #tpu.memory_space<vmem>>, %arg5: memref<512x256xf32, #tpu.memory_space<vmem>>, %arg6: memref<1x8x256xf32, #tpu.memory_space<vmem>>, %arg7: memref<8x512xf32, #tpu.memory_space<vmem>>) attributes {dimension_semantics = [#tpu.dimension_semantics<parallel>, #tpu.dimension_semantics<arbitrary>], iteration_bounds = array<i64: 2, 4>, scalar_prefetch = 0 : i64, scratch_operands = 1 : i64, tpu.core_type = #tpu.core_type<tc>, window_params = [{transform_indices = @transform_0, window_bounds = array<i64: 8, 4096>}, {transform_indices = @transform_1, window_bounds = array<i64: 4096, 512>}, {transform_indices = @transform_2, window_bounds = array<i64: 1, 512>}, {transform_indices = @transform_3, window_bounds = array<i64: 512, 256>}, {transform_indices = @transform_4, window_bounds = array<i64: 1, 8, 256>}]} {
    %c0_i32 = arith.constant 0 : i32
    %0 = arith.cmpi eq, %arg1, %c0_i32 : i32
    %1 = arith.extui %0 : i1 to i32
    %c0_i32_0 = arith.constant 0 : i32
    %2 = arith.cmpi ne, %1, %c0_i32_0 : i32
    scf.if %2 {
      %c0_9 = arith.constant 0 : index
      %c0_10 = arith.constant 0 : index
      %12 = vector.load %arg4[%c0_9, %c0_10] : memref<1x512xf32, #tpu.memory_space<vmem>>, vector<1x512xf32>
      %13 = vector.shape_cast %12 : vector<1x512xf32> to vector<1x512xf32>
      %14 = vector.broadcast %13 : vector<1x512xf32> to vector<8x512xf32>
      %c0_11 = arith.constant 0 : index
      %c0_12 = arith.constant 0 : index
      %15 = vector.load %arg7[%c0_11, %c0_12] : memref<8x512xf32, #tpu.memory_space<vmem>>, vector<8x512xf32>
      tpu.vector_store %arg7[%c0_11, %c0_12], %14 {strides = array<i32>} : memref<8x512xf32, #tpu.memory_space<vmem>>, vector<8x512xf32>,
    } else {
    }
    %c0 = arith.constant 0 : index
    %c0_1 = arith.constant 0 : index
    %3 = vector.load %arg7[%c0, %c0_1] : memref<8x512xf32, #tpu.memory_space<vmem>>, vector<8x512xf32>
    %c0_2 = arith.constant 0 : index
    %c0_3 = arith.constant 0 : index
    %4 = vector.load %arg2[%c0_2, %c0_3] : memref<8x4096xbf16, #tpu.memory_space<vmem>>, vector<8x4096xbf16>
    %c0_4 = arith.constant 0 : index
    %c0_5 = arith.constant 0 : index
    %5 = vector.load %arg3[%c0_4, %c0_5] : memref<4096x512xbf16, #tpu.memory_space<vmem>>, vector<4096x512xbf16>
    %cst = arith.constant dense<0.000000e+00> : vector<8x512xf32>
    %6 = tpu.matmul %4, %5, %cst {dimension_numbers = #tpu.dot_dimension_numbers<[1], [0], [0], [1], [0, 0, 1, 1], [], []>} : vector<8x4096xbf16>, vector<4096x512xbf16>, vector<8x512xf32> -> vector<8x512xf32>
    %7 = arith.addf %3, %6 : vector<8x512xf32>
    %c0_6 = arith.constant 0 : index
    %c0_7 = arith.constant 0 : index
    %8 = vector.load %arg7[%c0_6, %c0_7] : memref<8x512xf32, #tpu.memory_space<vmem>>, vector<8x512xf32>
    tpu.vector_store %arg7[%c0_6, %c0_7], %7 {strides = array<i32>} : memref<8x512xf32, #tpu.memory_space<vmem>>, vector<8x512xf32>,
    %c3_i32 = arith.constant 3 : i32
    %9 = arith.cmpi eq, %arg1, %c3_i32 : i32
    %10 = arith.extui %9 : i1 to i32
    %c0_i32_8 = arith.constant 0 : i32
    %11 = arith.cmpi ne, %10, %c0_i32_8 : i32
    scf.if %11 {
      %c0_9 = arith.constant 0 : index
      %c0_10 = arith.constant 0 : index
      %12 = vector.load %arg7[%c0_9, %c0_10] : memref<8x512xf32, #tpu.memory_space<vmem>>, vector<8x512xf32>
      %cst_11 = arith.constant 0.000000e+00 : f32
      %13 = vector.broadcast %cst_11 : f32 to vector<8x512xf32>
      %14 = arith.cmpf ogt, %12, %13 : vector<8x512xf32>
      %cst_12 = arith.constant 2.000000e-01 : f32
      %15 = vector.broadcast %cst_12 : f32 to vector<8x512xf32>
      %16 = arith.mulf %15, %12 : vector<8x512xf32>
      %17 = arith.select %14, %12, %16 : vector<8x512xi1>, vector<8x512xf32>
      %c0_13 = arith.constant 0 : index
      %c0_14 = arith.constant 0 : index
      %18 = vector.load %arg5[%c0_13, %c0_14] : memref<512x256xf32, #tpu.memory_space<vmem>>, vector<512x256xf32>
      %cst_15 = arith.constant dense<0.000000e+00> : vector<8x256xf32>
      %19 = tpu.matmul %17, %18, %cst_15 {dimension_numbers = #tpu.dot_dimension_numbers<[1], [0], [0], [1], [0, 0, 1, 1], [], []>} : vector<8x512xf32>, vector<512x256xf32>, vector<8x256xf32> -> vector<8x256xf32>
      %20 = vector.shape_cast %19 : vector<8x256xf32> to vector<1x8x256xf32>
      %c0_16 = arith.constant 0 : index
      %c0_17 = arith.constant 0 : index
      %c0_18 = arith.constant 0 : index
      %21 = vector.load %arg6[%c0_16, %c0_17, %c0_18] : memref<1x8x256xf32, #tpu.memory_space<vmem>>, vector<1x8x256xf32>
      tpu.vector_store %arg6[%c0_16, %c0_17, %c0_18], %20 {strides = array<i32>} : memref<1x8x256xf32, #tpu.memory_space<vmem>>, vector<1x8x256xf32>,
    } else {
    }
    return
  }
  func.func @transform_0(%arg0: i32, %arg1: i32) -> (i32, i32) {
    %c0_i32 = arith.constant 0 : i32
    %c0_i32_0 = arith.constant 0 : i32
    return %c0_i32, %arg1 : i32, i32
  }
  func.func @transform_1(%arg0: i32, %arg1: i32) -> (i32, i32) {
    %c0_i32 = arith.constant 0 : i32
    return %arg1, %arg0 : i32, i32
  }
  func.func @transform_2(%arg0: i32, %arg1: i32) -> (i32, i32) {
    %c0_i32 = arith.constant 0 : i32
    %c0_i32_0 = arith.constant 0 : i32
    return %c0_i32, %arg0 : i32, i32
  }
  func.func @transform_3(%arg0: i32, %arg1: i32) -> (i32, i32) {
    %c0_i32 = arith.constant 0 : i32
    %c0_i32_0 = arith.constant 0 : i32
    return %arg0, %c0_i32 : i32, i32
  }
  func.func @transform_4(%arg0: i32, %arg1: i32) -> (i32, i32, i32) {
    %c0_i32 = arith.constant 0 : i32
    %c0_i32_0 = arith.constant 0 : i32
    %c0_i32_1 = arith.constant 0 : i32
    return %arg0, %c0_i32, %c0_i32_0 : i32, i32, i32
  }
}

</mosaic_0001>

<bundles_post_ra>
// kernel: energy_function.1
= control target key start
LH: loop header
LB: loop body
LE: loop exit
PB: predicated region body
PF: predicated region fallthrough
CT: control target
= control target key end

     0   :  { %s17662_s0 = inlined_call_operand.hbm [shape: bf16[8,16384], index: 0, kind: input, shape index: {}]   ;;  %s17663_s1 = inlined_call_operand.vmem [shape: bf16[16384,1024], index: 1, kind: input, shape index: {}]   ;;  %s17664_s2 = inlined_call_operand.hbm [shape: f32[1,1024], index: 2, kind: input, shape index: {}]   ;;  %s17665_s3 = inlined_call_operand.hbm [shape: f32[1024,256], index: 3, kind: input, shape index: {}]   ;;  %s17666_s4 = inlined_call_operand.hbm [shape: f32[2,8,256], index: 4, kind: output, shape index: {}]  }
   0x1   :  { %17679 = sst [smem:[#allocation25_spill]] %s17662_s0 }
   0x2   :  { %17680 = sst [smem:[#allocation26_spill]] %s17666_s4 }
   0x3   :  { %9 = vsyncpa [#allocation4], 0 }
   0x4   :  { %11 = vsyncpa [#allocation4 + $0x1], 0 }
   0x5   :  { %12 = vsyncpa [#allocation8], 0 }
   0x6   :  { %14 = vsyncpa [#allocation8 + $0x1], 0 }
   0x7   :  { %15 = vsyncpa [#allocation5], 0 }
   0x8   :  { %17 = vsyncpa [#allocation5 + $0x1], 0  ;;  %s14793_s15 = smov 0   ;;  %s14795_s16 = smov 0  }
   0x9   :  { %s14797_s17 = smov 0   ;;  %s14799_s18 = smov 0  }
   0xa   :  { %s14801_s19 = smov 0   ;;  %s14803_s20 = smov 0  }
   0xb   :  { %s14805_s21 = smov 0   ;;  %s14807_s22 = smov 0  }
   0xc   :  { %s14809_s23 = smov 0   ;;  %s14811_s24 = smov 0  }
   0xd   :  { %s14813_s25 = smov 0   ;;  %s14815_s26 = smov 0  }
   0xe   :  { %s14817_s27 = smov 0  }
   0xf LB: > { %17681 = sst [smem:[#allocation14_spill]] %s14696_s15  ;;  %s14857_s28 = sadd.s32 4294967295, %s14744_s27   ;;  %s14744_s27 = sphi %s14817_s27, %s23_s27   ;;  %s14740_s26 = sphi %s14815_s26, %s17737_s26   ;;  %s14736_s25 = sphi %s14813_s25, %s17736_s25   ;;  %s14732_s24 = sphi %s14811_s24, %s17735_s24   ;;  %s14728_s23 = sphi %s14809_s23, %s17734_s23   ;;  %s14724_s22 = sphi %s14807_s22, %s17733_s22   ;;  %s14720_s21 = sphi %s14805_s21, %s17732_s21   ;;  %s14716_s20 = sphi %s14803_s20, %s17731_s20   ;;  %s14712_s19 = sphi %s14801_s19, %s17730_s19   ;;  %s14708_s18 = sphi %s14799_s18, %s17729_s18   ;;  %s14704_s17 = sphi %s14797_s17, %s17728_s17   ;;  %s14700_s16 = sphi %s14795_s16, %s17727_s16   ;;  %s14696_s15 = sphi %s14793_s15, %s17726_s15  }
  0x10   : > { %17682 = sst [smem:[#allocation15_spill]] %s14724_s22  ;;  %s32_s30 = sadd.s32 1, %s14736_s25 }
  0x11   : > { %17683 = sst [smem:[#allocation16_spill]] %s14728_s23  ;;  %s35_s5 = sadd.s32 1, %s14740_s26 }
  0x12   : > { %17684 = sst [smem:[#allocation17_spill]] %s14732_s24  ;;  %p33_p0 = scmp.ge.s32.totalorder %s32_s30, 4 }
  0x13   : > { %s42_s6 = sadd.s32 1, %s14724_s22  ;;  %p49_p1 = scmp.ne.s32.totalorder %s14724_s22, %s14720_s21 }
  0x14   : > { %p50_p2 = scmp.eq.s32.totalorder %s14744_s27, 0  ;;  %s17739_s30 = smov (%p33_p0, %s32_s30), 0 }
  0x15   : > { %17685 = sst [smem:[#allocation18_spill]] %s17739_s30  ;;  %s17741_s5 = smov (!%p33_p0, %s35_s5), %s14740_s26 }
  0x16   : > { %s39_s7 = ssub.s32 %s14736_s25, %s17739_s30  ;;  %p14873_p3 = por %p50_p2, %p49_p1 }
  0x17   : > { %p37_p4 = scmp.ge.s32.totalorder %s17741_s5, 2  ;;  %p40_p5 = scmp.eq.s32.totalorder %s39_s7, 0 }
  0x18   : > { %p55_p6 = scmp.ne.s32.totalorder %s14720_s21, %s14716_s20  ;;  %p56_p7 = scmp.eq.s32.totalorder %s14857_s28, 0 }
  0x19   : > { %s17743_s5 = smov (%p37_p4, %s17741_s5), 0  ;;  %s70_s13 = sadd.s32 1, %s14712_s19 }
  0x1a   : > { %17687 = sst [smem:[#allocation19_spill]] %s17743_s5  ;;  %p14886_p8 = por %p56_p7, %p55_p6 }
  0x1b   : > { %s14882_s9 = scalar_select %p40_p5, %s14724_s22, %s42_s6  }
  0x1c   : > { %s17689_s10 = scalar_select %p14886_p8, 1, 0 }
  0x1d   : > { %17688 = sst [smem:[#allocation20_spill]] %s14882_s9  ;;  %s66_s11 = ssub.s32 %s14740_s26, %s17743_s5 }
  0x1e   : > { %s67_s12 = sor.u32 %s66_s11, %s39_s7  ;;  %p77_p10 = scmp.ne.s32.totalorder %s14712_s19, %s14708_s18 }
  0x1f   : > { %p68_p9 = scmp.eq.s32.totalorder %s67_s12, 0  ;;  %p94_p11 = scmp.eq.s32.totalorder %s66_s11, 0 }
  0x20   : > { %s96_s14 = sadd.s32 1, %s14704_s17  ;;  %p14901_p12 = por %p77_p10, %p50_p2 }
  0x21   : > { %s14897_s20 = scalar_select %p68_p9, %s14712_s19, %s70_s13  }
  0x22   : > { %s17691_s6 = scalar_select %p14901_p12, 1, 0 }
  0x23   : > { %17690 = sst [smem:[#allocation21_spill]] %s14897_s20  ;;  %p103_p13 = scmp.ne.s32.totalorder %s14704_s17, %s14700_s16 }
  0x24   : > { %s14908_s29 = scalar_select %p94_p11, %s14704_s17, %s96_s14  }
  0x25   : > { %p14912_p0 = por %p103_p13, %p50_p2  ;;  %p109_p1 = scmp.ne.s32.totalorder %s14700_s16, %s14696_s15 }
  0x26   : > { %17692 = sst [smem:[#allocation22_spill]] %s14908_s29  ;;  %p159_p4 = scmp.eq.s32.totalorder %s14857_s28, 7 }
  0x27   : > { %s17693_s30 = scalar_select %p14912_p0, 1, 0 }
  0x28   : > { %s17694_s7 = sadd.s32 4294967294, %s14744_s27   ;;  %p14923_p6 = por %p109_p1, %p56_p7 }
  0x29   : > { %p165_p5 = scmp.eq.s32.totalorder %s17694_s7, 7  ;;  %p14927_p9 = por %p159_p4, %p103_p13 }
  0x2a   : > { %s17695_s11 = scalar_select %p14923_p6, 1, 0 }
  0x2b   : > { %s17696_s12 = scalar_select %p14927_p9, 1, 0 }
  0x2c   : > { %p14931_p10 = por %p165_p5, %p109_p1  ;;  %p11560_p2 = scmp.ge.s32.totalorder %s14744_s27, 8 }
  0x2d   : > { %17697 = sst [smem:[#allocation23_spill]] %s17696_s12  ;;  %s185_s14 = sand.u32 (!%p11560_p2), 1, %s14724_s22  }
  0x2e   : > { %s17698_s13 = scalar_select %p14931_p10, 1, 0 }
  0x2f   : > { %181 = sbr.rel (%p11560_p2) target bundleno = 651 (0x28b), region = 16  ;;  %s12647_s7 = sshll.u32 (!%p11560_p2), %s14736_s25, 11 }
  0x30   : > { %17699 = sst [smem:[#allocation24_spill]] %s17698_s13  ;;  %s11561_s5 = sshll.u32 (!%p11560_p2), %s185_s14, 7 }
  0x31   : > { %s17700_s0 = sld [smem:[#allocation25_spill]] (!%p11560_p2)  ;;  %s189_s15 = scalar_lea.vmem (!%p11560_p2), [#allocation3], %s11561_s5 }
  0x32   : > { %s197_s13 = sshll.u32 (!%p11560_p2), %s189_s15, 4  ;;  %s186_s4 = scalar_lea.sflag (!%p11560_p2), [#allocation4], %s185_s14  ;;  %s198_s13 = int_to_ptr.vmem [resolvable:$true] %s197_s13 }
  0x37   : > { %s14941_s29 = scalar_lea.hbm %s17700_s0, %s12647_s7  ;;  %s14506_s23 = scalar_lea.hbm %s17700_s0, 8192 }
  0x38   : > { %s14502_s12 = scalar_lea.hbm %s14941_s29, 2048  ;;  %p14507_p1 = scmp.lt.u32.totalorder %s14941_s29, %s17700_s0 }
  0x39   : > { %p14503_p7 = scmp.ne.s32.totalorder %s14941_s29, %s14502_s12  ;;  %p14508_p4 = scmp.lt.u32.totalorder %s14506_s23, %s14502_s12 }
  0x3a   : > { %p14510_p2 = scmp.lt.u32.totalorder %s14502_s12, %s14941_s29 }
  0x3b   : > { %p14504_p11 = pnand %p14503_p7, %p14873_p3  ;;  %p14509_p5 = por %p14508_p4, %p14507_p1 }
  0x3d   : > { %p14505_p13 = pneg %p14504_p11  ;;  %p14511_p10 = por %p14510_p2, %p14509_p5 }
  0x3f   : > { %p14512_p9 = pnand %p14511_p10, %p14505_p13 }
  0x41   : > { %14515 = shalt.err (!%p14512_p9)
}
  0x42   : > { %s14516_s15 = scalar_lea.vmem %s198_s13, 2048  ;;  %s14762_s5 = smov [#allocation3]  }
  0x43   : > { %p14517_p6 = scmp.ne.s32.totalorder %s198_s13, %s14516_s15  ;;  %s14520_s14 = sshll.u32 %s14762_s5, 4  ;;  %s14521_s14 = int_to_ptr.vmem [resolvable:$false] %s14520_s14 }
  0x44   : > { %s14522_s22 = scalar_lea.vmem %s14521_s14, 4096  ;;  %p14523_p8 = scmp.lt.s32.totalorder %s198_s13, %s14521_s14 }
  0x45   : > { %p14518_p7 = pnand %p14517_p6, %p14873_p3  ;;  %p14524_p0 = scmp.lt.s32.totalorder %s14522_s22, %s14516_s15 }
  0x47   : > { %p14519_p11 = pneg %p14518_p7  ;;  %p14525_p12 = por %p14524_p0, %p14523_p8 }
  0x49   : > { %p14526_p1 = pnand %p14525_p12, %p14519_p11 }
  0x4b   : > { %14529 = shalt.err (!%p14526_p1)
}
  0x4c   : > { %12783 = dma.hbm_to_vmem [thread:$0]  (%p14873_p3), %s14941_s29, 2048, %s198_s13, %s186_s4  }
  0x4d   : > { %p17701_p9 = scmp.ne.s32.totalorder %s17691_s6, 0 }
  0x4e   : > { %s205_s23 = sand.u32 (%p17701_p9), 1, %s14712_s19   ;;  %s11566_s24 = sshll.u32 (%p17701_p9), %s14740_s26, 2 }
  0x4f   : > { %203 = sbr.rel (!%p17701_p9) target bundleno = 599 (0x257), region = 24  ;;  %s14964_s12 = sshll.u32 (%p17701_p9), %s205_s23, 13 }
  0x50   : > { %s12648_s7 = sshll.u32 (%p17701_p9), %s14736_s25, 12  ;;  %s207_s4 = scalar_lea.vmem (%p17701_p9), [#allocation6], %s14964_s12  }
  0x51   : > { %s211_s9 = sadd.s32 (%p17701_p9), %s12648_s7, %s11566_s24  ;;  %s17702_s29 = smov (%p17701_p9), %s207_s4 }
  0x52   : > { %s11568_s20 = sshll.u32 (%p17701_p9), %s211_s9, 2  ;;  %s14980_s13 = smov (%p17701_p9), 0  }
  0x53   : > { %s14970_s8 = scalar_lea.vmem (%p17701_p9), %s17663_s1, %s11568_s20   ;;  %s14982_s14 = smov (%p17701_p9), 0  }
  0x54   : > { %s17703_s6 = smov (%p17701_p9), %s14970_s8 }
  0x56 LB: >> { %v229_v0 = vld [vmem:[%s14752_s6] sm:$0xff]  ;;  %s1253_s22 = sadd.s32 1, %s14756_s13  ;;  %s225_s14 = sadd.s32 1, %s14760_s14   ;;  %s14760_s14 = sphi %s14982_s14, %s225_s14   ;;  %s14756_s13 = sphi %s14980_s13, %s17706_s13   ;;  %s14752_s6 = sphi %s17703_s6, %s17705_s6   ;;  %s14748_s29 = sphi %s17702_s29, %s17704_s29  }
  0x57   : >> { %v231_v1 = vld [vmem:[%s14752_s6 + $0x20] sm:$0xff]  ;;  %230 = vst [vmem:[%s14748_s29] sm:$0xff] %v229_v0  ;;  %p1254_p3 = scmp.ge.s32.totalorder %s1253_s22, 2  ;;  %p222_p8 = scmp.ge.s32.totalorder %s225_s14, 2  }
  0x58   : >> { %v233_v2 = vld [vmem:[%s14752_s6 + $0x40] sm:$0xff]  ;;  %232 = vst [vmem:[%s14748_s29 + $0x10] sm:$0xff] %v231_v1 }
  0x59   : >> { %234 = vst [vmem:[%s14748_s29 + $0x20] sm:$0xff] %v233_v2  ;;  %v235_v3 = vld [vmem:[%s14752_s6 + $0x60] sm:$0xff]  ;;  %s17745_s22 = smov (%p1254_p3, %s1253_s22), 0 }
  0x5a   : >> { %v237_v4 = vld [vmem:[%s14752_s6 + $0x80] sm:$0xff]  ;;  %236 = vst [vmem:[%s14748_s29 + $0x30] sm:$0xff] %v235_v3  ;;  %s11569_s23 = sshll.u32 %s17745_s22, 3  ;;  %s17706_s13 = smov %s17745_s22 }
  0x5b   : >> { %v239_v5 = vld [vmem:[%s14752_s6 + $0xa0] sm:$0xff]  ;;  %238 = vst [vmem:[%s14748_s29 + $0x40] sm:$0xff] %v237_v4  ;;  %s15262_s24 = scalar_lea.vmem %s14970_s8, %s11569_s23   ;;  %s15266_s7 = scalar_lea.vmem %s207_s4, %s11569_s23 [#allocation6]  }
  0x5c   : >> { %240 = vst [vmem:[%s14748_s29 + $0x50] sm:$0xff] %v239_v5  ;;  %v241_v6 = vld [vmem:[%s14752_s6 + $0xc0] sm:$0xff] }
  0x5d   : >> { %v243_v7 = vld [vmem:[%s14752_s6 + $0xe0] sm:$0xff]  ;;  %242 = vst [vmem:[%s14748_s29 + $0x60] sm:$0xff] %v241_v6 }
  0x5e   : >> { %v245_v8 = vld [vmem:[%s14752_s6 + $0x100] sm:$0xff]  ;;  %244 = vst [vmem:[%s14748_s29 + $0x70] sm:$0xff] %v243_v7 }
  0x5f   : >> { %246 = vst [vmem:[%s14748_s29 + $0x80] sm:$0xff] %v245_v8  ;;  %v247_v9 = vld [vmem:[%s14752_s6 + $0x120] sm:$0xff] }
  0x60   : >> { %v249_v10 = vld [vmem:[%s14752_s6 + $0x140] sm:$0xff]  ;;  %248 = vst [vmem:[%s14748_s29 + $0x90] sm:$0xff] %v247_v9 }
  0x61   : >> { %v251_v11 = vld [vmem:[%s14752_s6 + $0x160] sm:$0xff]  ;;  %250 = vst [vmem:[%s14748_s29 + $0xa0] sm:$0xff] %v249_v10 }
  0x62   : >> { %252 = vst [vmem:[%s14748_s29 + $0xb0] sm:$0xff] %v251_v11  ;;  %v253_v12 = vld [vmem:[%s14752_s6 + $0x180] sm:$0xff] }
  0x63   : >> { %v255_v13 = vld [vmem:[%s14752_s6 + $0x1a0] sm:$0xff]  ;;  %254 = vst [vmem:[%s14748_s29 + $0xc0] sm:$0xff] %v253_v12 }
  0x64   : >> { %v257_v14 = vld [vmem:[%s14752_s6 + $0x1c0] sm:$0xff]  ;;  %256 = vst [vmem:[%s14748_s29 + $0xd0] sm:$0xff] %v255_v13 }
  0x65   : >> { %258 = vst [vmem:[%s14748_s29 + $0xe0] sm:$0xff] %v257_v14  ;;  %v259_v15 = vld [vmem:[%s14752_s6 + $0x1e0] sm:$0xff] }
  0x66   : >> { %v261_v16 = vld [vmem:[%s14752_s6 + $0x200] sm:$0xff]  ;;  %260 = vst [vmem:[%s14748_s29 + $0xf0] sm:$0xff] %v259_v15 }
  0x67   : >> { %v263_v17 = vld [vmem:[%s14752_s6 + $0x220] sm:$0xff]  ;;  %262 = vst [vmem:[%s14748_s29 + $0x100] sm:$0xff] %v261_v16 }
  0x68   : >> { %264 = vst [vmem:[%s14748_s29 + $0x110] sm:$0xff] %v263_v17  ;;  %v265_v18 = vld [vmem:[%s14752_s6 + $0x240] sm:$0xff] }
  0x69   : >> { %v267_v19 = vld [vmem:[%s14752_s6 + $0x260] sm:$0xff]  ;;  %266 = vst [vmem:[%s14748_s29 + $0x120] sm:$0xff] %v265_v18 }
  0x6a   : >> { %v269_v20 = vld [vmem:[%s14752_s6 + $0x280] sm:$0xff]  ;;  %268 = vst [vmem:[%s14748_s29 + $0x130] sm:$0xff] %v267_v19 }
  0x6b   : >> { %270 = vst [vmem:[%s14748_s29 + $0x140] sm:$0xff] %v269_v20  ;;  %v271_v21 = vld [vmem:[%s14752_s6 + $0x2a0] sm:$0xff] }
  0x6c   : >> { %v273_v22 = vld [vmem:[%s14752_s6 + $0x2c0] sm:$0xff]  ;;  %272 = vst [vmem:[%s14748_s29 + $0x150] sm:$0xff] %v271_v21 }
  0x6d   : >> { %v275_v23 = vld [vmem:[%s14752_s6 + $0x2e0] sm:$0xff]  ;;  %274 = vst [vmem:[%s14748_s29 + $0x160] sm:$0xff] %v273_v22 }
  0x6e   : >> { %276 = vst [vmem:[%s14748_s29 + $0x170] sm:$0xff] %v275_v23  ;;  %v277_v24 = vld [vmem:[%s14752_s6 + $0x300] sm:$0xff] }
  0x6f   : >> { %v279_v25 = vld [vmem:[%s14752_s6 + $0x320] sm:$0xff]  ;;  %278 = vst [vmem:[%s14748_s29 + $0x180] sm:$0xff] %v277_v24 }
  0x70   : >> { %v281_v26 = vld [vmem:[%s14752_s6 + $0x340] sm:$0xff]  ;;  %280 = vst [vmem:[%s14748_s29 + $0x190] sm:$0xff] %v279_v25 }
  0x71   : >> { %282 = vst [vmem:[%s14748_s29 + $0x1a0] sm:$0xff] %v281_v26  ;;  %v283_v27 = vld [vmem:[%s14752_s6 + $0x360] sm:$0xff] }
  0x72   : >> { %v285_v28 = vld [vmem:[%s14752_s6 + $0x380] sm:$0xff]  ;;  %284 = vst [vmem:[%s14748_s29 + $0x1b0] sm:$0xff] %v283_v27 }
  0x73   : >> { %v287_v29 = vld [vmem:[%s14752_s6 + $0x3a0] sm:$0xff]  ;;  %286 = vst [vmem:[%s14748_s29 + $0x1c0] sm:$0xff] %v285_v28 }
  0x74   : >> { %288 = vst [vmem:[%s14748_s29 + $0x1d0] sm:$0xff] %v287_v29  ;;  %v289_v30 = vld [vmem:[%s14752_s6 + $0x3c0] sm:$0xff] }
  0x75   : >> { %v291_v31 = vld [vmem:[%s14752_s6 + $0x3e0] sm:$0xff]  ;;  %290 = vst [vmem:[%s14748_s29 + $0x1e0] sm:$0xff] %v289_v30 }
  0x76   : >> { %v293_v32 = vld [vmem:[%s14752_s6 + $0x400] sm:$0xff]  ;;  %292 = vst [vmem:[%s14748_s29 + $0x1f0] sm:$0xff] %v291_v31 }
  0x77   : >> { %294 = vst [vmem:[%s14748_s29 + $0x200] sm:$0xff] %v293_v32  ;;  %v295_v33 = vld [vmem:[%s14752_s6 + $0x420] sm:$0xff] }
  0x78   : >> { %v297_v34 = vld [vmem:[%s14752_s6 + $0x440] sm:$0xff]  ;;  %296 = vst [vmem:[%s14748_s29 + $0x210] sm:$0xff] %v295_v33 }
  0x79   : >> { %v299_v35 = vld [vmem:[%s14752_s6 + $0x460] sm:$0xff]  ;;  %298 = vst [vmem:[%s14748_s29 + $0x220] sm:$0xff] %v297_v34 }
  0x7a   : >> { %300 = vst [vmem:[%s14748_s29 + $0x230] sm:$0xff] %v299_v35  ;;  %v301_v36 = vld [vmem:[%s14752_s6 + $0x480] sm:$0xff] }
  0x7b   : >> { %v303_v37 = vld [vmem:[%s14752_s6 + $0x4a0] sm:$0xff]  ;;  %302 = vst [vmem:[%s14748_s29 + $0x240] sm:$0xff] %v301_v36 }
  0x7c   : >> { %v305_v38 = vld [vmem:[%s14752_s6 + $0x4c0] sm:$0xff]  ;;  %304 = vst [vmem:[%s14748_s29 + $0x250] sm:$0xff] %v303_v37 }
  0x7d   : >> { %306 = vst [vmem:[%s14748_s29 + $0x260] sm:$0xff] %v305_v38  ;;  %v307_v39 = vld [vmem:[%s14752_s6 + $0x4e0] sm:$0xff] }
  0x7e   : >> { %v309_v40 = vld [vmem:[%s14752_s6 + $0x500] sm:$0xff]  ;;  %308 = vst [vmem:[%s14748_s29 + $0x270] sm:$0xff] %v307_v39 }
  0x7f   : >> { %v311_v41 = vld [vmem:[%s14752_s6 + $0x520] sm:$0xff]  ;;  %310 = vst [vmem:[%s14748_s29 + $0x280] sm:$0xff] %v309_v40 }
  0x80   : >> { %312 = vst [vmem:[%s14748_s29 + $0x290] sm:$0xff] %v311_v41  ;;  %v313_v42 = vld [vmem:[%s14752_s6 + $0x540] sm:$0xff] }
  0x81   : >> { %v315_v43 = vld [vmem:[%s14752_s6 + $0x560] sm:$0xff]  ;;  %314 = vst [vmem:[%s14748_s29 + $0x2a0] sm:$0xff] %v313_v42 }
  0x82   : >> { %v317_v44 = vld [vmem:[%s14752_s6 + $0x580] sm:$0xff]  ;;  %316 = vst [vmem:[%s14748_s29 + $0x2b0] sm:$0xff] %v315_v43 }
  0x83   : >> { %318 = vst [vmem:[%s14748_s29 + $0x2c0] sm:$0xff] %v317_v44  ;;  %v319_v45 = vld [vmem:[%s14752_s6 + $0x5a0] sm:$0xff] }
  0x84   : >> { %v321_v46 = vld [vmem:[%s14752_s6 + $0x5c0] sm:$0xff]  ;;  %320 = vst [vmem:[%s14748_s29 + $0x2d0] sm:$0xff] %v319_v45 }
  0x85   : >> { %v323_v47 = vld [vmem:[%s14752_s6 + $0x5e0] sm:$0xff]  ;;  %322 = vst [vmem:[%s14748_s29 + $0x2e0] sm:$0xff] %v321_v46 }
  0x86   : >> { %324 = vst [vmem:[%s14748_s29 + $0x2f0] sm:$0xff] %v323_v47  ;;  %v325_v48 = vld [vmem:[%s14752_s6 + $0x600] sm:$0xff] }
  0x87   : >> { %v327_v49 = vld [vmem:[%s14752_s6 + $0x620] sm:$0xff]  ;;  %326 = vst [vmem:[%s14748_s29 + $0x300] sm:$0xff] %v325_v48 }
  0x88   : >> { %v329_v50 = vld [vmem:[%s14752_s6 + $0x640] sm:$0xff]  ;;  %328 = vst [vmem:[%s14748_s29 + $0x310] sm:$0xff] %v327_v49 }
  0x89   : >> { %330 = vst [vmem:[%s14748_s29 + $0x320] sm:$0xff] %v329_v50  ;;  %v331_v51 = vld [vmem:[%s14752_s6 + $0x660] sm:$0xff] }
  0x8a   : >> { %v333_v52 = vld [vmem:[%s14752_s6 + $0x680] sm:$0xff]  ;;  %332 = vst [vmem:[%s14748_s29 + $0x330] sm:$0xff] %v331_v51 }
  0x8b   : >> { %v335_v53 = vld [vmem:[%s14752_s6 + $0x6a0] sm:$0xff]  ;;  %334 = vst [vmem:[%s14748_s29 + $0x340] sm:$0xff] %v333_v52 }
  0x8c   : >> { %336 = vst [vmem:[%s14748_s29 + $0x350] sm:$0xff] %v335_v53  ;;  %v337_v54 = vld [vmem:[%s14752_s6 + $0x6c0] sm:$0xff] }
  0x8d   : >> { %v339_v55 = vld [vmem:[%s14752_s6 + $0x6e0] sm:$0xff]  ;;  %338 = vst [vmem:[%s14748_s29 + $0x360] sm:$0xff] %v337_v54 }
  0x8e   : >> { %v341_v56 = vld [vmem:[%s14752_s6 + $0x700] sm:$0xff]  ;;  %340 = vst [vmem:[%s14748_s29 + $0x370] sm:$0xff] %v339_v55 }
  0x8f   : >> { %342 = vst [vmem:[%s14748_s29 + $0x380] sm:$0xff] %v341_v56  ;;  %v343_v57 = vld [vmem:[%s14752_s6 + $0x720] sm:$0xff] }
  0x90   : >> { %v345_v58 = vld [vmem:[%s14752_s6 + $0x740] sm:$0xff]  ;;  %344 = vst [vmem:[%s14748_s29 + $0x390] sm:$0xff] %v343_v57 }
  0x91   : >> { %v347_v59 = vld [vmem:[%s14752_s6 + $0x760] sm:$0xff]  ;;  %346 = vst [vmem:[%s14748_s29 + $0x3a0] sm:$0xff] %v345_v58 }
  0x92   : >> { %348 = vst [vmem:[%s14748_s29 + $0x3b0] sm:$0xff] %v347_v59  ;;  %v349_v60 = vld [vmem:[%s14752_s6 + $0x780] sm:$0xff] }
  0x93   : >> { %v351_v61 = vld [vmem:[%s14752_s6 + $0x7a0] sm:$0xff]  ;;  %350 = vst [vmem:[%s14748_s29 + $0x3c0] sm:$0xff] %v349_v60 }
  0x94   : >> { %v353_v62 = vld [vmem:[%s14752_s6 + $0x7c0] sm:$0xff]  ;;  %352 = vst [vmem:[%s14748_s29 + $0x3d0] sm:$0xff] %v351_v61 }
  0x95   : >> { %354 = vst [vmem:[%s14748_s29 + $0x3e0] sm:$0xff] %v353_v62  ;;  %v355_v63 = vld [vmem:[%s14752_s6 + $0x7e0] sm:$0xff] }
  0x96   : >> { %v357_v0 = vld [vmem:[%s14752_s6 + $0x800] sm:$0xff]  ;;  %356 = vst [vmem:[%s14748_s29 + $0x3f0] sm:$0xff] %v355_v63 }
  0x97   : >> { %v359_v1 = vld [vmem:[%s14752_s6 + $0x820] sm:$0xff]  ;;  %358 = vst [vmem:[%s14748_s29 + $0x400] sm:$0xff] %v357_v0 }
  0x98   : >> { %360 = vst [vmem:[%s14748_s29 + $0x410] sm:$0xff] %v359_v1  ;;  %v361_v2 = vld [vmem:[%s14752_s6 + $0x840] sm:$0xff] }
  0x99   : >> { %v363_v3 = vld [vmem:[%s14752_s6 + $0x860] sm:$0xff]  ;;  %362 = vst [vmem:[%s14748_s29 + $0x420] sm:$0xff] %v361_v2 }
  0x9a   : >> { %v365_v4 = vld [vmem:[%s14752_s6 + $0x880] sm:$0xff]  ;;  %364 = vst [vmem:[%s14748_s29 + $0x430] sm:$0xff] %v363_v3 }
  0x9b   : >> { %366 = vst [vmem:[%s14748_s29 + $0x440] sm:$0xff] %v365_v4  ;;  %v367_v5 = vld [vmem:[%s14752_s6 + $0x8a0] sm:$0xff] }
  0x9c   : >> { %v369_v6 = vld [vmem:[%s14752_s6 + $0x8c0] sm:$0xff]  ;;  %368 = vst [vmem:[%s14748_s29 + $0x450] sm:$0xff] %v367_v5 }
  0x9d   : >> { %v371_v7 = vld [vmem:[%s14752_s6 + $0x8e0] sm:$0xff]  ;;  %370 = vst [vmem:[%s14748_s29 + $0x460] sm:$0xff] %v369_v6 }
  0x9e   : >> { %372 = vst [vmem:[%s14748_s29 + $0x470] sm:$0xff] %v371_v7  ;;  %v373_v8 = vld [vmem:[%s14752_s6 + $0x900] sm:$0xff] }
  0x9f   : >> { %v375_v9 = vld [vmem:[%s14752_s6 + $0x920] sm:$0xff]  ;;  %374 = vst [vmem:[%s14748_s29 + $0x480] sm:$0xff] %v373_v8 }
  0xa0   : >> { %v377_v10 = vld [vmem:[%s14752_s6 + $0x940] sm:$0xff]  ;;  %376 = vst [vmem:[%s14748_s29 + $0x490] sm:$0xff] %v375_v9 }
  0xa1   : >> { %378 = vst [vmem:[%s14748_s29 + $0x4a0] sm:$0xff] %v377_v10  ;;  %v379_v11 = vld [vmem:[%s14752_s6 + $0x960] sm:$0xff] }
  0xa2   : >> { %v381_v12 = vld [vmem:[%s14752_s6 + $0x980] sm:$0xff]  ;;  %380 = vst [vmem:[%s14748_s29 + $0x4b0] sm:$0xff] %v379_v11 }
  0xa3   : >> { %v383_v13 = vld [vmem:[%s14752_s6 + $0x9a0] sm:$0xff]  ;;  %382 = vst [vmem:[%s14748_s29 + $0x4c0] sm:$0xff] %v381_v12 }
  0xa4   : >> { %384 = vst [vmem:[%s14748_s29 + $0x4d0] sm:$0xff] %v383_v13  ;;  %v385_v14 = vld [vmem:[%s14752_s6 + $0x9c0] sm:$0xff] }
  0xa5   : >> { %v387_v15 = vld [vmem:[%s14752_s6 + $0x9e0] sm:$0xff]  ;;  %386 = vst [vmem:[%s14748_s29 + $0x4e0] sm:$0xff] %v385_v14 }
  0xa6   : >> { %v389_v16 = vld [vmem:[%s14752_s6 + $0xa00] sm:$0xff]  ;;  %388 = vst [vmem:[%s14748_s29 + $0x4f0] sm:$0xff] %v387_v15 }
  0xa7   : >> { %390 = vst [vmem:[%s14748_s29 + $0x500] sm:$0xff] %v389_v16  ;;  %v391_v17 = vld [vmem:[%s14752_s6 + $0xa20] sm:$0xff] }
  0xa8   : >> { %v393_v18 = vld [vmem:[%s14752_s6 + $0xa40] sm:$0xff]  ;;  %392 = vst [vmem:[%s14748_s29 + $0x510] sm:$0xff] %v391_v17 }
  0xa9   : >> { %v395_v19 = vld [vmem:[%s14752_s6 + $0xa60] sm:$0xff]  ;;  %394 = vst [vmem:[%s14748_s29 + $0x520] sm:$0xff] %v393_v18 }
  0xaa   : >> { %396 = vst [vmem:[%s14748_s29 + $0x530] sm:$0xff] %v395_v19  ;;  %v397_v20 = vld [vmem:[%s14752_s6 + $0xa80] sm:$0xff] }
  0xab   : >> { %v399_v21 = vld [vmem:[%s14752_s6 + $0xaa0] sm:$0xff]  ;;  %398 = vst [vmem:[%s14748_s29 + $0x540] sm:$0xff] %v397_v20 }
  0xac   : >> { %v401_v22 = vld [vmem:[%s14752_s6 + $0xac0] sm:$0xff]  ;;  %400 = vst [vmem:[%s14748_s29 + $0x550] sm:$0xff] %v399_v21 }
  0xad   : >> { %402 = vst [vmem:[%s14748_s29 + $0x560] sm:$0xff] %v401_v22  ;;  %v403_v23 = vld [vmem:[%s14752_s6 + $0xae0] sm:$0xff] }
  0xae   : >> { %v405_v24 = vld [vmem:[%s14752_s6 + $0xb00] sm:$0xff]  ;;  %404 = vst [vmem:[%s14748_s29 + $0x570] sm:$0xff] %v403_v23 }
  0xaf   : >> { %v407_v25 = vld [vmem:[%s14752_s6 + $0xb20] sm:$0xff]  ;;  %406 = vst [vmem:[%s14748_s29 + $0x580] sm:$0xff] %v405_v24 }
  0xb0   : >> { %408 = vst [vmem:[%s14748_s29 + $0x590] sm:$0xff] %v407_v25  ;;  %v409_v26 = vld [vmem:[%s14752_s6 + $0xb40] sm:$0xff] }
  0xb1   : >> { %v411_v27 = vld [vmem:[%s14752_s6 + $0xb60] sm:$0xff]  ;;  %410 = vst [vmem:[%s14748_s29 + $0x5a0] sm:$0xff] %v409_v26 }
  0xb2   : >> { %v413_v28 = vld [vmem:[%s14752_s6 + $0xb80] sm:$0xff]  ;;  %412 = vst [vmem:[%s14748_s29 + $0x5b0] sm:$0xff] %v411_v27 }
  0xb3   : >> { %414 = vst [vmem:[%s14748_s29 + $0x5c0] sm:$0xff] %v413_v28  ;;  %v415_v29 = vld [vmem:[%s14752_s6 + $0xba0] sm:$0xff] }
  0xb4   : >> { %v417_v30 = vld [vmem:[%s14752_s6 + $0xbc0] sm:$0xff]  ;;  %416 = vst [vmem:[%s14748_s29 + $0x5d0] sm:$0xff] %v415_v29 }
  0xb5   : >> { %v419_v31 = vld [vmem:[%s14752_s6 + $0xbe0] sm:$0xff]  ;;  %418 = vst [vmem:[%s14748_s29 + $0x5e0] sm:$0xff] %v417_v30 }
  0xb6   : >> { %420 = vst [vmem:[%s14748_s29 + $0x5f0] sm:$0xff] %v419_v31  ;;  %v421_v32 = vld [vmem:[%s14752_s6 + $0xc00] sm:$0xff] }
  0xb7   : >> { %v423_v33 = vld [vmem:[%s14752_s6 + $0xc20] sm:$0xff]  ;;  %422 = vst [vmem:[%s14748_s29 + $0x600] sm:$0xff] %v421_v32 }
  0xb8   : >> { %v425_v34 = vld [vmem:[%s14752_s6 + $0xc40] sm:$0xff]  ;;  %424 = vst [vmem:[%s14748_s29 + $0x610] sm:$0xff] %v423_v33 }
  0xb9   : >> { %426 = vst [vmem:[%s14748_s29 + $0x620] sm:$0xff] %v425_v34  ;;  %v427_v35 = vld [vmem:[%s14752_s6 + $0xc60] sm:$0xff] }
  0xba   : >> { %v429_v36 = vld [vmem:[%s14752_s6 + $0xc80] sm:$0xff]  ;;  %428 = vst [vmem:[%s14748_s29 + $0x630] sm:$0xff] %v427_v35 }
  0xbb   : >> { %v431_v37 = vld [vmem:[%s14752_s6 + $0xca0] sm:$0xff]  ;;  %430 = vst [vmem:[%s14748_s29 + $0x640] sm:$0xff] %v429_v36 }
  0xbc   : >> { %432 = vst [vmem:[%s14748_s29 + $0x650] sm:$0xff] %v431_v37  ;;  %v433_v38 = vld [vmem:[%s14752_s6 + $0xcc0] sm:$0xff] }
  0xbd   : >> { %v435_v39 = vld [vmem:[%s14752_s6 + $0xce0] sm:$0xff]  ;;  %434 = vst [vmem:[%s14748_s29 + $0x660] sm:$0xff] %v433_v38 }
  0xbe   : >> { %v437_v40 = vld [vmem:[%s14752_s6 + $0xd00] sm:$0xff]  ;;  %436 = vst [vmem:[%s14748_s29 + $0x670] sm:$0xff] %v435_v39 }
  0xbf   : >> { %438 = vst [vmem:[%s14748_s29 + $0x680] sm:$0xff] %v437_v40  ;;  %v439_v41 = vld [vmem:[%s14752_s6 + $0xd20] sm:$0xff] }
  0xc0   : >> { %v441_v42 = vld [vmem:[%s14752_s6 + $0xd40] sm:$0xff]  ;;  %440 = vst [vmem:[%s14748_s29 + $0x690] sm:$0xff] %v439_v41 }
  0xc1   : >> { %v443_v43 = vld [vmem:[%s14752_s6 + $0xd60] sm:$0xff]  ;;  %442 = vst [vmem:[%s14748_s29 + $0x6a0] sm:$0xff] %v441_v42 }
  0xc2   : >> { %444 = vst [vmem:[%s14748_s29 + $0x6b0] sm:$0xff] %v443_v43  ;;  %v445_v44 = vld [vmem:[%s14752_s6 + $0xd80] sm:$0xff] }
  0xc3   : >> { %v447_v45 = vld [vmem:[%s14752_s6 + $0xda0] sm:$0xff]  ;;  %446 = vst [vmem:[%s14748_s29 + $0x6c0] sm:$0xff] %v445_v44 }
  0xc4   : >> { %v449_v46 = vld [vmem:[%s14752_s6 + $0xdc0] sm:$0xff]  ;;  %448 = vst [vmem:[%s14748_s29 + $0x6d0] sm:$0xff] %v447_v45 }
  0xc5   : >> { %450 = vst [vmem:[%s14748_s29 + $0x6e0] sm:$0xff] %v449_v46  ;;  %v451_v47 = vld [vmem:[%s14752_s6 + $0xde0] sm:$0xff] }
  0xc6   : >> { %v453_v48 = vld [vmem:[%s14752_s6 + $0xe00] sm:$0xff]  ;;  %452 = vst [vmem:[%s14748_s29 + $0x6f0] sm:$0xff] %v451_v47 }
  0xc7   : >> { %v455_v49 = vld [vmem:[%s14752_s6 + $0xe20] sm:$0xff]  ;;  %454 = vst [vmem:[%s14748_s29 + $0x700] sm:$0xff] %v453_v48 }
  0xc8   : >> { %456 = vst [vmem:[%s14748_s29 + $0x710] sm:$0xff] %v455_v49  ;;  %v457_v50 = vld [vmem:[%s14752_s6 + $0xe40] sm:$0xff] }
  0xc9   : >> { %v459_v51 = vld [vmem:[%s14752_s6 + $0xe60] sm:$0xff]  ;;  %458 = vst [vmem:[%s14748_s29 + $0x720] sm:$0xff] %v457_v50 }
  0xca   : >> { %v461_v52 = vld [vmem:[%s14752_s6 + $0xe80] sm:$0xff]  ;;  %460 = vst [vmem:[%s14748_s29 + $0x730] sm:$0xff] %v459_v51 }
  0xcb   : >> { %462 = vst [vmem:[%s14748_s29 + $0x740] sm:$0xff] %v461_v52  ;;  %v463_v53 = vld [vmem:[%s14752_s6 + $0xea0] sm:$0xff] }
  0xcc   : >> { %v465_v54 = vld [vmem:[%s14752_s6 + $0xec0] sm:$0xff]  ;;  %464 = vst [vmem:[%s14748_s29 + $0x750] sm:$0xff] %v463_v53 }
  0xcd   : >> { %v467_v55 = vld [vmem:[%s14752_s6 + $0xee0] sm:$0xff]  ;;  %466 = vst [vmem:[%s14748_s29 + $0x760] sm:$0xff] %v465_v54 }
  0xce   : >> { %468 = vst [vmem:[%s14748_s29 + $0x770] sm:$0xff] %v467_v55  ;;  %v469_v56 = vld [vmem:[%s14752_s6 + $0xf00] sm:$0xff] }
  0xcf   : >> { %v471_v57 = vld [vmem:[%s14752_s6 + $0xf20] sm:$0xff]  ;;  %470 = vst [vmem:[%s14748_s29 + $0x780] sm:$0xff] %v469_v56 }
  0xd0   : >> { %v473_v58 = vld [vmem:[%s14752_s6 + $0xf40] sm:$0xff]  ;;  %472 = vst [vmem:[%s14748_s29 + $0x790] sm:$0xff] %v471_v57 }
  0xd1   : >> { %474 = vst [vmem:[%s14748_s29 + $0x7a0] sm:$0xff] %v473_v58  ;;  %v475_v59 = vld [vmem:[%s14752_s6 + $0xf60] sm:$0xff] }
  0xd2   : >> { %v477_v60 = vld [vmem:[%s14752_s6 + $0xf80] sm:$0xff]  ;;  %476 = vst [vmem:[%s14748_s29 + $0x7b0] sm:$0xff] %v475_v59 }
  0xd3   : >> { %v479_v61 = vld [vmem:[%s14752_s6 + $0xfa0] sm:$0xff]  ;;  %478 = vst [vmem:[%s14748_s29 + $0x7c0] sm:$0xff] %v477_v60 }
  0xd4   : >> { %480 = vst [vmem:[%s14748_s29 + $0x7d0] sm:$0xff] %v479_v61  ;;  %v481_v62 = vld [vmem:[%s14752_s6 + $0xfc0] sm:$0xff] }
  0xd5   : >> { %v483_v63 = vld [vmem:[%s14752_s6 + $0xfe0] sm:$0xff]  ;;  %482 = vst [vmem:[%s14748_s29 + $0x7e0] sm:$0xff] %v481_v62 }
  0xd6   : >> { %v485_v0 = vld [vmem:[%s14752_s6 + $0x1000] sm:$0xff]  ;;  %484 = vst [vmem:[%s14748_s29 + $0x7f0] sm:$0xff] %v483_v63 }
  0xd7   : >> { %486 = vst [vmem:[%s14748_s29 + $0x800] sm:$0xff] %v485_v0  ;;  %v487_v1 = vld [vmem:[%s14752_s6 + $0x1020] sm:$0xff] }
  0xd8   : >> { %v489_v2 = vld [vmem:[%s14752_s6 + $0x1040] sm:$0xff]  ;;  %488 = vst [vmem:[%s14748_s29 + $0x810] sm:$0xff] %v487_v1 }
  0xd9   : >> { %v491_v3 = vld [vmem:[%s14752_s6 + $0x1060] sm:$0xff]  ;;  %490 = vst [vmem:[%s14748_s29 + $0x820] sm:$0xff] %v489_v2 }
  0xda   : >> { %492 = vst [vmem:[%s14748_s29 + $0x830] sm:$0xff] %v491_v3  ;;  %v493_v4 = vld [vmem:[%s14752_s6 + $0x1080] sm:$0xff] }
  0xdb   : >> { %v495_v5 = vld [vmem:[%s14752_s6 + $0x10a0] sm:$0xff]  ;;  %494 = vst [vmem:[%s14748_s29 + $0x840] sm:$0xff] %v493_v4 }
  0xdc   : >> { %v497_v6 = vld [vmem:[%s14752_s6 + $0x10c0] sm:$0xff]  ;;  %496 = vst [vmem:[%s14748_s29 + $0x850] sm:$0xff] %v495_v5 }
  0xdd   : >> { %498 = vst [vmem:[%s14748_s29 + $0x860] sm:$0xff] %v497_v6  ;;  %v499_v7 = vld [vmem:[%s14752_s6 + $0x10e0] sm:$0xff] }
  0xde   : >> { %v501_v8 = vld [vmem:[%s14752_s6 + $0x1100] sm:$0xff]  ;;  %500 = vst [vmem:[%s14748_s29 + $0x870] sm:$0xff] %v499_v7 }
  0xdf   : >> { %v503_v9 = vld [vmem:[%s14752_s6 + $0x1120] sm:$0xff]  ;;  %502 = vst [vmem:[%s14748_s29 + $0x880] sm:$0xff] %v501_v8 }
  0xe0   : >> { %504 = vst [vmem:[%s14748_s29 + $0x890] sm:$0xff] %v503_v9  ;;  %v505_v10 = vld [vmem:[%s14752_s6 + $0x1140] sm:$0xff] }
  0xe1   : >> { %v507_v11 = vld [vmem:[%s14752_s6 + $0x1160] sm:$0xff]  ;;  %506 = vst [vmem:[%s14748_s29 + $0x8a0] sm:$0xff] %v505_v10 }
  0xe2   : >> { %v509_v12 = vld [vmem:[%s14752_s6 + $0x1180] sm:$0xff]  ;;  %508 = vst [vmem:[%s14748_s29 + $0x8b0] sm:$0xff] %v507_v11 }
  0xe3   : >> { %510 = vst [vmem:[%s14748_s29 + $0x8c0] sm:$0xff] %v509_v12  ;;  %v511_v13 = vld [vmem:[%s14752_s6 + $0x11a0] sm:$0xff] }
  0xe4   : >> { %v513_v14 = vld [vmem:[%s14752_s6 + $0x11c0] sm:$0xff]  ;;  %512 = vst [vmem:[%s14748_s29 + $0x8d0] sm:$0xff] %v511_v13 }
  0xe5   : >> { %v515_v15 = vld [vmem:[%s14752_s6 + $0x11e0] sm:$0xff]  ;;  %514 = vst [vmem:[%s14748_s29 + $0x8e0] sm:$0xff] %v513_v14 }
  0xe6   : >> { %516 = vst [vmem:[%s14748_s29 + $0x8f0] sm:$0xff] %v515_v15  ;;  %v517_v16 = vld [vmem:[%s14752_s6 + $0x1200] sm:$0xff] }
  0xe7   : >> { %v519_v17 = vld [vmem:[%s14752_s6 + $0x1220] sm:$0xff]  ;;  %518 = vst [vmem:[%s14748_s29 + $0x900] sm:$0xff] %v517_v16 }
  0xe8   : >> { %v521_v18 = vld [vmem:[%s14752_s6 + $0x1240] sm:$0xff]  ;;  %520 = vst [vmem:[%s14748_s29 + $0x910] sm:$0xff] %v519_v17 }
  0xe9   : >> { %522 = vst [vmem:[%s14748_s29 + $0x920] sm:$0xff] %v521_v18  ;;  %v523_v19 = vld [vmem:[%s14752_s6 + $0x1260] sm:$0xff] }
  0xea   : >> { %v525_v20 = vld [vmem:[%s14752_s6 + $0x1280] sm:$0xff]  ;;  %524 = vst [vmem:[%s14748_s29 + $0x930] sm:$0xff] %v523_v19 }
  0xeb   : >> { %v527_v21 = vld [vmem:[%s14752_s6 + $0x12a0] sm:$0xff]  ;;  %526 = vst [vmem:[%s14748_s29 + $0x940] sm:$0xff] %v525_v20 }
  0xec   : >> { %528 = vst [vmem:[%s14748_s29 + $0x950] sm:$0xff] %v527_v21  ;;  %v529_v22 = vld [vmem:[%s14752_s6 + $0x12c0] sm:$0xff] }
  0xed   : >> { %v531_v23 = vld [vmem:[%s14752_s6 + $0x12e0] sm:$0xff]  ;;  %530 = vst [vmem:[%s14748_s29 + $0x960] sm:$0xff] %v529_v22 }
  0xee   : >> { %v533_v24 = vld [vmem:[%s14752_s6 + $0x1300] sm:$0xff]  ;;  %532 = vst [vmem:[%s14748_s29 + $0x970] sm:$0xff] %v531_v23 }
  0xef   : >> { %534 = vst [vmem:[%s14748_s29 + $0x980] sm:$0xff] %v533_v24  ;;  %v535_v25 = vld [vmem:[%s14752_s6 + $0x1320] sm:$0xff] }
  0xf0   : >> { %v537_v26 = vld [vmem:[%s14752_s6 + $0x1340] sm:$0xff]  ;;  %536 = vst [vmem:[%s14748_s29 + $0x990] sm:$0xff] %v535_v25 }
  0xf1   : >> { %v539_v27 = vld [vmem:[%s14752_s6 + $0x1360] sm:$0xff]  ;;  %538 = vst [vmem:[%s14748_s29 + $0x9a0] sm:$0xff] %v537_v26 }
  0xf2   : >> { %540 = vst [vmem:[%s14748_s29 + $0x9b0] sm:$0xff] %v539_v27  ;;  %v541_v28 = vld [vmem:[%s14752_s6 + $0x1380] sm:$0xff] }
  0xf3   : >> { %v543_v29 = vld [vmem:[%s14752_s6 + $0x13a0] sm:$0xff]  ;;  %542 = vst [vmem:[%s14748_s29 + $0x9c0] sm:$0xff] %v541_v28 }
  0xf4   : >> { %v545_v30 = vld [vmem:[%s14752_s6 + $0x13c0] sm:$0xff]  ;;  %544 = vst [vmem:[%s14748_s29 + $0x9d0] sm:$0xff] %v543_v29 }
  0xf5   : >> { %546 = vst [vmem:[%s14748_s29 + $0x9e0] sm:$0xff] %v545_v30  ;;  %v547_v31 = vld [vmem:[%s14752_s6 + $0x13e0] sm:$0xff] }
  0xf6   : >> { %v549_v32 = vld [vmem:[%s14752_s6 + $0x1400] sm:$0xff]  ;;  %548 = vst [vmem:[%s14748_s29 + $0x9f0] sm:$0xff] %v547_v31 }
  0xf7   : >> { %v551_v33 = vld [vmem:[%s14752_s6 + $0x1420] sm:$0xff]  ;;  %550 = vst [vmem:[%s14748_s29 + $0xa00] sm:$0xff] %v549_v32 }
  0xf8   : >> { %552 = vst [vmem:[%s14748_s29 + $0xa10] sm:$0xff] %v551_v33  ;;  %v553_v34 = vld [vmem:[%s14752_s6 + $0x1440] sm:$0xff] }
  0xf9   : >> { %v555_v35 = vld [vmem:[%s14752_s6 + $0x1460] sm:$0xff]  ;;  %554 = vst [vmem:[%s14748_s29 + $0xa20] sm:$0xff] %v553_v34 }
  0xfa   : >> { %v557_v36 = vld [vmem:[%s14752_s6 + $0x1480] sm:$0xff]  ;;  %556 = vst [vmem:[%s14748_s29 + $0xa30] sm:$0xff] %v555_v35 }
  0xfb   : >> { %558 = vst [vmem:[%s14748_s29 + $0xa40] sm:$0xff] %v557_v36  ;;  %v559_v37 = vld [vmem:[%s14752_s6 + $0x14a0] sm:$0xff] }
  0xfc   : >> { %v561_v38 = vld [vmem:[%s14752_s6 + $0x14c0] sm:$0xff]  ;;  %560 = vst [vmem:[%s14748_s29 + $0xa50] sm:$0xff] %v559_v37 }
  0xfd   : >> { %v563_v39 = vld [vmem:[%s14752_s6 + $0x14e0] sm:$0xff]  ;;  %562 = vst [vmem:[%s14748_s29 + $0xa60] sm:$0xff] %v561_v38 }
  0xfe   : >> { %564 = vst [vmem:[%s14748_s29 + $0xa70] sm:$0xff] %v563_v39  ;;  %v565_v40 = vld [vmem:[%s14752_s6 + $0x1500] sm:$0xff] }
  0xff   : >> { %v567_v41 = vld [vmem:[%s14752_s6 + $0x1520] sm:$0xff]  ;;  %566 = vst [vmem:[%s14748_s29 + $0xa80] sm:$0xff] %v565_v40 }
 0x100   : >> { %v569_v42 = vld [vmem:[%s14752_s6 + $0x1540] sm:$0xff]  ;;  %568 = vst [vmem:[%s14748_s29 + $0xa90] sm:$0xff] %v567_v41 }
 0x101   : >> { %570 = vst [vmem:[%s14748_s29 + $0xaa0] sm:$0xff] %v569_v42  ;;  %v571_v43 = vld [vmem:[%s14752_s6 + $0x1560] sm:$0xff] }
 0x102   : >> { %v573_v44 = vld [vmem:[%s14752_s6 + $0x1580] sm:$0xff]  ;;  %572 = vst [vmem:[%s14748_s29 + $0xab0] sm:$0xff] %v571_v43 }
 0x103   : >> { %v575_v45 = vld [vmem:[%s14752_s6 + $0x15a0] sm:$0xff]  ;;  %574 = vst [vmem:[%s14748_s29 + $0xac0] sm:$0xff] %v573_v44 }
 0x104   : >> { %576 = vst [vmem:[%s14748_s29 + $0xad0] sm:$0xff] %v575_v45  ;;  %v577_v46 = vld [vmem:[%s14752_s6 + $0x15c0] sm:$0xff] }
 0x105   : >> { %v579_v47 = vld [vmem:[%s14752_s6 + $0x15e0] sm:$0xff]  ;;  %578 = vst [vmem:[%s14748_s29 + $0xae0] sm:$0xff] %v577_v46 }
 0x106   : >> { %v581_v48 = vld [vmem:[%s14752_s6 + $0x1600] sm:$0xff]  ;;  %580 = vst [vmem:[%s14748_s29 + $0xaf0] sm:$0xff] %v579_v47 }
 0x107   : >> { %582 = vst [vmem:[%s14748_s29 + $0xb00] sm:$0xff] %v581_v48  ;;  %v583_v49 = vld [vmem:[%s14752_s6 + $0x1620] sm:$0xff] }
 0x108   : >> { %v585_v50 = vld [vmem:[%s14752_s6 + $0x1640] sm:$0xff]  ;;  %584 = vst [vmem:[%s14748_s29 + $0xb10] sm:$0xff] %v583_v49 }
 0x109   : >> { %v587_v51 = vld [vmem:[%s14752_s6 + $0x1660] sm:$0xff]  ;;  %586 = vst [vmem:[%s14748_s29 + $0xb20] sm:$0xff] %v585_v50 }
 0x10a   : >> { %588 = vst [vmem:[%s14748_s29 + $0xb30] sm:$0xff] %v587_v51  ;;  %v589_v52 = vld [vmem:[%s14752_s6 + $0x1680] sm:$0xff] }
 0x10b   : >> { %v591_v53 = vld [vmem:[%s14752_s6 + $0x16a0] sm:$0xff]  ;;  %590 = vst [vmem:[%s14748_s29 + $0xb40] sm:$0xff] %v589_v52 }
 0x10c   : >> { %v593_v54 = vld [vmem:[%s14752_s6 + $0x16c0] sm:$0xff]  ;;  %592 = vst [vmem:[%s14748_s29 + $0xb50] sm:$0xff] %v591_v53 }
 0x10d   : >> { %594 = vst [vmem:[%s14748_s29 + $0xb60] sm:$0xff] %v593_v54  ;;  %v595_v55 = vld [vmem:[%s14752_s6 + $0x16e0] sm:$0xff] }
 0x10e   : >> { %v597_v56 = vld [vmem:[%s14752_s6 + $0x1700] sm:$0xff]  ;;  %596 = vst [vmem:[%s14748_s29 + $0xb70] sm:$0xff] %v595_v55 }
 0x10f   : >> { %v599_v57 = vld [vmem:[%s14752_s6 + $0x1720] sm:$0xff]  ;;  %598 = vst [vmem:[%s14748_s29 + $0xb80] sm:$0xff] %v597_v56 }
 0x110   : >> { %600 = vst [vmem:[%s14748_s29 + $0xb90] sm:$0xff] %v599_v57  ;;  %v601_v58 = vld [vmem:[%s14752_s6 + $0x1740] sm:$0xff] }
 0x111   : >> { %v603_v59 = vld [vmem:[%s14752_s6 + $0x1760] sm:$0xff]  ;;  %602 = vst [vmem:[%s14748_s29 + $0xba0] sm:$0xff] %v601_v58 }
 0x112   : >> { %v605_v60 = vld [vmem:[%s14752_s6 + $0x1780] sm:$0xff]  ;;  %604 = vst [vmem:[%s14748_s29 + $0xbb0] sm:$0xff] %v603_v59 }
 0x113   : >> { %606 = vst [vmem:[%s14748_s29 + $0xbc0] sm:$0xff] %v605_v60  ;;  %v607_v61 = vld [vmem:[%s14752_s6 + $0x17a0] sm:$0xff] }
 0x114   : >> { %v609_v62 = vld [vmem:[%s14752_s6 + $0x17c0] sm:$0xff]  ;;  %608 = vst [vmem:[%s14748_s29 + $0xbd0] sm:$0xff] %v607_v61 }
 0x115   : >> { %v611_v63 = vld [vmem:[%s14752_s6 + $0x17e0] sm:$0xff]  ;;  %610 = vst [vmem:[%s14748_s29 + $0xbe0] sm:$0xff] %v609_v62 }
 0x116   : >> { %612 = vst [vmem:[%s14748_s29 + $0xbf0] sm:$0xff] %v611_v63  ;;  %v613_v0 = vld [vmem:[%s14752_s6 + $0x1800] sm:$0xff] }
 0x117   : >> { %v615_v1 = vld [vmem:[%s14752_s6 + $0x1820] sm:$0xff]  ;;  %614 = vst [vmem:[%s14748_s29 + $0xc00] sm:$0xff] %v613_v0 }
 0x118   : >> { %v617_v2 = vld [vmem:[%s14752_s6 + $0x1840] sm:$0xff]  ;;  %616 = vst [vmem:[%s14748_s29 + $0xc10] sm:$0xff] %v615_v1 }
 0x119   : >> { %618 = vst [vmem:[%s14748_s29 + $0xc20] sm:$0xff] %v617_v2  ;;  %v619_v3 = vld [vmem:[%s14752_s6 + $0x1860] sm:$0xff] }
 0x11a   : >> { %v621_v4 = vld [vmem:[%s14752_s6 + $0x1880] sm:$0xff]  ;;  %620 = vst [vmem:[%s14748_s29 + $0xc30] sm:$0xff] %v619_v3 }
 0x11b   : >> { %v623_v5 = vld [vmem:[%s14752_s6 + $0x18a0] sm:$0xff]  ;;  %622 = vst [vmem:[%s14748_s29 + $0xc40] sm:$0xff] %v621_v4 }
 0x11c   : >> { %624 = vst [vmem:[%s14748_s29 + $0xc50] sm:$0xff] %v623_v5  ;;  %v625_v6 = vld [vmem:[%s14752_s6 + $0x18c0] sm:$0xff] }
 0x11d   : >> { %v627_v7 = vld [vmem:[%s14752_s6 + $0x18e0] sm:$0xff]  ;;  %626 = vst [vmem:[%s14748_s29 + $0xc60] sm:$0xff] %v625_v6 }
 0x11e   : >> { %v629_v8 = vld [vmem:[%s14752_s6 + $0x1900] sm:$0xff]  ;;  %628 = vst [vmem:[%s14748_s29 + $0xc70] sm:$0xff] %v627_v7 }
 0x11f   : >> { %630 = vst [vmem:[%s14748_s29 + $0xc80] sm:$0xff] %v629_v8  ;;  %v631_v9 = vld [vmem:[%s14752_s6 + $0x1920] sm:$0xff] }
 0x120   : >> { %v633_v10 = vld [vmem:[%s14752_s6 + $0x1940] sm:$0xff]  ;;  %632 = vst [vmem:[%s14748_s29 + $0xc90] sm:$0xff] %v631_v9 }
 0x121   : >> { %v635_v11 = vld [vmem:[%s14752_s6 + $0x1960] sm:$0xff]  ;;  %634 = vst [vmem:[%s14748_s29 + $0xca0] sm:$0xff] %v633_v10 }
 0x122   : >> { %636 = vst [vmem:[%s14748_s29 + $0xcb0] sm:$0xff] %v635_v11  ;;  %v637_v12 = vld [vmem:[%s14752_s6 + $0x1980] sm:$0xff] }
 0x123   : >> { %v639_v13 = vld [vmem:[%s14752_s6 + $0x19a0] sm:$0xff]  ;;  %638 = vst [vmem:[%s14748_s29 + $0xcc0] sm:$0xff] %v637_v12 }
 0x124   : >> { %v641_v14 = vld [vmem:[%s14752_s6 + $0x19c0] sm:$0xff]  ;;  %640 = vst [vmem:[%s14748_s29 + $0xcd0] sm:$0xff] %v639_v13 }
 0x125   : >> { %642 = vst [vmem:[%s14748_s29 + $0xce0] sm:$0xff] %v641_v14  ;;  %v643_v15 = vld [vmem:[%s14752_s6 + $0x19e0] sm:$0xff] }
 0x126   : >> { %v645_v16 = vld [vmem:[%s14752_s6 + $0x1a00] sm:$0xff]  ;;  %644 = vst [vmem:[%s14748_s29 + $0xcf0] sm:$0xff] %v643_v15 }
 0x127   : >> { %v647_v17 = vld [vmem:[%s14752_s6 + $0x1a20] sm:$0xff]  ;;  %646 = vst [vmem:[%s14748_s29 + $0xd00] sm:$0xff] %v645_v16 }
 0x128   : >> { %648 = vst [vmem:[%s14748_s29 + $0xd10] sm:$0xff] %v647_v17  ;;  %v649_v18 = vld [vmem:[%s14752_s6 + $0x1a40] sm:$0xff] }
 0x129   : >> { %v651_v19 = vld [vmem:[%s14752_s6 + $0x1a60] sm:$0xff]  ;;  %650 = vst [vmem:[%s14748_s29 + $0xd20] sm:$0xff] %v649_v18 }
 0x12a   : >> { %v653_v20 = vld [vmem:[%s14752_s6 + $0x1a80] sm:$0xff]  ;;  %652 = vst [vmem:[%s14748_s29 + $0xd30] sm:$0xff] %v651_v19 }
 0x12b   : >> { %654 = vst [vmem:[%s14748_s29 + $0xd40] sm:$0xff] %v653_v20  ;;  %v655_v21 = vld [vmem:[%s14752_s6 + $0x1aa0] sm:$0xff] }
 0x12c   : >> { %v657_v22 = vld [vmem:[%s14752_s6 + $0x1ac0] sm:$0xff]  ;;  %656 = vst [vmem:[%s14748_s29 + $0xd50] sm:$0xff] %v655_v21 }
 0x12d   : >> { %v659_v23 = vld [vmem:[%s14752_s6 + $0x1ae0] sm:$0xff]  ;;  %658 = vst [vmem:[%s14748_s29 + $0xd60] sm:$0xff] %v657_v22 }
 0x12e   : >> { %660 = vst [vmem:[%s14748_s29 + $0xd70] sm:$0xff] %v659_v23  ;;  %v661_v24 = vld [vmem:[%s14752_s6 + $0x1b00] sm:$0xff] }
 0x12f   : >> { %v663_v25 = vld [vmem:[%s14752_s6 + $0x1b20] sm:$0xff]  ;;  %662 = vst [vmem:[%s14748_s29 + $0xd80] sm:$0xff] %v661_v24 }
 0x130   : >> { %v665_v26 = vld [vmem:[%s14752_s6 + $0x1b40] sm:$0xff]  ;;  %664 = vst [vmem:[%s14748_s29 + $0xd90] sm:$0xff] %v663_v25 }
 0x131   : >> { %666 = vst [vmem:[%s14748_s29 + $0xda0] sm:$0xff] %v665_v26  ;;  %v667_v27 = vld [vmem:[%s14752_s6 + $0x1b60] sm:$0xff] }
 0x132   : >> { %v669_v28 = vld [vmem:[%s14752_s6 + $0x1b80] sm:$0xff]  ;;  %668 = vst [vmem:[%s14748_s29 + $0xdb0] sm:$0xff] %v667_v27 }
 0x133   : >> { %v671_v29 = vld [vmem:[%s14752_s6 + $0x1ba0] sm:$0xff]  ;;  %670 = vst [vmem:[%s14748_s29 + $0xdc0] sm:$0xff] %v669_v28 }
 0x134   : >> { %672 = vst [vmem:[%s14748_s29 + $0xdd0] sm:$0xff] %v671_v29  ;;  %v673_v30 = vld [vmem:[%s14752_s6 + $0x1bc0] sm:$0xff] }
 0x135   : >> { %v675_v31 = vld [vmem:[%s14752_s6 + $0x1be0] sm:$0xff]  ;;  %674 = vst [vmem:[%s14748_s29 + $0xde0] sm:$0xff] %v673_v30 }
 0x136   : >> { %v677_v32 = vld [vmem:[%s14752_s6 + $0x1c00] sm:$0xff]  ;;  %676 = vst [vmem:[%s14748_s29 + $0xdf0] sm:$0xff] %v675_v31 }
 0x137   : >> { %678 = vst [vmem:[%s14748_s29 + $0xe00] sm:$0xff] %v677_v32  ;;  %v679_v33 = vld [vmem:[%s14752_s6 + $0x1c20] sm:$0xff] }
 0x138   : >> { %v681_v34 = vld [vmem:[%s14752_s6 + $0x1c40] sm:$0xff]  ;;  %680 = vst [vmem:[%s14748_s29 + $0xe10] sm:$0xff] %v679_v33 }
 0x139   : >> { %v683_v35 = vld [vmem:[%s14752_s6 + $0x1c60] sm:$0xff]  ;;  %682 = vst [vmem:[%s14748_s29 + $0xe20] sm:$0xff] %v681_v34 }
 0x13a   : >> { %684 = vst [vmem:[%s14748_s29 + $0xe30] sm:$0xff] %v683_v35  ;;  %v685_v36 = vld [vmem:[%s14752_s6 + $0x1c80] sm:$0xff] }
 0x13b   : >> { %v687_v37 = vld [vmem:[%s14752_s6 + $0x1ca0] sm:$0xff]  ;;  %686 = vst [vmem:[%s14748_s29 + $0xe40] sm:$0xff] %v685_v36 }
 0x13c   : >> { %v689_v38 = vld [vmem:[%s14752_s6 + $0x1cc0] sm:$0xff]  ;;  %688 = vst [vmem:[%s14748_s29 + $0xe50] sm:$0xff] %v687_v37 }
 0x13d   : >> { %690 = vst [vmem:[%s14748_s29 + $0xe60] sm:$0xff] %v689_v38  ;;  %v691_v39 = vld [vmem:[%s14752_s6 + $0x1ce0] sm:$0xff] }
 0x13e   : >> { %v693_v40 = vld [vmem:[%s14752_s6 + $0x1d00] sm:$0xff]  ;;  %692 = vst [vmem:[%s14748_s29 + $0xe70] sm:$0xff] %v691_v39 }
 0x13f   : >> { %v695_v41 = vld [vmem:[%s14752_s6 + $0x1d20] sm:$0xff]  ;;  %694 = vst [vmem:[%s14748_s29 + $0xe80] sm:$0xff] %v693_v40 }
 0x140   : >> { %696 = vst [vmem:[%s14748_s29 + $0xe90] sm:$0xff] %v695_v41  ;;  %v697_v42 = vld [vmem:[%s14752_s6 + $0x1d40] sm:$0xff] }
 0x141   : >> { %v699_v43 = vld [vmem:[%s14752_s6 + $0x1d60] sm:$0xff]  ;;  %698 = vst [vmem:[%s14748_s29 + $0xea0] sm:$0xff] %v697_v42 }
 0x142   : >> { %v701_v44 = vld [vmem:[%s14752_s6 + $0x1d80] sm:$0xff]  ;;  %700 = vst [vmem:[%s14748_s29 + $0xeb0] sm:$0xff] %v699_v43 }
 0x143   : >> { %702 = vst [vmem:[%s14748_s29 + $0xec0] sm:$0xff] %v701_v44  ;;  %v703_v45 = vld [vmem:[%s14752_s6 + $0x1da0] sm:$0xff] }
 0x144   : >> { %v705_v46 = vld [vmem:[%s14752_s6 + $0x1dc0] sm:$0xff]  ;;  %704 = vst [vmem:[%s14748_s29 + $0xed0] sm:$0xff] %v703_v45 }
 0x145   : >> { %v707_v47 = vld [vmem:[%s14752_s6 + $0x1de0] sm:$0xff]  ;;  %706 = vst [vmem:[%s14748_s29 + $0xee0] sm:$0xff] %v705_v46 }
 0x146   : >> { %708 = vst [vmem:[%s14748_s29 + $0xef0] sm:$0xff] %v707_v47  ;;  %v709_v48 = vld [vmem:[%s14752_s6 + $0x1e00] sm:$0xff] }
 0x147   : >> { %v711_v49 = vld [vmem:[%s14752_s6 + $0x1e20] sm:$0xff]  ;;  %710 = vst [vmem:[%s14748_s29 + $0xf00] sm:$0xff] %v709_v48 }
 0x148   : >> { %v713_v50 = vld [vmem:[%s14752_s6 + $0x1e40] sm:$0xff]  ;;  %712 = vst [vmem:[%s14748_s29 + $0xf10] sm:$0xff] %v711_v49 }
 0x149   : >> { %714 = vst [vmem:[%s14748_s29 + $0xf20] sm:$0xff] %v713_v50  ;;  %v715_v51 = vld [vmem:[%s14752_s6 + $0x1e60] sm:$0xff] }
 0x14a   : >> { %v717_v52 = vld [vmem:[%s14752_s6 + $0x1e80] sm:$0xff]  ;;  %716 = vst [vmem:[%s14748_s29 + $0xf30] sm:$0xff] %v715_v51 }
 0x14b   : >> { %v719_v53 = vld [vmem:[%s14752_s6 + $0x1ea0] sm:$0xff]  ;;  %718 = vst [vmem:[%s14748_s29 + $0xf40] sm:$0xff] %v717_v52 }
 0x14c   : >> { %720 = vst [vmem:[%s14748_s29 + $0xf50] sm:$0xff] %v719_v53  ;;  %v721_v54 = vld [vmem:[%s14752_s6 + $0x1ec0] sm:$0xff] }
 0x14d   : >> { %v723_v55 = vld [vmem:[%s14752_s6 + $0x1ee0] sm:$0xff]  ;;  %722 = vst [vmem:[%s14748_s29 + $0xf60] sm:$0xff] %v721_v54 }
 0x14e   : >> { %v725_v56 = vld [vmem:[%s14752_s6 + $0x1f00] sm:$0xff]  ;;  %724 = vst [vmem:[%s14748_s29 + $0xf70] sm:$0xff] %v723_v55 }
 0x14f   : >> { %726 = vst [vmem:[%s14748_s29 + $0xf80] sm:$0xff] %v725_v56  ;;  %v727_v57 = vld [vmem:[%s14752_s6 + $0x1f20] sm:$0xff] }
 0x150   : >> { %v729_v58 = vld [vmem:[%s14752_s6 + $0x1f40] sm:$0xff]  ;;  %728 = vst [vmem:[%s14748_s29 + $0xf90] sm:$0xff] %v727_v57 }
 0x151   : >> { %v731_v59 = vld [vmem:[%s14752_s6 + $0x1f60] sm:$0xff]  ;;  %730 = vst [vmem:[%s14748_s29 + $0xfa0] sm:$0xff] %v729_v58 }
 0x152   : >> { %732 = vst [vmem:[%s14748_s29 + $0xfb0] sm:$0xff] %v731_v59  ;;  %v733_v60 = vld [vmem:[%s14752_s6 + $0x1f80] sm:$0xff] }
 0x153   : >> { %v735_v61 = vld [vmem:[%s14752_s6 + $0x1fa0] sm:$0xff]  ;;  %734 = vst [vmem:[%s14748_s29 + $0xfc0] sm:$0xff] %v733_v60 }
 0x154   : >> { %v737_v62 = vld [vmem:[%s14752_s6 + $0x1fc0] sm:$0xff]  ;;  %736 = vst [vmem:[%s14748_s29 + $0xfd0] sm:$0xff] %v735_v61 }
 0x155   : >> { %738 = vst [vmem:[%s14748_s29 + $0xfe0] sm:$0xff] %v737_v62  ;;  %v739_v63 = vld [vmem:[%s14752_s6 + $0x1fe0] sm:$0xff] }
 0x156   : >> { %v741_v0 = vld [vmem:[%s14752_s6 + $0x2000] sm:$0xff]  ;;  %740 = vst [vmem:[%s14748_s29 + $0xff0] sm:$0xff] %v739_v63 }
 0x157   : >> { %v743_v1 = vld [vmem:[%s14752_s6 + $0x2020] sm:$0xff]  ;;  %742 = vst [vmem:[%s14748_s29 + $0x1000] sm:$0xff] %v741_v0 }
 0x158   : >> { %744 = vst [vmem:[%s14748_s29 + $0x1010] sm:$0xff] %v743_v1  ;;  %v745_v2 = vld [vmem:[%s14752_s6 + $0x2040] sm:$0xff] }
 0x159   : >> { %v747_v3 = vld [vmem:[%s14752_s6 + $0x2060] sm:$0xff]  ;;  %746 = vst [vmem:[%s14748_s29 + $0x1020] sm:$0xff] %v745_v2 }
 0x15a   : >> { %v749_v4 = vld [vmem:[%s14752_s6 + $0x2080] sm:$0xff]  ;;  %748 = vst [vmem:[%s14748_s29 + $0x1030] sm:$0xff] %v747_v3 }
 0x15b   : >> { %750 = vst [vmem:[%s14748_s29 + $0x1040] sm:$0xff] %v749_v4  ;;  %v751_v5 = vld [vmem:[%s14752_s6 + $0x20a0] sm:$0xff] }
 0x15c   : >> { %v753_v6 = vld [vmem:[%s14752_s6 + $0x20c0] sm:$0xff]  ;;  %752 = vst [vmem:[%s14748_s29 + $0x1050] sm:$0xff] %v751_v5 }
 0x15d   : >> { %v755_v7 = vld [vmem:[%s14752_s6 + $0x20e0] sm:$0xff]  ;;  %754 = vst [vmem:[%s14748_s29 + $0x1060] sm:$0xff] %v753_v6 }
 0x15e   : >> { %756 = vst [vmem:[%s14748_s29 + $0x1070] sm:$0xff] %v755_v7  ;;  %v757_v8 = vld [vmem:[%s14752_s6 + $0x2100] sm:$0xff] }
 0x15f   : >> { %v759_v9 = vld [vmem:[%s14752_s6 + $0x2120] sm:$0xff]  ;;  %758 = vst [vmem:[%s14748_s29 + $0x1080] sm:$0xff] %v757_v8 }
 0x160   : >> { %v761_v10 = vld [vmem:[%s14752_s6 + $0x2140] sm:$0xff]  ;;  %760 = vst [vmem:[%s14748_s29 + $0x1090] sm:$0xff] %v759_v9 }
 0x161   : >> { %762 = vst [vmem:[%s14748_s29 + $0x10a0] sm:$0xff] %v761_v10  ;;  %v763_v11 = vld [vmem:[%s14752_s6 + $0x2160] sm:$0xff] }
 0x162   : >> { %v765_v12 = vld [vmem:[%s14752_s6 + $0x2180] sm:$0xff]  ;;  %764 = vst [vmem:[%s14748_s29 + $0x10b0] sm:$0xff] %v763_v11 }
 0x163   : >> { %v767_v13 = vld [vmem:[%s14752_s6 + $0x21a0] sm:$0xff]  ;;  %766 = vst [vmem:[%s14748_s29 + $0x10c0] sm:$0xff] %v765_v12 }
 0x164   : >> { %768 = vst [vmem:[%s14748_s29 + $0x10d0] sm:$0xff] %v767_v13  ;;  %v769_v14 = vld [vmem:[%s14752_s6 + $0x21c0] sm:$0xff] }
 0x165   : >> { %v771_v15 = vld [vmem:[%s14752_s6 + $0x21e0] sm:$0xff]  ;;  %770 = vst [vmem:[%s14748_s29 + $0x10e0] sm:$0xff] %v769_v14 }
 0x166   : >> { %v773_v16 = vld [vmem:[%s14752_s6 + $0x2200] sm:$0xff]  ;;  %772 = vst [vmem:[%s14748_s29 + $0x10f0] sm:$0xff] %v771_v15 }
 0x167   : >> { %774 = vst [vmem:[%s14748_s29 + $0x1100] sm:$0xff] %v773_v16  ;;  %v775_v17 = vld [vmem:[%s14752_s6 + $0x2220] sm:$0xff] }
 0x168   : >> { %v777_v18 = vld [vmem:[%s14752_s6 + $0x2240] sm:$0xff]  ;;  %776 = vst [vmem:[%s14748_s29 + $0x1110] sm:$0xff] %v775_v17 }
 0x169   : >> { %v779_v19 = vld [vmem:[%s14752_s6 + $0x2260] sm:$0xff]  ;;  %778 = vst [vmem:[%s14748_s29 + $0x1120] sm:$0xff] %v777_v18 }
 0x16a   : >> { %780 = vst [vmem:[%s14748_s29 + $0x1130] sm:$0xff] %v779_v19  ;;  %v781_v20 = vld [vmem:[%s14752_s6 + $0x2280] sm:$0xff] }
 0x16b   : >> { %v783_v21 = vld [vmem:[%s14752_s6 + $0x22a0] sm:$0xff]  ;;  %782 = vst [vmem:[%s14748_s29 + $0x1140] sm:$0xff] %v781_v20 }
 0x16c   : >> { %v785_v22 = vld [vmem:[%s14752_s6 + $0x22c0] sm:$0xff]  ;;  %784 = vst [vmem:[%s14748_s29 + $0x1150] sm:$0xff] %v783_v21 }
 0x16d   : >> { %786 = vst [vmem:[%s14748_s29 + $0x1160] sm:$0xff] %v785_v22  ;;  %v787_v23 = vld [vmem:[%s14752_s6 + $0x22e0] sm:$0xff] }
 0x16e   : >> { %v789_v24 = vld [vmem:[%s14752_s6 + $0x2300] sm:$0xff]  ;;  %788 = vst [vmem:[%s14748_s29 + $0x1170] sm:$0xff] %v787_v23 }
 0x16f   : >> { %v791_v25 = vld [vmem:[%s14752_s6 + $0x2320] sm:$0xff]  ;;  %790 = vst [vmem:[%s14748_s29 + $0x1180] sm:$0xff] %v789_v24 }
 0x170   : >> { %792 = vst [vmem:[%s14748_s29 + $0x1190] sm:$0xff] %v791_v25  ;;  %v793_v26 = vld [vmem:[%s14752_s6 + $0x2340] sm:$0xff] }
 0x171   : >> { %v795_v27 = vld [vmem:[%s14752_s6 + $0x2360] sm:$0xff]  ;;  %794 = vst [vmem:[%s14748_s29 + $0x11a0] sm:$0xff] %v793_v26 }
 0x172   : >> { %v797_v28 = vld [vmem:[%s14752_s6 + $0x2380] sm:$0xff]  ;;  %796 = vst [vmem:[%s14748_s29 + $0x11b0] sm:$0xff] %v795_v27 }
 0x173   : >> { %798 = vst [vmem:[%s14748_s29 + $0x11c0] sm:$0xff] %v797_v28  ;;  %v799_v29 = vld [vmem:[%s14752_s6 + $0x23a0] sm:$0xff] }
 0x174   : >> { %v801_v30 = vld [vmem:[%s14752_s6 + $0x23c0] sm:$0xff]  ;;  %800 = vst [vmem:[%s14748_s29 + $0x11d0] sm:$0xff] %v799_v29 }
 0x175   : >> { %v803_v31 = vld [vmem:[%s14752_s6 + $0x23e0] sm:$0xff]  ;;  %802 = vst [vmem:[%s14748_s29 + $0x11e0] sm:$0xff] %v801_v30 }
 0x176   : >> { %804 = vst [vmem:[%s14748_s29 + $0x11f0] sm:$0xff] %v803_v31  ;;  %v805_v32 = vld [vmem:[%s14752_s6 + $0x2400] sm:$0xff] }
 0x177   : >> { %v807_v33 = vld [vmem:[%s14752_s6 + $0x2420] sm:$0xff]  ;;  %806 = vst [vmem:[%s14748_s29 + $0x1200] sm:$0xff] %v805_v32 }
 0x178   : >> { %v809_v34 = vld [vmem:[%s14752_s6 + $0x2440] sm:$0xff]  ;;  %808 = vst [vmem:[%s14748_s29 + $0x1210] sm:$0xff] %v807_v33 }
 0x179   : >> { %810 = vst [vmem:[%s14748_s29 + $0x1220] sm:$0xff] %v809_v34  ;;  %v811_v35 = vld [vmem:[%s14752_s6 + $0x2460] sm:$0xff] }
 0x17a   : >> { %v813_v36 = vld [vmem:[%s14752_s6 + $0x2480] sm:$0xff]  ;;  %812 = vst [vmem:[%s14748_s29 + $0x1230] sm:$0xff] %v811_v35 }
 0x17b   : >> { %v815_v37 = vld [vmem:[%s14752_s6 + $0x24a0] sm:$0xff]  ;;  %814 = vst [vmem:[%s14748_s29 + $0x1240] sm:$0xff] %v813_v36 }
 0x17c   : >> { %816 = vst [vmem:[%s14748_s29 + $0x1250] sm:$0xff] %v815_v37  ;;  %v817_v38 = vld [vmem:[%s14752_s6 + $0x24c0] sm:$0xff] }
 0x17d   : >> { %v819_v39 = vld [vmem:[%s14752_s6 + $0x24e0] sm:$0xff]  ;;  %818 = vst [vmem:[%s14748_s29 + $0x1260] sm:$0xff] %v817_v38 }
 0x17e   : >> { %v821_v40 = vld [vmem:[%s14752_s6 + $0x2500] sm:$0xff]  ;;  %820 = vst [vmem:[%s14748_s29 + $0x1270] sm:$0xff] %v819_v39 }
 0x17f   : >> { %822 = vst [vmem:[%s14748_s29 + $0x1280] sm:$0xff] %v821_v40  ;;  %v823_v41 = vld [vmem:[%s14752_s6 + $0x2520] sm:$0xff] }
 0x180   : >> { %v825_v42 = vld [vmem:[%s14752_s6 + $0x2540] sm:$0xff]  ;;  %824 = vst [vmem:[%s14748_s29 + $0x1290] sm:$0xff] %v823_v41 }
 0x181   : >> { %v827_v43 = vld [vmem:[%s14752_s6 + $0x2560] sm:$0xff]  ;;  %826 = vst [vmem:[%s14748_s29 + $0x12a0] sm:$0xff] %v825_v42 }
 0x182   : >> { %828 = vst [vmem:[%s14748_s29 + $0x12b0] sm:$0xff] %v827_v43  ;;  %v829_v44 = vld [vmem:[%s14752_s6 + $0x2580] sm:$0xff] }
 0x183   : >> { %v831_v45 = vld [vmem:[%s14752_s6 + $0x25a0] sm:$0xff]  ;;  %830 = vst [vmem:[%s14748_s29 + $0x12c0] sm:$0xff] %v829_v44 }
 0x184   : >> { %v833_v46 = vld [vmem:[%s14752_s6 + $0x25c0] sm:$0xff]  ;;  %832 = vst [vmem:[%s14748_s29 + $0x12d0] sm:$0xff] %v831_v45 }
 0x185   : >> { %834 = vst [vmem:[%s14748_s29 + $0x12e0] sm:$0xff] %v833_v46  ;;  %v835_v47 = vld [vmem:[%s14752_s6 + $0x25e0] sm:$0xff] }
 0x186   : >> { %v837_v48 = vld [vmem:[%s14752_s6 + $0x2600] sm:$0xff]  ;;  %836 = vst [vmem:[%s14748_s29 + $0x12f0] sm:$0xff] %v835_v47 }
 0x187   : >> { %v839_v49 = vld [vmem:[%s14752_s6 + $0x2620] sm:$0xff]  ;;  %838 = vst [vmem:[%s14748_s29 + $0x1300] sm:$0xff] %v837_v48 }
 0x188   : >> { %840 = vst [vmem:[%s14748_s29 + $0x1310] sm:$0xff] %v839_v49  ;;  %v841_v50 = vld [vmem:[%s14752_s6 + $0x2640] sm:$0xff] }
 0x189   : >> { %v843_v51 = vld [vmem:[%s14752_s6 + $0x2660] sm:$0xff]  ;;  %842 = vst [vmem:[%s14748_s29 + $0x1320] sm:$0xff] %v841_v50 }
 0x18a   : >> { %v845_v52 = vld [vmem:[%s14752_s6 + $0x2680] sm:$0xff]  ;;  %844 = vst [vmem:[%s14748_s29 + $0x1330] sm:$0xff] %v843_v51 }
 0x18b   : >> { %846 = vst [vmem:[%s14748_s29 + $0x1340] sm:$0xff] %v845_v52  ;;  %v847_v53 = vld [vmem:[%s14752_s6 + $0x26a0] sm:$0xff] }
 0x18c   : >> { %v849_v54 = vld [vmem:[%s14752_s6 + $0x26c0] sm:$0xff]  ;;  %848 = vst [vmem:[%s14748_s29 + $0x1350] sm:$0xff] %v847_v53 }
 0x18d   : >> { %v851_v55 = vld [vmem:[%s14752_s6 + $0x26e0] sm:$0xff]  ;;  %850 = vst [vmem:[%s14748_s29 + $0x1360] sm:$0xff] %v849_v54 }
 0x18e   : >> { %852 = vst [vmem:[%s14748_s29 + $0x1370] sm:$0xff] %v851_v55  ;;  %v853_v56 = vld [vmem:[%s14752_s6 + $0x2700] sm:$0xff] }
 0x18f   : >> { %v855_v57 = vld [vmem:[%s14752_s6 + $0x2720] sm:$0xff]  ;;  %854 = vst [vmem:[%s14748_s29 + $0x1380] sm:$0xff] %v853_v56 }
 0x190   : >> { %v857_v58 = vld [vmem:[%s14752_s6 + $0x2740] sm:$0xff]  ;;  %856 = vst [vmem:[%s14748_s29 + $0x1390] sm:$0xff] %v855_v57 }
 0x191   : >> { %858 = vst [vmem:[%s14748_s29 + $0x13a0] sm:$0xff] %v857_v58  ;;  %v859_v59 = vld [vmem:[%s14752_s6 + $0x2760] sm:$0xff] }
 0x192   : >> { %v861_v60 = vld [vmem:[%s14752_s6 + $0x2780] sm:$0xff]  ;;  %860 = vst [vmem:[%s14748_s29 + $0x13b0] sm:$0xff] %v859_v59 }
 0x193   : >> { %v863_v61 = vld [vmem:[%s14752_s6 + $0x27a0] sm:$0xff]  ;;  %862 = vst [vmem:[%s14748_s29 + $0x13c0] sm:$0xff] %v861_v60 }
 0x194   : >> { %864 = vst [vmem:[%s14748_s29 + $0x13d0] sm:$0xff] %v863_v61  ;;  %v865_v62 = vld [vmem:[%s14752_s6 + $0x27c0] sm:$0xff] }
 0x195   : >> { %v867_v63 = vld [vmem:[%s14752_s6 + $0x27e0] sm:$0xff]  ;;  %866 = vst [vmem:[%s14748_s29 + $0x13e0] sm:$0xff] %v865_v62 }
 0x196   : >> { %v869_v0 = vld [vmem:[%s14752_s6 + $0x2800] sm:$0xff]  ;;  %868 = vst [vmem:[%s14748_s29 + $0x13f0] sm:$0xff] %v867_v63 }
 0x197   : >> { %870 = vst [vmem:[%s14748_s29 + $0x1400] sm:$0xff] %v869_v0  ;;  %v871_v1 = vld [vmem:[%s14752_s6 + $0x2820] sm:$0xff] }
 0x198   : >> { %v873_v2 = vld [vmem:[%s14752_s6 + $0x2840] sm:$0xff]  ;;  %872 = vst [vmem:[%s14748_s29 + $0x1410] sm:$0xff] %v871_v1 }
 0x199   : >> { %v875_v3 = vld [vmem:[%s14752_s6 + $0x2860] sm:$0xff]  ;;  %874 = vst [vmem:[%s14748_s29 + $0x1420] sm:$0xff] %v873_v2 }
 0x19a   : >> { %876 = vst [vmem:[%s14748_s29 + $0x1430] sm:$0xff] %v875_v3  ;;  %v877_v4 = vld [vmem:[%s14752_s6 + $0x2880] sm:$0xff] }
 0x19b   : >> { %v879_v5 = vld [vmem:[%s14752_s6 + $0x28a0] sm:$0xff]  ;;  %878 = vst [vmem:[%s14748_s29 + $0x1440] sm:$0xff] %v877_v4 }
 0x19c   : >> { %v881_v6 = vld [vmem:[%s14752_s6 + $0x28c0] sm:$0xff]  ;;  %880 = vst [vmem:[%s14748_s29 + $0x1450] sm:$0xff] %v879_v5 }
 0x19d   : >> { %882 = vst [vmem:[%s14748_s29 + $0x1460] sm:$0xff] %v881_v6  ;;  %v883_v7 = vld [vmem:[%s14752_s6 + $0x28e0] sm:$0xff] }
 0x19e   : >> { %v885_v8 = vld [vmem:[%s14752_s6 + $0x2900] sm:$0xff]  ;;  %884 = vst [vmem:[%s14748_s29 + $0x1470] sm:$0xff] %v883_v7 }
 0x19f   : >> { %v887_v9 = vld [vmem:[%s14752_s6 + $0x2920] sm:$0xff]  ;;  %886 = vst [vmem:[%s14748_s29 + $0x1480] sm:$0xff] %v885_v8 }
 0x1a0   : >> { %888 = vst [vmem:[%s14748_s29 + $0x1490] sm:$0xff] %v887_v9  ;;  %v889_v10 = vld [vmem:[%s14752_s6 + $0x2940] sm:$0xff] }
 0x1a1   : >> { %v891_v11 = vld [vmem:[%s14752_s6 + $0x2960] sm:$0xff]  ;;  %890 = vst [vmem:[%s14748_s29 + $0x14a0] sm:$0xff] %v889_v10 }
 0x1a2   : >> { %v893_v12 = vld [vmem:[%s14752_s6 + $0x2980] sm:$0xff]  ;;  %892 = vst [vmem:[%s14748_s29 + $0x14b0] sm:$0xff] %v891_v11 }
 0x1a3   : >> { %894 = vst [vmem:[%s14748_s29 + $0x14c0] sm:$0xff] %v893_v12  ;;  %v895_v13 = vld [vmem:[%s14752_s6 + $0x29a0] sm:$0xff] }
 0x1a4   : >> { %v897_v14 = vld [vmem:[%s14752_s6 + $0x29c0] sm:$0xff]  ;;  %896 = vst [vmem:[%s14748_s29 + $0x14d0] sm:$0xff] %v895_v13 }
 0x1a5   : >> { %v899_v15 = vld [vmem:[%s14752_s6 + $0x29e0] sm:$0xff]  ;;  %898 = vst [vmem:[%s14748_s29 + $0x14e0] sm:$0xff] %v897_v14 }
 0x1a6   : >> { %900 = vst [vmem:[%s14748_s29 + $0x14f0] sm:$0xff] %v899_v15  ;;  %v901_v16 = vld [vmem:[%s14752_s6 + $0x2a00] sm:$0xff] }
 0x1a7   : >> { %v903_v17 = vld [vmem:[%s14752_s6 + $0x2a20] sm:$0xff]  ;;  %902 = vst [vmem:[%s14748_s29 + $0x1500] sm:$0xff] %v901_v16 }
 0x1a8   : >> { %v905_v18 = vld [vmem:[%s14752_s6 + $0x2a40] sm:$0xff]  ;;  %904 = vst [vmem:[%s14748_s29 + $0x1510] sm:$0xff] %v903_v17 }
 0x1a9   : >> { %906 = vst [vmem:[%s14748_s29 + $0x1520] sm:$0xff] %v905_v18  ;;  %v907_v19 = vld [vmem:[%s14752_s6 + $0x2a60] sm:$0xff] }
 0x1aa   : >> { %v909_v20 = vld [vmem:[%s14752_s6 + $0x2a80] sm:$0xff]  ;;  %908 = vst [vmem:[%s14748_s29 + $0x1530] sm:$0xff] %v907_v19 }
 0x1ab   : >> { %v911_v21 = vld [vmem:[%s14752_s6 + $0x2aa0] sm:$0xff]  ;;  %910 = vst [vmem:[%s14748_s29 + $0x1540] sm:$0xff] %v909_v20 }
 0x1ac   : >> { %912 = vst [vmem:[%s14748_s29 + $0x1550] sm:$0xff] %v911_v21  ;;  %v913_v22 = vld [vmem:[%s14752_s6 + $0x2ac0] sm:$0xff] }
 0x1ad   : >> { %v915_v23 = vld [vmem:[%s14752_s6 + $0x2ae0] sm:$0xff]  ;;  %914 = vst [vmem:[%s14748_s29 + $0x1560] sm:$0xff] %v913_v22 }
 0x1ae   : >> { %v917_v24 = vld [vmem:[%s14752_s6 + $0x2b00] sm:$0xff]  ;;  %916 = vst [vmem:[%s14748_s29 + $0x1570] sm:$0xff] %v915_v23 }
 0x1af   : >> { %918 = vst [vmem:[%s14748_s29 + $0x1580] sm:$0xff] %v917_v24  ;;  %v919_v25 = vld [vmem:[%s14752_s6 + $0x2b20] sm:$0xff] }
 0x1b0   : >> { %v921_v26 = vld [vmem:[%s14752_s6 + $0x2b40] sm:$0xff]  ;;  %920 = vst [vmem:[%s14748_s29 + $0x1590] sm:$0xff] %v919_v25 }
 0x1b1   : >> { %v923_v27 = vld [vmem:[%s14752_s6 + $0x2b60] sm:$0xff]  ;;  %922 = vst [vmem:[%s14748_s29 + $0x15a0] sm:$0xff] %v921_v26 }
 0x1b2   : >> { %924 = vst [vmem:[%s14748_s29 + $0x15b0] sm:$0xff] %v923_v27  ;;  %v925_v28 = vld [vmem:[%s14752_s6 + $0x2b80] sm:$0xff] }
 0x1b3   : >> { %v927_v29 = vld [vmem:[%s14752_s6 + $0x2ba0] sm:$0xff]  ;;  %926 = vst [vmem:[%s14748_s29 + $0x15c0] sm:$0xff] %v925_v28 }
 0x1b4   : >> { %v929_v30 = vld [vmem:[%s14752_s6 + $0x2bc0] sm:$0xff]  ;;  %928 = vst [vmem:[%s14748_s29 + $0x15d0] sm:$0xff] %v927_v29 }
 0x1b5   : >> { %930 = vst [vmem:[%s14748_s29 + $0x15e0] sm:$0xff] %v929_v30  ;;  %v931_v31 = vld [vmem:[%s14752_s6 + $0x2be0] sm:$0xff] }
 0x1b6   : >> { %v933_v32 = vld [vmem:[%s14752_s6 + $0x2c00] sm:$0xff]  ;;  %932 = vst [vmem:[%s14748_s29 + $0x15f0] sm:$0xff] %v931_v31 }
 0x1b7   : >> { %v935_v33 = vld [vmem:[%s14752_s6 + $0x2c20] sm:$0xff]  ;;  %934 = vst [vmem:[%s14748_s29 + $0x1600] sm:$0xff] %v933_v32 }
 0x1b8   : >> { %936 = vst [vmem:[%s14748_s29 + $0x1610] sm:$0xff] %v935_v33  ;;  %v937_v34 = vld [vmem:[%s14752_s6 + $0x2c40] sm:$0xff] }
 0x1b9   : >> { %v939_v35 = vld [vmem:[%s14752_s6 + $0x2c60] sm:$0xff]  ;;  %938 = vst [vmem:[%s14748_s29 + $0x1620] sm:$0xff] %v937_v34 }
 0x1ba   : >> { %v941_v36 = vld [vmem:[%s14752_s6 + $0x2c80] sm:$0xff]  ;;  %940 = vst [vmem:[%s14748_s29 + $0x1630] sm:$0xff] %v939_v35 }
 0x1bb   : >> { %942 = vst [vmem:[%s14748_s29 + $0x1640] sm:$0xff] %v941_v36  ;;  %v943_v37 = vld [vmem:[%s14752_s6 + $0x2ca0] sm:$0xff] }
 0x1bc   : >> { %v945_v38 = vld [vmem:[%s14752_s6 + $0x2cc0] sm:$0xff]  ;;  %944 = vst [vmem:[%s14748_s29 + $0x1650] sm:$0xff] %v943_v37 }
 0x1bd   : >> { %v947_v39 = vld [vmem:[%s14752_s6 + $0x2ce0] sm:$0xff]  ;;  %946 = vst [vmem:[%s14748_s29 + $0x1660] sm:$0xff] %v945_v38 }
 0x1be   : >> { %948 = vst [vmem:[%s14748_s29 + $0x1670] sm:$0xff] %v947_v39  ;;  %v949_v40 = vld [vmem:[%s14752_s6 + $0x2d00] sm:$0xff] }
 0x1bf   : >> { %v951_v41 = vld [vmem:[%s14752_s6 + $0x2d20] sm:$0xff]  ;;  %950 = vst [vmem:[%s14748_s29 + $0x1680] sm:$0xff] %v949_v40 }
 0x1c0   : >> { %v953_v42 = vld [vmem:[%s14752_s6 + $0x2d40] sm:$0xff]  ;;  %952 = vst [vmem:[%s14748_s29 + $0x1690] sm:$0xff] %v951_v41 }
 0x1c1   : >> { %954 = vst [vmem:[%s14748_s29 + $0x16a0] sm:$0xff] %v953_v42  ;;  %v955_v43 = vld [vmem:[%s14752_s6 + $0x2d60] sm:$0xff] }
 0x1c2   : >> { %v957_v44 = vld [vmem:[%s14752_s6 + $0x2d80] sm:$0xff]  ;;  %956 = vst [vmem:[%s14748_s29 + $0x16b0] sm:$0xff] %v955_v43 }
 0x1c3   : >> { %v959_v45 = vld [vmem:[%s14752_s6 + $0x2da0] sm:$0xff]  ;;  %958 = vst [vmem:[%s14748_s29 + $0x16c0] sm:$0xff] %v957_v44 }
 0x1c4   : >> { %960 = vst [vmem:[%s14748_s29 + $0x16d0] sm:$0xff] %v959_v45  ;;  %v961_v46 = vld [vmem:[%s14752_s6 + $0x2dc0] sm:$0xff] }
 0x1c5   : >> { %v963_v47 = vld [vmem:[%s14752_s6 + $0x2de0] sm:$0xff]  ;;  %962 = vst [vmem:[%s14748_s29 + $0x16e0] sm:$0xff] %v961_v46 }
 0x1c6   : >> { %v965_v48 = vld [vmem:[%s14752_s6 + $0x2e00] sm:$0xff]  ;;  %964 = vst [vmem:[%s14748_s29 + $0x16f0] sm:$0xff] %v963_v47 }
 0x1c7   : >> { %966 = vst [vmem:[%s14748_s29 + $0x1700] sm:$0xff] %v965_v48  ;;  %v967_v49 = vld [vmem:[%s14752_s6 + $0x2e20] sm:$0xff] }
 0x1c8   : >> { %v969_v50 = vld [vmem:[%s14752_s6 + $0x2e40] sm:$0xff]  ;;  %968 = vst [vmem:[%s14748_s29 + $0x1710] sm:$0xff] %v967_v49 }
 0x1c9   : >> { %v971_v51 = vld [vmem:[%s14752_s6 + $0x2e60] sm:$0xff]  ;;  %970 = vst [vmem:[%s14748_s29 + $0x1720] sm:$0xff] %v969_v50 }
 0x1ca   : >> { %972 = vst [vmem:[%s14748_s29 + $0x1730] sm:$0xff] %v971_v51  ;;  %v973_v52 = vld [vmem:[%s14752_s6 + $0x2e80] sm:$0xff] }
 0x1cb   : >> { %v975_v53 = vld [vmem:[%s14752_s6 + $0x2ea0] sm:$0xff]  ;;  %974 = vst [vmem:[%s14748_s29 + $0x1740] sm:$0xff] %v973_v52 }
 0x1cc   : >> { %v977_v54 = vld [vmem:[%s14752_s6 + $0x2ec0] sm:$0xff]  ;;  %976 = vst [vmem:[%s14748_s29 + $0x1750] sm:$0xff] %v975_v53 }
 0x1cd   : >> { %978 = vst [vmem:[%s14748_s29 + $0x1760] sm:$0xff] %v977_v54  ;;  %v979_v55 = vld [vmem:[%s14752_s6 + $0x2ee0] sm:$0xff] }
 0x1ce   : >> { %v981_v56 = vld [vmem:[%s14752_s6 + $0x2f00] sm:$0xff]  ;;  %980 = vst [vmem:[%s14748_s29 + $0x1770] sm:$0xff] %v979_v55 }
 0x1cf   : >> { %v983_v57 = vld [vmem:[%s14752_s6 + $0x2f20] sm:$0xff]  ;;  %982 = vst [vmem:[%s14748_s29 + $0x1780] sm:$0xff] %v981_v56 }
 0x1d0   : >> { %984 = vst [vmem:[%s14748_s29 + $0x1790] sm:$0xff] %v983_v57  ;;  %v985_v58 = vld [vmem:[%s14752_s6 + $0x2f40] sm:$0xff] }
 0x1d1   : >> { %v987_v59 = vld [vmem:[%s14752_s6 + $0x2f60] sm:$0xff]  ;;  %986 = vst [vmem:[%s14748_s29 + $0x17a0] sm:$0xff] %v985_v58 }
 0x1d2   : >> { %v989_v60 = vld [vmem:[%s14752_s6 + $0x2f80] sm:$0xff]  ;;  %988 = vst [vmem:[%s14748_s29 + $0x17b0] sm:$0xff] %v987_v59 }
 0x1d3   : >> { %990 = vst [vmem:[%s14748_s29 + $0x17c0] sm:$0xff] %v989_v60  ;;  %v991_v61 = vld [vmem:[%s14752_s6 + $0x2fa0] sm:$0xff] }
 0x1d4   : >> { %v993_v62 = vld [vmem:[%s14752_s6 + $0x2fc0] sm:$0xff]  ;;  %992 = vst [vmem:[%s14748_s29 + $0x17d0] sm:$0xff] %v991_v61 }
 0x1d5   : >> { %v995_v63 = vld [vmem:[%s14752_s6 + $0x2fe0] sm:$0xff]  ;;  %994 = vst [vmem:[%s14748_s29 + $0x17e0] sm:$0xff] %v993_v62 }
 0x1d6   : >> { %996 = vst [vmem:[%s14748_s29 + $0x17f0] sm:$0xff] %v995_v63  ;;  %v997_v0 = vld [vmem:[%s14752_s6 + $0x3000] sm:$0xff] }
 0x1d7   : >> { %v999_v1 = vld [vmem:[%s14752_s6 + $0x3020] sm:$0xff]  ;;  %998 = vst [vmem:[%s14748_s29 + $0x1800] sm:$0xff] %v997_v0 }
 0x1d8   : >> { %v1001_v2 = vld [vmem:[%s14752_s6 + $0x3040] sm:$0xff]  ;;  %1000 = vst [vmem:[%s14748_s29 + $0x1810] sm:$0xff] %v999_v1 }
 0x1d9   : >> { %1002 = vst [vmem:[%s14748_s29 + $0x1820] sm:$0xff] %v1001_v2  ;;  %v1003_v3 = vld [vmem:[%s14752_s6 + $0x3060] sm:$0xff] }
 0x1da   : >> { %v1005_v4 = vld [vmem:[%s14752_s6 + $0x3080] sm:$0xff]  ;;  %1004 = vst [vmem:[%s14748_s29 + $0x1830] sm:$0xff] %v1003_v3 }
 0x1db   : >> { %v1007_v5 = vld [vmem:[%s14752_s6 + $0x30a0] sm:$0xff]  ;;  %1006 = vst [vmem:[%s14748_s29 + $0x1840] sm:$0xff] %v1005_v4 }
 0x1dc   : >> { %1008 = vst [vmem:[%s14748_s29 + $0x1850] sm:$0xff] %v1007_v5  ;;  %v1009_v6 = vld [vmem:[%s14752_s6 + $0x30c0] sm:$0xff] }
 0x1dd   : >> { %v1011_v7 = vld [vmem:[%s14752_s6 + $0x30e0] sm:$0xff]  ;;  %1010 = vst [vmem:[%s14748_s29 + $0x1860] sm:$0xff] %v1009_v6 }
 0x1de   : >> { %v1013_v8 = vld [vmem:[%s14752_s6 + $0x3100] sm:$0xff]  ;;  %1012 = vst [vmem:[%s14748_s29 + $0x1870] sm:$0xff] %v1011_v7 }
 0x1df   : >> { %1014 = vst [vmem:[%s14748_s29 + $0x1880] sm:$0xff] %v1013_v8  ;;  %v1015_v9 = vld [vmem:[%s14752_s6 + $0x3120] sm:$0xff] }
 0x1e0   : >> { %v1017_v10 = vld [vmem:[%s14752_s6 + $0x3140] sm:$0xff]  ;;  %1016 = vst [vmem:[%s14748_s29 + $0x1890] sm:$0xff] %v1015_v9 }
 0x1e1   : >> { %v1019_v11 = vld [vmem:[%s14752_s6 + $0x3160] sm:$0xff]  ;;  %1018 = vst [vmem:[%s14748_s29 + $0x18a0] sm:$0xff] %v1017_v10 }
 0x1e2   : >> { %1020 = vst [vmem:[%s14748_s29 + $0x18b0] sm:$0xff] %v1019_v11  ;;  %v1021_v12 = vld [vmem:[%s14752_s6 + $0x3180] sm:$0xff] }
 0x1e3   : >> { %v1023_v13 = vld [vmem:[%s14752_s6 + $0x31a0] sm:$0xff]  ;;  %1022 = vst [vmem:[%s14748_s29 + $0x18c0] sm:$0xff] %v1021_v12 }
 0x1e4   : >> { %v1025_v14 = vld [vmem:[%s14752_s6 + $0x31c0] sm:$0xff]  ;;  %1024 = vst [vmem:[%s14748_s29 + $0x18d0] sm:$0xff] %v1023_v13 }
 0x1e5   : >> { %1026 = vst [vmem:[%s14748_s29 + $0x18e0] sm:$0xff] %v1025_v14  ;;  %v1027_v15 = vld [vmem:[%s14752_s6 + $0x31e0] sm:$0xff] }
 0x1e6   : >> { %v1029_v16 = vld [vmem:[%s14752_s6 + $0x3200] sm:$0xff]  ;;  %1028 = vst [vmem:[%s14748_s29 + $0x18f0] sm:$0xff] %v1027_v15 }
 0x1e7   : >> { %v1031_v17 = vld [vmem:[%s14752_s6 + $0x3220] sm:$0xff]  ;;  %1030 = vst [vmem:[%s14748_s29 + $0x1900] sm:$0xff] %v1029_v16 }
 0x1e8   : >> { %1032 = vst [vmem:[%s14748_s29 + $0x1910] sm:$0xff] %v1031_v17  ;;  %v1033_v18 = vld [vmem:[%s14752_s6 + $0x3240] sm:$0xff] }
 0x1e9   : >> { %v1035_v19 = vld [vmem:[%s14752_s6 + $0x3260] sm:$0xff]  ;;  %1034 = vst [vmem:[%s14748_s29 + $0x1920] sm:$0xff] %v1033_v18 }
 0x1ea   : >> { %v1037_v20 = vld [vmem:[%s14752_s6 + $0x3280] sm:$0xff]  ;;  %1036 = vst [vmem:[%s14748_s29 + $0x1930] sm:$0xff] %v1035_v19 }
 0x1eb   : >> { %1038 = vst [vmem:[%s14748_s29 + $0x1940] sm:$0xff] %v1037_v20  ;;  %v1039_v21 = vld [vmem:[%s14752_s6 + $0x32a0] sm:$0xff] }
 0x1ec   : >> { %v1041_v22 = vld [vmem:[%s14752_s6 + $0x32c0] sm:$0xff]  ;;  %1040 = vst [vmem:[%s14748_s29 + $0x1950] sm:$0xff] %v1039_v21 }
 0x1ed   : >> { %v1043_v23 = vld [vmem:[%s14752_s6 + $0x32e0] sm:$0xff]  ;;  %1042 = vst [vmem:[%s14748_s29 + $0x1960] sm:$0xff] %v1041_v22 }
 0x1ee   : >> { %1044 = vst [vmem:[%s14748_s29 + $0x1970] sm:$0xff] %v1043_v23  ;;  %v1045_v24 = vld [vmem:[%s14752_s6 + $0x3300] sm:$0xff] }
 0x1ef   : >> { %v1047_v25 = vld [vmem:[%s14752_s6 + $0x3320] sm:$0xff]  ;;  %1046 = vst [vmem:[%s14748_s29 + $0x1980] sm:$0xff] %v1045_v24 }
 0x1f0   : >> { %v1049_v26 = vld [vmem:[%s14752_s6 + $0x3340] sm:$0xff]  ;;  %1048 = vst [vmem:[%s14748_s29 + $0x1990] sm:$0xff] %v1047_v25 }
 0x1f1   : >> { %1050 = vst [vmem:[%s14748_s29 + $0x19a0] sm:$0xff] %v1049_v26  ;;  %v1051_v27 = vld [vmem:[%s14752_s6 + $0x3360] sm:$0xff] }
 0x1f2   : >> { %v1053_v28 = vld [vmem:[%s14752_s6 + $0x3380] sm:$0xff]  ;;  %1052 = vst [vmem:[%s14748_s29 + $0x19b0] sm:$0xff] %v1051_v27 }
 0x1f3   : >> { %v1055_v29 = vld [vmem:[%s14752_s6 + $0x33a0] sm:$0xff]  ;;  %1054 = vst [vmem:[%s14748_s29 + $0x19c0] sm:$0xff] %v1053_v28 }
 0x1f4   : >> { %1056 = vst [vmem:[%s14748_s29 + $0x19d0] sm:$0xff] %v1055_v29  ;;  %v1057_v30 = vld [vmem:[%s14752_s6 + $0x33c0] sm:$0xff] }
 0x1f5   : >> { %v1059_v31 = vld [vmem:[%s14752_s6 + $0x33e0] sm:$0xff]  ;;  %1058 = vst [vmem:[%s14748_s29 + $0x19e0] sm:$0xff] %v1057_v30 }
 0x1f6   : >> { %v1061_v32 = vld [vmem:[%s14752_s6 + $0x3400] sm:$0xff]  ;;  %1060 = vst [vmem:[%s14748_s29 + $0x19f0] sm:$0xff] %v1059_v31 }
 0x1f7   : >> { %1062 = vst [vmem:[%s14748_s29 + $0x1a00] sm:$0xff] %v1061_v32  ;;  %v1063_v33 = vld [vmem:[%s14752_s6 + $0x3420] sm:$0xff] }
 0x1f8   : >> { %v1065_v34 = vld [vmem:[%s14752_s6 + $0x3440] sm:$0xff]  ;;  %1064 = vst [vmem:[%s14748_s29 + $0x1a10] sm:$0xff] %v1063_v33 }
 0x1f9   : >> { %v1067_v35 = vld [vmem:[%s14752_s6 + $0x3460] sm:$0xff]  ;;  %1066 = vst [vmem:[%s14748_s29 + $0x1a20] sm:$0xff] %v1065_v34 }
 0x1fa   : >> { %1068 = vst [vmem:[%s14748_s29 + $0x1a30] sm:$0xff] %v1067_v35  ;;  %v1069_v36 = vld [vmem:[%s14752_s6 + $0x3480] sm:$0xff] }
 0x1fb   : >> { %v1071_v37 = vld [vmem:[%s14752_s6 + $0x34a0] sm:$0xff]  ;;  %1070 = vst [vmem:[%s14748_s29 + $0x1a40] sm:$0xff] %v1069_v36 }
 0x1fc   : >> { %v1073_v38 = vld [vmem:[%s14752_s6 + $0x34c0] sm:$0xff]  ;;  %1072 = vst [vmem:[%s14748_s29 + $0x1a50] sm:$0xff] %v1071_v37 }
 0x1fd   : >> { %1074 = vst [vmem:[%s14748_s29 + $0x1a60] sm:$0xff] %v1073_v38  ;;  %v1075_v39 = vld [vmem:[%s14752_s6 + $0x34e0] sm:$0xff] }
 0x1fe   : >> { %v1077_v40 = vld [vmem:[%s14752_s6 + $0x3500] sm:$0xff]  ;;  %1076 = vst [vmem:[%s14748_s29 + $0x1a70] sm:$0xff] %v1075_v39 }
 0x1ff   : >> { %v1079_v41 = vld [vmem:[%s14752_s6 + $0x3520] sm:$0xff]  ;;  %1078 = vst [vmem:[%s14748_s29 + $0x1a80] sm:$0xff] %v1077_v40 }
 0x200   : >> { %1080 = vst [vmem:[%s14748_s29 + $0x1a90] sm:$0xff] %v1079_v41  ;;  %v1081_v42 = vld [vmem:[%s14752_s6 + $0x3540] sm:$0xff] }
 0x201   : >> { %v1083_v43 = vld [vmem:[%s14752_s6 + $0x3560] sm:$0xff]  ;;  %1082 = vst [vmem:[%s14748_s29 + $0x1aa0] sm:$0xff] %v1081_v42 }
 0x202   : >> { %v1085_v44 = vld [vmem:[%s14752_s6 + $0x3580] sm:$0xff]  ;;  %1084 = vst [vmem:[%s14748_s29 + $0x1ab0] sm:$0xff] %v1083_v43 }
 0x203   : >> { %1086 = vst [vmem:[%s14748_s29 + $0x1ac0] sm:$0xff] %v1085_v44  ;;  %v1087_v45 = vld [vmem:[%s14752_s6 + $0x35a0] sm:$0xff] }
 0x204   : >> { %v1089_v46 = vld [vmem:[%s14752_s6 + $0x35c0] sm:$0xff]  ;;  %1088 = vst [vmem:[%s14748_s29 + $0x1ad0] sm:$0xff] %v1087_v45 }
 0x205   : >> { %v1091_v47 = vld [vmem:[%s14752_s6 + $0x35e0] sm:$0xff]  ;;  %1090 = vst [vmem:[%s14748_s29 + $0x1ae0] sm:$0xff] %v1089_v46 }
 0x206   : >> { %1092 = vst [vmem:[%s14748_s29 + $0x1af0] sm:$0xff] %v1091_v47  ;;  %v1093_v48 = vld [vmem:[%s14752_s6 + $0x3600] sm:$0xff] }
 0x207   : >> { %v1095_v49 = vld [vmem:[%s14752_s6 + $0x3620] sm:$0xff]  ;;  %1094 = vst [vmem:[%s14748_s29 + $0x1b00] sm:$0xff] %v1093_v48 }
 0x208   : >> { %v1097_v50 = vld [vmem:[%s14752_s6 + $0x3640] sm:$0xff]  ;;  %1096 = vst [vmem:[%s14748_s29 + $0x1b10] sm:$0xff] %v1095_v49 }
 0x209   : >> { %1098 = vst [vmem:[%s14748_s29 + $0x1b20] sm:$0xff] %v1097_v50  ;;  %v1099_v51 = vld [vmem:[%s14752_s6 + $0x3660] sm:$0xff] }
 0x20a   : >> { %v1101_v52 = vld [vmem:[%s14752_s6 + $0x3680] sm:$0xff]  ;;  %1100 = vst [vmem:[%s14748_s29 + $0x1b30] sm:$0xff] %v1099_v51 }
 0x20b   : >> { %v1103_v53 = vld [vmem:[%s14752_s6 + $0x36a0] sm:$0xff]  ;;  %1102 = vst [vmem:[%s14748_s29 + $0x1b40] sm:$0xff] %v1101_v52 }
 0x20c   : >> { %1104 = vst [vmem:[%s14748_s29 + $0x1b50] sm:$0xff] %v1103_v53  ;;  %v1105_v54 = vld [vmem:[%s14752_s6 + $0x36c0] sm:$0xff] }
 0x20d   : >> { %v1107_v55 = vld [vmem:[%s14752_s6 + $0x36e0] sm:$0xff]  ;;  %1106 = vst [vmem:[%s14748_s29 + $0x1b60] sm:$0xff] %v1105_v54 }
 0x20e   : >> { %v1109_v56 = vld [vmem:[%s14752_s6 + $0x3700] sm:$0xff]  ;;  %1108 = vst [vmem:[%s14748_s29 + $0x1b70] sm:$0xff] %v1107_v55 }
 0x20f   : >> { %1110 = vst [vmem:[%s14748_s29 + $0x1b80] sm:$0xff] %v1109_v56  ;;  %v1111_v57 = vld [vmem:[%s14752_s6 + $0x3720] sm:$0xff] }
 0x210   : >> { %v1113_v58 = vld [vmem:[%s14752_s6 + $0x3740] sm:$0xff]  ;;  %1112 = vst [vmem:[%s14748_s29 + $0x1b90] sm:$0xff] %v1111_v57 }
 0x211   : >> { %v1115_v59 = vld [vmem:[%s14752_s6 + $0x3760] sm:$0xff]  ;;  %1114 = vst [vmem:[%s14748_s29 + $0x1ba0] sm:$0xff] %v1113_v58 }
 0x212   : >> { %1116 = vst [vmem:[%s14748_s29 + $0x1bb0] sm:$0xff] %v1115_v59  ;;  %v1117_v60 = vld [vmem:[%s14752_s6 + $0x3780] sm:$0xff] }
 0x213   : >> { %v1119_v61 = vld [vmem:[%s14752_s6 + $0x37a0] sm:$0xff]  ;;  %1118 = vst [vmem:[%s14748_s29 + $0x1bc0] sm:$0xff] %v1117_v60 }
 0x214   : >> { %v1121_v62 = vld [vmem:[%s14752_s6 + $0x37c0] sm:$0xff]  ;;  %1120 = vst [vmem:[%s14748_s29 + $0x1bd0] sm:$0xff] %v1119_v61 }
 0x215   : >> { %1122 = vst [vmem:[%s14748_s29 + $0x1be0] sm:$0xff] %v1121_v62  ;;  %v1123_v63 = vld [vmem:[%s14752_s6 + $0x37e0] sm:$0xff] }
 0x216   : >> { %v1125_v0 = vld [vmem:[%s14752_s6 + $0x3800] sm:$0xff]  ;;  %1124 = vst [vmem:[%s14748_s29 + $0x1bf0] sm:$0xff] %v1123_v63 }
 0x217   : >> { %v1127_v1 = vld [vmem:[%s14752_s6 + $0x3820] sm:$0xff]  ;;  %1126 = vst [vmem:[%s14748_s29 + $0x1c00] sm:$0xff] %v1125_v0 }
 0x218   : >> { %1128 = vst [vmem:[%s14748_s29 + $0x1c10] sm:$0xff] %v1127_v1  ;;  %v1129_v2 = vld [vmem:[%s14752_s6 + $0x3840] sm:$0xff] }
 0x219   : >> { %v1131_v3 = vld [vmem:[%s14752_s6 + $0x3860] sm:$0xff]  ;;  %1130 = vst [vmem:[%s14748_s29 + $0x1c20] sm:$0xff] %v1129_v2 }
 0x21a   : >> { %v1133_v4 = vld [vmem:[%s14752_s6 + $0x3880] sm:$0xff]  ;;  %1132 = vst [vmem:[%s14748_s29 + $0x1c30] sm:$0xff] %v1131_v3 }
 0x21b   : >> { %1134 = vst [vmem:[%s14748_s29 + $0x1c40] sm:$0xff] %v1133_v4  ;;  %v1135_v5 = vld [vmem:[%s14752_s6 + $0x38a0] sm:$0xff] }
 0x21c   : >> { %v1137_v6 = vld [vmem:[%s14752_s6 + $0x38c0] sm:$0xff]  ;;  %1136 = vst [vmem:[%s14748_s29 + $0x1c50] sm:$0xff] %v1135_v5 }
 0x21d   : >> { %v1139_v7 = vld [vmem:[%s14752_s6 + $0x38e0] sm:$0xff]  ;;  %1138 = vst [vmem:[%s14748_s29 + $0x1c60] sm:$0xff] %v1137_v6 }
 0x21e   : >> { %1140 = vst [vmem:[%s14748_s29 + $0x1c70] sm:$0xff] %v1139_v7  ;;  %v1141_v8 = vld [vmem:[%s14752_s6 + $0x3900] sm:$0xff] }
 0x21f   : >> { %v1143_v9 = vld [vmem:[%s14752_s6 + $0x3920] sm:$0xff]  ;;  %1142 = vst [vmem:[%s14748_s29 + $0x1c80] sm:$0xff] %v1141_v8 }
 0x220   : >> { %v1145_v10 = vld [vmem:[%s14752_s6 + $0x3940] sm:$0xff]  ;;  %1144 = vst [vmem:[%s14748_s29 + $0x1c90] sm:$0xff] %v1143_v9 }
 0x221   : >> { %1146 = vst [vmem:[%s14748_s29 + $0x1ca0] sm:$0xff] %v1145_v10  ;;  %v1147_v11 = vld [vmem:[%s14752_s6 + $0x3960] sm:$0xff] }
 0x222   : >> { %v1149_v12 = vld [vmem:[%s14752_s6 + $0x3980] sm:$0xff]  ;;  %1148 = vst [vmem:[%s14748_s29 + $0x1cb0] sm:$0xff] %v1147_v11 }
 0x223   : >> { %v1151_v13 = vld [vmem:[%s14752_s6 + $0x39a0] sm:$0xff]  ;;  %1150 = vst [vmem:[%s14748_s29 + $0x1cc0] sm:$0xff] %v1149_v12 }
 0x224   : >> { %1152 = vst [vmem:[%s14748_s29 + $0x1cd0] sm:$0xff] %v1151_v13  ;;  %v1153_v14 = vld [vmem:[%s14752_s6 + $0x39c0] sm:$0xff] }
 0x225   : >> { %v1155_v15 = vld [vmem:[%s14752_s6 + $0x39e0] sm:$0xff]  ;;  %1154 = vst [vmem:[%s14748_s29 + $0x1ce0] sm:$0xff] %v1153_v14 }
 0x226   : >> { %v1157_v16 = vld [vmem:[%s14752_s6 + $0x3a00] sm:$0xff]  ;;  %1156 = vst [vmem:[%s14748_s29 + $0x1cf0] sm:$0xff] %v1155_v15 }
 0x227   : >> { %1158 = vst [vmem:[%s14748_s29 + $0x1d00] sm:$0xff] %v1157_v16  ;;  %v1159_v17 = vld [vmem:[%s14752_s6 + $0x3a20] sm:$0xff] }
 0x228   : >> { %v1161_v18 = vld [vmem:[%s14752_s6 + $0x3a40] sm:$0xff]  ;;  %1160 = vst [vmem:[%s14748_s29 + $0x1d10] sm:$0xff] %v1159_v17 }
 0x229   : >> { %v1163_v19 = vld [vmem:[%s14752_s6 + $0x3a60] sm:$0xff]  ;;  %1162 = vst [vmem:[%s14748_s29 + $0x1d20] sm:$0xff] %v1161_v18 }
 0x22a   : >> { %1164 = vst [vmem:[%s14748_s29 + $0x1d30] sm:$0xff] %v1163_v19  ;;  %v1165_v20 = vld [vmem:[%s14752_s6 + $0x3a80] sm:$0xff] }
 0x22b   : >> { %v1167_v21 = vld [vmem:[%s14752_s6 + $0x3aa0] sm:$0xff]  ;;  %1166 = vst [vmem:[%s14748_s29 + $0x1d40] sm:$0xff] %v1165_v20 }
 0x22c   : >> { %v1169_v22 = vld [vmem:[%s14752_s6 + $0x3ac0] sm:$0xff]  ;;  %1168 = vst [vmem:[%s14748_s29 + $0x1d50] sm:$0xff] %v1167_v21 }
 0x22d   : >> { %1170 = vst [vmem:[%s14748_s29 + $0x1d60] sm:$0xff] %v1169_v22  ;;  %v1171_v23 = vld [vmem:[%s14752_s6 + $0x3ae0] sm:$0xff] }
 0x22e   : >> { %v1173_v24 = vld [vmem:[%s14752_s6 + $0x3b00] sm:$0xff]  ;;  %1172 = vst [vmem:[%s14748_s29 + $0x1d70] sm:$0xff] %v1171_v23 }
 0x22f   : >> { %v1175_v25 = vld [vmem:[%s14752_s6 + $0x3b20] sm:$0xff]  ;;  %1174 = vst [vmem:[%s14748_s29 + $0x1d80] sm:$0xff] %v1173_v24 }
 0x230   : >> { %1176 = vst [vmem:[%s14748_s29 + $0x1d90] sm:$0xff] %v1175_v25  ;;  %v1177_v26 = vld [vmem:[%s14752_s6 + $0x3b40] sm:$0xff] }
 0x231   : >> { %v1179_v27 = vld [vmem:[%s14752_s6 + $0x3b60] sm:$0xff]  ;;  %1178 = vst [vmem:[%s14748_s29 + $0x1da0] sm:$0xff] %v1177_v26 }
 0x232   : >> { %v1181_v28 = vld [vmem:[%s14752_s6 + $0x3b80] sm:$0xff]  ;;  %1180 = vst [vmem:[%s14748_s29 + $0x1db0] sm:$0xff] %v1179_v27 }
 0x233   : >> { %1182 = vst [vmem:[%s14748_s29 + $0x1dc0] sm:$0xff] %v1181_v28  ;;  %v1183_v29 = vld [vmem:[%s14752_s6 + $0x3ba0] sm:$0xff] }
 0x234   : >> { %v1185_v30 = vld [vmem:[%s14752_s6 + $0x3bc0] sm:$0xff]  ;;  %1184 = vst [vmem:[%s14748_s29 + $0x1dd0] sm:$0xff] %v1183_v29 }
 0x235   : >> { %v1187_v31 = vld [vmem:[%s14752_s6 + $0x3be0] sm:$0xff]  ;;  %1186 = vst [vmem:[%s14748_s29 + $0x1de0] sm:$0xff] %v1185_v30 }
 0x236   : >> { %1188 = vst [vmem:[%s14748_s29 + $0x1df0] sm:$0xff] %v1187_v31  ;;  %v1189_v32 = vld [vmem:[%s14752_s6 + $0x3c00] sm:$0xff] }
 0x237   : >> { %v1191_v33 = vld [vmem:[%s14752_s6 + $0x3c20] sm:$0xff]  ;;  %1190 = vst [vmem:[%s14748_s29 + $0x1e00] sm:$0xff] %v1189_v32 }
 0x238   : >> { %v1193_v34 = vld [vmem:[%s14752_s6 + $0x3c40] sm:$0xff]  ;;  %1192 = vst [vmem:[%s14748_s29 + $0x1e10] sm:$0xff] %v1191_v33 }
 0x239   : >> { %1194 = vst [vmem:[%s14748_s29 + $0x1e20] sm:$0xff] %v1193_v34  ;;  %v1195_v35 = vld [vmem:[%s14752_s6 + $0x3c60] sm:$0xff] }
 0x23a   : >> { %v1197_v36 = vld [vmem:[%s14752_s6 + $0x3c80] sm:$0xff]  ;;  %1196 = vst [vmem:[%s14748_s29 + $0x1e30] sm:$0xff] %v1195_v35 }
 0x23b   : >> { %v1199_v37 = vld [vmem:[%s14752_s6 + $0x3ca0] sm:$0xff]  ;;  %1198 = vst [vmem:[%s14748_s29 + $0x1e40] sm:$0xff] %v1197_v36 }
 0x23c   : >> { %1200 = vst [vmem:[%s14748_s29 + $0x1e50] sm:$0xff] %v1199_v37  ;;  %v1201_v38 = vld [vmem:[%s14752_s6 + $0x3cc0] sm:$0xff] }
 0x23d   : >> { %v1203_v39 = vld [vmem:[%s14752_s6 + $0x3ce0] sm:$0xff]  ;;  %1202 = vst [vmem:[%s14748_s29 + $0x1e60] sm:$0xff] %v1201_v38 }
 0x23e   : >> { %v1205_v40 = vld [vmem:[%s14752_s6 + $0x3d00] sm:$0xff]  ;;  %1204 = vst [vmem:[%s14748_s29 + $0x1e70] sm:$0xff] %v1203_v39 }
 0x23f   : >> { %1206 = vst [vmem:[%s14748_s29 + $0x1e80] sm:$0xff] %v1205_v40  ;;  %v1207_v41 = vld [vmem:[%s14752_s6 + $0x3d20] sm:$0xff] }
 0x240   : >> { %v1209_v42 = vld [vmem:[%s14752_s6 + $0x3d40] sm:$0xff]  ;;  %1208 = vst [vmem:[%s14748_s29 + $0x1e90] sm:$0xff] %v1207_v41 }
 0x241   : >> { %v1211_v43 = vld [vmem:[%s14752_s6 + $0x3d60] sm:$0xff]  ;;  %1210 = vst [vmem:[%s14748_s29 + $0x1ea0] sm:$0xff] %v1209_v42 }
 0x242   : >> { %1212 = vst [vmem:[%s14748_s29 + $0x1eb0] sm:$0xff] %v1211_v43  ;;  %v1213_v44 = vld [vmem:[%s14752_s6 + $0x3d80] sm:$0xff] }
 0x243   : >> { %v1215_v45 = vld [vmem:[%s14752_s6 + $0x3da0] sm:$0xff]  ;;  %1214 = vst [vmem:[%s14748_s29 + $0x1ec0] sm:$0xff] %v1213_v44 }
 0x244   : >> { %v1217_v46 = vld [vmem:[%s14752_s6 + $0x3dc0] sm:$0xff]  ;;  %1216 = vst [vmem:[%s14748_s29 + $0x1ed0] sm:$0xff] %v1215_v45 }
 0x245   : >> { %1218 = vst [vmem:[%s14748_s29 + $0x1ee0] sm:$0xff] %v1217_v46  ;;  %v1219_v47 = vld [vmem:[%s14752_s6 + $0x3de0] sm:$0xff] }
 0x246   : >> { %v1221_v48 = vld [vmem:[%s14752_s6 + $0x3e00] sm:$0xff]  ;;  %1220 = vst [vmem:[%s14748_s29 + $0x1ef0] sm:$0xff] %v1219_v47 }
 0x247   : >> { %v1223_v49 = vld [vmem:[%s14752_s6 + $0x3e20] sm:$0xff]  ;;  %1222 = vst [vmem:[%s14748_s29 + $0x1f00] sm:$0xff] %v1221_v48 }
 0x248   : >> { %1224 = vst [vmem:[%s14748_s29 + $0x1f10] sm:$0xff] %v1223_v49  ;;  %v1225_v50 = vld [vmem:[%s14752_s6 + $0x3e40] sm:$0xff] }
 0x249   : >> { %v1227_v51 = vld [vmem:[%s14752_s6 + $0x3e60] sm:$0xff]  ;;  %1226 = vst [vmem:[%s14748_s29 + $0x1f20] sm:$0xff] %v1225_v50 }
 0x24a   : >> { %v1229_v52 = vld [vmem:[%s14752_s6 + $0x3e80] sm:$0xff]  ;;  %1228 = vst [vmem:[%s14748_s29 + $0x1f30] sm:$0xff] %v1227_v51 }
 0x24b   : >> { %1230 = vst [vmem:[%s14748_s29 + $0x1f40] sm:$0xff] %v1229_v52  ;;  %v1231_v53 = vld [vmem:[%s14752_s6 + $0x3ea0] sm:$0xff] }
 0x24c   : >> { %v1233_v54 = vld [vmem:[%s14752_s6 + $0x3ec0] sm:$0xff]  ;;  %1232 = vst [vmem:[%s14748_s29 + $0x1f50] sm:$0xff] %v1231_v53 }
 0x24d   : >> { %v1235_v55 = vld [vmem:[%s14752_s6 + $0x3ee0] sm:$0xff]  ;;  %1234 = vst [vmem:[%s14748_s29 + $0x1f60] sm:$0xff] %v1233_v54 }
 0x24e   : >> { %1236 = vst [vmem:[%s14748_s29 + $0x1f70] sm:$0xff] %v1235_v55  ;;  %v1237_v56 = vld [vmem:[%s14752_s6 + $0x3f00] sm:$0xff] }
 0x24f   : >> { %v1239_v57 = vld [vmem:[%s14752_s6 + $0x3f20] sm:$0xff]  ;;  %1238 = vst [vmem:[%s14748_s29 + $0x1f80] sm:$0xff] %v1237_v56 }
 0x250   : >> { %v1241_v58 = vld [vmem:[%s14752_s6 + $0x3f40] sm:$0xff]  ;;  %1240 = vst [vmem:[%s14748_s29 + $0x1f90] sm:$0xff] %v1239_v57  ;;  %224 = sbr.rel (!%p222_p8) target bundleno = 86 (0x56), region = 160 }
 0x251   : >> { %1242 = vst [vmem:[%s14748_s29 + $0x1fa0] sm:$0xff] %v1241_v58  ;;  %v1243_v59 = vld [vmem:[%s14752_s6 + $0x3f60] sm:$0xff] }
 0x252   : >> { %v1245_v60 = vld [vmem:[%s14752_s6 + $0x3f80] sm:$0xff]  ;;  %1244 = vst [vmem:[%s14748_s29 + $0x1fb0] sm:$0xff] %v1243_v59 }
 0x253   : >> { %v1247_v61 = vld [vmem:[%s14752_s6 + $0x3fa0] sm:$0xff]  ;;  %1246 = vst [vmem:[%s14748_s29 + $0x1fc0] sm:$0xff] %v1245_v60 }
 0x254   : >> { %1248 = vst [vmem:[%s14748_s29 + $0x1fd0] sm:$0xff] %v1247_v61  ;;  %v1249_v62 = vld [vmem:[%s14752_s6 + $0x3fc0] sm:$0xff] }
 0x255   : >> { %v1251_v63 = vld [vmem:[%s14752_s6 + $0x3fe0] sm:$0xff]  ;;  %1250 = vst [vmem:[%s14748_s29 + $0x1fe0] sm:$0xff] %v1249_v62  ;;  %s17705_s6 = smov %s15262_s24 }
 0x256   : >> { %1252 = vst [vmem:[%s14748_s29 + $0x1ff0] sm:$0xff] %v1251_v63  ;;  %s17704_s29 = smov %s15266_s7 }
 0x257 PF: > { %s3343_s9 = sand.u32 1, %s14744_s27   ;;  %s3345_s20 = sand.u32 1, %s14704_s17  }
 0x258   : > { %s11571_s15 = sshll.u32 %s3345_s20, 2  ;;  %s12649_s5 = sshll.u32 %s14740_s26, 6 }
 0x259   : > { %s16049_s7 = scalar_lea.hbm %s17664_s2, %s12649_s5  ;;  %s3347_s14 = scalar_lea.vmem [#allocation7], %s11571_s15 }
 0x25a   : > { %s3355_s22 = sshll.u32 %s3347_s14, 4  ;;  %s16053_s12 = sshll.u32 %s3345_s20, 10  ;;  %s16051_s22 = int_to_ptr.vmem [resolvable:$true] %s3355_s22 }
 0x25b   : > { %s16055_s8 = scalar_lea.sflag [#allocation8], %s3343_s9  ;;  %s14530_s4 = scalar_lea.hbm %s16049_s7, 64 }
 0x25c   : > { %p14531_p12 = scmp.ne.s32.totalorder %s16049_s7, %s14530_s4  ;;  %p17707_p0 = scmp.ne.s32.totalorder %s17693_s30, 0 }
 0x25d   : > { %s14534_s6 = scalar_lea.hbm %s17664_s2, 128  ;;  %p14535_p13 = scmp.lt.u32.totalorder %s16049_s7, %s17664_s2 }
 0x25e   : > { %p14532_p6 = pnand %p14531_p12, %p17707_p0  ;;  %p14536_p4 = scmp.lt.u32.totalorder %s14534_s6, %s14530_s4 }
 0x25f   : > { %p14538_p2 = scmp.lt.u32.totalorder %s14530_s4, %s16049_s7 }
 0x260   : > { %p14533_p10 = pneg %p14532_p6  ;;  %p14537_p5 = por %p14536_p4, %p14535_p13 }
 0x262   : > { %p14539_p7 = por %p14538_p2, %p14537_p5 }
 0x264   : > { %p14540_p11 = pnand %p14539_p7, %p14533_p10 }
 0x266   : > { %14543 = shalt.err (!%p14540_p11)
}
 0x267   : > { %s14544_s9 = scalar_lea.vmem %s16051_s22, 64  ;;  %s14763_s20 = smov [#allocation7]  }
 0x268   : > { %p14545_p1 = scmp.ne.s32.totalorder %s16051_s22, %s14544_s9  ;;  %s14548_s15 = sshll.u32 %s14763_s20, 4  ;;  %s14549_s15 = int_to_ptr.vmem [resolvable:$false] %s14548_s15 }
 0x269   : > { %s14550_s5 = scalar_lea.vmem %s14549_s15, 128  ;;  %p14551_p8 = scmp.lt.s32.totalorder %s16051_s22, %s14549_s15 }
 0x26a   : > { %p14546_p9 = pnand %p14545_p1, %p17707_p0  ;;  %p14552_p12 = scmp.lt.s32.totalorder %s14550_s5, %s14544_s9 }
 0x26c   : > { %p14547_p3 = pneg %p14546_p9  ;;  %p14553_p6 = por %p14552_p12, %p14551_p8 }
 0x26e   : > { %p14554_p13 = pnand %p14553_p6, %p14547_p3 }
 0x270   : > { %14557 = shalt.err (!%p14554_p13)
}
 0x271   : > { %12784 = dma.hbm_to_vmem [thread:$0]  (%p17707_p0), %s16049_s7, 64, %s16051_s22, %s16055_s8  }
 0x272   : > { %s12651_s23 = sshll.u32 %s14740_s26, 14  ;;  %s3366_s14 = scalar_lea.vmem [#allocation9], %s16053_s12 }
 0x273   : > { %s3374_s4 = sshll.u32 %s3366_s14, 4  ;;  %s16084_s6 = scalar_lea.hbm %s17665_s3, %s12651_s23  ;;  %s16086_s4 = int_to_ptr.vmem [resolvable:$true] %s3374_s4 }
 0x274   : > { %s14558_s13 = scalar_lea.hbm %s16084_s6, 16384  ;;  %s14562_s12 = scalar_lea.hbm %s17665_s3, 32768 }
 0x275   : > { %p14559_p10 = scmp.ne.s32.totalorder %s16084_s6, %s14558_s13  ;;  %p14563_p2 = scmp.lt.u32.totalorder %s16084_s6, %s17665_s3 }
 0x276   : > { %p14564_p7 = scmp.lt.u32.totalorder %s14562_s12, %s14558_s13  ;;  %p14566_p1 = scmp.lt.u32.totalorder %s14558_s13, %s16084_s6 }
 0x277   : > { %p14560_p4 = pnand %p14559_p10, %p17707_p0 }
 0x278   : > { %p14565_p11 = por %p14564_p7, %p14563_p2 }
 0x279   : > { %p14561_p5 = pneg %p14560_p4 }
 0x27a   : > { %p14567_p9 = por %p14566_p1, %p14565_p11 }
 0x27c   : > { %p14568_p3 = pnand %p14567_p9, %p14561_p5 }
 0x27e   : > { %14571 = shalt.err (!%p14568_p3)
}
 0x27f   : > { %s14572_s20 = scalar_lea.vmem %s16086_s4, 16384  ;;  %s14764_s15 = smov [#allocation9]  }
 0x280   : > { %p14573_p8 = scmp.ne.s32.totalorder %s16086_s4, %s14572_s20  ;;  %s14576_s5 = sshll.u32 %s14764_s15, 4  ;;  %s14577_s5 = int_to_ptr.vmem [resolvable:$false] %s14576_s5 }
 0x281   : > { %s14578_s23 = scalar_lea.vmem %s14577_s5, 32768  ;;  %p14579_p13 = scmp.lt.s32.totalorder %s16086_s4, %s14577_s5 }
 0x282   : > { %p14574_p12 = pnand %p14573_p8, %p17707_p0  ;;  %p14580_p10 = scmp.lt.s32.totalorder %s14578_s23, %s14572_s20 }
 0x284   : > { %p14575_p6 = pneg %p14574_p12  ;;  %p14581_p4 = por %p14580_p10, %p14579_p13 }
 0x286   : > { %p14582_p2 = pnand %p14581_p4, %p14575_p6 }
 0x288   : > { %14585 = shalt.err (!%p14582_p2)
}
 0x289   : > { %s14765_s14 = smov 256   ;;  %s14766_s0 = smov 16  }
 0x28a   : > { %12785 = dma.hbm_to_vmem [thread:$0]  (%p17707_p0), %s16084_s6, 16384, %s16086_s4, %s16055_s8, %s14765_s14, %s14765_s14, %s14766_s0  }
 0x28b PF: > { %p11578_p5 = scmp.ge.s32.totalorder %s14744_s27, 1  ;;  %p3382_p7 = scmp.lt.s32.totalorder %s14744_s27, 9 }
 0x28d   : > { %p3383_p11 = pnand %p11578_p5, %p3382_p7 }
 0x28e   : > { %s3388_s29 = sand.u32 (!%p3383_p11), 1, %s14720_s21   ;;  %p17708_p1 = scmp.ne.s32.totalorder (!%p3383_p11), %s17689_s10, 0 }
 0x28f   : > { %3386 = sbr.rel (%p3383_p11) target bundleno = 2225 (0x8b1), region = 69  ;;  %s11579_s13 = sshll.u32 (!%p3383_p11), %s3388_s29, 7 }
 0x290   : > { %s3389_s7 = scalar_lea.sflag (!%p3383_p11), [#allocation4], %s3388_s29  ;;  %s16113_s22 = scalar_lea.vmem (!%p3383_p11), [#allocation3], %s11579_s13 }
 0x296   : > { %14683 = dma.done.wait (%p17708_p1), %s3389_s7, 2048  }
 0x297   : > { %14685 = vsyncadd (%p17708_p1), %s3389_s7, 4294965248  ;;  %s3398_s30 = sand.u32 1, %s14708_s18   ;;  %s3404_s8 = sand.u32 1, %s14857_s28  }
 0x298   : > { %s11580_s4 = sshll.u32 %s3398_s30, 13  ;;  %s16122_s6 = sand.u32 1, %s14700_s16  }
 0x299   : > { %s11581_s12 = sshll.u32 %s16122_s6, 2  ;;  %s16125_s24 = scalar_lea.vmem [#allocation6], %s11580_s4 }
 0x29a   : > { %s3405_s9 = scalar_lea.sflag [#allocation8], %s3404_s8  ;;  %s3408_s20 = scalar_lea.vmem [#allocation7], %s11581_s12 }
 0x29b   : > { %p17709_p0 = scmp.ne.s32.totalorder %s17695_s11, 0 }
 0x29d   : > { %14687 = dma.done.wait (%p17709_p0), %s3405_s9, 16448  }
 0x29e   : > { %14689 = vsyncadd (%p17709_p0), %s3405_s9, 4294950848  ;;  %s11582_s10 = sshll.u32 %s16122_s6, 10  ;;  %s11583_s15 = sshll.u32 %s16122_s6, 4 }
 0x29f   : > { %s16133_s18 = scalar_lea.vmem [#allocation9], %s11582_s10  ;;  %s16135_s28 = scalar_lea.vmem [#allocation10], %s11583_s15 }
 0x2a0   : > { %s17710_s5 = sld [smem:[#allocation16_spill]] }
 0x2a6   : > { %p11584_p9 = scmp.ne.s32.totalorder %s17710_s5, 0 }
 0x2a7   : > { %v3467_v0 = vlaneseq (!%p11584_p9)  ;;  %v3465_v2 = vld [vmem:[%s3408_s20] sm:$0xf] (!%p11584_p9) }
 0x2a8   : > { %3464 = sbr.rel (%p11584_p9) target bundleno = 689 (0x2b1), region = 89 }
 0x2a9   : > { %v3468_v1 = vshrl.u32 (!%p11584_p9), %v3467_v0, 7 }
 0x2ab   : > { %v3469_v3 = vsub.s32 (!%p11584_p9), 0, %v3468_v1  ;;  %v3473_v4 = vsub.s32 (!%p11584_p9), 1, %v3468_v1  ;;  %v3477_v5 = vsub.s32 (!%p11584_p9), 2, %v3468_v1  ;;  %v3481_v6 = vsub.s32 (!%p11584_p9), 3, %v3468_v1 }
 0x2ad   : > { %v3470_v7 = vrot.slane (!%p11584_p9), %v3465_v2, %v3469_v3  ;;  %v3474_v8 = vrot.slane (!%p11584_p9), %v3465_v2, %v3473_v4  ;;  %v3478_v9 = vrot.slane (!%p11584_p9), %v3465_v2, %v3477_v5  ;;  %v3482_v10 = vrot.slane (!%p11584_p9), %v3465_v2, %v3481_v6 }
 0x2af   : > { %3487 = vst [vmem:[#allocation2] sm:$0xff] %v3470_v7  ;;  %3488 = vst [vmem:[#allocation2 + $0x8] sm:$0xff] %v3474_v8 }
 0x2b0   : > { %3489 = vst [vmem:[#allocation2 + $0x10] sm:$0xff] %v3478_v9  ;;  %3490 = vst [vmem:[#allocation2 + $0x18] sm:$0xff] %v3482_v10 }
 0x2b1 PF: > { %v12934_v11 = vld [vmem:[%s16125_s24 + $0x4] ss:$16 sps:$4 sm:$0xff]   ;;  %v12938_v13 = vld [vmem:[%s16125_s24] ss:$16 sps:$4 sm:$0xff]   ;;  %v3496_v59 = vld [vmem:[%s16113_s22 + $0x8] sm:$0xff]  ;;  %s17711_s11 = sld [smem:[#allocation16_spill]] }
 0x2b2   : > { %v12936_v12 = vld [vmem:[%s16125_s24 + $0x204] ss:$16 sps:$4 sm:$0xff]   ;;  %9767 = vmatprep.subr.bf16.mxu0 %v12934_v11  ;;  %v12939_v14 = vld [vmem:[%s16125_s24 + $0x200] ss:$16 sps:$4 sm:$0xff]   ;;  %v16190_v62 = vcombine.high %v3496_v59, %v3496_v59 }
 0x2b3   : > { %9808 = vmatprep.subr.bf16.mxu1 %v12936_v12  ;;  %v12940_v15 = vld [vmem:[%s16125_s24 + $0x24] ss:$16 sps:$4 sm:$0xff]   ;;  %9768 = vmatpush1.bf16.msra.mxu0 %v12938_v13  ;;  %v12944_v17 = vld [vmem:[%s16125_s24 + $0x20] ss:$16 sps:$4 sm:$0xff]  }
 0x2b4   : > { %9809 = vmatpush1.bf16.msra.mxu1 %v12939_v14  ;;  %v12942_v16 = vld [vmem:[%s16125_s24 + $0x224] ss:$16 sps:$4 sm:$0xff]   ;;  %9769 = vmatprep.subr.bf16.mxu0 %v12940_v15  ;;  %v12945_v18 = vld [vmem:[%s16125_s24 + $0x220] ss:$16 sps:$4 sm:$0xff]  }
 0x2b5   : > { %9810 = vmatprep.subr.bf16.mxu1 %v12942_v16  ;;  %v12946_v19 = vld [vmem:[%s16125_s24 + $0x44] ss:$16 sps:$4 sm:$0xff]   ;;  %v12950_v21 = vld [vmem:[%s16125_s24 + $0x40] ss:$16 sps:$4 sm:$0xff]   ;;  %9840 = vmatprep.mubr.bf16.mxu1 %v16190_v62 }
 0x2b6   : > { %v12948_v20 = vld [vmem:[%s16125_s24 + $0x244] ss:$16 sps:$4 sm:$0xff]   ;;  %v12951_v22 = vld [vmem:[%s16125_s24 + $0x240] ss:$16 sps:$4 sm:$0xff]  }
 0x2b7   : > { %9770 = vmatpush1.bf16.msra.mxu0 %v12944_v17  ;;  %v12952_v23 = vld [vmem:[%s16125_s24 + $0x64] ss:$16 sps:$4 sm:$0xff]   ;;  %v12956_v25 = vld [vmem:[%s16125_s24 + $0x60] ss:$16 sps:$4 sm:$0xff]   ;;  %p12641_p3 = scmp.ne.s32.totalorder %s17711_s11, 3 }
 0x2b8   : > { %9811 = vmatpush1.bf16.msra.mxu1 %v12945_v18  ;;  %9771 = vmatprep.subr.bf16.mxu0 %v12946_v19  ;;  %v12954_v24 = vld [vmem:[%s16125_s24 + $0x264] ss:$16 sps:$4 sm:$0xff]   ;;  %v12957_v26 = vld [vmem:[%s16125_s24 + $0x260] ss:$16 sps:$4 sm:$0xff]   ;;  %v16214_v18 = vcombine.low %v3496_v59, %v3496_v59 }
 0x2b9   : > { %9812 = vmatprep.subr.bf16.mxu1 %v12948_v20  ;;  %v12958_v27 = vld [vmem:[%s16125_s24 + $0x84] ss:$16 sps:$4 sm:$0xff]   ;;  %v12962_v29 = vld [vmem:[%s16125_s24 + $0x80] ss:$16 sps:$4 sm:$0xff]  }
 0x2ba   : > { %v12960_v28 = vld [vmem:[%s16125_s24 + $0x284] ss:$16 sps:$4 sm:$0xff]   ;;  %v12963_v30 = vld [vmem:[%s16125_s24 + $0x280] ss:$16 sps:$4 sm:$0xff]  }
 0x2bb   : > { %9772 = vmatpush1.bf16.msra.mxu0 %v12950_v21  ;;  %v12964_v31 = vld [vmem:[%s16125_s24 + $0xa4] ss:$16 sps:$4 sm:$0xff]   ;;  %v12968_v33 = vld [vmem:[%s16125_s24 + $0xa0] ss:$16 sps:$4 sm:$0xff]  }
 0x2bc   : > { %9813 = vmatpush1.bf16.msra.mxu1 %v12951_v22  ;;  %9773 = vmatprep.subr.bf16.mxu0 %v12952_v23  ;;  %v12966_v32 = vld [vmem:[%s16125_s24 + $0x2a4] ss:$16 sps:$4 sm:$0xff]   ;;  %v12969_v34 = vld [vmem:[%s16125_s24 + $0x2a0] ss:$16 sps:$4 sm:$0xff]  }
 0x2bd   : > { %9814 = vmatprep.subr.bf16.mxu1 %v12954_v24  ;;  %v12970_v35 = vld [vmem:[%s16125_s24 + $0xc4] ss:$16 sps:$4 sm:$0xff]   ;;  %v12974_v37 = vld [vmem:[%s16125_s24 + $0xc0] ss:$16 sps:$4 sm:$0xff]  }
 0x2be   : > { %v12972_v36 = vld [vmem:[%s16125_s24 + $0x2c4] ss:$16 sps:$4 sm:$0xff]   ;;  %v12975_v38 = vld [vmem:[%s16125_s24 + $0x2c0] ss:$16 sps:$4 sm:$0xff]  }
 0x2bf   : > { %9774 = vmatpush1.bf16.msra.mxu0 %v12956_v25  ;;  %v12976_v39 = vld [vmem:[%s16125_s24 + $0xe4] ss:$16 sps:$4 sm:$0xff]   ;;  %v12980_v41 = vld [vmem:[%s16125_s24 + $0xe0] ss:$16 sps:$4 sm:$0xff]  }
 0x2c0   : > { %9815 = vmatpush1.bf16.msra.mxu1 %v12957_v26  ;;  %9775 = vmatprep.subr.bf16.mxu0 %v12958_v27  ;;  %v12978_v40 = vld [vmem:[%s16125_s24 + $0x2e4] ss:$16 sps:$4 sm:$0xff]   ;;  %v12981_v42 = vld [vmem:[%s16125_s24 + $0x2e0] ss:$16 sps:$4 sm:$0xff]  }
 0x2c1   : > { %9816 = vmatprep.subr.bf16.mxu1 %v12960_v28  ;;  %v12982_v43 = vld [vmem:[%s16125_s24 + $0x104] ss:$16 sps:$4 sm:$0xff]   ;;  %v12986_v45 = vld [vmem:[%s16125_s24 + $0x100] ss:$16 sps:$4 sm:$0xff]  }
 0x2c2   : > { %v12984_v44 = vld [vmem:[%s16125_s24 + $0x304] ss:$16 sps:$4 sm:$0xff]   ;;  %v12987_v46 = vld [vmem:[%s16125_s24 + $0x300] ss:$16 sps:$4 sm:$0xff]  }
 0x2c3   : > { %9776 = vmatpush1.bf16.msra.mxu0 %v12962_v29  ;;  %v12988_v47 = vld [vmem:[%s16125_s24 + $0x124] ss:$16 sps:$4 sm:$0xff]   ;;  %v12992_v49 = vld [vmem:[%s16125_s24 + $0x120] ss:$16 sps:$4 sm:$0xff]  }
 0x2c4   : > { %9817 = vmatpush1.bf16.msra.mxu1 %v12963_v30  ;;  %9777 = vmatprep.subr.bf16.mxu0 %v12964_v31  ;;  %v12990_v48 = vld [vmem:[%s16125_s24 + $0x324] ss:$16 sps:$4 sm:$0xff]   ;;  %v12993_v50 = vld [vmem:[%s16125_s24 + $0x320] ss:$16 sps:$4 sm:$0xff]  }
 0x2c5   : > { %9818 = vmatprep.subr.bf16.mxu1 %v12966_v32  ;;  %v12994_v51 = vld [vmem:[%s16125_s24 + $0x144] ss:$16 sps:$4 sm:$0xff]   ;;  %v12998_v53 = vld [vmem:[%s16125_s24 + $0x140] ss:$16 sps:$4 sm:$0xff]  }
 0x2c6   : > { %v12996_v52 = vld [vmem:[%s16125_s24 + $0x344] ss:$16 sps:$4 sm:$0xff]   ;;  %v12999_v54 = vld [vmem:[%s16125_s24 + $0x340] ss:$16 sps:$4 sm:$0xff]  }
 0x2c7   : > { %9778 = vmatpush1.bf16.msra.mxu0 %v12968_v33  ;;  %v13000_v55 = vld [vmem:[%s16125_s24 + $0x164] ss:$16 sps:$4 sm:$0xff]   ;;  %v13004_v60 = vld [vmem:[%s16125_s24 + $0x160] ss:$16 sps:$4 sm:$0xff]  }
 0x2c8   : > { %9819 = vmatpush1.bf16.msra.mxu1 %v12969_v34  ;;  %9779 = vmatprep.subr.bf16.mxu0 %v12970_v35  ;;  %v13002_v56 = vld [vmem:[%s16125_s24 + $0x364] ss:$16 sps:$4 sm:$0xff]   ;;  %v13005_v61 = vld [vmem:[%s16125_s24 + $0x360] ss:$16 sps:$4 sm:$0xff]  }
 0x2c9   : > { %9820 = vmatprep.subr.bf16.mxu1 %v12972_v36  ;;  %v3495_v57 = vld [vmem:[%s16113_s22] sm:$0xff] }
 0x2ca   : > { %v16185_v58 = vcombine.high %v3495_v57, %v3495_v57  ;;  %v13006_v63 = vld [vmem:[%s16125_s24 + $0x184] ss:$16 sps:$4 sm:$0xff]   ;;  %v13010_v1 = vld [vmem:[%s16125_s24 + $0x180] ss:$16 sps:$4 sm:$0xff]   ;;  %v16212_v17 = vcombine.low %v3495_v57, %v3495_v57 }
 0x2cb   : > { %9780 = vmatpush1.bf16.msra.mxu0 %v12974_v37  ;;  %v13008_v0 = vld [vmem:[%s16125_s24 + $0x384] ss:$16 sps:$4 sm:$0xff]   ;;  %v13011_v2 = vld [vmem:[%s16125_s24 + $0x380] ss:$16 sps:$4 sm:$0xff]  }
 0x2cc   : > { %9821 = vmatpush1.bf16.msra.mxu1 %v12975_v38  ;;  %9781 = vmatprep.subr.bf16.mxu0 %v12976_v39  ;;  %v13012_v3 = vld [vmem:[%s16125_s24 + $0x1a4] ss:$16 sps:$4 sm:$0xff]   ;;  %v13016_v5 = vld [vmem:[%s16125_s24 + $0x1a0] ss:$16 sps:$4 sm:$0xff]  }
 0x2cd   : > { %9822 = vmatprep.subr.bf16.mxu1 %v12978_v40  ;;  %9799 = vmatprep.mubr.bf16.mxu0 %v16185_v58  ;;  %v13014_v4 = vld [vmem:[%s16125_s24 + $0x3a4] ss:$16 sps:$4 sm:$0xff]   ;;  %v13017_v6 = vld [vmem:[%s16125_s24 + $0x3a0] ss:$16 sps:$4 sm:$0xff]  }
 0x2ce   : > { %v13018_v7 = vld [vmem:[%s16125_s24 + $0x1c4] ss:$16 sps:$4 sm:$0xff]   ;;  %v13022_v9 = vld [vmem:[%s16125_s24 + $0x1c0] ss:$16 sps:$4 sm:$0xff]  }
 0x2cf   : > { %9782 = vmatpush1.bf16.msra.mxu0 %v12980_v41  ;;  %v13020_v8 = vld [vmem:[%s16125_s24 + $0x3c4] ss:$16 sps:$4 sm:$0xff]   ;;  %v13023_v10 = vld [vmem:[%s16125_s24 + $0x3c0] ss:$16 sps:$4 sm:$0xff]  }
 0x2d0   : > { %9823 = vmatpush1.bf16.msra.mxu1 %v12981_v42  ;;  %9783 = vmatprep.subr.bf16.mxu0 %v12982_v43  ;;  %v13024_v11 = vld [vmem:[%s16125_s24 + $0x1e4] ss:$16 sps:$4 sm:$0xff]   ;;  %v13028_v13 = vld [vmem:[%s16125_s24 + $0x1e0] ss:$16 sps:$4 sm:$0xff]  }
 0x2d1   : > { %9824 = vmatprep.subr.bf16.mxu1 %v12984_v44  ;;  %v13026_v12 = vld [vmem:[%s16125_s24 + $0x3e4] ss:$16 sps:$4 sm:$0xff]   ;;  %v13029_v14 = vld [vmem:[%s16125_s24 + $0x3e0] ss:$16 sps:$4 sm:$0xff]   ;;  %v16246_v44 = vld [vmem:[%s16113_s22 + $0x18] sm:$0xff] }
 0x2d2   : > { %v13036_v15 = vld [vmem:[%s16125_s24 + $0x404] ss:$16 sps:$4 sm:$0xff]   ;;  %v13034_v19 = vld [vmem:[%s16125_s24 + $0x400] ss:$16 sps:$4 sm:$0xff]  }
 0x2d3   : > { %9784 = vmatpush1.bf16.msra.mxu0 %v12986_v45  ;;  %v13039_v16 = vld [vmem:[%s16125_s24 + $0x604] ss:$16 sps:$4 sm:$0xff]   ;;  %v13037_v20 = vld [vmem:[%s16125_s24 + $0x600] ss:$16 sps:$4 sm:$0xff]  }
 0x2d4   : > { %9825 = vmatpush1.bf16.msra.mxu1 %v12987_v46  ;;  %9785 = vmatprep.subr.bf16.mxu0 %v12988_v47  ;;  %v13042_v21 = vld [vmem:[%s16125_s24 + $0x424] ss:$16 sps:$4 sm:$0xff]   ;;  %v13040_v23 = vld [vmem:[%s16125_s24 + $0x420] ss:$16 sps:$4 sm:$0xff]  }
 0x2d5   : > { %9826 = vmatprep.subr.bf16.mxu1 %v12990_v48  ;;  %v13045_v22 = vld [vmem:[%s16125_s24 + $0x624] ss:$16 sps:$4 sm:$0xff]   ;;  %v13043_v24 = vld [vmem:[%s16125_s24 + $0x620] ss:$16 sps:$4 sm:$0xff]   ;;  %v16256_v48 = vcombine.high %v16246_v44, %v16246_v44 }
 0x2d6   : > { %v13048_v25 = vld [vmem:[%s16125_s24 + $0x444] ss:$16 sps:$4 sm:$0xff]   ;;  %v13046_v27 = vld [vmem:[%s16125_s24 + $0x440] ss:$16 sps:$4 sm:$0xff]  }
 0x2d7   : > { %9786 = vmatpush1.bf16.msra.mxu0 %v12992_v49  ;;  %v13051_v26 = vld [vmem:[%s16125_s24 + $0x644] ss:$16 sps:$4 sm:$0xff]   ;;  %v13049_v28 = vld [vmem:[%s16125_s24 + $0x640] ss:$16 sps:$4 sm:$0xff]  }
 0x2d8   : > { %9827 = vmatpush1.bf16.msra.mxu1 %v12993_v50  ;;  %9787 = vmatprep.subr.bf16.mxu0 %v12994_v51  ;;  %v13054_v29 = vld [vmem:[%s16125_s24 + $0x464] ss:$16 sps:$4 sm:$0xff]   ;;  %v13052_v31 = vld [vmem:[%s16125_s24 + $0x460] ss:$16 sps:$4 sm:$0xff]  }
 0x2d9   : > { %9828 = vmatprep.subr.bf16.mxu1 %v12996_v52  ;;  %v13057_v30 = vld [vmem:[%s16125_s24 + $0x664] ss:$16 sps:$4 sm:$0xff]   ;;  %v13055_v32 = vld [vmem:[%s16125_s24 + $0x660] ss:$16 sps:$4 sm:$0xff]  }
 0x2da   : > { %v13060_v33 = vld [vmem:[%s16125_s24 + $0x484] ss:$16 sps:$4 sm:$0xff]   ;;  %v13058_v35 = vld [vmem:[%s16125_s24 + $0x480] ss:$16 sps:$4 sm:$0xff]  }
 0x2db   : > { %9788 = vmatpush1.bf16.msra.mxu0 %v12998_v53  ;;  %v13063_v34 = vld [vmem:[%s16125_s24 + $0x684] ss:$16 sps:$4 sm:$0xff]   ;;  %v13061_v36 = vld [vmem:[%s16125_s24 + $0x680] ss:$16 sps:$4 sm:$0xff]  }
 0x2dc   : > { %9829 = vmatpush1.bf16.msra.mxu1 %v12999_v54  ;;  %9789 = vmatprep.subr.bf16.mxu0 %v13000_v55  ;;  %v13066_v37 = vld [vmem:[%s16125_s24 + $0x4a4] ss:$16 sps:$4 sm:$0xff]   ;;  %v13064_v39 = vld [vmem:[%s16125_s24 + $0x4a0] ss:$16 sps:$4 sm:$0xff]  }
 0x2dd   : > { %9830 = vmatprep.subr.bf16.mxu1 %v13002_v56  ;;  %v13069_v38 = vld [vmem:[%s16125_s24 + $0x6a4] ss:$16 sps:$4 sm:$0xff]   ;;  %v13067_v40 = vld [vmem:[%s16125_s24 + $0x6a0] ss:$16 sps:$4 sm:$0xff]  }
 0x2de   : > { %v13072_v41 = vld [vmem:[%s16125_s24 + $0x4c4] ss:$16 sps:$4 sm:$0xff]   ;;  %v13070_v45 = vld [vmem:[%s16125_s24 + $0x4c0] ss:$16 sps:$4 sm:$0xff]  }
 0x2df   : > { %9790 = vmatpush1.bf16.msra.mxu0 %v13004_v60  ;;  %v13075_v42 = vld [vmem:[%s16125_s24 + $0x6c4] ss:$16 sps:$4 sm:$0xff]   ;;  %v13073_v46 = vld [vmem:[%s16125_s24 + $0x6c0] ss:$16 sps:$4 sm:$0xff]  }
 0x2e0   : > { %9831 = vmatpush1.bf16.msra.mxu1 %v13005_v61  ;;  %9791 = vmatprep.subr.bf16.mxu0 %v13006_v63  ;;  %v16243_v43 = vld [vmem:[%s16113_s22 + $0x10] sm:$0xff] }
 0x2e1   : > { %9832 = vmatprep.subr.bf16.mxu1 %v13008_v0  ;;  %v16252_v47 = vcombine.high %v16243_v43, %v16243_v43  ;;  %v13078_v49 = vld [vmem:[%s16125_s24 + $0x4e4] ss:$16 sps:$4 sm:$0xff]   ;;  %v13076_v51 = vld [vmem:[%s16125_s24 + $0x4e0] ss:$16 sps:$4 sm:$0xff]  }
 0x2e2   : > { %v13081_v50 = vld [vmem:[%s16125_s24 + $0x6e4] ss:$16 sps:$4 sm:$0xff]   ;;  %v13079_v52 = vld [vmem:[%s16125_s24 + $0x6e0] ss:$16 sps:$4 sm:$0xff]  }
 0x2e3   : > { %9792 = vmatpush1.bf16.msra.mxu0 %v13010_v1  ;;  %v13084_v53 = vld [vmem:[%s16125_s24 + $0x504] ss:$16 sps:$4 sm:$0xff]   ;;  %v13082_v55 = vld [vmem:[%s16125_s24 + $0x500] ss:$16 sps:$4 sm:$0xff]  }
 0x2e4   : > { %9833 = vmatpush1.bf16.msra.mxu1 %v13011_v2  ;;  %9793 = vmatprep.subr.bf16.mxu0 %v13012_v3  ;;  %v13087_v54 = vld [vmem:[%s16125_s24 + $0x704] ss:$16 sps:$4 sm:$0xff]   ;;  %v13085_v56 = vld [vmem:[%s16125_s24 + $0x700] ss:$16 sps:$4 sm:$0xff]  }
 0x2e5   : > { %9834 = vmatprep.subr.bf16.mxu1 %v13014_v4  ;;  %v13090_v57 = vld [vmem:[%s16125_s24 + $0x524] ss:$16 sps:$4 sm:$0xff]   ;;  %v13088_v60 = vld [vmem:[%s16125_s24 + $0x520] ss:$16 sps:$4 sm:$0xff]  }
 0x2e6   : > { %v13093_v59 = vld [vmem:[%s16125_s24 + $0x724] ss:$16 sps:$4 sm:$0xff]   ;;  %v13091_v61 = vld [vmem:[%s16125_s24 + $0x720] ss:$16 sps:$4 sm:$0xff]  }
 0x2e7   : > { %9794 = vmatpush1.bf16.msra.mxu0 %v13016_v5  ;;  %v13096_v63 = vld [vmem:[%s16125_s24 + $0x544] ss:$16 sps:$4 sm:$0xff]   ;;  %v13094_v1 = vld [vmem:[%s16125_s24 + $0x540] ss:$16 sps:$4 sm:$0xff]  }
 0x2e8   : > { %9835 = vmatpush1.bf16.msra.mxu1 %v13017_v6  ;;  %9795 = vmatprep.subr.bf16.mxu0 %v13018_v7  ;;  %v13099_v0 = vld [vmem:[%s16125_s24 + $0x744] ss:$16 sps:$4 sm:$0xff]   ;;  %v13097_v2 = vld [vmem:[%s16125_s24 + $0x740] ss:$16 sps:$4 sm:$0xff]  }
 0x2e9   : > { %9836 = vmatprep.subr.bf16.mxu1 %v13020_v8  ;;  %v13102_v3 = vld [vmem:[%s16125_s24 + $0x564] ss:$16 sps:$4 sm:$0xff]   ;;  %v13100_v5 = vld [vmem:[%s16125_s24 + $0x560] ss:$16 sps:$4 sm:$0xff]  }
 0x2ea   : > { %v13105_v4 = vld [vmem:[%s16125_s24 + $0x764] ss:$16 sps:$4 sm:$0xff]   ;;  %v13103_v6 = vld [vmem:[%s16125_s24 + $0x760] ss:$16 sps:$4 sm:$0xff]  }
 0x2eb   : > { %9796 = vmatpush1.bf16.msra.mxu0 %v13022_v9  ;;  %v13108_v7 = vld [vmem:[%s16125_s24 + $0x584] ss:$16 sps:$4 sm:$0xff]   ;;  %v13106_v9 = vld [vmem:[%s16125_s24 + $0x580] ss:$16 sps:$4 sm:$0xff]  }
 0x2ec   : > { %9837 = vmatpush1.bf16.msra.mxu1 %v13023_v10  ;;  %9797 = vmatprep.subr.bf16.mxu0 %v13024_v11  ;;  %v13111_v8 = vld [vmem:[%s16125_s24 + $0x784] ss:$16 sps:$4 sm:$0xff]   ;;  %v13109_v10 = vld [vmem:[%s16125_s24 + $0x780] ss:$16 sps:$4 sm:$0xff]  }
 0x2ed   : > { %9838 = vmatprep.subr.bf16.mxu1 %v13026_v12  ;;  %v13114_v11 = vld [vmem:[%s16125_s24 + $0x5a4] ss:$16 sps:$4 sm:$0xff]  }
 0x2ee   : > { %v13117_v12 = vld [vmem:[%s16125_s24 + $0x7a4] ss:$16 sps:$4 sm:$0xff]  }
 0x2ef   : > { %9798 = vmatpush1.bf16.msra.mxu0 %v13028_v13  ;;  %v13112_v13 = vld [vmem:[%s16125_s24 + $0x5a0] ss:$16 sps:$4 sm:$0xff]  }
 0x2f0   : > { %9839 = vmatpush1.bf16.msra.mxu1 %v13029_v14  ;;  %9849 = vmatprep.subr.bf16.mxu0 %v13036_v15  ;;  %v13115_v14 = vld [vmem:[%s16125_s24 + $0x7a0] ss:$16 sps:$4 sm:$0xff]   ;;  %v13120_v15 = vld [vmem:[%s16125_s24 + $0x5c4] ss:$16 sps:$4 sm:$0xff]  }
 0x2f1   : > { %9890 = vmatprep.subr.bf16.mxu1 %v13039_v16  ;;  %v13123_v16 = vld [vmem:[%s16125_s24 + $0x7c4] ss:$16 sps:$4 sm:$0xff]  }
 0x2f2   : > { %9800 = vmatmul.mubr.bf16.vlgmr.msra.gmra.mrb[0].mxu0 %v16212_v17 }
 0x2f3   : > { %9841 = vmatmul.mubr.bf16.vlgmr.msra.gmra.mrb[0].mxu1 %v16214_v18  ;;  %9850 = vmatpush1.bf16.msra.mxu0 %v13034_v19  ;;  %v13118_v19 = vld [vmem:[%s16125_s24 + $0x5c0] ss:$16 sps:$4 sm:$0xff]  }
 0x2f4   : > { %9891 = vmatpush1.bf16.msra.mxu1 %v13037_v20  ;;  %9851 = vmatprep.subr.bf16.mxu0 %v13042_v21  ;;  %v13121_v20 = vld [vmem:[%s16125_s24 + $0x7c0] ss:$16 sps:$4 sm:$0xff]   ;;  %v13126_v21 = vld [vmem:[%s16125_s24 + $0x5e4] ss:$16 sps:$4 sm:$0xff]  }
 0x2f5   : > { %9892 = vmatprep.subr.bf16.mxu1 %v13045_v22  ;;  %9881 = vmatprep.mubr.bf16.mxu0 %v16252_v47  ;;  %v13129_v22 = vld [vmem:[%s16125_s24 + $0x7e4] ss:$16 sps:$4 sm:$0xff]  }
 0x2f6   : > { %9922 = vmatprep.mubr.bf16.mxu1 %v16256_v48 }
 0x2f7   : > { %9852 = vmatpush1.bf16.msra.mxu0 %v13040_v23  ;;  %v13124_v23 = vld [vmem:[%s16125_s24 + $0x5e0] ss:$16 sps:$4 sm:$0xff]  }
 0x2f8   : > { %9893 = vmatpush1.bf16.msra.mxu1 %v13043_v24  ;;  %9853 = vmatprep.subr.bf16.mxu0 %v13048_v25  ;;  %v13127_v24 = vld [vmem:[%s16125_s24 + $0x7e0] ss:$16 sps:$4 sm:$0xff]   ;;  %v13136_v25 = vld [vmem:[%s16125_s24 + $0x804] ss:$16 sps:$4 sm:$0xff]  }
 0x2f9   : > { %9894 = vmatprep.subr.bf16.mxu1 %v13051_v26  ;;  %v13139_v26 = vld [vmem:[%s16125_s24 + $0xa04] ss:$16 sps:$4 sm:$0xff]  }
 0x2fb   : > { %9854 = vmatpush1.bf16.msra.mxu0 %v13046_v27  ;;  %v16300_v27 = vcombine.low %v16243_v43, %v16243_v43  ;;  %v13154_v43 = vld [vmem:[%s16125_s24 + $0x864] ss:$16 sps:$4 sm:$0xff]  }
 0x2fc   : > { %9895 = vmatpush1.bf16.msra.mxu1 %v13049_v28  ;;  %9855 = vmatprep.subr.bf16.mxu0 %v13054_v29  ;;  %v16304_v28 = vcombine.low %v16246_v44, %v16246_v44  ;;  %v13134_v29 = vld [vmem:[%s16125_s24 + $0x800] ss:$16 sps:$4 sm:$0xff]   ;;  %v13157_v44 = vld [vmem:[%s16125_s24 + $0xa64] ss:$16 sps:$4 sm:$0xff]  }
 0x2fd   : > { %9896 = vmatprep.subr.bf16.mxu1 %v13057_v30  ;;  %v13137_v30 = vld [vmem:[%s16125_s24 + $0xa00] ss:$16 sps:$4 sm:$0xff]  }
 0x2ff   : > { %9856 = vmatpush1.bf16.msra.mxu0 %v13052_v31  ;;  %v13142_v31 = vld [vmem:[%s16125_s24 + $0x824] ss:$16 sps:$4 sm:$0xff]  }
 0x300   : > { %9897 = vmatpush1.bf16.msra.mxu1 %v13055_v32  ;;  %9857 = vmatprep.subr.bf16.mxu0 %v13060_v33  ;;  %v13145_v32 = vld [vmem:[%s16125_s24 + $0xa24] ss:$16 sps:$4 sm:$0xff]  }
 0x301   : > { %9898 = vmatprep.subr.bf16.mxu1 %v13063_v34  ;;  %v16311_v33 = vld [vmem:[%s16113_s22 + $0x20] sm:$0xff]  ;;  %v16314_v34 = vld [vmem:[%s16113_s22 + $0x28] sm:$0xff] }
 0x303   : > { %9858 = vmatpush1.bf16.msra.mxu0 %v13058_v35  ;;  %v16318_v35 = vcombine.high %v16311_v33, %v16311_v33 }
 0x304   : > { %9899 = vmatpush1.bf16.msra.mxu1 %v13061_v36  ;;  %9859 = vmatprep.subr.bf16.mxu0 %v13066_v37  ;;  %v16322_v36 = vcombine.high %v16314_v34, %v16314_v34  ;;  %v13140_v37 = vld [vmem:[%s16125_s24 + $0x820] ss:$16 sps:$4 sm:$0xff]  }
 0x305   : > { %9900 = vmatprep.subr.bf16.mxu1 %v13069_v38  ;;  %v13143_v38 = vld [vmem:[%s16125_s24 + $0xa20] ss:$16 sps:$4 sm:$0xff]  }
 0x307   : > { %9860 = vmatpush1.bf16.msra.mxu0 %v13064_v39  ;;  %v13148_v39 = vld [vmem:[%s16125_s24 + $0x844] ss:$16 sps:$4 sm:$0xff]  }
 0x308   : > { %9901 = vmatpush1.bf16.msra.mxu1 %v13067_v40  ;;  %9861 = vmatprep.subr.bf16.mxu0 %v13072_v41  ;;  %v13151_v40 = vld [vmem:[%s16125_s24 + $0xa44] ss:$16 sps:$4 sm:$0xff]   ;;  %v13146_v41 = vld [vmem:[%s16125_s24 + $0x840] ss:$16 sps:$4 sm:$0xff]  }
 0x309   : > { %9902 = vmatprep.subr.bf16.mxu1 %v13075_v42  ;;  %v13149_v42 = vld [vmem:[%s16125_s24 + $0xa40] ss:$16 sps:$4 sm:$0xff]  }
 0x30b   : > { %9862 = vmatpush1.bf16.msra.mxu0 %v13070_v45  ;;  %v13152_v45 = vld [vmem:[%s16125_s24 + $0x860] ss:$16 sps:$4 sm:$0xff]  }
 0x30c   : > { %9903 = vmatpush1.bf16.msra.mxu1 %v13073_v46  ;;  %9863 = vmatprep.subr.bf16.mxu0 %v13078_v49  ;;  %v13155_v46 = vld [vmem:[%s16125_s24 + $0xa60] ss:$16 sps:$4 sm:$0xff]   ;;  %v13160_v49 = vld [vmem:[%s16125_s24 + $0x884] ss:$16 sps:$4 sm:$0xff]  }
 0x30d   : > { %9904 = vmatprep.subr.bf16.mxu1 %v13081_v50  ;;  %v13163_v50 = vld [vmem:[%s16125_s24 + $0xa84] ss:$16 sps:$4 sm:$0xff]  }
 0x30f   : > { %9864 = vmatpush1.bf16.msra.mxu0 %v13076_v51  ;;  %v13158_v51 = vld [vmem:[%s16125_s24 + $0x880] ss:$16 sps:$4 sm:$0xff]  }
 0x310   : > { %9905 = vmatpush1.bf16.msra.mxu1 %v13079_v52  ;;  %9865 = vmatprep.subr.bf16.mxu0 %v13084_v53  ;;  %v13161_v52 = vld [vmem:[%s16125_s24 + $0xa80] ss:$16 sps:$4 sm:$0xff]   ;;  %v13166_v53 = vld [vmem:[%s16125_s24 + $0x8a4] ss:$16 sps:$4 sm:$0xff]  }
 0x311   : > { %9906 = vmatprep.subr.bf16.mxu1 %v13087_v54  ;;  %v13169_v54 = vld [vmem:[%s16125_s24 + $0xaa4] ss:$16 sps:$4 sm:$0xff]  }
 0x313   : > { %9866 = vmatpush1.bf16.msra.mxu0 %v13082_v55  ;;  %v13164_v55 = vld [vmem:[%s16125_s24 + $0x8a0] ss:$16 sps:$4 sm:$0xff]  }
 0x314   : > { %9907 = vmatpush1.bf16.msra.mxu1 %v13085_v56  ;;  %9867 = vmatprep.subr.bf16.mxu0 %v13090_v57  ;;  %v13167_v56 = vld [vmem:[%s16125_s24 + $0xaa0] ss:$16 sps:$4 sm:$0xff]   ;;  %v13172_v57 = vld [vmem:[%s16125_s24 + $0x8c4] ss:$16 sps:$4 sm:$0xff]  }
 0x315   : > { %9908 = vmatprep.subr.bf16.mxu1 %v13093_v59  ;;  %v13175_v59 = vld [vmem:[%s16125_s24 + $0xac4] ss:$16 sps:$4 sm:$0xff]  }
 0x317   : > { %9868 = vmatpush1.bf16.msra.mxu0 %v13088_v60  ;;  %v13170_v60 = vld [vmem:[%s16125_s24 + $0x8c0] ss:$16 sps:$4 sm:$0xff]  }
 0x318   : > { %9909 = vmatpush1.bf16.msra.mxu1 %v13091_v61  ;;  %9869 = vmatprep.subr.bf16.mxu0 %v13096_v63  ;;  %v13173_v61 = vld [vmem:[%s16125_s24 + $0xac0] ss:$16 sps:$4 sm:$0xff]   ;;  %v13178_v63 = vld [vmem:[%s16125_s24 + $0x8e4] ss:$16 sps:$4 sm:$0xff]  }
 0x319   : > { %9910 = vmatprep.subr.bf16.mxu1 %v13099_v0  ;;  %v13181_v0 = vld [vmem:[%s16125_s24 + $0xae4] ss:$16 sps:$4 sm:$0xff]  }
 0x31b   : > { %9870 = vmatpush1.bf16.msra.mxu0 %v13094_v1  ;;  %v13176_v1 = vld [vmem:[%s16125_s24 + $0x8e0] ss:$16 sps:$4 sm:$0xff]  }
 0x31c   : > { %9911 = vmatpush1.bf16.msra.mxu1 %v13097_v2  ;;  %9871 = vmatprep.subr.bf16.mxu0 %v13102_v3  ;;  %v13179_v2 = vld [vmem:[%s16125_s24 + $0xae0] ss:$16 sps:$4 sm:$0xff]   ;;  %v13184_v3 = vld [vmem:[%s16125_s24 + $0x904] ss:$16 sps:$4 sm:$0xff]  }
 0x31d   : > { %9912 = vmatprep.subr.bf16.mxu1 %v13105_v4  ;;  %v13187_v4 = vld [vmem:[%s16125_s24 + $0xb04] ss:$16 sps:$4 sm:$0xff]  }
 0x31f   : > { %9872 = vmatpush1.bf16.msra.mxu0 %v13100_v5  ;;  %v13182_v5 = vld [vmem:[%s16125_s24 + $0x900] ss:$16 sps:$4 sm:$0xff]  }
 0x320   : > { %9913 = vmatpush1.bf16.msra.mxu1 %v13103_v6  ;;  %9873 = vmatprep.subr.bf16.mxu0 %v13108_v7  ;;  %v13185_v6 = vld [vmem:[%s16125_s24 + $0xb00] ss:$16 sps:$4 sm:$0xff]   ;;  %v13190_v7 = vld [vmem:[%s16125_s24 + $0x924] ss:$16 sps:$4 sm:$0xff]  }
 0x321   : > { %9914 = vmatprep.subr.bf16.mxu1 %v13111_v8  ;;  %v13193_v8 = vld [vmem:[%s16125_s24 + $0xb24] ss:$16 sps:$4 sm:$0xff]  }
 0x323   : > { %9874 = vmatpush1.bf16.msra.mxu0 %v13106_v9  ;;  %v13188_v9 = vld [vmem:[%s16125_s24 + $0x920] ss:$16 sps:$4 sm:$0xff]  }
 0x324   : > { %9915 = vmatpush1.bf16.msra.mxu1 %v13109_v10  ;;  %9875 = vmatprep.subr.bf16.mxu0 %v13114_v11  ;;  %v13191_v10 = vld [vmem:[%s16125_s24 + $0xb20] ss:$16 sps:$4 sm:$0xff]   ;;  %v13196_v11 = vld [vmem:[%s16125_s24 + $0x944] ss:$16 sps:$4 sm:$0xff]  }
 0x325   : > { %9916 = vmatprep.subr.bf16.mxu1 %v13117_v12  ;;  %v13199_v12 = vld [vmem:[%s16125_s24 + $0xb44] ss:$16 sps:$4 sm:$0xff]  }
 0x327   : > { %9876 = vmatpush1.bf16.msra.mxu0 %v13112_v13  ;;  %v13194_v13 = vld [vmem:[%s16125_s24 + $0x940] ss:$16 sps:$4 sm:$0xff]  }
 0x328   : > { %9917 = vmatpush1.bf16.msra.mxu1 %v13115_v14  ;;  %9877 = vmatprep.subr.bf16.mxu0 %v13120_v15  ;;  %v13197_v14 = vld [vmem:[%s16125_s24 + $0xb40] ss:$16 sps:$4 sm:$0xff]   ;;  %v13202_v15 = vld [vmem:[%s16125_s24 + $0x964] ss:$16 sps:$4 sm:$0xff]  }
 0x329   : > { %9918 = vmatprep.subr.bf16.mxu1 %v13123_v16  ;;  %v13205_v16 = vld [vmem:[%s16125_s24 + $0xb64] ss:$16 sps:$4 sm:$0xff]  }
 0x32b   : > { %9878 = vmatpush1.bf16.msra.mxu0 %v13118_v19  ;;  %v13200_v19 = vld [vmem:[%s16125_s24 + $0x960] ss:$16 sps:$4 sm:$0xff]  }
 0x32c   : > { %9919 = vmatpush1.bf16.msra.mxu1 %v13121_v20  ;;  %9879 = vmatprep.subr.bf16.mxu0 %v13126_v21  ;;  %v13203_v20 = vld [vmem:[%s16125_s24 + $0xb60] ss:$16 sps:$4 sm:$0xff]   ;;  %v13208_v21 = vld [vmem:[%s16125_s24 + $0x984] ss:$16 sps:$4 sm:$0xff]  }
 0x32d   : > { %9920 = vmatprep.subr.bf16.mxu1 %v13129_v22  ;;  %v13211_v22 = vld [vmem:[%s16125_s24 + $0xb84] ss:$16 sps:$4 sm:$0xff]  }
 0x32f   : > { %9880 = vmatpush1.bf16.msra.mxu0 %v13124_v23  ;;  %v13206_v23 = vld [vmem:[%s16125_s24 + $0x980] ss:$16 sps:$4 sm:$0xff]  }
 0x330   : > { %9921 = vmatpush1.bf16.msra.mxu1 %v13127_v24  ;;  %9931 = vmatprep.subr.bf16.mxu0 %v13136_v25  ;;  %v13209_v24 = vld [vmem:[%s16125_s24 + $0xb80] ss:$16 sps:$4 sm:$0xff]   ;;  %v13214_v25 = vld [vmem:[%s16125_s24 + $0x9a4] ss:$16 sps:$4 sm:$0xff]  }
 0x331   : > { %9972 = vmatprep.subr.bf16.mxu1 %v13139_v26  ;;  %v13217_v26 = vld [vmem:[%s16125_s24 + $0xba4] ss:$16 sps:$4 sm:$0xff]  }
 0x332   : > { %9882 = vmatmul.mubr.bf16.vlgmr.msra.gmra.mrb[4].mxu0 %v16300_v27 }
 0x333   : > { %9923 = vmatmul.mubr.bf16.vlgmr.msra.gmra.mrb[4].mxu1 %v16304_v28  ;;  %9932 = vmatpush1.bf16.msra.mxu0 %v13134_v29  ;;  %v13212_v29 = vld [vmem:[%s16125_s24 + $0x9a0] ss:$16 sps:$4 sm:$0xff]  }
 0x334   : > { %9973 = vmatpush1.bf16.msra.mxu1 %v13137_v30  ;;  %9933 = vmatprep.subr.bf16.mxu0 %v13142_v31  ;;  %v13215_v30 = vld [vmem:[%s16125_s24 + $0xba0] ss:$16 sps:$4 sm:$0xff]   ;;  %v13220_v31 = vld [vmem:[%s16125_s24 + $0x9c4] ss:$16 sps:$4 sm:$0xff]  }
 0x335   : > { %9974 = vmatprep.subr.bf16.mxu1 %v13145_v32  ;;  %9963 = vmatprep.mubr.bf16.mxu0 %v16318_v35  ;;  %v13223_v32 = vld [vmem:[%s16125_s24 + $0xbc4] ss:$16 sps:$4 sm:$0xff]  }
 0x336   : > { %10004 = vmatprep.mubr.bf16.mxu1 %v16322_v36 }
 0x337   : > { %9934 = vmatpush1.bf16.msra.mxu0 %v13140_v37  ;;  %v13218_v37 = vld [vmem:[%s16125_s24 + $0x9c0] ss:$16 sps:$4 sm:$0xff]  }
 0x338   : > { %9975 = vmatpush1.bf16.msra.mxu1 %v13143_v38  ;;  %9935 = vmatprep.subr.bf16.mxu0 %v13148_v39  ;;  %v13221_v38 = vld [vmem:[%s16125_s24 + $0xbc0] ss:$16 sps:$4 sm:$0xff]   ;;  %v13226_v39 = vld [vmem:[%s16125_s24 + $0x9e4] ss:$16 sps:$4 sm:$0xff]  }
 0x339   : > { %9976 = vmatprep.subr.bf16.mxu1 %v13151_v40  ;;  %v13229_v40 = vld [vmem:[%s16125_s24 + $0xbe4] ss:$16 sps:$4 sm:$0xff]  }
 0x33b   : > { %9936 = vmatpush1.bf16.msra.mxu0 %v13146_v41  ;;  %v13224_v41 = vld [vmem:[%s16125_s24 + $0x9e0] ss:$16 sps:$4 sm:$0xff]  }
 0x33c   : > { %9977 = vmatpush1.bf16.msra.mxu1 %v13149_v42  ;;  %9937 = vmatprep.subr.bf16.mxu0 %v13154_v43  ;;  %v13227_v42 = vld [vmem:[%s16125_s24 + $0xbe0] ss:$16 sps:$4 sm:$0xff]   ;;  %v13236_v43 = vld [vmem:[%s16125_s24 + $0xc04] ss:$16 sps:$4 sm:$0xff]  }
 0x33d   : > { %9978 = vmatprep.subr.bf16.mxu1 %v13157_v44  ;;  %v13239_v44 = vld [vmem:[%s16125_s24 + $0xe04] ss:$16 sps:$4 sm:$0xff]  }
 0x33f   : > { %9938 = vmatpush1.bf16.msra.mxu0 %v13152_v45  ;;  %v13234_v45 = vld [vmem:[%s16125_s24 + $0xc00] ss:$16 sps:$4 sm:$0xff]  }
 0x340   : > { %9979 = vmatpush1.bf16.msra.mxu1 %v13155_v46  ;;  %9939 = vmatprep.subr.bf16.mxu0 %v13160_v49  ;;  %v13237_v46 = vld [vmem:[%s16125_s24 + $0xe00] ss:$16 sps:$4 sm:$0xff]   ;;  %v16392_v49 = vcombine.low %v16311_v33, %v16311_v33 }
 0x341   : > { %9980 = vmatprep.subr.bf16.mxu1 %v13163_v50  ;;  %v16396_v50 = vcombine.low %v16314_v34, %v16314_v34 }
 0x343   : > { %9940 = vmatpush1.bf16.msra.mxu0 %v13158_v51  ;;  %v16399_v51 = vld [vmem:[%s16113_s22 + $0x30] sm:$0xff] }
 0x344   : > { %9981 = vmatpush1.bf16.msra.mxu1 %v13161_v52  ;;  %9941 = vmatprep.subr.bf16.mxu0 %v13166_v53  ;;  %v16402_v52 = vld [vmem:[%s16113_s22 + $0x38] sm:$0xff]  ;;  %v13242_v53 = vld [vmem:[%s16125_s24 + $0xc24] ss:$16 sps:$4 sm:$0xff]   ;;  %v16408_v33 = vcombine.high %v16399_v51, %v16399_v51 }
 0x345   : > { %9982 = vmatprep.subr.bf16.mxu1 %v13169_v54  ;;  %v13245_v54 = vld [vmem:[%s16125_s24 + $0xe24] ss:$16 sps:$4 sm:$0xff]   ;;  %v16412_v34 = vcombine.high %v16402_v52, %v16402_v52 }
 0x347   : > { %9942 = vmatpush1.bf16.msra.mxu0 %v13164_v55  ;;  %v13240_v55 = vld [vmem:[%s16125_s24 + $0xc20] ss:$16 sps:$4 sm:$0xff]  }
 0x348   : > { %9983 = vmatpush1.bf16.msra.mxu1 %v13167_v56  ;;  %9943 = vmatprep.subr.bf16.mxu0 %v13172_v57  ;;  %v13243_v56 = vld [vmem:[%s16125_s24 + $0xe20] ss:$16 sps:$4 sm:$0xff]   ;;  %v13248_v57 = vld [vmem:[%s16125_s24 + $0xc44] ss:$16 sps:$4 sm:$0xff]  }
 0x349   : > { %9984 = vmatprep.subr.bf16.mxu1 %v13175_v59  ;;  %v13251_v59 = vld [vmem:[%s16125_s24 + $0xe44] ss:$16 sps:$4 sm:$0xff]  }
 0x34b   : > { %9944 = vmatpush1.bf16.msra.mxu0 %v13170_v60  ;;  %v13246_v60 = vld [vmem:[%s16125_s24 + $0xc40] ss:$16 sps:$4 sm:$0xff]  }
 0x34c   : > { %9985 = vmatpush1.bf16.msra.mxu1 %v13173_v61  ;;  %9945 = vmatprep.subr.bf16.mxu0 %v13178_v63  ;;  %v13249_v61 = vld [vmem:[%s16125_s24 + $0xe40] ss:$16 sps:$4 sm:$0xff]   ;;  %v13254_v63 = vld [vmem:[%s16125_s24 + $0xc64] ss:$16 sps:$4 sm:$0xff]  }
 0x34d   : > { %9986 = vmatprep.subr.bf16.mxu1 %v13181_v0  ;;  %v13257_v0 = vld [vmem:[%s16125_s24 + $0xe64] ss:$16 sps:$4 sm:$0xff]  }
 0x34f   : > { %9946 = vmatpush1.bf16.msra.mxu0 %v13176_v1  ;;  %v13252_v1 = vld [vmem:[%s16125_s24 + $0xc60] ss:$16 sps:$4 sm:$0xff]  }
 0x350   : > { %9987 = vmatpush1.bf16.msra.mxu1 %v13179_v2  ;;  %9947 = vmatprep.subr.bf16.mxu0 %v13184_v3  ;;  %v13255_v2 = vld [vmem:[%s16125_s24 + $0xe60] ss:$16 sps:$4 sm:$0xff]   ;;  %v13260_v3 = vld [vmem:[%s16125_s24 + $0xc84] ss:$16 sps:$4 sm:$0xff]  }
 0x351   : > { %9988 = vmatprep.subr.bf16.mxu1 %v13187_v4  ;;  %v13263_v4 = vld [vmem:[%s16125_s24 + $0xe84] ss:$16 sps:$4 sm:$0xff]  }
 0x353   : > { %9948 = vmatpush1.bf16.msra.mxu0 %v13182_v5  ;;  %v13258_v5 = vld [vmem:[%s16125_s24 + $0xc80] ss:$16 sps:$4 sm:$0xff]  }
 0x354   : > { %9989 = vmatpush1.bf16.msra.mxu1 %v13185_v6  ;;  %9949 = vmatprep.subr.bf16.mxu0 %v13190_v7  ;;  %v13261_v6 = vld [vmem:[%s16125_s24 + $0xe80] ss:$16 sps:$4 sm:$0xff]   ;;  %v13266_v7 = vld [vmem:[%s16125_s24 + $0xca4] ss:$16 sps:$4 sm:$0xff]  }
 0x355   : > { %9990 = vmatprep.subr.bf16.mxu1 %v13193_v8  ;;  %v13269_v8 = vld [vmem:[%s16125_s24 + $0xea4] ss:$16 sps:$4 sm:$0xff]  }
 0x357   : > { %9950 = vmatpush1.bf16.msra.mxu0 %v13188_v9  ;;  %v13264_v9 = vld [vmem:[%s16125_s24 + $0xca0] ss:$16 sps:$4 sm:$0xff]  }
 0x358   : > { %9991 = vmatpush1.bf16.msra.mxu1 %v13191_v10  ;;  %9951 = vmatprep.subr.bf16.mxu0 %v13196_v11  ;;  %v13267_v10 = vld [vmem:[%s16125_s24 + $0xea0] ss:$16 sps:$4 sm:$0xff]   ;;  %v13272_v11 = vld [vmem:[%s16125_s24 + $0xcc4] ss:$16 sps:$4 sm:$0xff]  }
 0x359   : > { %9992 = vmatprep.subr.bf16.mxu1 %v13199_v12  ;;  %v13275_v12 = vld [vmem:[%s16125_s24 + $0xec4] ss:$16 sps:$4 sm:$0xff]  }
 0x35b   : > { %9952 = vmatpush1.bf16.msra.mxu0 %v13194_v13  ;;  %v13270_v13 = vld [vmem:[%s16125_s24 + $0xcc0] ss:$16 sps:$4 sm:$0xff]  }
 0x35c   : > { %9993 = vmatpush1.bf16.msra.mxu1 %v13197_v14  ;;  %9953 = vmatprep.subr.bf16.mxu0 %v13202_v15  ;;  %v13273_v14 = vld [vmem:[%s16125_s24 + $0xec0] ss:$16 sps:$4 sm:$0xff]   ;;  %v13278_v15 = vld [vmem:[%s16125_s24 + $0xce4] ss:$16 sps:$4 sm:$0xff]  }
 0x35d   : > { %9994 = vmatprep.subr.bf16.mxu1 %v13205_v16  ;;  %v13281_v16 = vld [vmem:[%s16125_s24 + $0xee4] ss:$16 sps:$4 sm:$0xff]  }
 0x35f   : > { %9954 = vmatpush1.bf16.msra.mxu0 %v13200_v19  ;;  %v13276_v19 = vld [vmem:[%s16125_s24 + $0xce0] ss:$16 sps:$4 sm:$0xff]  }
 0x360   : > { %9995 = vmatpush1.bf16.msra.mxu1 %v13203_v20  ;;  %9955 = vmatprep.subr.bf16.mxu0 %v13208_v21  ;;  %v13279_v20 = vld [vmem:[%s16125_s24 + $0xee0] ss:$16 sps:$4 sm:$0xff]   ;;  %v13284_v21 = vld [vmem:[%s16125_s24 + $0xd04] ss:$16 sps:$4 sm:$0xff]  }
 0x361   : > { %9996 = vmatprep.subr.bf16.mxu1 %v13211_v22  ;;  %v13287_v22 = vld [vmem:[%s16125_s24 + $0xf04] ss:$16 sps:$4 sm:$0xff]  }
 0x363   : > { %9956 = vmatpush1.bf16.msra.mxu0 %v13206_v23  ;;  %v13282_v23 = vld [vmem:[%s16125_s24 + $0xd00] ss:$16 sps:$4 sm:$0xff]  }
 0x364   : > { %9997 = vmatpush1.bf16.msra.mxu1 %v13209_v24  ;;  %9957 = vmatprep.subr.bf16.mxu0 %v13214_v25  ;;  %v13285_v24 = vld [vmem:[%s16125_s24 + $0xf00] ss:$16 sps:$4 sm:$0xff]   ;;  %v13290_v25 = vld [vmem:[%s16125_s24 + $0xd24] ss:$16 sps:$4 sm:$0xff]  }
 0x365   : > { %9998 = vmatprep.subr.bf16.mxu1 %v13217_v26  ;;  %v13293_v26 = vld [vmem:[%s16125_s24 + $0xf24] ss:$16 sps:$4 sm:$0xff]  }
 0x367   : > { %9958 = vmatpush1.bf16.msra.mxu0 %v13212_v29  ;;  %v13288_v29 = vld [vmem:[%s16125_s24 + $0xd20] ss:$16 sps:$4 sm:$0xff]  }
 0x368   : > { %9999 = vmatpush1.bf16.msra.mxu1 %v13215_v30  ;;  %9959 = vmatprep.subr.bf16.mxu0 %v13220_v31  ;;  %v13291_v30 = vld [vmem:[%s16125_s24 + $0xf20] ss:$16 sps:$4 sm:$0xff]   ;;  %v13296_v31 = vld [vmem:[%s16125_s24 + $0xd44] ss:$16 sps:$4 sm:$0xff]  }
 0x369   : > { %10000 = vmatprep.subr.bf16.mxu1 %v13223_v32  ;;  %v13299_v32 = vld [vmem:[%s16125_s24 + $0xf44] ss:$16 sps:$4 sm:$0xff]  }
 0x36b   : > { %9960 = vmatpush1.bf16.msra.mxu0 %v13218_v37  ;;  %v13294_v37 = vld [vmem:[%s16125_s24 + $0xd40] ss:$16 sps:$4 sm:$0xff]  }
 0x36c   : > { %10001 = vmatpush1.bf16.msra.mxu1 %v13221_v38  ;;  %9961 = vmatprep.subr.bf16.mxu0 %v13226_v39  ;;  %v13297_v38 = vld [vmem:[%s16125_s24 + $0xf40] ss:$16 sps:$4 sm:$0xff]   ;;  %v13302_v39 = vld [vmem:[%s16125_s24 + $0xd64] ss:$16 sps:$4 sm:$0xff]  }
 0x36d   : > { %10002 = vmatprep.subr.bf16.mxu1 %v13229_v40  ;;  %v13305_v40 = vld [vmem:[%s16125_s24 + $0xf64] ss:$16 sps:$4 sm:$0xff]  }
 0x36f   : > { %9962 = vmatpush1.bf16.msra.mxu0 %v13224_v41  ;;  %v13300_v41 = vld [vmem:[%s16125_s24 + $0xd60] ss:$16 sps:$4 sm:$0xff]  }
 0x370   : > { %10003 = vmatpush1.bf16.msra.mxu1 %v13227_v42  ;;  %10013 = vmatprep.subr.bf16.mxu0 %v13236_v43  ;;  %v13303_v42 = vld [vmem:[%s16125_s24 + $0xf60] ss:$16 sps:$4 sm:$0xff]   ;;  %v13308_v43 = vld [vmem:[%s16125_s24 + $0xd84] ss:$16 sps:$4 sm:$0xff]  }
 0x371   : > { %10054 = vmatprep.subr.bf16.mxu1 %v13239_v44  ;;  %v13311_v44 = vld [vmem:[%s16125_s24 + $0xf84] ss:$16 sps:$4 sm:$0xff]  }
 0x372   : > { %9964 = vmatmul.mubr.bf16.vlgmr.msra.gmra.mrb[8].mxu0 %v16392_v49 }
 0x373   : > { %10005 = vmatmul.mubr.bf16.vlgmr.msra.gmra.mrb[8].mxu1 %v16396_v50  ;;  %10014 = vmatpush1.bf16.msra.mxu0 %v13234_v45  ;;  %v13306_v45 = vld [vmem:[%s16125_s24 + $0xd80] ss:$16 sps:$4 sm:$0xff]  }
 0x374   : > { %10055 = vmatpush1.bf16.msra.mxu1 %v13237_v46  ;;  %10015 = vmatprep.subr.bf16.mxu0 %v13242_v53  ;;  %v13309_v46 = vld [vmem:[%s16125_s24 + $0xf80] ss:$16 sps:$4 sm:$0xff]   ;;  %v13314_v53 = vld [vmem:[%s16125_s24 + $0xda4] ss:$16 sps:$4 sm:$0xff]  }
 0x375   : > { %10056 = vmatprep.subr.bf16.mxu1 %v13245_v54  ;;  %10045 = vmatprep.mubr.bf16.mxu0 %v16408_v33  ;;  %v13317_v54 = vld [vmem:[%s16125_s24 + $0xfa4] ss:$16 sps:$4 sm:$0xff]  }
 0x376   : > { %10086 = vmatprep.mubr.bf16.mxu1 %v16412_v34 }
 0x377   : > { %10016 = vmatpush1.bf16.msra.mxu0 %v13240_v55  ;;  %v13312_v55 = vld [vmem:[%s16125_s24 + $0xda0] ss:$16 sps:$4 sm:$0xff]  }
 0x378   : > { %10057 = vmatpush1.bf16.msra.mxu1 %v13243_v56  ;;  %10017 = vmatprep.subr.bf16.mxu0 %v13248_v57  ;;  %v13315_v56 = vld [vmem:[%s16125_s24 + $0xfa0] ss:$16 sps:$4 sm:$0xff]   ;;  %v13320_v57 = vld [vmem:[%s16125_s24 + $0xdc4] ss:$16 sps:$4 sm:$0xff]  }
 0x379   : > { %10058 = vmatprep.subr.bf16.mxu1 %v13251_v59  ;;  %v13323_v59 = vld [vmem:[%s16125_s24 + $0xfc4] ss:$16 sps:$4 sm:$0xff]  }
 0x37b   : > { %10018 = vmatpush1.bf16.msra.mxu0 %v13246_v60  ;;  %v13318_v60 = vld [vmem:[%s16125_s24 + $0xdc0] ss:$16 sps:$4 sm:$0xff]  }
 0x37c   : > { %10059 = vmatpush1.bf16.msra.mxu1 %v13249_v61  ;;  %10019 = vmatprep.subr.bf16.mxu0 %v13254_v63  ;;  %v13321_v61 = vld [vmem:[%s16125_s24 + $0xfc0] ss:$16 sps:$4 sm:$0xff]   ;;  %v13326_v63 = vld [vmem:[%s16125_s24 + $0xde4] ss:$16 sps:$4 sm:$0xff]  }
 0x37d   : > { %10060 = vmatprep.subr.bf16.mxu1 %v13257_v0  ;;  %v13329_v0 = vld [vmem:[%s16125_s24 + $0xfe4] ss:$16 sps:$4 sm:$0xff]  }
 0x37f   : > { %10020 = vmatpush1.bf16.msra.mxu0 %v13252_v1  ;;  %v13324_v1 = vld [vmem:[%s16125_s24 + $0xde0] ss:$16 sps:$4 sm:$0xff]  }
 0x380   : > { %10061 = vmatpush1.bf16.msra.mxu1 %v13255_v2  ;;  %10021 = vmatprep.subr.bf16.mxu0 %v13260_v3  ;;  %v13327_v2 = vld [vmem:[%s16125_s24 + $0xfe0] ss:$16 sps:$4 sm:$0xff]   ;;  %v13336_v3 = vld [vmem:[%s16125_s24 + $0x1004] ss:$16 sps:$4 sm:$0xff]  }
 0x381   : > { %10062 = vmatprep.subr.bf16.mxu1 %v13263_v4  ;;  %v13339_v4 = vld [vmem:[%s16125_s24 + $0x1204] ss:$16 sps:$4 sm:$0xff]  }
 0x383   : > { %10022 = vmatpush1.bf16.msra.mxu0 %v13258_v5  ;;  %v16479_v5 = vld [vmem:[%s16113_s22 + $0x40] sm:$0xff] }
 0x384   : > { %10063 = vmatpush1.bf16.msra.mxu1 %v13261_v6  ;;  %10023 = vmatprep.subr.bf16.mxu0 %v13266_v7  ;;  %v16483_v6 = vcombine.low %v16399_v51, %v16399_v51  ;;  %v16487_v7 = vcombine.low %v16402_v52, %v16402_v52  ;;  %v16498_v51 = vcombine.high %v16479_v5, %v16479_v5 }
 0x385   : > { %10064 = vmatprep.subr.bf16.mxu1 %v13269_v8  ;;  %v16490_v8 = vld [vmem:[%s16113_s22 + $0x48] sm:$0xff] }
 0x386   : > { %v16502_v52 = vcombine.high %v16490_v8, %v16490_v8 }
 0x387   : > { %10024 = vmatpush1.bf16.msra.mxu0 %v13264_v9  ;;  %v13334_v9 = vld [vmem:[%s16125_s24 + $0x1000] ss:$16 sps:$4 sm:$0xff]  }
 0x388   : > { %10065 = vmatpush1.bf16.msra.mxu1 %v13267_v10  ;;  %10025 = vmatprep.subr.bf16.mxu0 %v13272_v11  ;;  %v13337_v10 = vld [vmem:[%s16125_s24 + $0x1200] ss:$16 sps:$4 sm:$0xff]   ;;  %v13342_v11 = vld [vmem:[%s16125_s24 + $0x1024] ss:$16 sps:$4 sm:$0xff]  }
 0x389   : > { %10066 = vmatprep.subr.bf16.mxu1 %v13275_v12  ;;  %v13345_v12 = vld [vmem:[%s16125_s24 + $0x1224] ss:$16 sps:$4 sm:$0xff]  }
 0x38b   : > { %10026 = vmatpush1.bf16.msra.mxu0 %v13270_v13  ;;  %v13340_v13 = vld [vmem:[%s16125_s24 + $0x1020] ss:$16 sps:$4 sm:$0xff]  }
 0x38c   : > { %10067 = vmatpush1.bf16.msra.mxu1 %v13273_v14  ;;  %10027 = vmatprep.subr.bf16.mxu0 %v13278_v15  ;;  %v13343_v14 = vld [vmem:[%s16125_s24 + $0x1220] ss:$16 sps:$4 sm:$0xff]   ;;  %v13348_v15 = vld [vmem:[%s16125_s24 + $0x1044] ss:$16 sps:$4 sm:$0xff]  }
 0x38d   : > { %10068 = vmatprep.subr.bf16.mxu1 %v13281_v16  ;;  %v13351_v16 = vld [vmem:[%s16125_s24 + $0x1244] ss:$16 sps:$4 sm:$0xff]  }
 0x38f   : > { %10028 = vmatpush1.bf16.msra.mxu0 %v13276_v19  ;;  %v13346_v19 = vld [vmem:[%s16125_s24 + $0x1040] ss:$16 sps:$4 sm:$0xff]  }
 0x390   : > { %10069 = vmatpush1.bf16.msra.mxu1 %v13279_v20  ;;  %10029 = vmatprep.subr.bf16.mxu0 %v13284_v21  ;;  %v13349_v20 = vld [vmem:[%s16125_s24 + $0x1240] ss:$16 sps:$4 sm:$0xff]   ;;  %v13354_v21 = vld [vmem:[%s16125_s24 + $0x1064] ss:$16 sps:$4 sm:$0xff]  }
 0x391   : > { %10070 = vmatprep.subr.bf16.mxu1 %v13287_v22  ;;  %v13357_v22 = vld [vmem:[%s16125_s24 + $0x1264] ss:$16 sps:$4 sm:$0xff]  }
 0x393   : > { %10030 = vmatpush1.bf16.msra.mxu0 %v13282_v23  ;;  %v13352_v23 = vld [vmem:[%s16125_s24 + $0x1060] ss:$16 sps:$4 sm:$0xff]  }
 0x394   : > { %10071 = vmatpush1.bf16.msra.mxu1 %v13285_v24  ;;  %10031 = vmatprep.subr.bf16.mxu0 %v13290_v25  ;;  %v13355_v24 = vld [vmem:[%s16125_s24 + $0x1260] ss:$16 sps:$4 sm:$0xff]   ;;  %v13360_v25 = vld [vmem:[%s16125_s24 + $0x1084] ss:$16 sps:$4 sm:$0xff]  }
 0x395   : > { %10072 = vmatprep.subr.bf16.mxu1 %v13293_v26  ;;  %v13363_v26 = vld [vmem:[%s16125_s24 + $0x1284] ss:$16 sps:$4 sm:$0xff]  }
 0x397   : > { %10032 = vmatpush1.bf16.msra.mxu0 %v13288_v29  ;;  %v13358_v29 = vld [vmem:[%s16125_s24 + $0x1080] ss:$16 sps:$4 sm:$0xff]  }
 0x398   : > { %10073 = vmatpush1.bf16.msra.mxu1 %v13291_v30  ;;  %10033 = vmatprep.subr.bf16.mxu0 %v13296_v31  ;;  %v13361_v30 = vld [vmem:[%s16125_s24 + $0x1280] ss:$16 sps:$4 sm:$0xff]   ;;  %v13366_v31 = vld [vmem:[%s16125_s24 + $0x10a4] ss:$16 sps:$4 sm:$0xff]  }
 0x399   : > { %10074 = vmatprep.subr.bf16.mxu1 %v13299_v32  ;;  %v13369_v32 = vld [vmem:[%s16125_s24 + $0x12a4] ss:$16 sps:$4 sm:$0xff]  }
 0x39b   : > { %10034 = vmatpush1.bf16.msra.mxu0 %v13294_v37  ;;  %v13364_v37 = vld [vmem:[%s16125_s24 + $0x10a0] ss:$16 sps:$4 sm:$0xff]  }
 0x39c   : > { %10075 = vmatpush1.bf16.msra.mxu1 %v13297_v38  ;;  %10035 = vmatprep.subr.bf16.mxu0 %v13302_v39  ;;  %v13367_v38 = vld [vmem:[%s16125_s24 + $0x12a0] ss:$16 sps:$4 sm:$0xff]   ;;  %v13372_v39 = vld [vmem:[%s16125_s24 + $0x10c4] ss:$16 sps:$4 sm:$0xff]  }
 0x39d   : > { %10076 = vmatprep.subr.bf16.mxu1 %v13305_v40  ;;  %v13375_v40 = vld [vmem:[%s16125_s24 + $0x12c4] ss:$16 sps:$4 sm:$0xff]  }
 0x39f   : > { %10036 = vmatpush1.bf16.msra.mxu0 %v13300_v41 }
 0x3a0   : > { %10077 = vmatpush1.bf16.msra.mxu1 %v13303_v42  ;;  %10037 = vmatprep.subr.bf16.mxu0 %v13308_v43  ;;  %v13370_v43 = vld [vmem:[%s16125_s24 + $0x10c0] ss:$16 sps:$4 sm:$0xff]  }
 0x3a1   : > { %10078 = vmatprep.subr.bf16.mxu1 %v13311_v44  ;;  %v13373_v44 = vld [vmem:[%s16125_s24 + $0x12c0] ss:$16 sps:$4 sm:$0xff]  }
 0x3a3   : > { %10038 = vmatpush1.bf16.msra.mxu0 %v13306_v45 }
 0x3a4   : > { %10079 = vmatpush1.bf16.msra.mxu1 %v13309_v46  ;;  %10039 = vmatprep.subr.bf16.mxu0 %v13314_v53 }
 0x3a5   : > { %10080 = vmatprep.subr.bf16.mxu1 %v13317_v54 }
 0x3a7   : > { %10040 = vmatpush1.bf16.msra.mxu0 %v13312_v55 }
 0x3a8   : > { %10081 = vmatpush1.bf16.msra.mxu1 %v13315_v56  ;;  %10041 = vmatprep.subr.bf16.mxu0 %v13320_v57 }
 0x3a9   : > { %10082 = vmatprep.subr.bf16.mxu1 %v13323_v59 }
 0x3ab   : > { %10042 = vmatpush1.bf16.msra.mxu0 %v13318_v60  ;;  %v13378_v60 = vld [vmem:[%s16125_s24 + $0x10e4] ss:$16 sps:$4 sm:$0xff]  }
 0x3ac   : > { %10083 = vmatpush1.bf16.msra.mxu1 %v13321_v61  ;;  %10043 = vmatprep.subr.bf16.mxu0 %v13326_v63  ;;  %v13381_v61 = vld [vmem:[%s16125_s24 + $0x12e4] ss:$16 sps:$4 sm:$0xff]   ;;  %v13376_v63 = vld [vmem:[%s16125_s24 + $0x10e0] ss:$16 sps:$4 sm:$0xff]  }
 0x3ad   : > { %10084 = vmatprep.subr.bf16.mxu1 %v13329_v0  ;;  %v13379_v0 = vld [vmem:[%s16125_s24 + $0x12e0] ss:$16 sps:$4 sm:$0xff]  }
 0x3af   : > { %10044 = vmatpush1.bf16.msra.mxu0 %v13324_v1  ;;  %v13384_v1 = vld [vmem:[%s16125_s24 + $0x1104] ss:$16 sps:$4 sm:$0xff]  }
 0x3b0   : > { %10085 = vmatpush1.bf16.msra.mxu1 %v13327_v2  ;;  %10095 = vmatprep.subr.bf16.mxu0 %v13336_v3  ;;  %v13387_v2 = vld [vmem:[%s16125_s24 + $0x1304] ss:$16 sps:$4 sm:$0xff]   ;;  %v13382_v3 = vld [vmem:[%s16125_s24 + $0x1100] ss:$16 sps:$4 sm:$0xff]  }
 0x3b1   : > { %10136 = vmatprep.subr.bf16.mxu1 %v13339_v4  ;;  %v13385_v4 = vld [vmem:[%s16125_s24 + $0x1300] ss:$16 sps:$4 sm:$0xff]  }
 0x3b2   : > { %10046 = vmatmul.mubr.bf16.vlgmr.msra.gmra.mrb[12].mxu0 %v16483_v6 }
 0x3b3   : > { %10087 = vmatmul.mubr.bf16.vlgmr.msra.gmra.mrb[12].mxu1 %v16487_v7  ;;  %10096 = vmatpush1.bf16.msra.mxu0 %v13334_v9  ;;  %v13390_v9 = vld [vmem:[%s16125_s24 + $0x1124] ss:$16 sps:$4 sm:$0xff]  }
 0x3b4   : > { %10137 = vmatpush1.bf16.msra.mxu1 %v13337_v10  ;;  %10097 = vmatprep.subr.bf16.mxu0 %v13342_v11  ;;  %v13393_v10 = vld [vmem:[%s16125_s24 + $0x1324] ss:$16 sps:$4 sm:$0xff]   ;;  %v13388_v11 = vld [vmem:[%s16125_s24 + $0x1120] ss:$16 sps:$4 sm:$0xff]  }
 0x3b5   : > { %10138 = vmatprep.subr.bf16.mxu1 %v13345_v12  ;;  %10127 = vmatprep.mubr.bf16.mxu0 %v16498_v51  ;;  %v13391_v12 = vld [vmem:[%s16125_s24 + $0x1320] ss:$16 sps:$4 sm:$0xff]  }
 0x3b6   : > { %10168 = vmatprep.mubr.bf16.mxu1 %v16502_v52 }
 0x3b7   : > { %10098 = vmatpush1.bf16.msra.mxu0 %v13340_v13  ;;  %v13396_v13 = vld [vmem:[%s16125_s24 + $0x1144] ss:$16 sps:$4 sm:$0xff]  }
 0x3b8   : > { %10139 = vmatpush1.bf16.msra.mxu1 %v13343_v14  ;;  %10099 = vmatprep.subr.bf16.mxu0 %v13348_v15  ;;  %v13399_v14 = vld [vmem:[%s16125_s24 + $0x1344] ss:$16 sps:$4 sm:$0xff]   ;;  %v13394_v15 = vld [vmem:[%s16125_s24 + $0x1140] ss:$16 sps:$4 sm:$0xff]  }
 0x3b9   : > { %10140 = vmatprep.subr.bf16.mxu1 %v13351_v16  ;;  %v13397_v16 = vld [vmem:[%s16125_s24 + $0x1340] ss:$16 sps:$4 sm:$0xff]  }
 0x3bb   : > { %10100 = vmatpush1.bf16.msra.mxu0 %v13346_v19  ;;  %v13402_v19 = vld [vmem:[%s16125_s24 + $0x1164] ss:$16 sps:$4 sm:$0xff]  }
 0x3bc   : > { %10141 = vmatpush1.bf16.msra.mxu1 %v13349_v20  ;;  %10101 = vmatprep.subr.bf16.mxu0 %v13354_v21  ;;  %v13405_v20 = vld [vmem:[%s16125_s24 + $0x1364] ss:$16 sps:$4 sm:$0xff]   ;;  %v13400_v21 = vld [vmem:[%s16125_s24 + $0x1160] ss:$16 sps:$4 sm:$0xff]  }
 0x3bd   : > { %10142 = vmatprep.subr.bf16.mxu1 %v13357_v22  ;;  %v13403_v22 = vld [vmem:[%s16125_s24 + $0x1360] ss:$16 sps:$4 sm:$0xff]  }
 0x3bf   : > { %10102 = vmatpush1.bf16.msra.mxu0 %v13352_v23  ;;  %v13408_v23 = vld [vmem:[%s16125_s24 + $0x1184] ss:$16 sps:$4 sm:$0xff]  }
 0x3c0   : > { %10143 = vmatpush1.bf16.msra.mxu1 %v13355_v24  ;;  %10103 = vmatprep.subr.bf16.mxu0 %v13360_v25  ;;  %v13411_v24 = vld [vmem:[%s16125_s24 + $0x1384] ss:$16 sps:$4 sm:$0xff]   ;;  %v13406_v25 = vld [vmem:[%s16125_s24 + $0x1180] ss:$16 sps:$4 sm:$0xff]  }
 0x3c1   : > { %10144 = vmatprep.subr.bf16.mxu1 %v13363_v26  ;;  %v13409_v26 = vld [vmem:[%s16125_s24 + $0x1380] ss:$16 sps:$4 sm:$0xff]  }
 0x3c3   : > { %10104 = vmatpush1.bf16.msra.mxu0 %v13358_v29  ;;  %v13414_v29 = vld [vmem:[%s16125_s24 + $0x11a4] ss:$16 sps:$4 sm:$0xff]  }
 0x3c4   : > { %10145 = vmatpush1.bf16.msra.mxu1 %v13361_v30  ;;  %10105 = vmatprep.subr.bf16.mxu0 %v13366_v31  ;;  %v13417_v30 = vld [vmem:[%s16125_s24 + $0x13a4] ss:$16 sps:$4 sm:$0xff]   ;;  %v13412_v31 = vld [vmem:[%s16125_s24 + $0x11a0] ss:$16 sps:$4 sm:$0xff]  }
 0x3c5   : > { %10146 = vmatprep.subr.bf16.mxu1 %v13369_v32  ;;  %v9801_v41 = vpop.f32.mrb[0].mxu0  ;;  %v13415_v32 = vld [vmem:[%s16125_s24 + $0x13a0] ss:$16 sps:$4 sm:$0xff]  }
 0x3c6   : > { %v9842_v42 = vpop.f32.mrb[0].mxu1  ;;  %v9803_v46 = vpop.f32.mrb[1].mxu0 }
 0x3c7   : > { %v16530_v45 = vadd.f32 %v9842_v42, %v9801_v41  ;;  %v9844_v53 = vpop.f32.mrb[1].mxu1  ;;  %v9805_v55 = vpop.f32.mrb[2].mxu0  ;;  %10106 = vmatpush1.bf16.msra.mxu0 %v13364_v37  ;;  %v13420_v37 = vld [vmem:[%s16125_s24 + $0x11c4] ss:$16 sps:$4 sm:$0xff]  }
 0x3c8   : > { %v16532_v54 = vadd.f32 %v9844_v53, %v9803_v46  ;;  %v9846_v56 = vpop.f32.mrb[2].mxu1  ;;  %10147 = vmatpush1.bf16.msra.mxu1 %v13367_v38  ;;  %v9806_v57 = vpop.f32.mrb[3].mxu0  ;;  %10107 = vmatprep.subr.bf16.mxu0 %v13372_v39  ;;  %v13423_v38 = vld [vmem:[%s16125_s24 + $0x13c4] ss:$16 sps:$4 sm:$0xff]   ;;  %v13418_v39 = vld [vmem:[%s16125_s24 + $0x11c0] ss:$16 sps:$4 sm:$0xff]  }
 0x3c9   : > { %v9847_v59 = vpop.f32.mrb[3].mxu1  ;;  %10148 = vmatprep.subr.bf16.mxu1 %v13375_v40  ;;  %v13421_v40 = vld [vmem:[%s16125_s24 + $0x13c0] ss:$16 sps:$4 sm:$0xff]   ;;  %v13426_v41 = vld [vmem:[%s16125_s24 + $0x11e4] ss:$16 sps:$4 sm:$0xff]   ;;  %v16576_v57 = vcombine.low %v16479_v5, %v16479_v5 }
 0x3ca   : > { %v13429_v42 = vld [vmem:[%s16125_s24 + $0x13e4] ss:$16 sps:$4 sm:$0xff]   ;;  %v13434_v55 = vld [vmem:[%s16125_s24 + $0x1400] ss:$16 sps:$4 sm:$0xff]   ;;  %v16580_v59 = vcombine.low %v16490_v8, %v16490_v8 }
 0x3cb   : > { %10108 = vmatpush1.bf16.msra.mxu0 %v13370_v43  ;;  %v13424_v43 = vld [vmem:[%s16125_s24 + $0x11e0] ss:$16 sps:$4 sm:$0xff]   ;;  %v13436_v46 = vld [vmem:[%s16125_s24 + $0x1404] ss:$16 sps:$4 sm:$0xff]  }
 0x3cc   : > { %10149 = vmatpush1.bf16.msra.mxu1 %v13373_v44  ;;  %10109 = vmatprep.subr.bf16.mxu0 %v13378_v60  ;;  %v13427_v44 = vld [vmem:[%s16125_s24 + $0x13e0] ss:$16 sps:$4 sm:$0xff]   ;;  %v13439_v53 = vld [vmem:[%s16125_s24 + $0x1604] ss:$16 sps:$4 sm:$0xff]  }
 0x3cd   : > { %10150 = vmatprep.subr.bf16.mxu1 %v13381_v61  ;;  %v13437_v56 = vld [vmem:[%s16125_s24 + $0x1600] ss:$16 sps:$4 sm:$0xff]   ;;  %v16586_v61 = vld [vmem:[%s16113_s22 + $0x58] sm:$0xff] }
 0x3ce   : > { %v16583_v60 = vld [vmem:[%s16113_s22 + $0x50] sm:$0xff]  ;;  %v16596_v8 = vcombine.high %v16586_v61, %v16586_v61 }
 0x3cf   : > { %10110 = vmatpush1.bf16.msra.mxu0 %v13376_v63  ;;  %v13442_v63 = vld [vmem:[%s16125_s24 + $0x1424] ss:$16 sps:$4 sm:$0xff]   ;;  %v16592_v5 = vcombine.high %v16583_v60, %v16583_v60 }
 0x3d0   : > { %10151 = vmatpush1.bf16.msra.mxu1 %v13379_v0  ;;  %10111 = vmatprep.subr.bf16.mxu0 %v13384_v1  ;;  %v13445_v0 = vld [vmem:[%s16125_s24 + $0x1624] ss:$16 sps:$4 sm:$0xff]   ;;  %v13440_v1 = vld [vmem:[%s16125_s24 + $0x1420] ss:$16 sps:$4 sm:$0xff]  }
 0x3d1   : > { %10152 = vmatprep.subr.bf16.mxu1 %v13387_v2  ;;  %v13443_v2 = vld [vmem:[%s16125_s24 + $0x1620] ss:$16 sps:$4 sm:$0xff]  }
 0x3d3   : > { %10112 = vmatpush1.bf16.msra.mxu0 %v13382_v3  ;;  %v13448_v3 = vld [vmem:[%s16125_s24 + $0x1444] ss:$16 sps:$4 sm:$0xff]  }
 0x3d4   : > { %10153 = vmatpush1.bf16.msra.mxu1 %v13385_v4  ;;  %10113 = vmatprep.subr.bf16.mxu0 %v13390_v9  ;;  %v13451_v4 = vld [vmem:[%s16125_s24 + $0x1644] ss:$16 sps:$4 sm:$0xff]   ;;  %v13446_v9 = vld [vmem:[%s16125_s24 + $0x1440] ss:$16 sps:$4 sm:$0xff]  }
 0x3d5   : > { %10154 = vmatprep.subr.bf16.mxu1 %v13393_v10  ;;  %v13449_v10 = vld [vmem:[%s16125_s24 + $0x1640] ss:$16 sps:$4 sm:$0xff]  }
 0x3d7   : > { %10114 = vmatpush1.bf16.msra.mxu0 %v13388_v11  ;;  %v13454_v11 = vld [vmem:[%s16125_s24 + $0x1464] ss:$16 sps:$4 sm:$0xff]  }
 0x3d8   : > { %10155 = vmatpush1.bf16.msra.mxu1 %v13391_v12  ;;  %10115 = vmatprep.subr.bf16.mxu0 %v13396_v13  ;;  %v13457_v12 = vld [vmem:[%s16125_s24 + $0x1664] ss:$16 sps:$4 sm:$0xff]   ;;  %v13452_v13 = vld [vmem:[%s16125_s24 + $0x1460] ss:$16 sps:$4 sm:$0xff]  }
 0x3d9   : > { %10156 = vmatprep.subr.bf16.mxu1 %v13399_v14  ;;  %v13455_v14 = vld [vmem:[%s16125_s24 + $0x1660] ss:$16 sps:$4 sm:$0xff]  }
 0x3db   : > { %10116 = vmatpush1.bf16.msra.mxu0 %v13394_v15  ;;  %v13460_v15 = vld [vmem:[%s16125_s24 + $0x1484] ss:$16 sps:$4 sm:$0xff]  }
 0x3dc   : > { %10157 = vmatpush1.bf16.msra.mxu1 %v13397_v16  ;;  %10117 = vmatprep.subr.bf16.mxu0 %v13402_v19  ;;  %v13463_v16 = vld [vmem:[%s16125_s24 + $0x1684] ss:$16 sps:$4 sm:$0xff]   ;;  %v13458_v19 = vld [vmem:[%s16125_s24 + $0x1480] ss:$16 sps:$4 sm:$0xff]  }
 0x3dd   : > { %10158 = vmatprep.subr.bf16.mxu1 %v13405_v20  ;;  %v13461_v20 = vld [vmem:[%s16125_s24 + $0x1680] ss:$16 sps:$4 sm:$0xff]  }
 0x3df   : > { %10118 = vmatpush1.bf16.msra.mxu0 %v13400_v21  ;;  %v13466_v21 = vld [vmem:[%s16125_s24 + $0x14a4] ss:$16 sps:$4 sm:$0xff]  }
 0x3e0   : > { %10159 = vmatpush1.bf16.msra.mxu1 %v13403_v22  ;;  %10119 = vmatprep.subr.bf16.mxu0 %v13408_v23  ;;  %v13469_v22 = vld [vmem:[%s16125_s24 + $0x16a4] ss:$16 sps:$4 sm:$0xff]   ;;  %v13464_v23 = vld [vmem:[%s16125_s24 + $0x14a0] ss:$16 sps:$4 sm:$0xff]  }
 0x3e1   : > { %10160 = vmatprep.subr.bf16.mxu1 %v13411_v24  ;;  %v13467_v24 = vld [vmem:[%s16125_s24 + $0x16a0] ss:$16 sps:$4 sm:$0xff]  }
 0x3e3   : > { %10120 = vmatpush1.bf16.msra.mxu0 %v13406_v25  ;;  %v13472_v25 = vld [vmem:[%s16125_s24 + $0x14c4] ss:$16 sps:$4 sm:$0xff]  }
 0x3e4   : > { %10161 = vmatpush1.bf16.msra.mxu1 %v13409_v26  ;;  %10121 = vmatprep.subr.bf16.mxu0 %v13414_v29  ;;  %v13475_v26 = vld [vmem:[%s16125_s24 + $0x16c4] ss:$16 sps:$4 sm:$0xff]  }
 0x3e5   : > { %10162 = vmatprep.subr.bf16.mxu1 %v13417_v30 }
 0x3e7   : > { %10122 = vmatpush1.bf16.msra.mxu0 %v13412_v31  ;;  %v13470_v31 = vld [vmem:[%s16125_s24 + $0x14c0] ss:$16 sps:$4 sm:$0xff]  }
 0x3e8   : > { %10163 = vmatpush1.bf16.msra.mxu1 %v13415_v32  ;;  %10123 = vmatprep.subr.bf16.mxu0 %v13420_v37  ;;  %v13473_v32 = vld [vmem:[%s16125_s24 + $0x16c0] ss:$16 sps:$4 sm:$0xff]  }
 0x3e9   : > { %10164 = vmatprep.subr.bf16.mxu1 %v13423_v38 }
 0x3eb   : > { %10124 = vmatpush1.bf16.msra.mxu0 %v13418_v39 }
 0x3ec   : > { %10165 = vmatpush1.bf16.msra.mxu1 %v13421_v40  ;;  %10125 = vmatprep.subr.bf16.mxu0 %v13426_v41 }
 0x3ed   : > { %10166 = vmatprep.subr.bf16.mxu1 %v13429_v42 }
 0x3ef   : > { %10126 = vmatpush1.bf16.msra.mxu0 %v13424_v43 }
 0x3f0   : > { %10167 = vmatpush1.bf16.msra.mxu1 %v13427_v44  ;;  %10177 = vmatprep.subr.bf16.mxu0 %v13436_v46 }
 0x3f1   : > { %10218 = vmatprep.subr.bf16.mxu1 %v13439_v53  ;;  %v13481_v53 = vld [vmem:[%s16125_s24 + $0x16e4] ss:$16 sps:$4 sm:$0xff]  }
 0x3f2   : > { %10128 = vmatmul.mubr.bf16.vlgmr.msra.gmra.mrb[16].mxu0 %v16576_v57 }
 0x3f3   : > { %10169 = vmatmul.mubr.bf16.vlgmr.msra.gmra.mrb[16].mxu1 %v16580_v59  ;;  %10178 = vmatpush1.bf16.msra.mxu0 %v13434_v55 }
 0x3f4   : > { %10219 = vmatpush1.bf16.msra.mxu1 %v13437_v56  ;;  %10179 = vmatprep.subr.bf16.mxu0 %v13442_v63  ;;  %v13479_v56 = vld [vmem:[%s16125_s24 + $0x16e0] ss:$16 sps:$4 sm:$0xff]   ;;  %v13484_v63 = vld [vmem:[%s16125_s24 + $0x1504] ss:$16 sps:$4 sm:$0xff]  }
 0x3f5   : > { %10220 = vmatprep.subr.bf16.mxu1 %v13445_v0  ;;  %10209 = vmatprep.mubr.bf16.mxu0 %v16592_v5  ;;  %v13487_v0 = vld [vmem:[%s16125_s24 + $0x1704] ss:$16 sps:$4 sm:$0xff]  }
 0x3f6   : > { %10250 = vmatprep.mubr.bf16.mxu1 %v16596_v8 }
 0x3f7   : > { %10180 = vmatpush1.bf16.msra.mxu0 %v13440_v1  ;;  %v13482_v1 = vld [vmem:[%s16125_s24 + $0x1500] ss:$16 sps:$4 sm:$0xff]  }
 0x3f8   : > { %10221 = vmatpush1.bf16.msra.mxu1 %v13443_v2  ;;  %10181 = vmatprep.subr.bf16.mxu0 %v13448_v3  ;;  %v13485_v2 = vld [vmem:[%s16125_s24 + $0x1700] ss:$16 sps:$4 sm:$0xff]   ;;  %v13490_v3 = vld [vmem:[%s16125_s24 + $0x1524] ss:$16 sps:$4 sm:$0xff]  }
 0x3f9   : > { %10222 = vmatprep.subr.bf16.mxu1 %v13451_v4  ;;  %v13493_v4 = vld [vmem:[%s16125_s24 + $0x1724] ss:$16 sps:$4 sm:$0xff]  }
 0x3fb   : > { %10182 = vmatpush1.bf16.msra.mxu0 %v13446_v9  ;;  %v13488_v9 = vld [vmem:[%s16125_s24 + $0x1520] ss:$16 sps:$4 sm:$0xff]  }
 0x3fc   : > { %10223 = vmatpush1.bf16.msra.mxu1 %v13449_v10  ;;  %10183 = vmatprep.subr.bf16.mxu0 %v13454_v11  ;;  %v13491_v10 = vld [vmem:[%s16125_s24 + $0x1720] ss:$16 sps:$4 sm:$0xff]   ;;  %v13496_v11 = vld [vmem:[%s16125_s24 + $0x1544] ss:$16 sps:$4 sm:$0xff]  }
 0x3fd   : > { %10224 = vmatprep.subr.bf16.mxu1 %v13457_v12  ;;  %v13499_v12 = vld [vmem:[%s16125_s24 + $0x1744] ss:$16 sps:$4 sm:$0xff]  }
 0x3ff   : > { %10184 = vmatpush1.bf16.msra.mxu0 %v13452_v13  ;;  %v13494_v13 = vld [vmem:[%s16125_s24 + $0x1540] ss:$16 sps:$4 sm:$0xff]  }
 0x400   : > { %10225 = vmatpush1.bf16.msra.mxu1 %v13455_v14  ;;  %10185 = vmatprep.subr.bf16.mxu0 %v13460_v15  ;;  %v13497_v14 = vld [vmem:[%s16125_s24 + $0x1740] ss:$16 sps:$4 sm:$0xff]   ;;  %v13502_v15 = vld [vmem:[%s16125_s24 + $0x1564] ss:$16 sps:$4 sm:$0xff]  }
 0x401   : > { %10226 = vmatprep.subr.bf16.mxu1 %v13463_v16  ;;  %v13505_v16 = vld [vmem:[%s16125_s24 + $0x1764] ss:$16 sps:$4 sm:$0xff]  }
 0x403   : > { %10186 = vmatpush1.bf16.msra.mxu0 %v13458_v19  ;;  %v13500_v19 = vld [vmem:[%s16125_s24 + $0x1560] ss:$16 sps:$4 sm:$0xff]  }
 0x404   : > { %10227 = vmatpush1.bf16.msra.mxu1 %v13461_v20  ;;  %10187 = vmatprep.subr.bf16.mxu0 %v13466_v21  ;;  %v13503_v20 = vld [vmem:[%s16125_s24 + $0x1760] ss:$16 sps:$4 sm:$0xff]   ;;  %v13508_v21 = vld [vmem:[%s16125_s24 + $0x1584] ss:$16 sps:$4 sm:$0xff]  }
 0x405   : > { %10228 = vmatprep.subr.bf16.mxu1 %v13469_v22  ;;  %v9883_v29 = vpop.f32.mrb[4].mxu0  ;;  %v13511_v22 = vld [vmem:[%s16125_s24 + $0x1784] ss:$16 sps:$4 sm:$0xff]  }
 0x406   : > { %v9924_v30 = vpop.f32.mrb[4].mxu1  ;;  %v9884_v37 = vadd.f32 %v9883_v29, %v16530_v45  ;;  %v9885_v38 = vpop.f32.mrb[5].mxu0  ;;  %v13478_v45 = vld [vmem:[%s16125_s24 + $0x14e4] ss:$16 sps:$4 sm:$0xff]   ;;  %v13512_v29 = vld [vmem:[%s16125_s24 + $0x15a0] ss:$16 sps:$4 sm:$0xff]  }
 0x407   : > { %v9926_v39 = vpop.f32.mrb[5].mxu1  ;;  %v9886_v40 = vadd.f32 %v9885_v38, %v16532_v54  ;;  %v9887_v41 = vpop.f32.mrb[6].mxu0  ;;  %10188 = vmatpush1.bf16.msra.mxu0 %v13464_v23  ;;  %v13476_v54 = vld [vmem:[%s16125_s24 + $0x14e0] ss:$16 sps:$4 sm:$0xff]  }
 0x408   : > { %v9928_v42 = vpop.f32.mrb[6].mxu1  ;;  %10229 = vmatpush1.bf16.msra.mxu1 %v13467_v24  ;;  %v16626_v43 = vadd.f32 %v9924_v30, %v9884_v37  ;;  %v9888_v44 = vpop.f32.mrb[7].mxu0  ;;  %10189 = vmatprep.subr.bf16.mxu0 %v13472_v25  ;;  %v13506_v23 = vld [vmem:[%s16125_s24 + $0x1580] ss:$16 sps:$4 sm:$0xff]   ;;  %v13514_v25 = vld [vmem:[%s16125_s24 + $0x15a4] ss:$16 sps:$4 sm:$0xff]  }
 0x409   : > { %v9929_v46 = vpop.f32.mrb[7].mxu1  ;;  %10230 = vmatprep.subr.bf16.mxu1 %v13475_v26  ;;  %v16630_v55 = vadd.f32 %v9926_v39, %v9886_v40  ;;  %v13509_v24 = vld [vmem:[%s16125_s24 + $0x1780] ss:$16 sps:$4 sm:$0xff]   ;;  %v13517_v26 = vld [vmem:[%s16125_s24 + $0x17a4] ss:$16 sps:$4 sm:$0xff]  }
 0x40a   : > { %v13515_v30 = vld [vmem:[%s16125_s24 + $0x17a0] ss:$16 sps:$4 sm:$0xff]   ;;  %v13526_v39 = vld [vmem:[%s16125_s24 + $0x15e4] ss:$16 sps:$4 sm:$0xff]  }
 0x40b   : > { %10190 = vmatpush1.bf16.msra.mxu0 %v13470_v31  ;;  %v13520_v31 = vld [vmem:[%s16125_s24 + $0x15c4] ss:$16 sps:$4 sm:$0xff]   ;;  %v13518_v37 = vld [vmem:[%s16125_s24 + $0x15c0] ss:$16 sps:$4 sm:$0xff]  }
 0x40c   : > { %10231 = vmatpush1.bf16.msra.mxu1 %v13473_v32  ;;  %10191 = vmatprep.subr.bf16.mxu0 %v13478_v45  ;;  %v13523_v32 = vld [vmem:[%s16125_s24 + $0x17c4] ss:$16 sps:$4 sm:$0xff]   ;;  %v13521_v38 = vld [vmem:[%s16125_s24 + $0x17c0] ss:$16 sps:$4 sm:$0xff]  }
 0x40d   : > { %10232 = vmatprep.subr.bf16.mxu1 %v13481_v53  ;;  %v13529_v40 = vld [vmem:[%s16125_s24 + $0x17e4] ss:$16 sps:$4 sm:$0xff]   ;;  %v13524_v41 = vld [vmem:[%s16125_s24 + $0x15e0] ss:$16 sps:$4 sm:$0xff]  }
 0x40e   : > { %v13527_v42 = vld [vmem:[%s16125_s24 + $0x17e0] ss:$16 sps:$4 sm:$0xff]   ;;  %v13536_v44 = vld [vmem:[%s16125_s24 + $0x1804] ss:$16 sps:$4 sm:$0xff]  }
 0x40f   : > { %10192 = vmatpush1.bf16.msra.mxu0 %v13476_v54  ;;  %v13539_v46 = vld [vmem:[%s16125_s24 + $0x1a04] ss:$16 sps:$4 sm:$0xff]   ;;  %v13534_v45 = vld [vmem:[%s16125_s24 + $0x1800] ss:$16 sps:$4 sm:$0xff]   ;;  %v16672_v54 = vcombine.low %v16583_v60, %v16583_v60 }
 0x410   : > { %10233 = vmatpush1.bf16.msra.mxu1 %v13479_v56  ;;  %10193 = vmatprep.subr.bf16.mxu0 %v13484_v63  ;;  %v13537_v53 = vld [vmem:[%s16125_s24 + $0x1a00] ss:$16 sps:$4 sm:$0xff]   ;;  %v16676_v56 = vcombine.low %v16586_v61, %v16586_v61 }
 0x411   : > { %10234 = vmatprep.subr.bf16.mxu1 %v13487_v0  ;;  %v16679_v63 = vld [vmem:[%s16113_s22 + $0x60] sm:$0xff]  ;;  %v16682_v0 = vld [vmem:[%s16113_s22 + $0x68] sm:$0xff] }
 0x412   : > { %v16688_v60 = vcombine.high %v16679_v63, %v16679_v63  ;;  %v16692_v61 = vcombine.high %v16682_v0, %v16682_v0 }
 0x413   : > { %10194 = vmatpush1.bf16.msra.mxu0 %v13482_v1  ;;  %v13542_v1 = vld [vmem:[%s16125_s24 + $0x1824] ss:$16 sps:$4 sm:$0xff]  }
 0x414   : > { %10235 = vmatpush1.bf16.msra.mxu1 %v13485_v2  ;;  %10195 = vmatprep.subr.bf16.mxu0 %v13490_v3  ;;  %v13545_v2 = vld [vmem:[%s16125_s24 + $0x1a24] ss:$16 sps:$4 sm:$0xff]   ;;  %v13540_v3 = vld [vmem:[%s16125_s24 + $0x1820] ss:$16 sps:$4 sm:$0xff]  }
 0x415   : > { %10236 = vmatprep.subr.bf16.mxu1 %v13493_v4  ;;  %v13543_v4 = vld [vmem:[%s16125_s24 + $0x1a20] ss:$16 sps:$4 sm:$0xff]  }
 0x417   : > { %10196 = vmatpush1.bf16.msra.mxu0 %v13488_v9  ;;  %v13548_v9 = vld [vmem:[%s16125_s24 + $0x1844] ss:$16 sps:$4 sm:$0xff]  }
 0x418   : > { %10237 = vmatpush1.bf16.msra.mxu1 %v13491_v10  ;;  %10197 = vmatprep.subr.bf16.mxu0 %v13496_v11  ;;  %v13551_v10 = vld [vmem:[%s16125_s24 + $0x1a44] ss:$16 sps:$4 sm:$0xff]   ;;  %v13546_v11 = vld [vmem:[%s16125_s24 + $0x1840] ss:$16 sps:$4 sm:$0xff]  }
 0x419   : > { %10238 = vmatprep.subr.bf16.mxu1 %v13499_v12  ;;  %v13549_v12 = vld [vmem:[%s16125_s24 + $0x1a40] ss:$16 sps:$4 sm:$0xff]  }
 0x41b   : > { %10198 = vmatpush1.bf16.msra.mxu0 %v13494_v13  ;;  %v13554_v13 = vld [vmem:[%s16125_s24 + $0x1864] ss:$16 sps:$4 sm:$0xff]  }
 0x41c   : > { %10239 = vmatpush1.bf16.msra.mxu1 %v13497_v14  ;;  %10199 = vmatprep.subr.bf16.mxu0 %v13502_v15  ;;  %v13557_v14 = vld [vmem:[%s16125_s24 + $0x1a64] ss:$16 sps:$4 sm:$0xff]   ;;  %v13552_v15 = vld [vmem:[%s16125_s24 + $0x1860] ss:$16 sps:$4 sm:$0xff]  }
 0x41d   : > { %10240 = vmatprep.subr.bf16.mxu1 %v13505_v16  ;;  %v13555_v16 = vld [vmem:[%s16125_s24 + $0x1a60] ss:$16 sps:$4 sm:$0xff]  }
 0x41f   : > { %10200 = vmatpush1.bf16.msra.mxu0 %v13500_v19  ;;  %v13560_v19 = vld [vmem:[%s16125_s24 + $0x1884] ss:$16 sps:$4 sm:$0xff]  }
 0x420   : > { %10241 = vmatpush1.bf16.msra.mxu1 %v13503_v20  ;;  %10201 = vmatprep.subr.bf16.mxu0 %v13508_v21  ;;  %v13563_v20 = vld [vmem:[%s16125_s24 + $0x1a84] ss:$16 sps:$4 sm:$0xff]   ;;  %v13558_v21 = vld [vmem:[%s16125_s24 + $0x1880] ss:$16 sps:$4 sm:$0xff]  }
 0x421   : > { %10242 = vmatprep.subr.bf16.mxu1 %v13511_v22  ;;  %v13561_v22 = vld [vmem:[%s16125_s24 + $0x1a80] ss:$16 sps:$4 sm:$0xff]  }
 0x423   : > { %10202 = vmatpush1.bf16.msra.mxu0 %v13506_v23  ;;  %v13566_v23 = vld [vmem:[%s16125_s24 + $0x18a4] ss:$16 sps:$4 sm:$0xff]  }
 0x424   : > { %10243 = vmatpush1.bf16.msra.mxu1 %v13509_v24  ;;  %10203 = vmatprep.subr.bf16.mxu0 %v13514_v25  ;;  %v13569_v24 = vld [vmem:[%s16125_s24 + $0x1aa4] ss:$16 sps:$4 sm:$0xff]   ;;  %v13564_v25 = vld [vmem:[%s16125_s24 + $0x18a0] ss:$16 sps:$4 sm:$0xff]  }
 0x425   : > { %10244 = vmatprep.subr.bf16.mxu1 %v13517_v26  ;;  %v13567_v26 = vld [vmem:[%s16125_s24 + $0x1aa0] ss:$16 sps:$4 sm:$0xff]  }
 0x427   : > { %10204 = vmatpush1.bf16.msra.mxu0 %v13512_v29  ;;  %v13572_v29 = vld [vmem:[%s16125_s24 + $0x18c4] ss:$16 sps:$4 sm:$0xff]  }
 0x428   : > { %10245 = vmatpush1.bf16.msra.mxu1 %v13515_v30  ;;  %10205 = vmatprep.subr.bf16.mxu0 %v13520_v31  ;;  %v13575_v30 = vld [vmem:[%s16125_s24 + $0x1ac4] ss:$16 sps:$4 sm:$0xff]  }
 0x429   : > { %10246 = vmatprep.subr.bf16.mxu1 %v13523_v32 }
 0x42b   : > { %10206 = vmatpush1.bf16.msra.mxu0 %v13518_v37  ;;  %v13570_v37 = vld [vmem:[%s16125_s24 + $0x18c0] ss:$16 sps:$4 sm:$0xff]  }
 0x42c   : > { %10247 = vmatpush1.bf16.msra.mxu1 %v13521_v38  ;;  %10207 = vmatprep.subr.bf16.mxu0 %v13526_v39  ;;  %v13573_v38 = vld [vmem:[%s16125_s24 + $0x1ac0] ss:$16 sps:$4 sm:$0xff]  }
 0x42d   : > { %10248 = vmatprep.subr.bf16.mxu1 %v13529_v40 }
 0x42f   : > { %10208 = vmatpush1.bf16.msra.mxu0 %v13524_v41 }
 0x430   : > { %10249 = vmatpush1.bf16.msra.mxu1 %v13527_v42  ;;  %10259 = vmatprep.subr.bf16.mxu0 %v13536_v44 }
 0x431   : > { %10300 = vmatprep.subr.bf16.mxu1 %v13539_v46 }
 0x432   : > { %10210 = vmatmul.mubr.bf16.vlgmr.msra.gmra.mrb[20].mxu0 %v16672_v54 }
 0x433   : > { %10251 = vmatmul.mubr.bf16.vlgmr.msra.gmra.mrb[20].mxu1 %v16676_v56  ;;  %10260 = vmatpush1.bf16.msra.mxu0 %v13534_v45 }
 0x434   : > { %10301 = vmatpush1.bf16.msra.mxu1 %v13537_v53  ;;  %10261 = vmatprep.subr.bf16.mxu0 %v13542_v1 }
 0x435   : > { %10302 = vmatprep.subr.bf16.mxu1 %v13545_v2  ;;  %10291 = vmatprep.mubr.bf16.mxu0 %v16688_v60  ;;  %v13581_v2 = vld [vmem:[%s16125_s24 + $0x1ae4] ss:$16 sps:$4 sm:$0xff]  }
 0x436   : > { %10332 = vmatprep.mubr.bf16.mxu1 %v16692_v61 }
 0x437   : > { %10262 = vmatpush1.bf16.msra.mxu0 %v13540_v3 }
 0x438   : > { %10303 = vmatpush1.bf16.msra.mxu1 %v13543_v4  ;;  %10263 = vmatprep.subr.bf16.mxu0 %v13548_v9  ;;  %v13579_v4 = vld [vmem:[%s16125_s24 + $0x1ae0] ss:$16 sps:$4 sm:$0xff]   ;;  %v13584_v9 = vld [vmem:[%s16125_s24 + $0x1904] ss:$16 sps:$4 sm:$0xff]  }
 0x439   : > { %10304 = vmatprep.subr.bf16.mxu1 %v13551_v10  ;;  %v13587_v10 = vld [vmem:[%s16125_s24 + $0x1b04] ss:$16 sps:$4 sm:$0xff]  }
 0x43b   : > { %10264 = vmatpush1.bf16.msra.mxu0 %v13546_v11  ;;  %v13582_v11 = vld [vmem:[%s16125_s24 + $0x1900] ss:$16 sps:$4 sm:$0xff]  }
 0x43c   : > { %10305 = vmatpush1.bf16.msra.mxu1 %v13549_v12  ;;  %10265 = vmatprep.subr.bf16.mxu0 %v13554_v13  ;;  %v13585_v12 = vld [vmem:[%s16125_s24 + $0x1b00] ss:$16 sps:$4 sm:$0xff]   ;;  %v13590_v13 = vld [vmem:[%s16125_s24 + $0x1924] ss:$16 sps:$4 sm:$0xff]  }
 0x43d   : > { %10306 = vmatprep.subr.bf16.mxu1 %v13557_v14  ;;  %v13593_v14 = vld [vmem:[%s16125_s24 + $0x1b24] ss:$16 sps:$4 sm:$0xff]  }
 0x43f   : > { %10266 = vmatpush1.bf16.msra.mxu0 %v13552_v15  ;;  %v13588_v15 = vld [vmem:[%s16125_s24 + $0x1920] ss:$16 sps:$4 sm:$0xff]  }
 0x440   : > { %10307 = vmatpush1.bf16.msra.mxu1 %v13555_v16  ;;  %10267 = vmatprep.subr.bf16.mxu0 %v13560_v19  ;;  %v13591_v16 = vld [vmem:[%s16125_s24 + $0x1b20] ss:$16 sps:$4 sm:$0xff]   ;;  %v13596_v19 = vld [vmem:[%s16125_s24 + $0x1944] ss:$16 sps:$4 sm:$0xff]  }
 0x441   : > { %10308 = vmatprep.subr.bf16.mxu1 %v13563_v20  ;;  %v13599_v20 = vld [vmem:[%s16125_s24 + $0x1b44] ss:$16 sps:$4 sm:$0xff]  }
 0x443   : > { %10268 = vmatpush1.bf16.msra.mxu0 %v13558_v21  ;;  %v13594_v21 = vld [vmem:[%s16125_s24 + $0x1940] ss:$16 sps:$4 sm:$0xff]  }
 0x444   : > { %10309 = vmatpush1.bf16.msra.mxu1 %v13561_v22  ;;  %10269 = vmatprep.subr.bf16.mxu0 %v13566_v23  ;;  %v13597_v22 = vld [vmem:[%s16125_s24 + $0x1b40] ss:$16 sps:$4 sm:$0xff]   ;;  %v13602_v23 = vld [vmem:[%s16125_s24 + $0x1964] ss:$16 sps:$4 sm:$0xff]  }
 0x445   : > { %10310 = vmatprep.subr.bf16.mxu1 %v13569_v24  ;;  %v9965_v31 = vpop.f32.mrb[8].mxu0  ;;  %v13605_v24 = vld [vmem:[%s16125_s24 + $0x1b64] ss:$16 sps:$4 sm:$0xff]  }
 0x446   : > { %v10006_v32 = vpop.f32.mrb[8].mxu1  ;;  %v9966_v39 = vadd.f32 %v9965_v31, %v16626_v43  ;;  %v9967_v40 = vpop.f32.mrb[9].mxu0  ;;  %v13578_v43 = vld [vmem:[%s16125_s24 + $0x18e4] ss:$16 sps:$4 sm:$0xff]   ;;  %v13606_v31 = vld [vmem:[%s16125_s24 + $0x1980] ss:$16 sps:$4 sm:$0xff]  }
 0x447   : > { %v10008_v41 = vpop.f32.mrb[9].mxu1  ;;  %v9968_v42 = vadd.f32 %v9967_v40, %v16630_v55  ;;  %v9969_v44 = vpop.f32.mrb[10].mxu0  ;;  %10270 = vmatpush1.bf16.msra.mxu0 %v13564_v25  ;;  %v13576_v55 = vld [vmem:[%s16125_s24 + $0x18e0] ss:$16 sps:$4 sm:$0xff]  }
 0x448   : > { %v10010_v46 = vpop.f32.mrb[10].mxu1  ;;  %10311 = vmatpush1.bf16.msra.mxu1 %v13567_v26  ;;  %v16722_v45 = vadd.f32 %v10006_v32, %v9966_v39  ;;  %v9970_v53 = vpop.f32.mrb[11].mxu0  ;;  %10271 = vmatprep.subr.bf16.mxu0 %v13572_v29  ;;  %v13600_v25 = vld [vmem:[%s16125_s24 + $0x1960] ss:$16 sps:$4 sm:$0xff]   ;;  %v13608_v29 = vld [vmem:[%s16125_s24 + $0x1984] ss:$16 sps:$4 sm:$0xff]  }
 0x449   : > { %v10011_v1 = vpop.f32.mrb[11].mxu1  ;;  %10312 = vmatprep.subr.bf16.mxu1 %v13575_v30  ;;  %v16726_v3 = vadd.f32 %v10008_v41, %v9968_v42  ;;  %v13603_v26 = vld [vmem:[%s16125_s24 + $0x1b60] ss:$16 sps:$4 sm:$0xff]   ;;  %v13611_v30 = vld [vmem:[%s16125_s24 + $0x1b84] ss:$16 sps:$4 sm:$0xff]  }
 0x44a   : > { %v13609_v32 = vld [vmem:[%s16125_s24 + $0x1b80] ss:$16 sps:$4 sm:$0xff]   ;;  %v13620_v41 = vld [vmem:[%s16125_s24 + $0x19c4] ss:$16 sps:$4 sm:$0xff]  }
 0x44b   : > { %10272 = vmatpush1.bf16.msra.mxu0 %v13570_v37  ;;  %v13614_v37 = vld [vmem:[%s16125_s24 + $0x19a4] ss:$16 sps:$4 sm:$0xff]   ;;  %v13612_v39 = vld [vmem:[%s16125_s24 + $0x19a0] ss:$16 sps:$4 sm:$0xff]  }
 0x44c   : > { %10313 = vmatpush1.bf16.msra.mxu1 %v13573_v38  ;;  %10273 = vmatprep.subr.bf16.mxu0 %v13578_v43  ;;  %v13617_v38 = vld [vmem:[%s16125_s24 + $0x1ba4] ss:$16 sps:$4 sm:$0xff]   ;;  %v13615_v40 = vld [vmem:[%s16125_s24 + $0x1ba0] ss:$16 sps:$4 sm:$0xff]  }
 0x44d   : > { %10314 = vmatprep.subr.bf16.mxu1 %v13581_v2  ;;  %v13623_v42 = vld [vmem:[%s16125_s24 + $0x1bc4] ss:$16 sps:$4 sm:$0xff]   ;;  %v13618_v44 = vld [vmem:[%s16125_s24 + $0x19c0] ss:$16 sps:$4 sm:$0xff]  }
 0x44e   : > { %v13621_v46 = vld [vmem:[%s16125_s24 + $0x1bc0] ss:$16 sps:$4 sm:$0xff]   ;;  %v13626_v53 = vld [vmem:[%s16125_s24 + $0x19e4] ss:$16 sps:$4 sm:$0xff]  }
 0x44f   : > { %10274 = vmatpush1.bf16.msra.mxu0 %v13576_v55  ;;  %v13629_v1 = vld [vmem:[%s16125_s24 + $0x1be4] ss:$16 sps:$4 sm:$0xff]   ;;  %v13624_v43 = vld [vmem:[%s16125_s24 + $0x19e0] ss:$16 sps:$4 sm:$0xff]  }
 0x450   : > { %10315 = vmatpush1.bf16.msra.mxu1 %v13579_v4  ;;  %10275 = vmatprep.subr.bf16.mxu0 %v13584_v9  ;;  %v13627_v2 = vld [vmem:[%s16125_s24 + $0x1be0] ss:$16 sps:$4 sm:$0xff]   ;;  %v13636_v55 = vld [vmem:[%s16125_s24 + $0x1c04] ss:$16 sps:$4 sm:$0xff]  }
 0x451   : > { %10316 = vmatprep.subr.bf16.mxu1 %v13587_v10  ;;  %v13639_v4 = vld [vmem:[%s16125_s24 + $0x1e04] ss:$16 sps:$4 sm:$0xff]   ;;  %v16768_v10 = vld [vmem:[%s16113_s22 + $0x78] sm:$0xff] }
 0x452   : > { %v16765_v9 = vld [vmem:[%s16113_s22 + $0x70] sm:$0xff] }
 0x453   : > { %10276 = vmatpush1.bf16.msra.mxu0 %v13582_v11  ;;  %v13634_v11 = vld [vmem:[%s16125_s24 + $0x1c00] ss:$16 sps:$4 sm:$0xff]  }
 0x454   : > { %10317 = vmatpush1.bf16.msra.mxu1 %v13585_v12  ;;  %10277 = vmatprep.subr.bf16.mxu0 %v13590_v13  ;;  %v13637_v12 = vld [vmem:[%s16125_s24 + $0x1e00] ss:$16 sps:$4 sm:$0xff]   ;;  %v16774_v13 = vcombine.low %v16679_v63, %v16679_v63  ;;  %v16788_v63 = vcombine.high %v16768_v10, %v16768_v10 }
 0x455   : > { %10318 = vmatprep.subr.bf16.mxu1 %v13593_v14  ;;  %v16778_v14 = vcombine.low %v16682_v0, %v16682_v0  ;;  %v13640_v0 = vld [vmem:[%s16125_s24 + $0x1c20] ss:$16 sps:$4 sm:$0xff]  }
 0x457   : > { %10278 = vmatpush1.bf16.msra.mxu0 %v13588_v15  ;;  %v13642_v15 = vld [vmem:[%s16125_s24 + $0x1c24] ss:$16 sps:$4 sm:$0xff]  }
 0x458   : > { %10319 = vmatpush1.bf16.msra.mxu1 %v13591_v16  ;;  %10279 = vmatprep.subr.bf16.mxu0 %v13596_v19  ;;  %v13645_v16 = vld [vmem:[%s16125_s24 + $0x1e24] ss:$16 sps:$4 sm:$0xff]   ;;  %v16784_v19 = vcombine.high %v16765_v9, %v16765_v9 }
 0x459   : > { %10320 = vmatprep.subr.bf16.mxu1 %v13599_v20  ;;  %v13643_v20 = vld [vmem:[%s16125_s24 + $0x1e20] ss:$16 sps:$4 sm:$0xff]  }
 0x45b   : > { %10280 = vmatpush1.bf16.msra.mxu0 %v13594_v21  ;;  %v13648_v21 = vld [vmem:[%s16125_s24 + $0x1c44] ss:$16 sps:$4 sm:$0xff]  }
 0x45c   : > { %10321 = vmatpush1.bf16.msra.mxu1 %v13597_v22  ;;  %10281 = vmatprep.subr.bf16.mxu0 %v13602_v23  ;;  %v13651_v22 = vld [vmem:[%s16125_s24 + $0x1e44] ss:$16 sps:$4 sm:$0xff]   ;;  %v13646_v23 = vld [vmem:[%s16125_s24 + $0x1c40] ss:$16 sps:$4 sm:$0xff]  }
 0x45d   : > { %10322 = vmatprep.subr.bf16.mxu1 %v13605_v24  ;;  %v13649_v24 = vld [vmem:[%s16125_s24 + $0x1e40] ss:$16 sps:$4 sm:$0xff]  }
 0x45f   : > { %10282 = vmatpush1.bf16.msra.mxu0 %v13600_v25  ;;  %v13654_v25 = vld [vmem:[%s16125_s24 + $0x1c64] ss:$16 sps:$4 sm:$0xff]  }
 0x460   : > { %10323 = vmatpush1.bf16.msra.mxu1 %v13603_v26  ;;  %10283 = vmatprep.subr.bf16.mxu0 %v13608_v29  ;;  %v13657_v26 = vld [vmem:[%s16125_s24 + $0x1e64] ss:$16 sps:$4 sm:$0xff]   ;;  %v13652_v29 = vld [vmem:[%s16125_s24 + $0x1c60] ss:$16 sps:$4 sm:$0xff]  }
 0x461   : > { %10324 = vmatprep.subr.bf16.mxu1 %v13611_v30  ;;  %v13655_v30 = vld [vmem:[%s16125_s24 + $0x1e60] ss:$16 sps:$4 sm:$0xff]  }
 0x463   : > { %10284 = vmatpush1.bf16.msra.mxu0 %v13606_v31  ;;  %v13660_v31 = vld [vmem:[%s16125_s24 + $0x1c84] ss:$16 sps:$4 sm:$0xff]  }
 0x464   : > { %10325 = vmatpush1.bf16.msra.mxu1 %v13609_v32  ;;  %10285 = vmatprep.subr.bf16.mxu0 %v13614_v37  ;;  %v13663_v32 = vld [vmem:[%s16125_s24 + $0x1e84] ss:$16 sps:$4 sm:$0xff]   ;;  %v13658_v37 = vld [vmem:[%s16125_s24 + $0x1c80] ss:$16 sps:$4 sm:$0xff]  }
 0x465   : > { %10326 = vmatprep.subr.bf16.mxu1 %v13617_v38  ;;  %v13661_v38 = vld [vmem:[%s16125_s24 + $0x1e80] ss:$16 sps:$4 sm:$0xff]  }
 0x467   : > { %10286 = vmatpush1.bf16.msra.mxu0 %v13612_v39  ;;  %v13666_v39 = vld [vmem:[%s16125_s24 + $0x1ca4] ss:$16 sps:$4 sm:$0xff]  }
 0x468   : > { %10327 = vmatpush1.bf16.msra.mxu1 %v13615_v40  ;;  %10287 = vmatprep.subr.bf16.mxu0 %v13620_v41  ;;  %v13669_v40 = vld [vmem:[%s16125_s24 + $0x1ea4] ss:$16 sps:$4 sm:$0xff]   ;;  %v13664_v41 = vld [vmem:[%s16125_s24 + $0x1ca0] ss:$16 sps:$4 sm:$0xff]  }
 0x469   : > { %10328 = vmatprep.subr.bf16.mxu1 %v13623_v42  ;;  %v13667_v42 = vld [vmem:[%s16125_s24 + $0x1ea0] ss:$16 sps:$4 sm:$0xff]  }
 0x46b   : > { %10288 = vmatpush1.bf16.msra.mxu0 %v13618_v44  ;;  %v13672_v44 = vld [vmem:[%s16125_s24 + $0x1cc4] ss:$16 sps:$4 sm:$0xff]  }
 0x46c   : > { %10329 = vmatpush1.bf16.msra.mxu1 %v13621_v46  ;;  %10289 = vmatprep.subr.bf16.mxu0 %v13626_v53  ;;  %v13675_v46 = vld [vmem:[%s16125_s24 + $0x1ec4] ss:$16 sps:$4 sm:$0xff]  }
 0x46d   : > { %10330 = vmatprep.subr.bf16.mxu1 %v13629_v1 }
 0x46f   : > { %10290 = vmatpush1.bf16.msra.mxu0 %v13624_v43  ;;  %v13670_v43 = vld [vmem:[%s16125_s24 + $0x1cc0] ss:$16 sps:$4 sm:$0xff]  }
 0x470   : > { %10331 = vmatpush1.bf16.msra.mxu1 %v13627_v2  ;;  %10341 = vmatprep.subr.bf16.mxu0 %v13636_v55  ;;  %v13673_v2 = vld [vmem:[%s16125_s24 + $0x1ec0] ss:$16 sps:$4 sm:$0xff]  }
 0x471   : > { %10382 = vmatprep.subr.bf16.mxu1 %v13639_v4 }
 0x472   : > { %10292 = vmatmul.mubr.bf16.vlgmr.msra.gmra.mrb[24].mxu0 %v16774_v13 }
 0x473   : > { %10333 = vmatmul.mubr.bf16.vlgmr.msra.gmra.mrb[24].mxu1 %v16778_v14  ;;  %10342 = vmatpush1.bf16.msra.mxu0 %v13634_v11 }
 0x474   : > { %10383 = vmatpush1.bf16.msra.mxu1 %v13637_v12  ;;  %10343 = vmatprep.subr.bf16.mxu0 %v13642_v15 }
 0x475   : > { %10384 = vmatprep.subr.bf16.mxu1 %v13645_v16  ;;  %10373 = vmatprep.mubr.bf16.mxu0 %v16784_v19 }
 0x476   : > { %10414 = vmatprep.mubr.bf16.mxu1 %v16788_v63 }
 0x477   : > { %10344 = vmatpush1.bf16.msra.mxu0 %v13640_v0 }
 0x478   : > { %10385 = vmatpush1.bf16.msra.mxu1 %v13643_v20  ;;  %10345 = vmatprep.subr.bf16.mxu0 %v13648_v21 }
 0x479   : > { %10386 = vmatprep.subr.bf16.mxu1 %v13651_v22  ;;  %v13681_v22 = vld [vmem:[%s16125_s24 + $0x1ee4] ss:$16 sps:$4 sm:$0xff]  }
 0x47b   : > { %10346 = vmatpush1.bf16.msra.mxu0 %v13646_v23 }
 0x47c   : > { %10387 = vmatpush1.bf16.msra.mxu1 %v13649_v24  ;;  %10347 = vmatprep.subr.bf16.mxu0 %v13654_v25  ;;  %v13679_v24 = vld [vmem:[%s16125_s24 + $0x1ee0] ss:$16 sps:$4 sm:$0xff]   ;;  %v13684_v25 = vld [vmem:[%s16125_s24 + $0x1d04] ss:$16 sps:$4 sm:$0xff]  }
 0x47d   : > { %10388 = vmatprep.subr.bf16.mxu1 %v13657_v26  ;;  %v13687_v26 = vld [vmem:[%s16125_s24 + $0x1f04] ss:$16 sps:$4 sm:$0xff]  }
 0x47f   : > { %10348 = vmatpush1.bf16.msra.mxu0 %v13652_v29  ;;  %v13682_v29 = vld [vmem:[%s16125_s24 + $0x1d00] ss:$16 sps:$4 sm:$0xff]  }
 0x480   : > { %10389 = vmatpush1.bf16.msra.mxu1 %v13655_v30  ;;  %10349 = vmatprep.subr.bf16.mxu0 %v13660_v31  ;;  %v13685_v30 = vld [vmem:[%s16125_s24 + $0x1f00] ss:$16 sps:$4 sm:$0xff]   ;;  %v13690_v31 = vld [vmem:[%s16125_s24 + $0x1d24] ss:$16 sps:$4 sm:$0xff]  }
 0x481   : > { %10390 = vmatprep.subr.bf16.mxu1 %v13663_v32  ;;  %v13693_v32 = vld [vmem:[%s16125_s24 + $0x1f24] ss:$16 sps:$4 sm:$0xff]  }
 0x483   : > { %10350 = vmatpush1.bf16.msra.mxu0 %v13658_v37  ;;  %v13688_v37 = vld [vmem:[%s16125_s24 + $0x1d20] ss:$16 sps:$4 sm:$0xff]  }
 0x484   : > { %10391 = vmatpush1.bf16.msra.mxu1 %v13661_v38  ;;  %10351 = vmatprep.subr.bf16.mxu0 %v13666_v39  ;;  %v13691_v38 = vld [vmem:[%s16125_s24 + $0x1f20] ss:$16 sps:$4 sm:$0xff]   ;;  %v13696_v39 = vld [vmem:[%s16125_s24 + $0x1d44] ss:$16 sps:$4 sm:$0xff]  }
 0x485   : > { %10392 = vmatprep.subr.bf16.mxu1 %v13669_v40  ;;  %v10047_v53 = vpop.f32.mrb[12].mxu0  ;;  %v13699_v40 = vld [vmem:[%s16125_s24 + $0x1f44] ss:$16 sps:$4 sm:$0xff]  }
 0x486   : > { %v10088_v1 = vpop.f32.mrb[12].mxu1  ;;  %v10048_v55 = vadd.f32 %v10047_v53, %v16722_v45  ;;  %v10049_v4 = vpop.f32.mrb[13].mxu0  ;;  %v13678_v45 = vld [vmem:[%s16125_s24 + $0x1ce4] ss:$16 sps:$4 sm:$0xff]   ;;  %v13700_v53 = vld [vmem:[%s16125_s24 + $0x1d60] ss:$16 sps:$4 sm:$0xff]  }
 0x487   : > { %v10090_v11 = vpop.f32.mrb[13].mxu1  ;;  %v10050_v12 = vadd.f32 %v10049_v4, %v16726_v3  ;;  %v10051_v15 = vpop.f32.mrb[14].mxu0  ;;  %10352 = vmatpush1.bf16.msra.mxu0 %v13664_v41  ;;  %v13676_v3 = vld [vmem:[%s16125_s24 + $0x1ce0] ss:$16 sps:$4 sm:$0xff]  }
 0x488   : > { %v10092_v16 = vpop.f32.mrb[14].mxu1  ;;  %10393 = vmatpush1.bf16.msra.mxu1 %v13667_v42  ;;  %v16818_v0 = vadd.f32 %v10088_v1, %v10048_v55  ;;  %v10052_v20 = vpop.f32.mrb[15].mxu0  ;;  %10353 = vmatprep.subr.bf16.mxu0 %v13672_v44  ;;  %v13694_v41 = vld [vmem:[%s16125_s24 + $0x1d40] ss:$16 sps:$4 sm:$0xff]   ;;  %v13702_v44 = vld [vmem:[%s16125_s24 + $0x1d64] ss:$16 sps:$4 sm:$0xff]  }
 0x489   : > { %v10093_v21 = vpop.f32.mrb[15].mxu1  ;;  %10394 = vmatprep.subr.bf16.mxu1 %v13675_v46  ;;  %v16822_v23 = vadd.f32 %v10090_v11, %v10050_v12  ;;  %v13697_v42 = vld [vmem:[%s16125_s24 + $0x1f40] ss:$16 sps:$4 sm:$0xff]   ;;  %v13705_v46 = vld [vmem:[%s16125_s24 + $0x1f64] ss:$16 sps:$4 sm:$0xff]  }
 0x48a   : > { %v13703_v1 = vld [vmem:[%s16125_s24 + $0x1f60] ss:$16 sps:$4 sm:$0xff]   ;;  %v13714_v11 = vld [vmem:[%s16125_s24 + $0x1da4] ss:$16 sps:$4 sm:$0xff]  }
 0x48b   : > { %10354 = vmatpush1.bf16.msra.mxu0 %v13670_v43  ;;  %v13708_v43 = vld [vmem:[%s16125_s24 + $0x1d84] ss:$16 sps:$4 sm:$0xff]   ;;  %v13706_v55 = vld [vmem:[%s16125_s24 + $0x1d80] ss:$16 sps:$4 sm:$0xff]  }
 0x48c   : > { %10395 = vmatpush1.bf16.msra.mxu1 %v13673_v2  ;;  %10355 = vmatprep.subr.bf16.mxu0 %v13678_v45  ;;  %v13711_v2 = vld [vmem:[%s16125_s24 + $0x1f84] ss:$16 sps:$4 sm:$0xff]   ;;  %v13709_v4 = vld [vmem:[%s16125_s24 + $0x1f80] ss:$16 sps:$4 sm:$0xff]  }
 0x48d   : > { %10396 = vmatprep.subr.bf16.mxu1 %v13681_v22  ;;  %v13717_v12 = vld [vmem:[%s16125_s24 + $0x1fa4] ss:$16 sps:$4 sm:$0xff]   ;;  %v13712_v15 = vld [vmem:[%s16125_s24 + $0x1da0] ss:$16 sps:$4 sm:$0xff]  }
 0x48e   : > { %v13715_v16 = vld [vmem:[%s16125_s24 + $0x1fa0] ss:$16 sps:$4 sm:$0xff]   ;;  %v13720_v20 = vld [vmem:[%s16125_s24 + $0x1dc4] ss:$16 sps:$4 sm:$0xff]  }
 0x48f   : > { %10356 = vmatpush1.bf16.msra.mxu0 %v13676_v3  ;;  %v13723_v21 = vld [vmem:[%s16125_s24 + $0x1fc4] ss:$16 sps:$4 sm:$0xff]   ;;  %v13718_v45 = vld [vmem:[%s16125_s24 + $0x1dc0] ss:$16 sps:$4 sm:$0xff]  }
 0x490   : > { %10397 = vmatpush1.bf16.msra.mxu1 %v13679_v24  ;;  %10357 = vmatprep.subr.bf16.mxu0 %v13684_v25  ;;  %v13721_v22 = vld [vmem:[%s16125_s24 + $0x1fc0] ss:$16 sps:$4 sm:$0xff]   ;;  %v13726_v3 = vld [vmem:[%s16125_s24 + $0x1de4] ss:$16 sps:$4 sm:$0xff]  }
 0x491   : > { %10398 = vmatprep.subr.bf16.mxu1 %v13687_v26  ;;  %v13729_v24 = vld [vmem:[%s16125_s24 + $0x1fe4] ss:$16 sps:$4 sm:$0xff]   ;;  %v13724_v25 = vld [vmem:[%s16125_s24 + $0x1de0] ss:$16 sps:$4 sm:$0xff]  }
 0x492   : > { %v13727_v26 = vld [vmem:[%s16125_s24 + $0x1fe0] ss:$16 sps:$4 sm:$0xff]  }
 0x493   : > { %10358 = vmatpush1.bf16.msra.mxu0 %v13682_v29  ;;  %v13736_v29 = vld [vmem:[%s16125_s24 + $0xc] ss:$16 sps:$4 sm:$0xff]  }
 0x494   : > { %10399 = vmatpush1.bf16.msra.mxu1 %v13685_v30  ;;  %10359 = vmatprep.subr.bf16.mxu0 %v13690_v31  ;;  %v13739_v30 = vld [vmem:[%s16125_s24 + $0x20c] ss:$16 sps:$4 sm:$0xff]   ;;  %v13734_v31 = vld [vmem:[%s16125_s24 + $0x8] ss:$16 sps:$4 sm:$0xff]  }
 0x495   : > { %10400 = vmatprep.subr.bf16.mxu1 %v13693_v32  ;;  %v13737_v32 = vld [vmem:[%s16125_s24 + $0x208] ss:$16 sps:$4 sm:$0xff]  }
 0x497   : > { %10360 = vmatpush1.bf16.msra.mxu0 %v13688_v37  ;;  %v16864_v37 = vcombine.low %v16765_v9, %v16765_v9  ;;  %v13740_v9 = vld [vmem:[%s16125_s24 + $0x28] ss:$16 sps:$4 sm:$0xff]  }
 0x498   : > { %10401 = vmatpush1.bf16.msra.mxu1 %v13691_v38  ;;  %10361 = vmatprep.subr.bf16.mxu0 %v13696_v39  ;;  %v16868_v38 = vcombine.low %v16768_v10, %v16768_v10  ;;  %v13742_v39 = vld [vmem:[%s16125_s24 + $0x2c] ss:$16 sps:$4 sm:$0xff]   ;;  %v13743_v10 = vld [vmem:[%s16125_s24 + $0x228] ss:$16 sps:$4 sm:$0xff]  }
 0x499   : > { %10402 = vmatprep.subr.bf16.mxu1 %v13699_v40  ;;  %v13745_v40 = vld [vmem:[%s16125_s24 + $0x22c] ss:$16 sps:$4 sm:$0xff]  }
 0x49b   : > { %10362 = vmatpush1.bf16.msra.mxu0 %v13694_v41  ;;  %v13748_v41 = vld [vmem:[%s16125_s24 + $0x4c] ss:$16 sps:$4 sm:$0xff]  }
 0x49c   : > { %10403 = vmatpush1.bf16.msra.mxu1 %v13697_v42  ;;  %10363 = vmatprep.subr.bf16.mxu0 %v13702_v44  ;;  %v13751_v42 = vld [vmem:[%s16125_s24 + $0x24c] ss:$16 sps:$4 sm:$0xff]   ;;  %v13746_v44 = vld [vmem:[%s16125_s24 + $0x48] ss:$16 sps:$4 sm:$0xff]  }
 0x49d   : > { %10404 = vmatprep.subr.bf16.mxu1 %v13705_v46  ;;  %v13749_v46 = vld [vmem:[%s16125_s24 + $0x248] ss:$16 sps:$4 sm:$0xff]  }
 0x49f   : > { %10364 = vmatpush1.bf16.msra.mxu0 %v13700_v53  ;;  %v13754_v53 = vld [vmem:[%s16125_s24 + $0x6c] ss:$16 sps:$4 sm:$0xff]  }
 0x4a0   : > { %10405 = vmatpush1.bf16.msra.mxu1 %v13703_v1  ;;  %10365 = vmatprep.subr.bf16.mxu0 %v13708_v43  ;;  %v13757_v1 = vld [vmem:[%s16125_s24 + $0x26c] ss:$16 sps:$4 sm:$0xff]   ;;  %v13755_v43 = vld [vmem:[%s16125_s24 + $0x268] ss:$16 sps:$4 sm:$0xff]  }
 0x4a1   : > { %10406 = vmatprep.subr.bf16.mxu1 %v13711_v2  ;;  %v13763_v2 = vld [vmem:[%s16125_s24 + $0x28c] ss:$16 sps:$4 sm:$0xff]  }
 0x4a3   : > { %10366 = vmatpush1.bf16.msra.mxu0 %v13706_v55  ;;  %v13758_v55 = vld [vmem:[%s16125_s24 + $0x88] ss:$16 sps:$4 sm:$0xff]  }
 0x4a4   : > { %10407 = vmatpush1.bf16.msra.mxu1 %v13709_v4  ;;  %10367 = vmatprep.subr.bf16.mxu0 %v13714_v11  ;;  %v13761_v4 = vld [vmem:[%s16125_s24 + $0x288] ss:$16 sps:$4 sm:$0xff]   ;;  %v13766_v11 = vld [vmem:[%s16125_s24 + $0xac] ss:$16 sps:$4 sm:$0xff]  }
 0x4a5   : > { %10408 = vmatprep.subr.bf16.mxu1 %v13717_v12  ;;  %v13769_v12 = vld [vmem:[%s16125_s24 + $0x2ac] ss:$16 sps:$4 sm:$0xff]  }
 0x4a7   : > { %10368 = vmatpush1.bf16.msra.mxu0 %v13712_v15  ;;  %v13764_v15 = vld [vmem:[%s16125_s24 + $0xa8] ss:$16 sps:$4 sm:$0xff]  }
 0x4a8   : > { %10409 = vmatpush1.bf16.msra.mxu1 %v13715_v16  ;;  %10369 = vmatprep.subr.bf16.mxu0 %v13720_v20  ;;  %v13767_v16 = vld [vmem:[%s16125_s24 + $0x2a8] ss:$16 sps:$4 sm:$0xff]   ;;  %v13772_v20 = vld [vmem:[%s16125_s24 + $0xcc] ss:$16 sps:$4 sm:$0xff]  }
 0x4a9   : > { %10410 = vmatprep.subr.bf16.mxu1 %v13723_v21  ;;  %v13775_v21 = vld [vmem:[%s16125_s24 + $0x2cc] ss:$16 sps:$4 sm:$0xff]  }
 0x4ab   : > { %10370 = vmatpush1.bf16.msra.mxu0 %v13718_v45 }
 0x4ac   : > { %10411 = vmatpush1.bf16.msra.mxu1 %v13721_v22  ;;  %10371 = vmatprep.subr.bf16.mxu0 %v13726_v3  ;;  %v13770_v3 = vld [vmem:[%s16125_s24 + $0xc8] ss:$16 sps:$4 sm:$0xff]  }
 0x4ad   : > { %10412 = vmatprep.subr.bf16.mxu1 %v13729_v24  ;;  %v13773_v24 = vld [vmem:[%s16125_s24 + $0x2c8] ss:$16 sps:$4 sm:$0xff]  }
 0x4af   : > { %10372 = vmatpush1.bf16.msra.mxu0 %v13724_v25 }
 0x4b0   : > { %10413 = vmatpush1.bf16.msra.mxu1 %v13727_v26  ;;  %10423 = vmatprep.subr.bf16.mxu0 %v13736_v29 }
 0x4b1   : > { %10464 = vmatprep.subr.bf16.mxu1 %v13739_v30 }
 0x4b2   : > { %10374 = vmatmul.mubr.bf16.vlgmr.msra.gmra.mrb[28].mxu0 %v16864_v37 }
 0x4b3   : > { %10415 = vmatmul.mubr.bf16.vlgmr.msra.gmra.mrb[28].mxu1 %v16868_v38  ;;  %10424 = vmatpush1.bf16.msra.mxu0 %v13734_v31 }
 0x4b4   : > { %10465 = vmatpush1.bf16.msra.mxu1 %v13737_v32  ;;  %10425 = vmatprep.subr.bf16.mxu0 %v13742_v39 }
 0x4b5   : > { %10466 = vmatprep.subr.bf16.mxu1 %v13745_v40  ;;  %10455 = vmatprep.mubr.bf16.mxu0 %v16185_v58  ;;  %v13752_v58 = vld [vmem:[%s16125_s24 + $0x68] ss:$16 sps:$4 sm:$0xff]  }
 0x4b6   : > { %10496 = vmatprep.mubr.bf16.mxu1 %v16190_v62  ;;  %v13760_v62 = vld [vmem:[%s16125_s24 + $0x8c] ss:$16 sps:$4 sm:$0xff]  }
 0x4b7   : > { %10426 = vmatpush1.bf16.msra.mxu0 %v13740_v9 }
 0x4b8   : > { %10467 = vmatpush1.bf16.msra.mxu1 %v13743_v10  ;;  %10427 = vmatprep.subr.bf16.mxu0 %v13748_v41  ;;  %v13781_v10 = vld [vmem:[%s16125_s24 + $0x2ec] ss:$16 sps:$4 sm:$0xff]  }
 0x4b9   : > { %10468 = vmatprep.subr.bf16.mxu1 %v13751_v42  ;;  %v13779_v42 = vld [vmem:[%s16125_s24 + $0x2e8] ss:$16 sps:$4 sm:$0xff]  }
 0x4bb   : > { %10428 = vmatpush1.bf16.msra.mxu0 %v13746_v44  ;;  %v13784_v44 = vld [vmem:[%s16125_s24 + $0x10c] ss:$16 sps:$4 sm:$0xff]  }
 0x4bc   : > { %10469 = vmatpush1.bf16.msra.mxu1 %v13749_v46  ;;  %10429 = vmatprep.subr.bf16.mxu0 %v13754_v53  ;;  %v13787_v46 = vld [vmem:[%s16125_s24 + $0x30c] ss:$16 sps:$4 sm:$0xff]   ;;  %v13782_v53 = vld [vmem:[%s16125_s24 + $0x108] ss:$16 sps:$4 sm:$0xff]  }
 0x4bd   : > { %10470 = vmatprep.subr.bf16.mxu1 %v13757_v1  ;;  %v13785_v1 = vld [vmem:[%s16125_s24 + $0x308] ss:$16 sps:$4 sm:$0xff]  }
 0x4bf   : > { %10430 = vmatpush1.bf16.msra.mxu0 %v13752_v58  ;;  %v13790_v58 = vld [vmem:[%s16125_s24 + $0x12c] ss:$16 sps:$4 sm:$0xff]  }
 0x4c0   : > { %10471 = vmatpush1.bf16.msra.mxu1 %v13755_v43  ;;  %10431 = vmatprep.subr.bf16.mxu0 %v13760_v62  ;;  %v13793_v43 = vld [vmem:[%s16125_s24 + $0x32c] ss:$16 sps:$4 sm:$0xff]   ;;  %v13788_v62 = vld [vmem:[%s16125_s24 + $0x128] ss:$16 sps:$4 sm:$0xff]  }
 0x4c1   : > { %10472 = vmatprep.subr.bf16.mxu1 %v13763_v2  ;;  %v13791_v2 = vld [vmem:[%s16125_s24 + $0x328] ss:$16 sps:$4 sm:$0xff]  }
 0x4c3   : > { %10432 = vmatpush1.bf16.msra.mxu0 %v13758_v55  ;;  %v13796_v55 = vld [vmem:[%s16125_s24 + $0x14c] ss:$16 sps:$4 sm:$0xff]  }
 0x4c4   : > { %10473 = vmatpush1.bf16.msra.mxu1 %v13761_v4  ;;  %10433 = vmatprep.subr.bf16.mxu0 %v13766_v11  ;;  %v13799_v4 = vld [vmem:[%s16125_s24 + $0x34c] ss:$16 sps:$4 sm:$0xff]   ;;  %v13794_v11 = vld [vmem:[%s16125_s24 + $0x148] ss:$16 sps:$4 sm:$0xff]  }
 0x4c5   : > { %10474 = vmatprep.subr.bf16.mxu1 %v13769_v12  ;;  %v10129_v45 = vpop.f32.mrb[16].mxu0  ;;  %v13797_v12 = vld [vmem:[%s16125_s24 + $0x348] ss:$16 sps:$4 sm:$0xff]  }
 0x4c6   : > { %v10170_v22 = vpop.f32.mrb[16].mxu1  ;;  %v10130_v25 = vadd.f32 %v10129_v45, %v16818_v0  ;;  %v10131_v26 = vpop.f32.mrb[17].mxu0  ;;  %v13778_v0 = vld [vmem:[%s16125_s24 + $0xec] ss:$16 sps:$4 sm:$0xff]  }
 0x4c7   : > { %v10172_v29 = vpop.f32.mrb[17].mxu1  ;;  %v10132_v30 = vadd.f32 %v10131_v26, %v16822_v23  ;;  %v10133_v31 = vpop.f32.mrb[18].mxu0  ;;  %10434 = vmatpush1.bf16.msra.mxu0 %v13764_v15  ;;  %v13776_v23 = vld [vmem:[%s16125_s24 + $0xe8] ss:$16 sps:$4 sm:$0xff]   ;;  %v13802_v15 = vld [vmem:[%s16125_s24 + $0x16c] ss:$16 sps:$4 sm:$0xff]  }
 0x4c8   : > { %v10174_v32 = vpop.f32.mrb[18].mxu1  ;;  %10475 = vmatpush1.bf16.msra.mxu1 %v13767_v16  ;;  %v16900_v39 = vadd.f32 %v10170_v22, %v10130_v25  ;;  %v10134_v40 = vpop.f32.mrb[19].mxu0  ;;  %10435 = vmatprep.subr.bf16.mxu0 %v13772_v20  ;;  %v13805_v16 = vld [vmem:[%s16125_s24 + $0x36c] ss:$16 sps:$4 sm:$0xff]   ;;  %v13800_v20 = vld [vmem:[%s16125_s24 + $0x168] ss:$16 sps:$4 sm:$0xff]  }
 0x4c9   : > { %v10175_v9 = vpop.f32.mrb[19].mxu1  ;;  %10476 = vmatprep.subr.bf16.mxu1 %v13775_v21  ;;  %v16904_v41 = vadd.f32 %v10172_v29, %v10132_v30  ;;  %v13803_v21 = vld [vmem:[%s16125_s24 + $0x368] ss:$16 sps:$4 sm:$0xff]   ;;  %v13808_v45 = vld [vmem:[%s16125_s24 + $0x18c] ss:$16 sps:$4 sm:$0xff]  }
 0x4ca   : > { %v13811_v22 = vld [vmem:[%s16125_s24 + $0x38c] ss:$16 sps:$4 sm:$0xff]   ;;  %v13812_v29 = vld [vmem:[%s16125_s24 + $0x1a8] ss:$16 sps:$4 sm:$0xff]  }
 0x4cb   : > { %10436 = vmatpush1.bf16.msra.mxu0 %v13770_v3  ;;  %v13806_v3 = vld [vmem:[%s16125_s24 + $0x188] ss:$16 sps:$4 sm:$0xff]   ;;  %v13814_v25 = vld [vmem:[%s16125_s24 + $0x1ac] ss:$16 sps:$4 sm:$0xff]  }
 0x4cc   : > { %10477 = vmatpush1.bf16.msra.mxu1 %v13773_v24  ;;  %10437 = vmatprep.subr.bf16.mxu0 %v13778_v0  ;;  %v13809_v24 = vld [vmem:[%s16125_s24 + $0x388] ss:$16 sps:$4 sm:$0xff]   ;;  %v13817_v26 = vld [vmem:[%s16125_s24 + $0x3ac] ss:$16 sps:$4 sm:$0xff]  }
 0x4cd   : > { %10478 = vmatprep.subr.bf16.mxu1 %v13781_v10  ;;  %v13815_v30 = vld [vmem:[%s16125_s24 + $0x3a8] ss:$16 sps:$4 sm:$0xff]   ;;  %v13820_v31 = vld [vmem:[%s16125_s24 + $0x1cc] ss:$16 sps:$4 sm:$0xff]  }
 0x4ce   : > { %v13823_v32 = vld [vmem:[%s16125_s24 + $0x3cc] ss:$16 sps:$4 sm:$0xff]   ;;  %v13818_v40 = vld [vmem:[%s16125_s24 + $0x1c8] ss:$16 sps:$4 sm:$0xff]  }
 0x4cf   : > { %10438 = vmatpush1.bf16.msra.mxu0 %v13776_v23  ;;  %v13821_v9 = vld [vmem:[%s16125_s24 + $0x3c8] ss:$16 sps:$4 sm:$0xff]   ;;  %v13826_v0 = vld [vmem:[%s16125_s24 + $0x1ec] ss:$16 sps:$4 sm:$0xff]  }
 0x4d0   : > { %10479 = vmatpush1.bf16.msra.mxu1 %v13779_v42  ;;  %10439 = vmatprep.subr.bf16.mxu0 %v13784_v44  ;;  %v13829_v10 = vld [vmem:[%s16125_s24 + $0x3ec] ss:$16 sps:$4 sm:$0xff]   ;;  %v13824_v23 = vld [vmem:[%s16125_s24 + $0x1e8] ss:$16 sps:$4 sm:$0xff]  }
 0x4d1   : > { %10480 = vmatprep.subr.bf16.mxu1 %v13787_v46  ;;  %v13827_v42 = vld [vmem:[%s16125_s24 + $0x3e8] ss:$16 sps:$4 sm:$0xff]   ;;  %v13832_v44 = vld [vmem:[%s16125_s24 + $0x40c] ss:$16 sps:$4 sm:$0xff]  }
 0x4d2   : > { %v13835_v46 = vld [vmem:[%s16125_s24 + $0x60c] ss:$16 sps:$4 sm:$0xff]  }
 0x4d3   : > { %10440 = vmatpush1.bf16.msra.mxu0 %v13782_v53  ;;  %v13830_v53 = vld [vmem:[%s16125_s24 + $0x408] ss:$16 sps:$4 sm:$0xff]  }
 0x4d4   : > { %10481 = vmatpush1.bf16.msra.mxu1 %v13785_v1  ;;  %10441 = vmatprep.subr.bf16.mxu0 %v13790_v58  ;;  %v13833_v1 = vld [vmem:[%s16125_s24 + $0x608] ss:$16 sps:$4 sm:$0xff]   ;;  %v13838_v58 = vld [vmem:[%s16125_s24 + $0x42c] ss:$16 sps:$4 sm:$0xff]  }
 0x4d5   : > { %10482 = vmatprep.subr.bf16.mxu1 %v13793_v43  ;;  %v13841_v43 = vld [vmem:[%s16125_s24 + $0x62c] ss:$16 sps:$4 sm:$0xff]  }
 0x4d7   : > { %10442 = vmatpush1.bf16.msra.mxu0 %v13788_v62  ;;  %v13836_v62 = vld [vmem:[%s16125_s24 + $0x428] ss:$16 sps:$4 sm:$0xff]  }
 0x4d8   : > { %10483 = vmatpush1.bf16.msra.mxu1 %v13791_v2  ;;  %10443 = vmatprep.subr.bf16.mxu0 %v13796_v55  ;;  %v13839_v2 = vld [vmem:[%s16125_s24 + $0x628] ss:$16 sps:$4 sm:$0xff]   ;;  %v13844_v55 = vld [vmem:[%s16125_s24 + $0x44c] ss:$16 sps:$4 sm:$0xff]  }
 0x4d9   : > { %10484 = vmatprep.subr.bf16.mxu1 %v13799_v4  ;;  %v13847_v4 = vld [vmem:[%s16125_s24 + $0x64c] ss:$16 sps:$4 sm:$0xff]  }
 0x4db   : > { %10444 = vmatpush1.bf16.msra.mxu0 %v13794_v11  ;;  %v13850_v11 = vld [vmem:[%s16125_s24 + $0x46c] ss:$16 sps:$4 sm:$0xff]  }
 0x4dc   : > { %10485 = vmatpush1.bf16.msra.mxu1 %v13797_v12  ;;  %10445 = vmatprep.subr.bf16.mxu0 %v13802_v15  ;;  %v13853_v12 = vld [vmem:[%s16125_s24 + $0x66c] ss:$16 sps:$4 sm:$0xff]   ;;  %v13848_v15 = vld [vmem:[%s16125_s24 + $0x468] ss:$16 sps:$4 sm:$0xff]  }
 0x4dd   : > { %10486 = vmatprep.subr.bf16.mxu1 %v13805_v16  ;;  %v13859_v16 = vld [vmem:[%s16125_s24 + $0x68c] ss:$16 sps:$4 sm:$0xff]  }
 0x4df   : > { %10446 = vmatpush1.bf16.msra.mxu0 %v13800_v20  ;;  %v13854_v20 = vld [vmem:[%s16125_s24 + $0x488] ss:$16 sps:$4 sm:$0xff]  }
 0x4e0   : > { %10487 = vmatpush1.bf16.msra.mxu1 %v13803_v21  ;;  %10447 = vmatprep.subr.bf16.mxu0 %v13808_v45  ;;  %v13857_v21 = vld [vmem:[%s16125_s24 + $0x688] ss:$16 sps:$4 sm:$0xff]   ;;  %v13862_v45 = vld [vmem:[%s16125_s24 + $0x4ac] ss:$16 sps:$4 sm:$0xff]  }
 0x4e1   : > { %10488 = vmatprep.subr.bf16.mxu1 %v13811_v22  ;;  %v13865_v22 = vld [vmem:[%s16125_s24 + $0x6ac] ss:$16 sps:$4 sm:$0xff]  }
 0x4e3   : > { %10448 = vmatpush1.bf16.msra.mxu0 %v13806_v3  ;;  %v13860_v3 = vld [vmem:[%s16125_s24 + $0x4a8] ss:$16 sps:$4 sm:$0xff]  }
 0x4e4   : > { %10489 = vmatpush1.bf16.msra.mxu1 %v13809_v24  ;;  %10449 = vmatprep.subr.bf16.mxu0 %v13814_v25  ;;  %v13863_v24 = vld [vmem:[%s16125_s24 + $0x6a8] ss:$16 sps:$4 sm:$0xff]   ;;  %v13868_v25 = vld [vmem:[%s16125_s24 + $0x4cc] ss:$16 sps:$4 sm:$0xff]  }
 0x4e5   : > { %10490 = vmatprep.subr.bf16.mxu1 %v13817_v26  ;;  %v13871_v26 = vld [vmem:[%s16125_s24 + $0x6cc] ss:$16 sps:$4 sm:$0xff]  }
 0x4e7   : > { %10450 = vmatpush1.bf16.msra.mxu0 %v13812_v29 }
 0x4e8   : > { %10491 = vmatpush1.bf16.msra.mxu1 %v13815_v30  ;;  %10451 = vmatprep.subr.bf16.mxu0 %v13820_v31 }
 0x4e9   : > { %10492 = vmatprep.subr.bf16.mxu1 %v13823_v32 }
 0x4eb   : > { %10452 = vmatpush1.bf16.msra.mxu0 %v13818_v40 }
 0x4ec   : > { %10493 = vmatpush1.bf16.msra.mxu1 %v13821_v9  ;;  %10453 = vmatprep.subr.bf16.mxu0 %v13826_v0 }
 0x4ed   : > { %10494 = vmatprep.subr.bf16.mxu1 %v13829_v10 }
 0x4ef   : > { %10454 = vmatpush1.bf16.msra.mxu0 %v13824_v23  ;;  %v13866_v23 = vld [vmem:[%s16125_s24 + $0x4c8] ss:$16 sps:$4 sm:$0xff]  }
 0x4f0   : > { %10495 = vmatpush1.bf16.msra.mxu1 %v13827_v42  ;;  %10505 = vmatprep.subr.bf16.mxu0 %v13832_v44  ;;  %v13869_v42 = vld [vmem:[%s16125_s24 + $0x6c8] ss:$16 sps:$4 sm:$0xff]  }
 0x4f1   : > { %10546 = vmatprep.subr.bf16.mxu1 %v13835_v46 }
 0x4f2   : > { %10456 = vmatmul.mubr.bf16.vlgmr.msra.gmra.mrb[32].mxu0 %v16212_v17  ;;  %v13842_v17 = vld [vmem:[%s16125_s24 + $0x448] ss:$16 sps:$4 sm:$0xff]  }
 0x4f3   : > { %10497 = vmatmul.mubr.bf16.vlgmr.msra.gmra.mrb[32].mxu1 %v16214_v18  ;;  %10506 = vmatpush1.bf16.msra.mxu0 %v13830_v53  ;;  %v13845_v18 = vld [vmem:[%s16125_s24 + $0x648] ss:$16 sps:$4 sm:$0xff]  }
 0x4f4   : > { %10547 = vmatpush1.bf16.msra.mxu1 %v13833_v1  ;;  %10507 = vmatprep.subr.bf16.mxu0 %v13838_v58  ;;  %v13872_v58 = vld [vmem:[%s16125_s24 + $0x4e8] ss:$16 sps:$4 sm:$0xff]  }
 0x4f5   : > { %10548 = vmatprep.subr.bf16.mxu1 %v13841_v43  ;;  %10537 = vmatprep.mubr.bf16.mxu0 %v16252_v47  ;;  %v13851_v47 = vld [vmem:[%s16125_s24 + $0x668] ss:$16 sps:$4 sm:$0xff]  }
 0x4f6   : > { %10578 = vmatprep.mubr.bf16.mxu1 %v16256_v48  ;;  %v13856_v48 = vld [vmem:[%s16125_s24 + $0x48c] ss:$16 sps:$4 sm:$0xff]   ;;  %v13875_v43 = vld [vmem:[%s16125_s24 + $0x6e8] ss:$16 sps:$4 sm:$0xff]  }
 0x4f7   : > { %10508 = vmatpush1.bf16.msra.mxu0 %v13836_v62  ;;  %v13880_v62 = vld [vmem:[%s16125_s24 + $0x50c] ss:$16 sps:$4 sm:$0xff]  }
 0x4f8   : > { %10549 = vmatpush1.bf16.msra.mxu1 %v13839_v2  ;;  %10509 = vmatprep.subr.bf16.mxu0 %v13844_v55  ;;  %v13883_v2 = vld [vmem:[%s16125_s24 + $0x70c] ss:$16 sps:$4 sm:$0xff]   ;;  %v13878_v55 = vld [vmem:[%s16125_s24 + $0x508] ss:$16 sps:$4 sm:$0xff]  }
 0x4f9   : > { %10550 = vmatprep.subr.bf16.mxu1 %v13847_v4  ;;  %v13881_v4 = vld [vmem:[%s16125_s24 + $0x708] ss:$16 sps:$4 sm:$0xff]  }
 0x4fb   : > { %10510 = vmatpush1.bf16.msra.mxu0 %v13842_v17  ;;  %v13886_v17 = vld [vmem:[%s16125_s24 + $0x52c] ss:$16 sps:$4 sm:$0xff]  }
 0x4fc   : > { %10551 = vmatpush1.bf16.msra.mxu1 %v13845_v18  ;;  %10511 = vmatprep.subr.bf16.mxu0 %v13850_v11  ;;  %v13889_v18 = vld [vmem:[%s16125_s24 + $0x72c] ss:$16 sps:$4 sm:$0xff]   ;;  %v13884_v11 = vld [vmem:[%s16125_s24 + $0x528] ss:$16 sps:$4 sm:$0xff]  }
 0x4fd   : > { %10552 = vmatprep.subr.bf16.mxu1 %v13853_v12  ;;  %v13887_v12 = vld [vmem:[%s16125_s24 + $0x728] ss:$16 sps:$4 sm:$0xff]  }
 0x4ff   : > { %10512 = vmatpush1.bf16.msra.mxu0 %v13848_v15  ;;  %v13892_v15 = vld [vmem:[%s16125_s24 + $0x54c] ss:$16 sps:$4 sm:$0xff]  }
 0x500   : > { %10553 = vmatpush1.bf16.msra.mxu1 %v13851_v47  ;;  %10513 = vmatprep.subr.bf16.mxu0 %v13856_v48  ;;  %v13895_v47 = vld [vmem:[%s16125_s24 + $0x74c] ss:$16 sps:$4 sm:$0xff]   ;;  %v13890_v48 = vld [vmem:[%s16125_s24 + $0x548] ss:$16 sps:$4 sm:$0xff]  }
 0x501   : > { %10554 = vmatprep.subr.bf16.mxu1 %v13859_v16  ;;  %v13893_v16 = vld [vmem:[%s16125_s24 + $0x748] ss:$16 sps:$4 sm:$0xff]  }
 0x503   : > { %10514 = vmatpush1.bf16.msra.mxu0 %v13854_v20  ;;  %v13898_v20 = vld [vmem:[%s16125_s24 + $0x56c] ss:$16 sps:$4 sm:$0xff]  }
 0x504   : > { %10555 = vmatpush1.bf16.msra.mxu1 %v13857_v21  ;;  %10515 = vmatprep.subr.bf16.mxu0 %v13862_v45  ;;  %v13901_v21 = vld [vmem:[%s16125_s24 + $0x76c] ss:$16 sps:$4 sm:$0xff]   ;;  %v13896_v45 = vld [vmem:[%s16125_s24 + $0x568] ss:$16 sps:$4 sm:$0xff]  }
 0x505   : > { %10556 = vmatprep.subr.bf16.mxu1 %v13865_v22  ;;  %v10211_v29 = vpop.f32.mrb[20].mxu0  ;;  %v13899_v22 = vld [vmem:[%s16125_s24 + $0x768] ss:$16 sps:$4 sm:$0xff]  }
 0x506   : > { %v10252_v30 = vpop.f32.mrb[20].mxu1  ;;  %v10212_v31 = vadd.f32 %v10211_v29, %v16900_v39  ;;  %v10213_v32 = vpop.f32.mrb[21].mxu0  ;;  %v13874_v39 = vld [vmem:[%s16125_s24 + $0x4ec] ss:$16 sps:$4 sm:$0xff]  }
 0x507   : > { %v10254_v40 = vpop.f32.mrb[21].mxu1  ;;  %v10214_v9 = vadd.f32 %v10213_v32, %v16904_v41  ;;  %v10215_v0 = vpop.f32.mrb[22].mxu0  ;;  %10516 = vmatpush1.bf16.msra.mxu0 %v13860_v3  ;;  %v13877_v41 = vld [vmem:[%s16125_s24 + $0x6ec] ss:$16 sps:$4 sm:$0xff]   ;;  %v13911_v32 = vld [vmem:[%s16125_s24 + $0x7a8] ss:$16 sps:$4 sm:$0xff]  }
 0x508   : > { %v10256_v10 = vpop.f32.mrb[22].mxu1  ;;  %10557 = vmatpush1.bf16.msra.mxu1 %v13863_v24  ;;  %v16974_v44 = vadd.f32 %v10252_v30, %v10212_v31  ;;  %v10216_v46 = vpop.f32.mrb[23].mxu0  ;;  %10517 = vmatprep.subr.bf16.mxu0 %v13868_v25  ;;  %v13904_v3 = vld [vmem:[%s16125_s24 + $0x58c] ss:$16 sps:$4 sm:$0xff]   ;;  %v13902_v25 = vld [vmem:[%s16125_s24 + $0x588] ss:$16 sps:$4 sm:$0xff]  }
 0x509   : > { %v10257_v53 = vpop.f32.mrb[23].mxu1  ;;  %10558 = vmatprep.subr.bf16.mxu1 %v13871_v26  ;;  %v16978_v1 = vadd.f32 %v10254_v40, %v10214_v9  ;;  %v13907_v24 = vld [vmem:[%s16125_s24 + $0x78c] ss:$16 sps:$4 sm:$0xff]   ;;  %v13905_v26 = vld [vmem:[%s16125_s24 + $0x788] ss:$16 sps:$4 sm:$0xff]  }
 0x50a   : > { %v13910_v29 = vld [vmem:[%s16125_s24 + $0x5ac] ss:$16 sps:$4 sm:$0xff]   ;;  %v13908_v31 = vld [vmem:[%s16125_s24 + $0x5a8] ss:$16 sps:$4 sm:$0xff]  }
 0x50b   : > { %10518 = vmatpush1.bf16.msra.mxu0 %v13866_v23  ;;  %v13913_v30 = vld [vmem:[%s16125_s24 + $0x7ac] ss:$16 sps:$4 sm:$0xff]   ;;  %v13914_v0 = vld [vmem:[%s16125_s24 + $0x5c8] ss:$16 sps:$4 sm:$0xff]  }
 0x50c   : > { %10559 = vmatpush1.bf16.msra.mxu1 %v13869_v42  ;;  %10519 = vmatprep.subr.bf16.mxu0 %v13874_v39  ;;  %v13916_v40 = vld [vmem:[%s16125_s24 + $0x5cc] ss:$16 sps:$4 sm:$0xff]   ;;  %v13917_v10 = vld [vmem:[%s16125_s24 + $0x7c8] ss:$16 sps:$4 sm:$0xff]  }
 0x50d   : > { %10560 = vmatprep.subr.bf16.mxu1 %v13877_v41  ;;  %v13919_v9 = vld [vmem:[%s16125_s24 + $0x7cc] ss:$16 sps:$4 sm:$0xff]   ;;  %v13920_v46 = vld [vmem:[%s16125_s24 + $0x5e8] ss:$16 sps:$4 sm:$0xff]  }
 0x50e   : > { %v13922_v23 = vld [vmem:[%s16125_s24 + $0x5ec] ss:$16 sps:$4 sm:$0xff]   ;;  %v13923_v53 = vld [vmem:[%s16125_s24 + $0x7e8] ss:$16 sps:$4 sm:$0xff]  }
 0x50f   : > { %10520 = vmatpush1.bf16.msra.mxu0 %v13872_v58  ;;  %v13925_v42 = vld [vmem:[%s16125_s24 + $0x7ec] ss:$16 sps:$4 sm:$0xff]   ;;  %v13926_v58 = vld [vmem:[%s16125_s24 + $0x808] ss:$16 sps:$4 sm:$0xff]  }
 0x510   : > { %10561 = vmatpush1.bf16.msra.mxu1 %v13875_v43  ;;  %10521 = vmatprep.subr.bf16.mxu0 %v13880_v62  ;;  %v13928_v39 = vld [vmem:[%s16125_s24 + $0x80c] ss:$16 sps:$4 sm:$0xff]   ;;  %v13929_v43 = vld [vmem:[%s16125_s24 + $0xa08] ss:$16 sps:$4 sm:$0xff]  }
 0x511   : > { %10562 = vmatprep.subr.bf16.mxu1 %v13883_v2  ;;  %v13931_v41 = vld [vmem:[%s16125_s24 + $0xa0c] ss:$16 sps:$4 sm:$0xff]  }
 0x512   : > { %v13934_v62 = vld [vmem:[%s16125_s24 + $0x82c] ss:$16 sps:$4 sm:$0xff]  }
 0x513   : > { %10522 = vmatpush1.bf16.msra.mxu0 %v13878_v55  ;;  %v13937_v2 = vld [vmem:[%s16125_s24 + $0xa2c] ss:$16 sps:$4 sm:$0xff]   ;;  %v13932_v55 = vld [vmem:[%s16125_s24 + $0x828] ss:$16 sps:$4 sm:$0xff]  }
 0x514   : > { %10563 = vmatpush1.bf16.msra.mxu1 %v13881_v4  ;;  %10523 = vmatprep.subr.bf16.mxu0 %v13886_v17  ;;  %v13935_v4 = vld [vmem:[%s16125_s24 + $0xa28] ss:$16 sps:$4 sm:$0xff]   ;;  %v13940_v17 = vld [vmem:[%s16125_s24 + $0x84c] ss:$16 sps:$4 sm:$0xff]  }
 0x515   : > { %10564 = vmatprep.subr.bf16.mxu1 %v13889_v18  ;;  %v13943_v18 = vld [vmem:[%s16125_s24 + $0xa4c] ss:$16 sps:$4 sm:$0xff]  }
 0x517   : > { %10524 = vmatpush1.bf16.msra.mxu0 %v13884_v11  ;;  %v13946_v11 = vld [vmem:[%s16125_s24 + $0x86c] ss:$16 sps:$4 sm:$0xff]  }
 0x518   : > { %10565 = vmatpush1.bf16.msra.mxu1 %v13887_v12  ;;  %10525 = vmatprep.subr.bf16.mxu0 %v13892_v15  ;;  %v13949_v12 = vld [vmem:[%s16125_s24 + $0xa6c] ss:$16 sps:$4 sm:$0xff]   ;;  %v13944_v15 = vld [vmem:[%s16125_s24 + $0x868] ss:$16 sps:$4 sm:$0xff]  }
 0x519   : > { %10566 = vmatprep.subr.bf16.mxu1 %v13895_v47  ;;  %v13955_v47 = vld [vmem:[%s16125_s24 + $0xa8c] ss:$16 sps:$4 sm:$0xff]  }
 0x51b   : > { %10526 = vmatpush1.bf16.msra.mxu0 %v13890_v48  ;;  %v13950_v48 = vld [vmem:[%s16125_s24 + $0x888] ss:$16 sps:$4 sm:$0xff]  }
 0x51c   : > { %10567 = vmatpush1.bf16.msra.mxu1 %v13893_v16  ;;  %10527 = vmatprep.subr.bf16.mxu0 %v13898_v20  ;;  %v13953_v16 = vld [vmem:[%s16125_s24 + $0xa88] ss:$16 sps:$4 sm:$0xff]   ;;  %v13958_v20 = vld [vmem:[%s16125_s24 + $0x8ac] ss:$16 sps:$4 sm:$0xff]  }
 0x51d   : > { %10568 = vmatprep.subr.bf16.mxu1 %v13901_v21  ;;  %v13961_v21 = vld [vmem:[%s16125_s24 + $0xaac] ss:$16 sps:$4 sm:$0xff]  }
 0x51f   : > { %10528 = vmatpush1.bf16.msra.mxu0 %v13896_v45  ;;  %v13956_v45 = vld [vmem:[%s16125_s24 + $0x8a8] ss:$16 sps:$4 sm:$0xff]  }
 0x520   : > { %10569 = vmatpush1.bf16.msra.mxu1 %v13899_v22  ;;  %10529 = vmatprep.subr.bf16.mxu0 %v13904_v3  ;;  %v13959_v22 = vld [vmem:[%s16125_s24 + $0xaa8] ss:$16 sps:$4 sm:$0xff]   ;;  %v13964_v3 = vld [vmem:[%s16125_s24 + $0x8cc] ss:$16 sps:$4 sm:$0xff]  }
 0x521   : > { %10570 = vmatprep.subr.bf16.mxu1 %v13907_v24  ;;  %v13967_v24 = vld [vmem:[%s16125_s24 + $0xacc] ss:$16 sps:$4 sm:$0xff]  }
 0x523   : > { %10530 = vmatpush1.bf16.msra.mxu0 %v13902_v25 }
 0x524   : > { %10571 = vmatpush1.bf16.msra.mxu1 %v13905_v26  ;;  %10531 = vmatprep.subr.bf16.mxu0 %v13910_v29 }
 0x525   : > { %10572 = vmatprep.subr.bf16.mxu1 %v13913_v30 }
 0x527   : > { %10532 = vmatpush1.bf16.msra.mxu0 %v13908_v31 }
 0x528   : > { %10573 = vmatpush1.bf16.msra.mxu1 %v13911_v32  ;;  %10533 = vmatprep.subr.bf16.mxu0 %v13916_v40 }
 0x529   : > { %10574 = vmatprep.subr.bf16.mxu1 %v13919_v9 }
 0x52b   : > { %10534 = vmatpush1.bf16.msra.mxu0 %v13914_v0  ;;  %v13962_v0 = vld [vmem:[%s16125_s24 + $0x8c8] ss:$16 sps:$4 sm:$0xff]  }
 0x52c   : > { %10575 = vmatpush1.bf16.msra.mxu1 %v13917_v10  ;;  %10535 = vmatprep.subr.bf16.mxu0 %v13922_v23  ;;  %v13965_v10 = vld [vmem:[%s16125_s24 + $0xac8] ss:$16 sps:$4 sm:$0xff]  }
 0x52d   : > { %10576 = vmatprep.subr.bf16.mxu1 %v13925_v42 }
 0x52f   : > { %10536 = vmatpush1.bf16.msra.mxu0 %v13920_v46 }
 0x530   : > { %10577 = vmatpush1.bf16.msra.mxu1 %v13923_v53  ;;  %10587 = vmatprep.subr.bf16.mxu0 %v13928_v39  ;;  %v13968_v39 = vld [vmem:[%s16125_s24 + $0x8e8] ss:$16 sps:$4 sm:$0xff]  }
 0x531   : > { %10628 = vmatprep.subr.bf16.mxu1 %v13931_v41  ;;  %v13971_v41 = vld [vmem:[%s16125_s24 + $0xae8] ss:$16 sps:$4 sm:$0xff]  }
 0x532   : > { %10538 = vmatmul.mubr.bf16.vlgmr.msra.gmra.mrb[36].mxu0 %v16300_v27  ;;  %v13938_v27 = vld [vmem:[%s16125_s24 + $0x848] ss:$16 sps:$4 sm:$0xff]  }
 0x533   : > { %10579 = vmatmul.mubr.bf16.vlgmr.msra.gmra.mrb[36].mxu1 %v16304_v28  ;;  %10588 = vmatpush1.bf16.msra.mxu0 %v13926_v58  ;;  %v13941_v28 = vld [vmem:[%s16125_s24 + $0xa48] ss:$16 sps:$4 sm:$0xff]   ;;  %v13976_v58 = vld [vmem:[%s16125_s24 + $0x90c] ss:$16 sps:$4 sm:$0xff]  }
 0x534   : > { %10629 = vmatpush1.bf16.msra.mxu1 %v13929_v43  ;;  %10589 = vmatprep.subr.bf16.mxu0 %v13934_v62  ;;  %v13979_v43 = vld [vmem:[%s16125_s24 + $0xb0c] ss:$16 sps:$4 sm:$0xff]   ;;  %v13974_v62 = vld [vmem:[%s16125_s24 + $0x908] ss:$16 sps:$4 sm:$0xff]  }
 0x535   : > { %10630 = vmatprep.subr.bf16.mxu1 %v13937_v2  ;;  %10619 = vmatprep.mubr.bf16.mxu0 %v16318_v35  ;;  %v13947_v35 = vld [vmem:[%s16125_s24 + $0xa68] ss:$16 sps:$4 sm:$0xff]  }
 0x536   : > { %10660 = vmatprep.mubr.bf16.mxu1 %v16322_v36  ;;  %v13952_v36 = vld [vmem:[%s16125_s24 + $0x88c] ss:$16 sps:$4 sm:$0xff]   ;;  %v13977_v2 = vld [vmem:[%s16125_s24 + $0xb08] ss:$16 sps:$4 sm:$0xff]  }
 0x537   : > { %10590 = vmatpush1.bf16.msra.mxu0 %v13932_v55  ;;  %v13982_v55 = vld [vmem:[%s16125_s24 + $0x92c] ss:$16 sps:$4 sm:$0xff]  }
 0x538   : > { %10631 = vmatpush1.bf16.msra.mxu1 %v13935_v4  ;;  %10591 = vmatprep.subr.bf16.mxu0 %v13940_v17  ;;  %v13985_v4 = vld [vmem:[%s16125_s24 + $0xb2c] ss:$16 sps:$4 sm:$0xff]   ;;  %v13980_v17 = vld [vmem:[%s16125_s24 + $0x928] ss:$16 sps:$4 sm:$0xff]  }
 0x539   : > { %10632 = vmatprep.subr.bf16.mxu1 %v13943_v18  ;;  %v13983_v18 = vld [vmem:[%s16125_s24 + $0xb28] ss:$16 sps:$4 sm:$0xff]  }
 0x53b   : > { %10592 = vmatpush1.bf16.msra.mxu0 %v13938_v27  ;;  %v13988_v27 = vld [vmem:[%s16125_s24 + $0x94c] ss:$16 sps:$4 sm:$0xff]  }
 0x53c   : > { %10633 = vmatpush1.bf16.msra.mxu1 %v13941_v28  ;;  %10593 = vmatprep.subr.bf16.mxu0 %v13946_v11  ;;  %v13991_v28 = vld [vmem:[%s16125_s24 + $0xb4c] ss:$16 sps:$4 sm:$0xff]   ;;  %v13986_v11 = vld [vmem:[%s16125_s24 + $0x948] ss:$16 sps:$4 sm:$0xff]  }
 0x53d   : > { %10634 = vmatprep.subr.bf16.mxu1 %v13949_v12  ;;  %v13989_v12 = vld [vmem:[%s16125_s24 + $0xb48] ss:$16 sps:$4 sm:$0xff]  }
 0x53f   : > { %10594 = vmatpush1.bf16.msra.mxu0 %v13944_v15  ;;  %v13994_v15 = vld [vmem:[%s16125_s24 + $0x96c] ss:$16 sps:$4 sm:$0xff]  }
 0x540   : > { %10635 = vmatpush1.bf16.msra.mxu1 %v13947_v35  ;;  %10595 = vmatprep.subr.bf16.mxu0 %v13952_v36  ;;  %v13997_v35 = vld [vmem:[%s16125_s24 + $0xb6c] ss:$16 sps:$4 sm:$0xff]   ;;  %v13992_v36 = vld [vmem:[%s16125_s24 + $0x968] ss:$16 sps:$4 sm:$0xff]  }
 0x541   : > { %10636 = vmatprep.subr.bf16.mxu1 %v13955_v47  ;;  %v13995_v47 = vld [vmem:[%s16125_s24 + $0xb68] ss:$16 sps:$4 sm:$0xff]  }
 0x543   : > { %10596 = vmatpush1.bf16.msra.mxu0 %v13950_v48  ;;  %v14000_v48 = vld [vmem:[%s16125_s24 + $0x98c] ss:$16 sps:$4 sm:$0xff]  }
 0x544   : > { %10637 = vmatpush1.bf16.msra.mxu1 %v13953_v16  ;;  %10597 = vmatprep.subr.bf16.mxu0 %v13958_v20  ;;  %v14003_v16 = vld [vmem:[%s16125_s24 + $0xb8c] ss:$16 sps:$4 sm:$0xff]   ;;  %v13998_v20 = vld [vmem:[%s16125_s24 + $0x988] ss:$16 sps:$4 sm:$0xff]  }
 0x545   : > { %10638 = vmatprep.subr.bf16.mxu1 %v13961_v21  ;;  %v10293_v25 = vpop.f32.mrb[24].mxu0  ;;  %v14001_v21 = vld [vmem:[%s16125_s24 + $0xb88] ss:$16 sps:$4 sm:$0xff]  }
 0x546   : > { %v10334_v26 = vpop.f32.mrb[24].mxu1  ;;  %v10294_v29 = vadd.f32 %v10293_v25, %v16974_v44  ;;  %v10295_v30 = vpop.f32.mrb[25].mxu0  ;;  %v13970_v44 = vld [vmem:[%s16125_s24 + $0x8ec] ss:$16 sps:$4 sm:$0xff]  }
 0x547   : > { %v10336_v31 = vpop.f32.mrb[25].mxu1  ;;  %v10296_v32 = vadd.f32 %v10295_v30, %v16978_v1  ;;  %v10297_v40 = vpop.f32.mrb[26].mxu0  ;;  %10598 = vmatpush1.bf16.msra.mxu0 %v13956_v45  ;;  %v13973_v1 = vld [vmem:[%s16125_s24 + $0xaec] ss:$16 sps:$4 sm:$0xff]   ;;  %v14013_v30 = vld [vmem:[%s16125_s24 + $0xbc8] ss:$16 sps:$4 sm:$0xff]  }
 0x548   : > { %v10338_v9 = vpop.f32.mrb[26].mxu1  ;;  %10639 = vmatpush1.bf16.msra.mxu1 %v13959_v22  ;;  %v17048_v23 = vadd.f32 %v10334_v26, %v10294_v29  ;;  %v10298_v42 = vpop.f32.mrb[27].mxu0  ;;  %10599 = vmatprep.subr.bf16.mxu0 %v13964_v3  ;;  %v14006_v45 = vld [vmem:[%s16125_s24 + $0x9ac] ss:$16 sps:$4 sm:$0xff]   ;;  %v14004_v3 = vld [vmem:[%s16125_s24 + $0x9a8] ss:$16 sps:$4 sm:$0xff]  }
 0x549   : > { %v10339_v46 = vpop.f32.mrb[27].mxu1  ;;  %10640 = vmatprep.subr.bf16.mxu1 %v13967_v24  ;;  %v17052_v53 = vadd.f32 %v10336_v31, %v10296_v32  ;;  %v14009_v22 = vld [vmem:[%s16125_s24 + $0xbac] ss:$16 sps:$4 sm:$0xff]   ;;  %v14007_v24 = vld [vmem:[%s16125_s24 + $0xba8] ss:$16 sps:$4 sm:$0xff]  }
 0x54a   : > { %v14012_v25 = vld [vmem:[%s16125_s24 + $0x9cc] ss:$16 sps:$4 sm:$0xff]   ;;  %v14010_v29 = vld [vmem:[%s16125_s24 + $0x9c8] ss:$16 sps:$4 sm:$0xff]  }
 0x54b   : > { %10600 = vmatpush1.bf16.msra.mxu0 %v13962_v0  ;;  %v14015_v26 = vld [vmem:[%s16125_s24 + $0xbcc] ss:$16 sps:$4 sm:$0xff]   ;;  %v14016_v40 = vld [vmem:[%s16125_s24 + $0x9e8] ss:$16 sps:$4 sm:$0xff]  }
 0x54c   : > { %10641 = vmatpush1.bf16.msra.mxu1 %v13965_v10  ;;  %10601 = vmatprep.subr.bf16.mxu0 %v13970_v44  ;;  %v14018_v31 = vld [vmem:[%s16125_s24 + $0x9ec] ss:$16 sps:$4 sm:$0xff]   ;;  %v14019_v9 = vld [vmem:[%s16125_s24 + $0xbe8] ss:$16 sps:$4 sm:$0xff]  }
 0x54d   : > { %10642 = vmatprep.subr.bf16.mxu1 %v13973_v1  ;;  %v14021_v32 = vld [vmem:[%s16125_s24 + $0xbec] ss:$16 sps:$4 sm:$0xff]   ;;  %v14022_v42 = vld [vmem:[%s16125_s24 + $0xc08] ss:$16 sps:$4 sm:$0xff]  }
 0x54e   : > { %v14024_v0 = vld [vmem:[%s16125_s24 + $0xc0c] ss:$16 sps:$4 sm:$0xff]   ;;  %v14025_v46 = vld [vmem:[%s16125_s24 + $0xe08] ss:$16 sps:$4 sm:$0xff]  }
 0x54f   : > { %10602 = vmatpush1.bf16.msra.mxu0 %v13968_v39  ;;  %v14027_v10 = vld [vmem:[%s16125_s24 + $0xe0c] ss:$16 sps:$4 sm:$0xff]   ;;  %v14028_v39 = vld [vmem:[%s16125_s24 + $0xc28] ss:$16 sps:$4 sm:$0xff]  }
 0x550   : > { %10643 = vmatpush1.bf16.msra.mxu1 %v13971_v41  ;;  %10603 = vmatprep.subr.bf16.mxu0 %v13976_v58  ;;  %v14030_v44 = vld [vmem:[%s16125_s24 + $0xc2c] ss:$16 sps:$4 sm:$0xff]   ;;  %v14031_v41 = vld [vmem:[%s16125_s24 + $0xe28] ss:$16 sps:$4 sm:$0xff]  }
 0x551   : > { %10644 = vmatprep.subr.bf16.mxu1 %v13979_v43  ;;  %v14033_v1 = vld [vmem:[%s16125_s24 + $0xe2c] ss:$16 sps:$4 sm:$0xff]  }
 0x552   : > { %v14036_v58 = vld [vmem:[%s16125_s24 + $0xc4c] ss:$16 sps:$4 sm:$0xff]  }
 0x553   : > { %10604 = vmatpush1.bf16.msra.mxu0 %v13974_v62  ;;  %v14039_v43 = vld [vmem:[%s16125_s24 + $0xe4c] ss:$16 sps:$4 sm:$0xff]  }
 0x554   : > { %10645 = vmatpush1.bf16.msra.mxu1 %v13977_v2  ;;  %10605 = vmatprep.subr.bf16.mxu0 %v13982_v55  ;;  %v14042_v62 = vld [vmem:[%s16125_s24 + $0xc6c] ss:$16 sps:$4 sm:$0xff]   ;;  %v14040_v55 = vld [vmem:[%s16125_s24 + $0xc68] ss:$16 sps:$4 sm:$0xff]  }
 0x555   : > { %10646 = vmatprep.subr.bf16.mxu1 %v13985_v4  ;;  %v14045_v2 = vld [vmem:[%s16125_s24 + $0xe6c] ss:$16 sps:$4 sm:$0xff]  }
 0x556   : > { %v14051_v4 = vld [vmem:[%s16125_s24 + $0xe8c] ss:$16 sps:$4 sm:$0xff]  }
 0x557   : > { %10606 = vmatpush1.bf16.msra.mxu0 %v13980_v17  ;;  %v14046_v17 = vld [vmem:[%s16125_s24 + $0xc88] ss:$16 sps:$4 sm:$0xff]  }
 0x558   : > { %10647 = vmatpush1.bf16.msra.mxu1 %v13983_v18  ;;  %10607 = vmatprep.subr.bf16.mxu0 %v13988_v27  ;;  %v14049_v18 = vld [vmem:[%s16125_s24 + $0xe88] ss:$16 sps:$4 sm:$0xff]   ;;  %v14054_v27 = vld [vmem:[%s16125_s24 + $0xcac] ss:$16 sps:$4 sm:$0xff]  }
 0x559   : > { %10648 = vmatprep.subr.bf16.mxu1 %v13991_v28  ;;  %v14057_v28 = vld [vmem:[%s16125_s24 + $0xeac] ss:$16 sps:$4 sm:$0xff]  }
 0x55b   : > { %10608 = vmatpush1.bf16.msra.mxu0 %v13986_v11  ;;  %v14052_v11 = vld [vmem:[%s16125_s24 + $0xca8] ss:$16 sps:$4 sm:$0xff]  }
 0x55c   : > { %10649 = vmatpush1.bf16.msra.mxu1 %v13989_v12  ;;  %10609 = vmatprep.subr.bf16.mxu0 %v13994_v15  ;;  %v14055_v12 = vld [vmem:[%s16125_s24 + $0xea8] ss:$16 sps:$4 sm:$0xff]   ;;  %v14060_v15 = vld [vmem:[%s16125_s24 + $0xccc] ss:$16 sps:$4 sm:$0xff]  }
 0x55d   : > { %10650 = vmatprep.subr.bf16.mxu1 %v13997_v35  ;;  %v14063_v35 = vld [vmem:[%s16125_s24 + $0xecc] ss:$16 sps:$4 sm:$0xff]  }
 0x55f   : > { %10610 = vmatpush1.bf16.msra.mxu0 %v13992_v36 }
 0x560   : > { %10651 = vmatpush1.bf16.msra.mxu1 %v13995_v47  ;;  %10611 = vmatprep.subr.bf16.mxu0 %v14000_v48 }
 0x561   : > { %10652 = vmatprep.subr.bf16.mxu1 %v14003_v16 }
 0x563   : > { %10612 = vmatpush1.bf16.msra.mxu0 %v13998_v20 }
 0x564   : > { %10653 = vmatpush1.bf16.msra.mxu1 %v14001_v21  ;;  %10613 = vmatprep.subr.bf16.mxu0 %v14006_v45  ;;  %v14058_v21 = vld [vmem:[%s16125_s24 + $0xcc8] ss:$16 sps:$4 sm:$0xff]   ;;  %v3491_v45 = vld [vmem:[#allocation2] sm:$0xff] }
 0x565   : > { %10654 = vmatprep.subr.bf16.mxu1 %v14009_v22 }
 0x567   : > { %10614 = vmatpush1.bf16.msra.mxu0 %v14004_v3  ;;  %v3492_v3 = vld [vmem:[#allocation2 + $0x8] sm:$0xff] }
 0x568   : > { %10655 = vmatpush1.bf16.msra.mxu1 %v14007_v24  ;;  %10615 = vmatprep.subr.bf16.mxu0 %v14012_v25 }
 0x569   : > { %10656 = vmatprep.subr.bf16.mxu1 %v14015_v26  ;;  %v14061_v26 = vld [vmem:[%s16125_s24 + $0xec8] ss:$16 sps:$4 sm:$0xff]  }
 0x56b   : > { %10616 = vmatpush1.bf16.msra.mxu0 %v14010_v29 }
 0x56c   : > { %10657 = vmatpush1.bf16.msra.mxu1 %v14013_v30  ;;  %10617 = vmatprep.subr.bf16.mxu0 %v14018_v31  ;;  %v14066_v31 = vld [vmem:[%s16125_s24 + $0xcec] ss:$16 sps:$4 sm:$0xff]  }
 0x56d   : > { %10658 = vmatprep.subr.bf16.mxu1 %v14021_v32  ;;  %v14069_v32 = vld [vmem:[%s16125_s24 + $0xeec] ss:$16 sps:$4 sm:$0xff]  }
 0x56f   : > { %10618 = vmatpush1.bf16.msra.mxu0 %v14016_v40 }
 0x570   : > { %10659 = vmatpush1.bf16.msra.mxu1 %v14019_v9  ;;  %10669 = vmatprep.subr.bf16.mxu0 %v14024_v0  ;;  %v14064_v0 = vld [vmem:[%s16125_s24 + $0xce8] ss:$16 sps:$4 sm:$0xff]  }
 0x571   : > { %10710 = vmatprep.subr.bf16.mxu1 %v14027_v10  ;;  %v14067_v10 = vld [vmem:[%s16125_s24 + $0xee8] ss:$16 sps:$4 sm:$0xff]  }
 0x572   : > { %10620 = vmatmul.mubr.bf16.vlgmr.msra.gmra.mrb[40].mxu0 %v16392_v49  ;;  %v14034_v49 = vld [vmem:[%s16125_s24 + $0xc48] ss:$16 sps:$4 sm:$0xff]  }
 0x573   : > { %10661 = vmatmul.mubr.bf16.vlgmr.msra.gmra.mrb[40].mxu1 %v16396_v50  ;;  %10670 = vmatpush1.bf16.msra.mxu0 %v14022_v42  ;;  %v14037_v50 = vld [vmem:[%s16125_s24 + $0xe48] ss:$16 sps:$4 sm:$0xff]   ;;  %v14072_v42 = vld [vmem:[%s16125_s24 + $0xd0c] ss:$16 sps:$4 sm:$0xff]  }
 0x574   : > { %10711 = vmatpush1.bf16.msra.mxu1 %v14025_v46  ;;  %10671 = vmatprep.subr.bf16.mxu0 %v14030_v44  ;;  %v14075_v46 = vld [vmem:[%s16125_s24 + $0xf0c] ss:$16 sps:$4 sm:$0xff]   ;;  %v14070_v44 = vld [vmem:[%s16125_s24 + $0xd08] ss:$16 sps:$4 sm:$0xff]  }
 0x575   : > { %10712 = vmatprep.subr.bf16.mxu1 %v14033_v1  ;;  %10701 = vmatprep.mubr.bf16.mxu0 %v16408_v33  ;;  %v14043_v33 = vld [vmem:[%s16125_s24 + $0xe68] ss:$16 sps:$4 sm:$0xff]  }
 0x576   : > { %10742 = vmatprep.mubr.bf16.mxu1 %v16412_v34  ;;  %v14048_v34 = vld [vmem:[%s16125_s24 + $0xc8c] ss:$16 sps:$4 sm:$0xff]   ;;  %v14073_v1 = vld [vmem:[%s16125_s24 + $0xf08] ss:$16 sps:$4 sm:$0xff]  }
 0x577   : > { %10672 = vmatpush1.bf16.msra.mxu0 %v14028_v39  ;;  %v14078_v39 = vld [vmem:[%s16125_s24 + $0xd2c] ss:$16 sps:$4 sm:$0xff]  }
 0x578   : > { %10713 = vmatpush1.bf16.msra.mxu1 %v14031_v41  ;;  %10673 = vmatprep.subr.bf16.mxu0 %v14036_v58  ;;  %v14081_v41 = vld [vmem:[%s16125_s24 + $0xf2c] ss:$16 sps:$4 sm:$0xff]   ;;  %v14076_v58 = vld [vmem:[%s16125_s24 + $0xd28] ss:$16 sps:$4 sm:$0xff]  }
 0x579   : > { %10714 = vmatprep.subr.bf16.mxu1 %v14039_v43  ;;  %v14079_v43 = vld [vmem:[%s16125_s24 + $0xf28] ss:$16 sps:$4 sm:$0xff]  }
 0x57b   : > { %10674 = vmatpush1.bf16.msra.mxu0 %v14034_v49  ;;  %v14084_v49 = vld [vmem:[%s16125_s24 + $0xd4c] ss:$16 sps:$4 sm:$0xff]  }
 0x57c   : > { %10715 = vmatpush1.bf16.msra.mxu1 %v14037_v50  ;;  %10675 = vmatprep.subr.bf16.mxu0 %v14042_v62  ;;  %v14087_v50 = vld [vmem:[%s16125_s24 + $0xf4c] ss:$16 sps:$4 sm:$0xff]   ;;  %v14082_v62 = vld [vmem:[%s16125_s24 + $0xd48] ss:$16 sps:$4 sm:$0xff]  }
 0x57d   : > { %10716 = vmatprep.subr.bf16.mxu1 %v14045_v2  ;;  %v14085_v2 = vld [vmem:[%s16125_s24 + $0xf48] ss:$16 sps:$4 sm:$0xff]  }
 0x57f   : > { %10676 = vmatpush1.bf16.msra.mxu0 %v14040_v55  ;;  %v14090_v55 = vld [vmem:[%s16125_s24 + $0xd6c] ss:$16 sps:$4 sm:$0xff]  }
 0x580   : > { %10717 = vmatpush1.bf16.msra.mxu1 %v14043_v33  ;;  %10677 = vmatprep.subr.bf16.mxu0 %v14048_v34  ;;  %v14093_v33 = vld [vmem:[%s16125_s24 + $0xf6c] ss:$16 sps:$4 sm:$0xff]   ;;  %v14088_v34 = vld [vmem:[%s16125_s24 + $0xd68] ss:$16 sps:$4 sm:$0xff]  }
 0x581   : > { %10718 = vmatprep.subr.bf16.mxu1 %v14051_v4  ;;  %v14091_v4 = vld [vmem:[%s16125_s24 + $0xf68] ss:$16 sps:$4 sm:$0xff]  }
 0x583   : > { %10678 = vmatpush1.bf16.msra.mxu0 %v14046_v17  ;;  %v14096_v17 = vld [vmem:[%s16125_s24 + $0xd8c] ss:$16 sps:$4 sm:$0xff]  }
 0x584   : > { %10719 = vmatpush1.bf16.msra.mxu1 %v14049_v18  ;;  %10679 = vmatprep.subr.bf16.mxu0 %v14054_v27  ;;  %v14099_v18 = vld [vmem:[%s16125_s24 + $0xf8c] ss:$16 sps:$4 sm:$0xff]   ;;  %v14094_v27 = vld [vmem:[%s16125_s24 + $0xd88] ss:$16 sps:$4 sm:$0xff]  }
 0x585   : > { %10720 = vmatprep.subr.bf16.mxu1 %v14057_v28  ;;  %v10375_v36 = vpop.f32.mrb[28].mxu0  ;;  %v14097_v28 = vld [vmem:[%s16125_s24 + $0xf88] ss:$16 sps:$4 sm:$0xff]  }
 0x586   : > { %v10416_v47 = vpop.f32.mrb[28].mxu1  ;;  %v10376_v48 = vadd.f32 %v10375_v36, %v17048_v23  ;;  %v10377_v16 = vpop.f32.mrb[29].mxu0  ;;  %v14108_v36 = vld [vmem:[%s16125_s24 + $0xdcc] ss:$16 sps:$4 sm:$0xff]  }
 0x587   : > { %v10418_v20 = vpop.f32.mrb[29].mxu1  ;;  %v10378_v22 = vadd.f32 %v10377_v16, %v17052_v53  ;;  %v10379_v24 = vpop.f32.mrb[30].mxu0  ;;  %10680 = vmatpush1.bf16.msra.mxu0 %v14052_v11  ;;  %v14102_v11 = vld [vmem:[%s16125_s24 + $0xdac] ss:$16 sps:$4 sm:$0xff]   ;;  %v14109_v16 = vld [vmem:[%s16125_s24 + $0xfc8] ss:$16 sps:$4 sm:$0xff]  }
 0x588   : > { %v10420_v25 = vpop.f32.mrb[30].mxu1  ;;  %10721 = vmatpush1.bf16.msra.mxu1 %v14055_v12  ;;  %v10417_v29 = vadd.f32 %v10416_v47, %v10376_v48  ;;  %v10380_v30 = vpop.f32.mrb[31].mxu0  ;;  %10681 = vmatprep.subr.bf16.mxu0 %v14060_v15  ;;  %v14105_v12 = vld [vmem:[%s16125_s24 + $0xfac] ss:$16 sps:$4 sm:$0xff]   ;;  %v14100_v15 = vld [vmem:[%s16125_s24 + $0xda8] ss:$16 sps:$4 sm:$0xff]  }
 0x589   : > { %v10421_v23 = vpop.f32.mrb[31].mxu1  ;;  %10722 = vmatprep.subr.bf16.mxu1 %v14063_v35  ;;  %v10419_v40 = vadd.f32 %v10418_v20, %v10378_v22  ;;  %v14103_v35 = vld [vmem:[%s16125_s24 + $0xfa8] ss:$16 sps:$4 sm:$0xff]   ;;  %v14111_v47 = vld [vmem:[%s16125_s24 + $0xfcc] ss:$16 sps:$4 sm:$0xff]  }
 0x58a   : > { %v11079_v53 = vadd.f32 %v10417_v29, %v3491_v45  ;;  %v14106_v48 = vld [vmem:[%s16125_s24 + $0xdc8] ss:$16 sps:$4 sm:$0xff]   ;;  %v14114_v20 = vld [vmem:[%s16125_s24 + $0xdec] ss:$16 sps:$4 sm:$0xff]  }
 0x58b   : > { %v11080_v9 = vadd.f32 %v10419_v40, %v3492_v3  ;;  %10682 = vmatpush1.bf16.msra.mxu0 %v14058_v21  ;;  %v14117_v21 = vld [vmem:[%s16125_s24 + $0xfec] ss:$16 sps:$4 sm:$0xff]   ;;  %v14112_v45 = vld [vmem:[%s16125_s24 + $0xde8] ss:$16 sps:$4 sm:$0xff]  }
 0x58c   : > { %10723 = vmatpush1.bf16.msra.mxu1 %v14061_v26  ;;  %11083 = vst [vmem:[#allocation2] sm:$0xff] %v11079_v53  ;;  %10683 = vmatprep.subr.bf16.mxu0 %v14066_v31  ;;  %v14115_v22 = vld [vmem:[%s16125_s24 + $0xfe8] ss:$16 sps:$4 sm:$0xff]   ;;  %v14120_v3 = vld [vmem:[%s16125_s24 + $0x100c] ss:$16 sps:$4 sm:$0xff]  }
 0x58d   : > { %10724 = vmatprep.subr.bf16.mxu1 %v14069_v32  ;;  %11084 = vst [vmem:[#allocation2 + $0x8] sm:$0xff] %v11080_v9  ;;  %v14123_v24 = vld [vmem:[%s16125_s24 + $0x120c] ss:$16 sps:$4 sm:$0xff]   ;;  %v14118_v25 = vld [vmem:[%s16125_s24 + $0x1008] ss:$16 sps:$4 sm:$0xff]  }
 0x58e   : > { %v14121_v26 = vld [vmem:[%s16125_s24 + $0x1208] ss:$16 sps:$4 sm:$0xff]   ;;  %v14126_v29 = vld [vmem:[%s16125_s24 + $0x102c] ss:$16 sps:$4 sm:$0xff]  }
 0x58f   : > { %10684 = vmatpush1.bf16.msra.mxu0 %v14064_v0  ;;  %v14129_v30 = vld [vmem:[%s16125_s24 + $0x122c] ss:$16 sps:$4 sm:$0xff]   ;;  %v14124_v23 = vld [vmem:[%s16125_s24 + $0x1028] ss:$16 sps:$4 sm:$0xff]  }
 0x590   : > { %10725 = vmatpush1.bf16.msra.mxu1 %v14067_v10  ;;  %10685 = vmatprep.subr.bf16.mxu0 %v14072_v42  ;;  %v14127_v31 = vld [vmem:[%s16125_s24 + $0x1228] ss:$16 sps:$4 sm:$0xff]   ;;  %v14132_v32 = vld [vmem:[%s16125_s24 + $0x104c] ss:$16 sps:$4 sm:$0xff]  }
 0x591   : > { %10726 = vmatprep.subr.bf16.mxu1 %v14075_v46  ;;  %v14135_v40 = vld [vmem:[%s16125_s24 + $0x124c] ss:$16 sps:$4 sm:$0xff]   ;;  %v14136_v0 = vld [vmem:[%s16125_s24 + $0x1068] ss:$16 sps:$4 sm:$0xff]  }
 0x592   : > { %v14138_v53 = vld [vmem:[%s16125_s24 + $0x106c] ss:$16 sps:$4 sm:$0xff]   ;;  %v14142_v42 = vld [vmem:[%s16125_s24 + $0x1088] ss:$16 sps:$4 sm:$0xff]  }
 0x593   : > { %10686 = vmatpush1.bf16.msra.mxu0 %v14070_v44  ;;  %v14141_v9 = vld [vmem:[%s16125_s24 + $0x126c] ss:$16 sps:$4 sm:$0xff]   ;;  %v14145_v46 = vld [vmem:[%s16125_s24 + $0x1288] ss:$16 sps:$4 sm:$0xff]  }
 0x594   : > { %10727 = vmatpush1.bf16.msra.mxu1 %v14073_v1  ;;  %10687 = vmatprep.subr.bf16.mxu0 %v14078_v39  ;;  %v14147_v10 = vld [vmem:[%s16125_s24 + $0x128c] ss:$16 sps:$4 sm:$0xff]   ;;  %v14148_v39 = vld [vmem:[%s16125_s24 + $0x10a8] ss:$16 sps:$4 sm:$0xff]  }
 0x595   : > { %10728 = vmatprep.subr.bf16.mxu1 %v14081_v41  ;;  %v14150_v44 = vld [vmem:[%s16125_s24 + $0x10ac] ss:$16 sps:$4 sm:$0xff]   ;;  %v14151_v41 = vld [vmem:[%s16125_s24 + $0x12a8] ss:$16 sps:$4 sm:$0xff]  }
 0x596   : > { %v14153_v1 = vld [vmem:[%s16125_s24 + $0x12ac] ss:$16 sps:$4 sm:$0xff]  }
 0x597   : > { %10688 = vmatpush1.bf16.msra.mxu0 %v14076_v58  ;;  %v14156_v58 = vld [vmem:[%s16125_s24 + $0x10cc] ss:$16 sps:$4 sm:$0xff]  }
 0x598   : > { %10729 = vmatpush1.bf16.msra.mxu1 %v14079_v43  ;;  %10689 = vmatprep.subr.bf16.mxu0 %v14084_v49  ;;  %v14159_v43 = vld [vmem:[%s16125_s24 + $0x12cc] ss:$16 sps:$4 sm:$0xff]  }
 0x599   : > { %10730 = vmatprep.subr.bf16.mxu1 %v14087_v50 }
 0x59b   : > { %10690 = vmatpush1.bf16.msra.mxu0 %v14082_v62 }
 0x59c   : > { %10731 = vmatpush1.bf16.msra.mxu1 %v14085_v2  ;;  %10691 = vmatprep.subr.bf16.mxu0 %v14090_v55 }
 0x59d   : > { %10732 = vmatprep.subr.bf16.mxu1 %v14093_v33 }
 0x59f   : > { %10692 = vmatpush1.bf16.msra.mxu0 %v14088_v34 }
 0x5a0   : > { %10733 = vmatpush1.bf16.msra.mxu1 %v14091_v4  ;;  %10693 = vmatprep.subr.bf16.mxu0 %v14096_v17  ;;  %v14154_v17 = vld [vmem:[%s16125_s24 + $0x10c8] ss:$16 sps:$4 sm:$0xff]  }
 0x5a1   : > { %10734 = vmatprep.subr.bf16.mxu1 %v14099_v18  ;;  %v14157_v18 = vld [vmem:[%s16125_s24 + $0x12c8] ss:$16 sps:$4 sm:$0xff]  }
 0x5a3   : > { %10694 = vmatpush1.bf16.msra.mxu0 %v14094_v27 }
 0x5a4   : > { %10735 = vmatpush1.bf16.msra.mxu1 %v14097_v28  ;;  %10695 = vmatprep.subr.bf16.mxu0 %v14102_v11  ;;  %v14162_v11 = vld [vmem:[%s16125_s24 + $0x10ec] ss:$16 sps:$4 sm:$0xff]  }
 0x5a5   : > { %10736 = vmatprep.subr.bf16.mxu1 %v14105_v12  ;;  %v14165_v12 = vld [vmem:[%s16125_s24 + $0x12ec] ss:$16 sps:$4 sm:$0xff]  }
 0x5a7   : > { %10696 = vmatpush1.bf16.msra.mxu0 %v14100_v15  ;;  %v14160_v15 = vld [vmem:[%s16125_s24 + $0x10e8] ss:$16 sps:$4 sm:$0xff]  }
 0x5a8   : > { %10737 = vmatpush1.bf16.msra.mxu1 %v14103_v35  ;;  %10697 = vmatprep.subr.bf16.mxu0 %v14108_v36  ;;  %v14163_v35 = vld [vmem:[%s16125_s24 + $0x12e8] ss:$16 sps:$4 sm:$0xff]   ;;  %v14168_v36 = vld [vmem:[%s16125_s24 + $0x110c] ss:$16 sps:$4 sm:$0xff]  }
 0x5a9   : > { %10738 = vmatprep.subr.bf16.mxu1 %v14111_v47  ;;  %v14171_v47 = vld [vmem:[%s16125_s24 + $0x130c] ss:$16 sps:$4 sm:$0xff]  }
 0x5ab   : > { %10698 = vmatpush1.bf16.msra.mxu0 %v14106_v48  ;;  %v14166_v48 = vld [vmem:[%s16125_s24 + $0x1108] ss:$16 sps:$4 sm:$0xff]  }
 0x5ac   : > { %10739 = vmatpush1.bf16.msra.mxu1 %v14109_v16  ;;  %10699 = vmatprep.subr.bf16.mxu0 %v14114_v20  ;;  %v14169_v16 = vld [vmem:[%s16125_s24 + $0x1308] ss:$16 sps:$4 sm:$0xff]   ;;  %v14174_v20 = vld [vmem:[%s16125_s24 + $0x112c] ss:$16 sps:$4 sm:$0xff]  }
 0x5ad   : > { %10740 = vmatprep.subr.bf16.mxu1 %v14117_v21  ;;  %v14177_v21 = vld [vmem:[%s16125_s24 + $0x132c] ss:$16 sps:$4 sm:$0xff]  }
 0x5af   : > { %10700 = vmatpush1.bf16.msra.mxu0 %v14112_v45  ;;  %v14172_v45 = vld [vmem:[%s16125_s24 + $0x1128] ss:$16 sps:$4 sm:$0xff]  }
 0x5b0   : > { %10741 = vmatpush1.bf16.msra.mxu1 %v14115_v22  ;;  %10751 = vmatprep.subr.bf16.mxu0 %v14120_v3  ;;  %v14175_v22 = vld [vmem:[%s16125_s24 + $0x1328] ss:$16 sps:$4 sm:$0xff]   ;;  %v14180_v3 = vld [vmem:[%s16125_s24 + $0x114c] ss:$16 sps:$4 sm:$0xff]  }
 0x5b1   : > { %10792 = vmatprep.subr.bf16.mxu1 %v14123_v24  ;;  %v14183_v24 = vld [vmem:[%s16125_s24 + $0x134c] ss:$16 sps:$4 sm:$0xff]  }
 0x5b2   : > { %10702 = vmatmul.mubr.bf16.vlgmr.msra.gmra.mrb[44].mxu0 %v16483_v6  ;;  %v14130_v6 = vld [vmem:[%s16125_s24 + $0x1048] ss:$16 sps:$4 sm:$0xff]  }
 0x5b3   : > { %10743 = vmatmul.mubr.bf16.vlgmr.msra.gmra.mrb[44].mxu1 %v16487_v7  ;;  %10752 = vmatpush1.bf16.msra.mxu0 %v14118_v25  ;;  %v14133_v7 = vld [vmem:[%s16125_s24 + $0x1248] ss:$16 sps:$4 sm:$0xff]  }
 0x5b4   : > { %10793 = vmatpush1.bf16.msra.mxu1 %v14121_v26  ;;  %10753 = vmatprep.subr.bf16.mxu0 %v14126_v29  ;;  %v14178_v25 = vld [vmem:[%s16125_s24 + $0x1148] ss:$16 sps:$4 sm:$0xff]   ;;  %v14186_v29 = vld [vmem:[%s16125_s24 + $0x116c] ss:$16 sps:$4 sm:$0xff]  }
 0x5b5   : > { %10794 = vmatprep.subr.bf16.mxu1 %v14129_v30  ;;  %10783 = vmatprep.mubr.bf16.mxu0 %v16498_v51  ;;  %v14139_v51 = vld [vmem:[%s16125_s24 + $0x1268] ss:$16 sps:$4 sm:$0xff]   ;;  %v14189_v30 = vld [vmem:[%s16125_s24 + $0x136c] ss:$16 sps:$4 sm:$0xff]  }
 0x5b6   : > { %10824 = vmatprep.mubr.bf16.mxu1 %v16502_v52  ;;  %v14144_v52 = vld [vmem:[%s16125_s24 + $0x108c] ss:$16 sps:$4 sm:$0xff]   ;;  %v14181_v26 = vld [vmem:[%s16125_s24 + $0x1348] ss:$16 sps:$4 sm:$0xff]  }
 0x5b7   : > { %10754 = vmatpush1.bf16.msra.mxu0 %v14124_v23  ;;  %v14184_v23 = vld [vmem:[%s16125_s24 + $0x1168] ss:$16 sps:$4 sm:$0xff]  }
 0x5b8   : > { %10795 = vmatpush1.bf16.msra.mxu1 %v14127_v31  ;;  %10755 = vmatprep.subr.bf16.mxu0 %v14132_v32  ;;  %v14187_v31 = vld [vmem:[%s16125_s24 + $0x1368] ss:$16 sps:$4 sm:$0xff]   ;;  %v14192_v32 = vld [vmem:[%s16125_s24 + $0x118c] ss:$16 sps:$4 sm:$0xff]  }
 0x5b9   : > { %10796 = vmatprep.subr.bf16.mxu1 %v14135_v40  ;;  %v14195_v40 = vld [vmem:[%s16125_s24 + $0x138c] ss:$16 sps:$4 sm:$0xff]  }
 0x5bb   : > { %10756 = vmatpush1.bf16.msra.mxu0 %v14130_v6  ;;  %v14190_v6 = vld [vmem:[%s16125_s24 + $0x1188] ss:$16 sps:$4 sm:$0xff]  }
 0x5bc   : > { %10797 = vmatpush1.bf16.msra.mxu1 %v14133_v7  ;;  %10757 = vmatprep.subr.bf16.mxu0 %v14138_v53  ;;  %v14193_v7 = vld [vmem:[%s16125_s24 + $0x1388] ss:$16 sps:$4 sm:$0xff]   ;;  %v14198_v53 = vld [vmem:[%s16125_s24 + $0x11ac] ss:$16 sps:$4 sm:$0xff]  }
 0x5bd   : > { %10798 = vmatprep.subr.bf16.mxu1 %v14141_v9  ;;  %v14201_v9 = vld [vmem:[%s16125_s24 + $0x13ac] ss:$16 sps:$4 sm:$0xff]  }
 0x5bf   : > { %10758 = vmatpush1.bf16.msra.mxu0 %v14136_v0  ;;  %v14196_v0 = vld [vmem:[%s16125_s24 + $0x11a8] ss:$16 sps:$4 sm:$0xff]  }
 0x5c0   : > { %10799 = vmatpush1.bf16.msra.mxu1 %v14139_v51  ;;  %10759 = vmatprep.subr.bf16.mxu0 %v14144_v52  ;;  %v14199_v51 = vld [vmem:[%s16125_s24 + $0x13a8] ss:$16 sps:$4 sm:$0xff]   ;;  %v14204_v52 = vld [vmem:[%s16125_s24 + $0x11cc] ss:$16 sps:$4 sm:$0xff]  }
 0x5c1   : > { %10800 = vmatprep.subr.bf16.mxu1 %v14147_v10  ;;  %v14207_v10 = vld [vmem:[%s16125_s24 + $0x13cc] ss:$16 sps:$4 sm:$0xff]  }
 0x5c3   : > { %10760 = vmatpush1.bf16.msra.mxu0 %v14142_v42  ;;  %v14202_v42 = vld [vmem:[%s16125_s24 + $0x11c8] ss:$16 sps:$4 sm:$0xff]  }
 0x5c4   : > { %10801 = vmatpush1.bf16.msra.mxu1 %v14145_v46  ;;  %10761 = vmatprep.subr.bf16.mxu0 %v14150_v44  ;;  %v14205_v46 = vld [vmem:[%s16125_s24 + $0x13c8] ss:$16 sps:$4 sm:$0xff]   ;;  %v14210_v44 = vld [vmem:[%s16125_s24 + $0x11ec] ss:$16 sps:$4 sm:$0xff]  }
 0x5c5   : > { %10802 = vmatprep.subr.bf16.mxu1 %v14153_v1  ;;  %v10457_v49 = vpop.f32.mrb[32].mxu0  ;;  %v14213_v1 = vld [vmem:[%s16125_s24 + $0x13ec] ss:$16 sps:$4 sm:$0xff]  }
 0x5c6   : > { %v10498_v50 = vpop.f32.mrb[32].mxu1  ;;  %v10459_v2 = vpop.f32.mrb[33].mxu0 }
 0x5c7   : > { %v17188_v62 = vadd.f32 %v10498_v50, %v10457_v49  ;;  %v10500_v55 = vpop.f32.mrb[33].mxu1  ;;  %v10461_v34 = vpop.f32.mrb[34].mxu0  ;;  %10762 = vmatpush1.bf16.msra.mxu0 %v14148_v39  ;;  %v14208_v39 = vld [vmem:[%s16125_s24 + $0x11e8] ss:$16 sps:$4 sm:$0xff]  }
 0x5c8   : > { %v17190_v33 = vadd.f32 %v10500_v55, %v10459_v2  ;;  %v10502_v4 = vpop.f32.mrb[34].mxu1  ;;  %10803 = vmatpush1.bf16.msra.mxu1 %v14151_v41  ;;  %v10462_v27 = vpop.f32.mrb[35].mxu0  ;;  %10763 = vmatprep.subr.bf16.mxu0 %v14156_v58  ;;  %v14211_v41 = vld [vmem:[%s16125_s24 + $0x13e8] ss:$16 sps:$4 sm:$0xff]   ;;  %v14216_v58 = vld [vmem:[%s16125_s24 + $0x140c] ss:$16 sps:$4 sm:$0xff]  }
 0x5c9   : > { %v10503_v28 = vpop.f32.mrb[35].mxu1  ;;  %10804 = vmatprep.subr.bf16.mxu1 %v14159_v43  ;;  %v14219_v43 = vld [vmem:[%s16125_s24 + $0x160c] ss:$16 sps:$4 sm:$0xff]   ;;  %v14214_v49 = vld [vmem:[%s16125_s24 + $0x1408] ss:$16 sps:$4 sm:$0xff]  }
 0x5ca   : > { %v14217_v50 = vld [vmem:[%s16125_s24 + $0x1608] ss:$16 sps:$4 sm:$0xff]   ;;  %v14222_v2 = vld [vmem:[%s16125_s24 + $0x142c] ss:$16 sps:$4 sm:$0xff]  }
 0x5cb   : > { %10764 = vmatpush1.bf16.msra.mxu0 %v14154_v17  ;;  %v14225_v55 = vld [vmem:[%s16125_s24 + $0x162c] ss:$16 sps:$4 sm:$0xff]   ;;  %v14220_v34 = vld [vmem:[%s16125_s24 + $0x1428] ss:$16 sps:$4 sm:$0xff]  }
 0x5cc   : > { %10805 = vmatpush1.bf16.msra.mxu1 %v14157_v18  ;;  %10765 = vmatprep.subr.bf16.mxu0 %v14162_v11  ;;  %v14223_v4 = vld [vmem:[%s16125_s24 + $0x1628] ss:$16 sps:$4 sm:$0xff]   ;;  %v14228_v17 = vld [vmem:[%s16125_s24 + $0x144c] ss:$16 sps:$4 sm:$0xff]  }
 0x5cd   : > { %10806 = vmatprep.subr.bf16.mxu1 %v14165_v12  ;;  %v14231_v18 = vld [vmem:[%s16125_s24 + $0x164c] ss:$16 sps:$4 sm:$0xff]   ;;  %v14232_v11 = vld [vmem:[%s16125_s24 + $0x1468] ss:$16 sps:$4 sm:$0xff]  }
 0x5ce   : > { %v14234_v27 = vld [vmem:[%s16125_s24 + $0x146c] ss:$16 sps:$4 sm:$0xff]  }
 0x5cf   : > { %10766 = vmatpush1.bf16.msra.mxu0 %v14160_v15  ;;  %v14237_v28 = vld [vmem:[%s16125_s24 + $0x166c] ss:$16 sps:$4 sm:$0xff]   ;;  %v14238_v15 = vld [vmem:[%s16125_s24 + $0x1488] ss:$16 sps:$4 sm:$0xff]  }
 0x5d0   : > { %10807 = vmatpush1.bf16.msra.mxu1 %v14163_v35  ;;  %10767 = vmatprep.subr.bf16.mxu0 %v14168_v36  ;;  %v14243_v12 = vld [vmem:[%s16125_s24 + $0x168c] ss:$16 sps:$4 sm:$0xff]   ;;  %v14241_v35 = vld [vmem:[%s16125_s24 + $0x1688] ss:$16 sps:$4 sm:$0xff]  }
 0x5d1   : > { %10808 = vmatprep.subr.bf16.mxu1 %v14171_v47  ;;  %v14246_v36 = vld [vmem:[%s16125_s24 + $0x14ac] ss:$16 sps:$4 sm:$0xff]  }
 0x5d2   : > { %v14249_v47 = vld [vmem:[%s16125_s24 + $0x16ac] ss:$16 sps:$4 sm:$0xff]  }
 0x5d3   : > { %10768 = vmatpush1.bf16.msra.mxu0 %v14166_v48  ;;  %v14244_v48 = vld [vmem:[%s16125_s24 + $0x14a8] ss:$16 sps:$4 sm:$0xff]  }
 0x5d4   : > { %10809 = vmatpush1.bf16.msra.mxu1 %v14169_v16  ;;  %10769 = vmatprep.subr.bf16.mxu0 %v14174_v20  ;;  %v14247_v16 = vld [vmem:[%s16125_s24 + $0x16a8] ss:$16 sps:$4 sm:$0xff]   ;;  %v14252_v20 = vld [vmem:[%s16125_s24 + $0x14cc] ss:$16 sps:$4 sm:$0xff]  }
 0x5d5   : > { %10810 = vmatprep.subr.bf16.mxu1 %v14177_v21  ;;  %v14255_v21 = vld [vmem:[%s16125_s24 + $0x16cc] ss:$16 sps:$4 sm:$0xff]  }
 0x5d7   : > { %10770 = vmatpush1.bf16.msra.mxu0 %v14172_v45 }
 0x5d8   : > { %10811 = vmatpush1.bf16.msra.mxu1 %v14175_v22  ;;  %10771 = vmatprep.subr.bf16.mxu0 %v14180_v3 }
 0x5d9   : > { %10812 = vmatprep.subr.bf16.mxu1 %v14183_v24 }
 0x5db   : > { %10772 = vmatpush1.bf16.msra.mxu0 %v14178_v25 }
 0x5dc   : > { %10813 = vmatpush1.bf16.msra.mxu1 %v14181_v26  ;;  %10773 = vmatprep.subr.bf16.mxu0 %v14186_v29 }
 0x5dd   : > { %10814 = vmatprep.subr.bf16.mxu1 %v14189_v30 }
 0x5df   : > { %10774 = vmatpush1.bf16.msra.mxu0 %v14184_v23  ;;  %v14250_v23 = vld [vmem:[%s16125_s24 + $0x14c8] ss:$16 sps:$4 sm:$0xff]  }
 0x5e0   : > { %10815 = vmatpush1.bf16.msra.mxu1 %v14187_v31  ;;  %10775 = vmatprep.subr.bf16.mxu0 %v14192_v32  ;;  %v14253_v31 = vld [vmem:[%s16125_s24 + $0x16c8] ss:$16 sps:$4 sm:$0xff]  }
 0x5e1   : > { %10816 = vmatprep.subr.bf16.mxu1 %v14195_v40 }
 0x5e3   : > { %10776 = vmatpush1.bf16.msra.mxu0 %v14190_v6 }
 0x5e4   : > { %10817 = vmatpush1.bf16.msra.mxu1 %v14193_v7  ;;  %10777 = vmatprep.subr.bf16.mxu0 %v14198_v53  ;;  %v14256_v53 = vld [vmem:[%s16125_s24 + $0x14e8] ss:$16 sps:$4 sm:$0xff]  }
 0x5e5   : > { %10818 = vmatprep.subr.bf16.mxu1 %v14201_v9  ;;  %v14259_v9 = vld [vmem:[%s16125_s24 + $0x16e8] ss:$16 sps:$4 sm:$0xff]  }
 0x5e7   : > { %10778 = vmatpush1.bf16.msra.mxu0 %v14196_v0  ;;  %v14264_v0 = vld [vmem:[%s16125_s24 + $0x150c] ss:$16 sps:$4 sm:$0xff]  }
 0x5e8   : > { %10819 = vmatpush1.bf16.msra.mxu1 %v14199_v51  ;;  %10779 = vmatprep.subr.bf16.mxu0 %v14204_v52  ;;  %v14267_v51 = vld [vmem:[%s16125_s24 + $0x170c] ss:$16 sps:$4 sm:$0xff]   ;;  %v14262_v52 = vld [vmem:[%s16125_s24 + $0x1508] ss:$16 sps:$4 sm:$0xff]  }
 0x5e9   : > { %10820 = vmatprep.subr.bf16.mxu1 %v14207_v10  ;;  %v14265_v10 = vld [vmem:[%s16125_s24 + $0x1708] ss:$16 sps:$4 sm:$0xff]  }
 0x5eb   : > { %10780 = vmatpush1.bf16.msra.mxu0 %v14202_v42  ;;  %v14270_v42 = vld [vmem:[%s16125_s24 + $0x152c] ss:$16 sps:$4 sm:$0xff]  }
 0x5ec   : > { %10821 = vmatpush1.bf16.msra.mxu1 %v14205_v46  ;;  %10781 = vmatprep.subr.bf16.mxu0 %v14210_v44  ;;  %v14273_v46 = vld [vmem:[%s16125_s24 + $0x172c] ss:$16 sps:$4 sm:$0xff]   ;;  %v14268_v44 = vld [vmem:[%s16125_s24 + $0x1528] ss:$16 sps:$4 sm:$0xff]  }
 0x5ed   : > { %10822 = vmatprep.subr.bf16.mxu1 %v14213_v1  ;;  %v14271_v1 = vld [vmem:[%s16125_s24 + $0x1728] ss:$16 sps:$4 sm:$0xff]  }
 0x5ef   : > { %10782 = vmatpush1.bf16.msra.mxu0 %v14208_v39  ;;  %v14276_v39 = vld [vmem:[%s16125_s24 + $0x154c] ss:$16 sps:$4 sm:$0xff]  }
 0x5f0   : > { %10823 = vmatpush1.bf16.msra.mxu1 %v14211_v41  ;;  %10833 = vmatprep.subr.bf16.mxu0 %v14216_v58  ;;  %v14279_v41 = vld [vmem:[%s16125_s24 + $0x174c] ss:$16 sps:$4 sm:$0xff]   ;;  %v14274_v58 = vld [vmem:[%s16125_s24 + $0x1548] ss:$16 sps:$4 sm:$0xff]  }
 0x5f1   : > { %10874 = vmatprep.subr.bf16.mxu1 %v14219_v43  ;;  %v14277_v43 = vld [vmem:[%s16125_s24 + $0x1748] ss:$16 sps:$4 sm:$0xff]  }
 0x5f2   : > { %10784 = vmatmul.mubr.bf16.vlgmr.msra.gmra.mrb[48].mxu0 %v16576_v57  ;;  %v14226_v57 = vld [vmem:[%s16125_s24 + $0x1448] ss:$16 sps:$4 sm:$0xff]  }
 0x5f3   : > { %10825 = vmatmul.mubr.bf16.vlgmr.msra.gmra.mrb[48].mxu1 %v16580_v59  ;;  %10834 = vmatpush1.bf16.msra.mxu0 %v14214_v49  ;;  %v14229_v59 = vld [vmem:[%s16125_s24 + $0x1648] ss:$16 sps:$4 sm:$0xff]   ;;  %v14282_v49 = vld [vmem:[%s16125_s24 + $0x156c] ss:$16 sps:$4 sm:$0xff]  }
 0x5f4   : > { %10875 = vmatpush1.bf16.msra.mxu1 %v14217_v50  ;;  %10835 = vmatprep.subr.bf16.mxu0 %v14222_v2  ;;  %v14285_v50 = vld [vmem:[%s16125_s24 + $0x176c] ss:$16 sps:$4 sm:$0xff]   ;;  %v14280_v2 = vld [vmem:[%s16125_s24 + $0x1568] ss:$16 sps:$4 sm:$0xff]  }
 0x5f5   : > { %10876 = vmatprep.subr.bf16.mxu1 %v14225_v55  ;;  %10865 = vmatprep.mubr.bf16.mxu0 %v16592_v5  ;;  %v14235_v5 = vld [vmem:[%s16125_s24 + $0x1668] ss:$16 sps:$4 sm:$0xff]  }
 0x5f6   : > { %10906 = vmatprep.mubr.bf16.mxu1 %v16596_v8  ;;  %v14240_v8 = vld [vmem:[%s16125_s24 + $0x148c] ss:$16 sps:$4 sm:$0xff]   ;;  %v14283_v55 = vld [vmem:[%s16125_s24 + $0x1768] ss:$16 sps:$4 sm:$0xff]  }
 0x5f7   : > { %10836 = vmatpush1.bf16.msra.mxu0 %v14220_v34  ;;  %v14288_v34 = vld [vmem:[%s16125_s24 + $0x158c] ss:$16 sps:$4 sm:$0xff]  }
 0x5f8   : > { %10877 = vmatpush1.bf16.msra.mxu1 %v14223_v4  ;;  %10837 = vmatprep.subr.bf16.mxu0 %v14228_v17  ;;  %v14291_v4 = vld [vmem:[%s16125_s24 + $0x178c] ss:$16 sps:$4 sm:$0xff]   ;;  %v14286_v17 = vld [vmem:[%s16125_s24 + $0x1588] ss:$16 sps:$4 sm:$0xff]  }
 0x5f9   : > { %10878 = vmatprep.subr.bf16.mxu1 %v14231_v18  ;;  %v14289_v18 = vld [vmem:[%s16125_s24 + $0x1788] ss:$16 sps:$4 sm:$0xff]  }
 0x5fb   : > { %10838 = vmatpush1.bf16.msra.mxu0 %v14226_v57  ;;  %v14294_v57 = vld [vmem:[%s16125_s24 + $0x15ac] ss:$16 sps:$4 sm:$0xff]  }
 0x5fc   : > { %10879 = vmatpush1.bf16.msra.mxu1 %v14229_v59  ;;  %10839 = vmatprep.subr.bf16.mxu0 %v14234_v27  ;;  %v14297_v59 = vld [vmem:[%s16125_s24 + $0x17ac] ss:$16 sps:$4 sm:$0xff]   ;;  %v14292_v27 = vld [vmem:[%s16125_s24 + $0x15a8] ss:$16 sps:$4 sm:$0xff]  }
 0x5fd   : > { %10880 = vmatprep.subr.bf16.mxu1 %v14237_v28  ;;  %v14295_v28 = vld [vmem:[%s16125_s24 + $0x17a8] ss:$16 sps:$4 sm:$0xff]  }
 0x5ff   : > { %10840 = vmatpush1.bf16.msra.mxu0 %v14232_v11  ;;  %v14300_v11 = vld [vmem:[%s16125_s24 + $0x15cc] ss:$16 sps:$4 sm:$0xff]  }
 0x600   : > { %10881 = vmatpush1.bf16.msra.mxu1 %v14235_v5  ;;  %10841 = vmatprep.subr.bf16.mxu0 %v14240_v8  ;;  %v14303_v5 = vld [vmem:[%s16125_s24 + $0x17cc] ss:$16 sps:$4 sm:$0xff]   ;;  %v14298_v8 = vld [vmem:[%s16125_s24 + $0x15c8] ss:$16 sps:$4 sm:$0xff]  }
 0x601   : > { %10882 = vmatprep.subr.bf16.mxu1 %v14243_v12  ;;  %v14301_v12 = vld [vmem:[%s16125_s24 + $0x17c8] ss:$16 sps:$4 sm:$0xff]  }
 0x603   : > { %10842 = vmatpush1.bf16.msra.mxu0 %v14238_v15  ;;  %v14306_v15 = vld [vmem:[%s16125_s24 + $0x15ec] ss:$16 sps:$4 sm:$0xff]  }
 0x604   : > { %10883 = vmatpush1.bf16.msra.mxu1 %v14241_v35  ;;  %10843 = vmatprep.subr.bf16.mxu0 %v14246_v36  ;;  %v14309_v35 = vld [vmem:[%s16125_s24 + $0x17ec] ss:$16 sps:$4 sm:$0xff]   ;;  %v14304_v36 = vld [vmem:[%s16125_s24 + $0x15e8] ss:$16 sps:$4 sm:$0xff]  }
 0x605   : > { %10884 = vmatprep.subr.bf16.mxu1 %v14249_v47  ;;  %v10539_v45 = vpop.f32.mrb[36].mxu0  ;;  %v14307_v47 = vld [vmem:[%s16125_s24 + $0x17e8] ss:$16 sps:$4 sm:$0xff]  }
 0x606   : > { %v10580_v22 = vpop.f32.mrb[36].mxu1  ;;  %v10540_v3 = vadd.f32 %v10539_v45, %v17188_v62  ;;  %v10541_v24 = vpop.f32.mrb[37].mxu0  ;;  %v14258_v62 = vld [vmem:[%s16125_s24 + $0x14ec] ss:$16 sps:$4 sm:$0xff]  }
 0x607   : > { %v10582_v25 = vpop.f32.mrb[37].mxu1  ;;  %v10542_v26 = vadd.f32 %v10541_v24, %v17190_v33  ;;  %v10543_v29 = vpop.f32.mrb[38].mxu0  ;;  %10844 = vmatpush1.bf16.msra.mxu0 %v14244_v48  ;;  %v14261_v33 = vld [vmem:[%s16125_s24 + $0x16ec] ss:$16 sps:$4 sm:$0xff]   ;;  %v14319_v24 = vld [vmem:[%s16125_s24 + $0x1a28] ss:$16 sps:$4 sm:$0xff]  }
 0x608   : > { %v10584_v30 = vpop.f32.mrb[38].mxu1  ;;  %10885 = vmatpush1.bf16.msra.mxu1 %v14247_v16  ;;  %v17264_v32 = vadd.f32 %v10580_v22, %v10540_v3  ;;  %v10544_v40 = vpop.f32.mrb[39].mxu0  ;;  %10845 = vmatprep.subr.bf16.mxu0 %v14252_v20  ;;  %v14312_v48 = vld [vmem:[%s16125_s24 + $0x180c] ss:$16 sps:$4 sm:$0xff]   ;;  %v14310_v20 = vld [vmem:[%s16125_s24 + $0x1808] ss:$16 sps:$4 sm:$0xff]  }
 0x609   : > { %v10585_v6 = vpop.f32.mrb[39].mxu1  ;;  %10886 = vmatprep.subr.bf16.mxu1 %v14255_v21  ;;  %v17268_v7 = vadd.f32 %v10582_v25, %v10542_v26  ;;  %v14315_v16 = vld [vmem:[%s16125_s24 + $0x1a0c] ss:$16 sps:$4 sm:$0xff]   ;;  %v14313_v21 = vld [vmem:[%s16125_s24 + $0x1a08] ss:$16 sps:$4 sm:$0xff]  }
 0x60a   : > { %v14318_v45 = vld [vmem:[%s16125_s24 + $0x182c] ss:$16 sps:$4 sm:$0xff]   ;;  %v14316_v3 = vld [vmem:[%s16125_s24 + $0x1828] ss:$16 sps:$4 sm:$0xff]  }
 0x60b   : > { %10846 = vmatpush1.bf16.msra.mxu0 %v14250_v23  ;;  %v14321_v22 = vld [vmem:[%s16125_s24 + $0x1a2c] ss:$16 sps:$4 sm:$0xff]   ;;  %v14328_v23 = vld [vmem:[%s16125_s24 + $0x1868] ss:$16 sps:$4 sm:$0xff]  }
 0x60c   : > { %10887 = vmatpush1.bf16.msra.mxu1 %v14253_v31  ;;  %10847 = vmatprep.subr.bf16.mxu0 %v14258_v62  ;;  %v14324_v25 = vld [vmem:[%s16125_s24 + $0x184c] ss:$16 sps:$4 sm:$0xff]   ;;  %v14334_v40 = vld [vmem:[%s16125_s24 + $0x1888] ss:$16 sps:$4 sm:$0xff]  }
 0x60d   : > { %10888 = vmatprep.subr.bf16.mxu1 %v14261_v33  ;;  %v14327_v26 = vld [vmem:[%s16125_s24 + $0x1a4c] ss:$16 sps:$4 sm:$0xff]   ;;  %v14337_v6 = vld [vmem:[%s16125_s24 + $0x1a88] ss:$16 sps:$4 sm:$0xff]  }
 0x60e   : > { %v14330_v29 = vld [vmem:[%s16125_s24 + $0x186c] ss:$16 sps:$4 sm:$0xff]  }
 0x60f   : > { %10848 = vmatpush1.bf16.msra.mxu0 %v14256_v53  ;;  %v14333_v30 = vld [vmem:[%s16125_s24 + $0x1a6c] ss:$16 sps:$4 sm:$0xff]   ;;  %v14340_v53 = vld [vmem:[%s16125_s24 + $0x18a8] ss:$16 sps:$4 sm:$0xff]  }
 0x610   : > { %10889 = vmatpush1.bf16.msra.mxu1 %v14259_v9  ;;  %10849 = vmatprep.subr.bf16.mxu0 %v14264_v0  ;;  %v14339_v31 = vld [vmem:[%s16125_s24 + $0x1a8c] ss:$16 sps:$4 sm:$0xff]   ;;  %v14343_v9 = vld [vmem:[%s16125_s24 + $0x1aa8] ss:$16 sps:$4 sm:$0xff]  }
 0x611   : > { %10890 = vmatprep.subr.bf16.mxu1 %v14267_v51  ;;  %v14342_v62 = vld [vmem:[%s16125_s24 + $0x18ac] ss:$16 sps:$4 sm:$0xff]  }
 0x612   : > { %v14345_v33 = vld [vmem:[%s16125_s24 + $0x1aac] ss:$16 sps:$4 sm:$0xff]  }
 0x613   : > { %10850 = vmatpush1.bf16.msra.mxu0 %v14262_v52  ;;  %v14348_v0 = vld [vmem:[%s16125_s24 + $0x18cc] ss:$16 sps:$4 sm:$0xff]  }
 0x614   : > { %10891 = vmatpush1.bf16.msra.mxu1 %v14265_v10  ;;  %10851 = vmatprep.subr.bf16.mxu0 %v14270_v42  ;;  %v14351_v51 = vld [vmem:[%s16125_s24 + $0x1acc] ss:$16 sps:$4 sm:$0xff]  }
 0x615   : > { %10892 = vmatprep.subr.bf16.mxu1 %v14273_v46 }
 0x617   : > { %10852 = vmatpush1.bf16.msra.mxu0 %v14268_v44 }
 0x618   : > { %10893 = vmatpush1.bf16.msra.mxu1 %v14271_v1  ;;  %10853 = vmatprep.subr.bf16.mxu0 %v14276_v39 }
 0x619   : > { %10894 = vmatprep.subr.bf16.mxu1 %v14279_v41 }
 0x61b   : > { %10854 = vmatpush1.bf16.msra.mxu0 %v14274_v58  ;;  %v14346_v58 = vld [vmem:[%s16125_s24 + $0x18c8] ss:$16 sps:$4 sm:$0xff]  }
 0x61c   : > { %10895 = vmatpush1.bf16.msra.mxu1 %v14277_v43  ;;  %10855 = vmatprep.subr.bf16.mxu0 %v14282_v49  ;;  %v14349_v43 = vld [vmem:[%s16125_s24 + $0x1ac8] ss:$16 sps:$4 sm:$0xff]  }
 0x61d   : > { %10896 = vmatprep.subr.bf16.mxu1 %v14285_v50 }
 0x61f   : > { %10856 = vmatpush1.bf16.msra.mxu0 %v14280_v2 }
 0x620   : > { %10897 = vmatpush1.bf16.msra.mxu1 %v14283_v55  ;;  %10857 = vmatprep.subr.bf16.mxu0 %v14288_v34  ;;  %v14352_v34 = vld [vmem:[%s16125_s24 + $0x18e8] ss:$16 sps:$4 sm:$0xff]  }
 0x621   : > { %10898 = vmatprep.subr.bf16.mxu1 %v14291_v4  ;;  %v14355_v4 = vld [vmem:[%s16125_s24 + $0x1ae8] ss:$16 sps:$4 sm:$0xff]  }
 0x623   : > { %10858 = vmatpush1.bf16.msra.mxu0 %v14286_v17  ;;  %v14360_v17 = vld [vmem:[%s16125_s24 + $0x190c] ss:$16 sps:$4 sm:$0xff]  }
 0x624   : > { %10899 = vmatpush1.bf16.msra.mxu1 %v14289_v18  ;;  %10859 = vmatprep.subr.bf16.mxu0 %v14294_v57  ;;  %v14363_v18 = vld [vmem:[%s16125_s24 + $0x1b0c] ss:$16 sps:$4 sm:$0xff]   ;;  %v14358_v57 = vld [vmem:[%s16125_s24 + $0x1908] ss:$16 sps:$4 sm:$0xff]  }
 0x625   : > { %10900 = vmatprep.subr.bf16.mxu1 %v14297_v59  ;;  %v14361_v59 = vld [vmem:[%s16125_s24 + $0x1b08] ss:$16 sps:$4 sm:$0xff]  }
 0x627   : > { %10860 = vmatpush1.bf16.msra.mxu0 %v14292_v27  ;;  %v14366_v27 = vld [vmem:[%s16125_s24 + $0x192c] ss:$16 sps:$4 sm:$0xff]  }
 0x628   : > { %10901 = vmatpush1.bf16.msra.mxu1 %v14295_v28  ;;  %10861 = vmatprep.subr.bf16.mxu0 %v14300_v11  ;;  %v14369_v28 = vld [vmem:[%s16125_s24 + $0x1b2c] ss:$16 sps:$4 sm:$0xff]   ;;  %v14364_v11 = vld [vmem:[%s16125_s24 + $0x1928] ss:$16 sps:$4 sm:$0xff]  }
 0x629   : > { %10902 = vmatprep.subr.bf16.mxu1 %v14303_v5  ;;  %v14367_v5 = vld [vmem:[%s16125_s24 + $0x1b28] ss:$16 sps:$4 sm:$0xff]  }
 0x62b   : > { %10862 = vmatpush1.bf16.msra.mxu0 %v14298_v8  ;;  %v14372_v8 = vld [vmem:[%s16125_s24 + $0x194c] ss:$16 sps:$4 sm:$0xff]  }
 0x62c   : > { %10903 = vmatpush1.bf16.msra.mxu1 %v14301_v12  ;;  %10863 = vmatprep.subr.bf16.mxu0 %v14306_v15  ;;  %v14375_v12 = vld [vmem:[%s16125_s24 + $0x1b4c] ss:$16 sps:$4 sm:$0xff]   ;;  %v14370_v15 = vld [vmem:[%s16125_s24 + $0x1948] ss:$16 sps:$4 sm:$0xff]  }
 0x62d   : > { %10904 = vmatprep.subr.bf16.mxu1 %v14309_v35  ;;  %v14373_v35 = vld [vmem:[%s16125_s24 + $0x1b48] ss:$16 sps:$4 sm:$0xff]  }
 0x62f   : > { %10864 = vmatpush1.bf16.msra.mxu0 %v14304_v36  ;;  %v14378_v36 = vld [vmem:[%s16125_s24 + $0x196c] ss:$16 sps:$4 sm:$0xff]  }
 0x630   : > { %10905 = vmatpush1.bf16.msra.mxu1 %v14307_v47  ;;  %10915 = vmatprep.subr.bf16.mxu0 %v14312_v48  ;;  %v14381_v47 = vld [vmem:[%s16125_s24 + $0x1b6c] ss:$16 sps:$4 sm:$0xff]   ;;  %v14376_v48 = vld [vmem:[%s16125_s24 + $0x1968] ss:$16 sps:$4 sm:$0xff]  }
 0x631   : > { %10956 = vmatprep.subr.bf16.mxu1 %v14315_v16  ;;  %v14379_v16 = vld [vmem:[%s16125_s24 + $0x1b68] ss:$16 sps:$4 sm:$0xff]  }
 0x632   : > { %10866 = vmatmul.mubr.bf16.vlgmr.msra.gmra.mrb[52].mxu0 %v16672_v54  ;;  %v14322_v54 = vld [vmem:[%s16125_s24 + $0x1848] ss:$16 sps:$4 sm:$0xff]  }
 0x633   : > { %10907 = vmatmul.mubr.bf16.vlgmr.msra.gmra.mrb[52].mxu1 %v16676_v56  ;;  %10916 = vmatpush1.bf16.msra.mxu0 %v14310_v20  ;;  %v14325_v56 = vld [vmem:[%s16125_s24 + $0x1a48] ss:$16 sps:$4 sm:$0xff]   ;;  %v14384_v20 = vld [vmem:[%s16125_s24 + $0x198c] ss:$16 sps:$4 sm:$0xff]  }
 0x634   : > { %10957 = vmatpush1.bf16.msra.mxu1 %v14313_v21  ;;  %10917 = vmatprep.subr.bf16.mxu0 %v14318_v45  ;;  %v14387_v21 = vld [vmem:[%s16125_s24 + $0x1b8c] ss:$16 sps:$4 sm:$0xff]   ;;  %v14382_v45 = vld [vmem:[%s16125_s24 + $0x1988] ss:$16 sps:$4 sm:$0xff]  }
 0x635   : > { %10958 = vmatprep.subr.bf16.mxu1 %v14321_v22  ;;  %10947 = vmatprep.mubr.bf16.mxu0 %v16688_v60  ;;  %v14331_v60 = vld [vmem:[%s16125_s24 + $0x1a68] ss:$16 sps:$4 sm:$0xff]  }
 0x636   : > { %10988 = vmatprep.mubr.bf16.mxu1 %v16692_v61  ;;  %v14336_v61 = vld [vmem:[%s16125_s24 + $0x188c] ss:$16 sps:$4 sm:$0xff]   ;;  %v14385_v22 = vld [vmem:[%s16125_s24 + $0x1b88] ss:$16 sps:$4 sm:$0xff]  }
 0x637   : > { %10918 = vmatpush1.bf16.msra.mxu0 %v14316_v3  ;;  %v14390_v3 = vld [vmem:[%s16125_s24 + $0x19ac] ss:$16 sps:$4 sm:$0xff]  }
 0x638   : > { %10959 = vmatpush1.bf16.msra.mxu1 %v14319_v24  ;;  %10919 = vmatprep.subr.bf16.mxu0 %v14324_v25  ;;  %v14393_v24 = vld [vmem:[%s16125_s24 + $0x1bac] ss:$16 sps:$4 sm:$0xff]   ;;  %v14388_v25 = vld [vmem:[%s16125_s24 + $0x19a8] ss:$16 sps:$4 sm:$0xff]  }
 0x639   : > { %10960 = vmatprep.subr.bf16.mxu1 %v14327_v26  ;;  %v14391_v26 = vld [vmem:[%s16125_s24 + $0x1ba8] ss:$16 sps:$4 sm:$0xff]  }
 0x63b   : > { %10920 = vmatpush1.bf16.msra.mxu0 %v14322_v54  ;;  %v14396_v54 = vld [vmem:[%s16125_s24 + $0x19cc] ss:$16 sps:$4 sm:$0xff]  }
 0x63c   : > { %10961 = vmatpush1.bf16.msra.mxu1 %v14325_v56  ;;  %10921 = vmatprep.subr.bf16.mxu0 %v14330_v29  ;;  %v14399_v56 = vld [vmem:[%s16125_s24 + $0x1bcc] ss:$16 sps:$4 sm:$0xff]   ;;  %v14394_v29 = vld [vmem:[%s16125_s24 + $0x19c8] ss:$16 sps:$4 sm:$0xff]  }
 0x63d   : > { %10962 = vmatprep.subr.bf16.mxu1 %v14333_v30  ;;  %v14397_v30 = vld [vmem:[%s16125_s24 + $0x1bc8] ss:$16 sps:$4 sm:$0xff]  }
 0x63f   : > { %10922 = vmatpush1.bf16.msra.mxu0 %v14328_v23  ;;  %v14402_v23 = vld [vmem:[%s16125_s24 + $0x19ec] ss:$16 sps:$4 sm:$0xff]  }
 0x640   : > { %10963 = vmatpush1.bf16.msra.mxu1 %v14331_v60  ;;  %10923 = vmatprep.subr.bf16.mxu0 %v14336_v61  ;;  %v14405_v60 = vld [vmem:[%s16125_s24 + $0x1bec] ss:$16 sps:$4 sm:$0xff]   ;;  %v14400_v61 = vld [vmem:[%s16125_s24 + $0x19e8] ss:$16 sps:$4 sm:$0xff]  }
 0x641   : > { %10964 = vmatprep.subr.bf16.mxu1 %v14339_v31  ;;  %v14403_v31 = vld [vmem:[%s16125_s24 + $0x1be8] ss:$16 sps:$4 sm:$0xff]  }
 0x643   : > { %10924 = vmatpush1.bf16.msra.mxu0 %v14334_v40  ;;  %v14408_v40 = vld [vmem:[%s16125_s24 + $0x1c0c] ss:$16 sps:$4 sm:$0xff]  }
 0x644   : > { %10965 = vmatpush1.bf16.msra.mxu1 %v14337_v6  ;;  %10925 = vmatprep.subr.bf16.mxu0 %v14342_v62  ;;  %v14411_v6 = vld [vmem:[%s16125_s24 + $0x1e0c] ss:$16 sps:$4 sm:$0xff]   ;;  %v14406_v62 = vld [vmem:[%s16125_s24 + $0x1c08] ss:$16 sps:$4 sm:$0xff]  }
 0x645   : > { %10966 = vmatprep.subr.bf16.mxu1 %v14345_v33  ;;  %v10621_v52 = vpop.f32.mrb[40].mxu0  ;;  %v14409_v33 = vld [vmem:[%s16125_s24 + $0x1e08] ss:$16 sps:$4 sm:$0xff]  }
 0x646   : > { %v10662_v10 = vpop.f32.mrb[40].mxu1  ;;  %v10622_v42 = vadd.f32 %v10621_v52, %v17264_v32  ;;  %v10623_v46 = vpop.f32.mrb[41].mxu0  ;;  %v14354_v32 = vld [vmem:[%s16125_s24 + $0x18ec] ss:$16 sps:$4 sm:$0xff]  }
 0x647   : > { %v10664_v44 = vpop.f32.mrb[41].mxu1  ;;  %v10624_v1 = vadd.f32 %v10623_v46, %v17268_v7  ;;  %v10625_v39 = vpop.f32.mrb[42].mxu0  ;;  %10926 = vmatpush1.bf16.msra.mxu0 %v14340_v53  ;;  %v14357_v7 = vld [vmem:[%s16125_s24 + $0x1aec] ss:$16 sps:$4 sm:$0xff]  }
 0x648   : > { %v10666_v41 = vpop.f32.mrb[42].mxu1  ;;  %10967 = vmatpush1.bf16.msra.mxu1 %v14343_v9  ;;  %v17338_v49 = vadd.f32 %v10662_v10, %v10622_v42  ;;  %v10626_v50 = vpop.f32.mrb[43].mxu0  ;;  %10927 = vmatprep.subr.bf16.mxu0 %v14348_v0  ;;  %v14414_v53 = vld [vmem:[%s16125_s24 + $0x1c2c] ss:$16 sps:$4 sm:$0xff]   ;;  %v14412_v0 = vld [vmem:[%s16125_s24 + $0x1c28] ss:$16 sps:$4 sm:$0xff]  }
 0x649   : > { %v10667_v2 = vpop.f32.mrb[43].mxu1  ;;  %10968 = vmatprep.subr.bf16.mxu1 %v14351_v51  ;;  %v17342_v55 = vadd.f32 %v10664_v44, %v10624_v1  ;;  %v14417_v9 = vld [vmem:[%s16125_s24 + $0x1e2c] ss:$16 sps:$4 sm:$0xff]   ;;  %v14415_v51 = vld [vmem:[%s16125_s24 + $0x1e28] ss:$16 sps:$4 sm:$0xff]  }
 0x64a   : > { %v14420_v52 = vld [vmem:[%s16125_s24 + $0x1c4c] ss:$16 sps:$4 sm:$0xff]   ;;  %v14424_v44 = vld [vmem:[%s16125_s24 + $0x1c68] ss:$16 sps:$4 sm:$0xff]  }
 0x64b   : > { %10928 = vmatpush1.bf16.msra.mxu0 %v14346_v58  ;;  %v14423_v10 = vld [vmem:[%s16125_s24 + $0x1e4c] ss:$16 sps:$4 sm:$0xff]   ;;  %v14430_v39 = vld [vmem:[%s16125_s24 + $0x1c88] ss:$16 sps:$4 sm:$0xff]  }
 0x64c   : > { %10969 = vmatpush1.bf16.msra.mxu1 %v14349_v43  ;;  %10929 = vmatprep.subr.bf16.mxu0 %v14354_v32  ;;  %v14426_v42 = vld [vmem:[%s16125_s24 + $0x1c6c] ss:$16 sps:$4 sm:$0xff]   ;;  %v14433_v41 = vld [vmem:[%s16125_s24 + $0x1e88] ss:$16 sps:$4 sm:$0xff]  }
 0x64d   : > { %10970 = vmatprep.subr.bf16.mxu1 %v14357_v7  ;;  %v14429_v46 = vld [vmem:[%s16125_s24 + $0x1e6c] ss:$16 sps:$4 sm:$0xff]   ;;  %v14436_v50 = vld [vmem:[%s16125_s24 + $0x1ca8] ss:$16 sps:$4 sm:$0xff]  }
 0x64e   : > { %v14435_v1 = vld [vmem:[%s16125_s24 + $0x1e8c] ss:$16 sps:$4 sm:$0xff]   ;;  %v14439_v2 = vld [vmem:[%s16125_s24 + $0x1ea8] ss:$16 sps:$4 sm:$0xff]  }
 0x64f   : > { %10930 = vmatpush1.bf16.msra.mxu0 %v14352_v34  ;;  %v14438_v58 = vld [vmem:[%s16125_s24 + $0x1cac] ss:$16 sps:$4 sm:$0xff]  }
 0x650   : > { %10971 = vmatpush1.bf16.msra.mxu1 %v14355_v4  ;;  %10931 = vmatprep.subr.bf16.mxu0 %v14360_v17  ;;  %v14441_v43 = vld [vmem:[%s16125_s24 + $0x1eac] ss:$16 sps:$4 sm:$0xff]  }
 0x651   : > { %10972 = vmatprep.subr.bf16.mxu1 %v14363_v18  ;;  %v14444_v32 = vld [vmem:[%s16125_s24 + $0x1ccc] ss:$16 sps:$4 sm:$0xff]  }
 0x652   : > { %v14447_v7 = vld [vmem:[%s16125_s24 + $0x1ecc] ss:$16 sps:$4 sm:$0xff]  }
 0x653   : > { %10932 = vmatpush1.bf16.msra.mxu0 %v14358_v57 }
 0x654   : > { %10973 = vmatpush1.bf16.msra.mxu1 %v14361_v59  ;;  %10933 = vmatprep.subr.bf16.mxu0 %v14366_v27 }
 0x655   : > { %10974 = vmatprep.subr.bf16.mxu1 %v14369_v28 }
 0x657   : > { %10934 = vmatpush1.bf16.msra.mxu0 %v14364_v11  ;;  %v14442_v11 = vld [vmem:[%s16125_s24 + $0x1cc8] ss:$16 sps:$4 sm:$0xff]  }
 0x658   : > { %10975 = vmatpush1.bf16.msra.mxu1 %v14367_v5  ;;  %10935 = vmatprep.subr.bf16.mxu0 %v14372_v8  ;;  %v14445_v5 = vld [vmem:[%s16125_s24 + $0x1ec8] ss:$16 sps:$4 sm:$0xff]  }
 0x659   : > { %10976 = vmatprep.subr.bf16.mxu1 %v14375_v12 }
 0x65b   : > { %10936 = vmatpush1.bf16.msra.mxu0 %v14370_v15 }
 0x65c   : > { %10977 = vmatpush1.bf16.msra.mxu1 %v14373_v35  ;;  %10937 = vmatprep.subr.bf16.mxu0 %v14378_v36  ;;  %v14448_v36 = vld [vmem:[%s16125_s24 + $0x1ce8] ss:$16 sps:$4 sm:$0xff]  }
 0x65d   : > { %10978 = vmatprep.subr.bf16.mxu1 %v14381_v47  ;;  %v14451_v47 = vld [vmem:[%s16125_s24 + $0x1ee8] ss:$16 sps:$4 sm:$0xff]  }
 0x65f   : > { %10938 = vmatpush1.bf16.msra.mxu0 %v14376_v48  ;;  %v14456_v48 = vld [vmem:[%s16125_s24 + $0x1d0c] ss:$16 sps:$4 sm:$0xff]  }
 0x660   : > { %10979 = vmatpush1.bf16.msra.mxu1 %v14379_v16  ;;  %10939 = vmatprep.subr.bf16.mxu0 %v14384_v20  ;;  %v14459_v16 = vld [vmem:[%s16125_s24 + $0x1f0c] ss:$16 sps:$4 sm:$0xff]   ;;  %v14454_v20 = vld [vmem:[%s16125_s24 + $0x1d08] ss:$16 sps:$4 sm:$0xff]  }
 0x661   : > { %10980 = vmatprep.subr.bf16.mxu1 %v14387_v21  ;;  %v14457_v21 = vld [vmem:[%s16125_s24 + $0x1f08] ss:$16 sps:$4 sm:$0xff]  }
 0x663   : > { %10940 = vmatpush1.bf16.msra.mxu0 %v14382_v45  ;;  %v14462_v45 = vld [vmem:[%s16125_s24 + $0x1d2c] ss:$16 sps:$4 sm:$0xff]  }
 0x664   : > { %10981 = vmatpush1.bf16.msra.mxu1 %v14385_v22  ;;  %10941 = vmatprep.subr.bf16.mxu0 %v14390_v3  ;;  %v14465_v22 = vld [vmem:[%s16125_s24 + $0x1f2c] ss:$16 sps:$4 sm:$0xff]   ;;  %v14460_v3 = vld [vmem:[%s16125_s24 + $0x1d28] ss:$16 sps:$4 sm:$0xff]  }
 0x665   : > { %10982 = vmatprep.subr.bf16.mxu1 %v14393_v24  ;;  %v14463_v24 = vld [vmem:[%s16125_s24 + $0x1f28] ss:$16 sps:$4 sm:$0xff]  }
 0x667   : > { %10942 = vmatpush1.bf16.msra.mxu0 %v14388_v25  ;;  %v14468_v25 = vld [vmem:[%s16125_s24 + $0x1d4c] ss:$16 sps:$4 sm:$0xff]  }
 0x668   : > { %10983 = vmatpush1.bf16.msra.mxu1 %v14391_v26  ;;  %10943 = vmatprep.subr.bf16.mxu0 %v14396_v54  ;;  %v14471_v26 = vld [vmem:[%s16125_s24 + $0x1f4c] ss:$16 sps:$4 sm:$0xff]   ;;  %v14466_v54 = vld [vmem:[%s16125_s24 + $0x1d48] ss:$16 sps:$4 sm:$0xff]  }
 0x669   : > { %10984 = vmatprep.subr.bf16.mxu1 %v14399_v56  ;;  %v14469_v56 = vld [vmem:[%s16125_s24 + $0x1f48] ss:$16 sps:$4 sm:$0xff]  }
 0x66b   : > { %10944 = vmatpush1.bf16.msra.mxu0 %v14394_v29  ;;  %v14474_v29 = vld [vmem:[%s16125_s24 + $0x1d6c] ss:$16 sps:$4 sm:$0xff]  }
 0x66c   : > { %10985 = vmatpush1.bf16.msra.mxu1 %v14397_v30  ;;  %10945 = vmatprep.subr.bf16.mxu0 %v14402_v23  ;;  %v14477_v30 = vld [vmem:[%s16125_s24 + $0x1f6c] ss:$16 sps:$4 sm:$0xff]   ;;  %v14472_v23 = vld [vmem:[%s16125_s24 + $0x1d68] ss:$16 sps:$4 sm:$0xff]  }
 0x66d   : > { %10986 = vmatprep.subr.bf16.mxu1 %v14405_v60  ;;  %v14475_v60 = vld [vmem:[%s16125_s24 + $0x1f68] ss:$16 sps:$4 sm:$0xff]  }
 0x66f   : > { %10946 = vmatpush1.bf16.msra.mxu0 %v14400_v61  ;;  %v14480_v61 = vld [vmem:[%s16125_s24 + $0x1d8c] ss:$16 sps:$4 sm:$0xff]  }
 0x670   : > { %10987 = vmatpush1.bf16.msra.mxu1 %v14403_v31  ;;  %10997 = vmatprep.subr.bf16.mxu0 %v14408_v40  ;;  %v14483_v31 = vld [vmem:[%s16125_s24 + $0x1f8c] ss:$16 sps:$4 sm:$0xff]   ;;  %v14478_v40 = vld [vmem:[%s16125_s24 + $0x1d88] ss:$16 sps:$4 sm:$0xff]  }
 0x671   : > { %11038 = vmatprep.subr.bf16.mxu1 %v14411_v6  ;;  %v14481_v6 = vld [vmem:[%s16125_s24 + $0x1f88] ss:$16 sps:$4 sm:$0xff]  }
 0x672   : > { %10948 = vmatmul.mubr.bf16.vlgmr.msra.gmra.mrb[56].mxu0 %v16774_v13  ;;  %v14418_v13 = vld [vmem:[%s16125_s24 + $0x1c48] ss:$16 sps:$4 sm:$0xff]  }
 0x673   : > { %10989 = vmatmul.mubr.bf16.vlgmr.msra.gmra.mrb[56].mxu1 %v16778_v14  ;;  %10998 = vmatpush1.bf16.msra.mxu0 %v14406_v62  ;;  %v14421_v14 = vld [vmem:[%s16125_s24 + $0x1e48] ss:$16 sps:$4 sm:$0xff]   ;;  %v14486_v62 = vld [vmem:[%s16125_s24 + $0x1dac] ss:$16 sps:$4 sm:$0xff]  }
 0x674   : > { %11039 = vmatpush1.bf16.msra.mxu1 %v14409_v33  ;;  %10999 = vmatprep.subr.bf16.mxu0 %v14414_v53  ;;  %v14489_v33 = vld [vmem:[%s16125_s24 + $0x1fac] ss:$16 sps:$4 sm:$0xff]   ;;  %v14484_v53 = vld [vmem:[%s16125_s24 + $0x1da8] ss:$16 sps:$4 sm:$0xff]  }
 0x675   : > { %11040 = vmatprep.subr.bf16.mxu1 %v14417_v9  ;;  %11029 = vmatprep.mubr.bf16.mxu0 %v16784_v19  ;;  %v14427_v19 = vld [vmem:[%s16125_s24 + $0x1e68] ss:$16 sps:$4 sm:$0xff]  }
 0x676   : > { %11070 = vmatprep.mubr.bf16.mxu1 %v16788_v63  ;;  %v14432_v63 = vld [vmem:[%s16125_s24 + $0x1c8c] ss:$16 sps:$4 sm:$0xff]   ;;  %v14487_v9 = vld [vmem:[%s16125_s24 + $0x1fa8] ss:$16 sps:$4 sm:$0xff]  }
 0x677   : > { %11000 = vmatpush1.bf16.msra.mxu0 %v14412_v0  ;;  %v14492_v0 = vld [vmem:[%s16125_s24 + $0x1dcc] ss:$16 sps:$4 sm:$0xff]  }
 0x678   : > { %11041 = vmatpush1.bf16.msra.mxu1 %v14415_v51  ;;  %11001 = vmatprep.subr.bf16.mxu0 %v14420_v52  ;;  %v14495_v51 = vld [vmem:[%s16125_s24 + $0x1fcc] ss:$16 sps:$4 sm:$0xff]   ;;  %v14490_v52 = vld [vmem:[%s16125_s24 + $0x1dc8] ss:$16 sps:$4 sm:$0xff]  }
 0x679   : > { %11042 = vmatprep.subr.bf16.mxu1 %v14423_v10  ;;  %v14493_v10 = vld [vmem:[%s16125_s24 + $0x1fc8] ss:$16 sps:$4 sm:$0xff]  }
 0x67b   : > { %11002 = vmatpush1.bf16.msra.mxu0 %v14418_v13  ;;  %v14498_v13 = vld [vmem:[%s16125_s24 + $0x1dec] ss:$16 sps:$4 sm:$0xff]  }
 0x67c   : > { %11043 = vmatpush1.bf16.msra.mxu1 %v14421_v14  ;;  %11003 = vmatprep.subr.bf16.mxu0 %v14426_v42  ;;  %v14501_v14 = vld [vmem:[%s16125_s24 + $0x1fec] ss:$16 sps:$4 sm:$0xff]   ;;  %v14496_v42 = vld [vmem:[%s16125_s24 + $0x1de8] ss:$16 sps:$4 sm:$0xff]  }
 0x67d   : > { %11044 = vmatprep.subr.bf16.mxu1 %v14429_v46  ;;  %v14499_v46 = vld [vmem:[%s16125_s24 + $0x1fe8] ss:$16 sps:$4 sm:$0xff]  }
 0x67f   : > { %11004 = vmatpush1.bf16.msra.mxu0 %v14424_v44 }
 0x680   : > { %11045 = vmatpush1.bf16.msra.mxu1 %v14427_v19  ;;  %11005 = vmatprep.subr.bf16.mxu0 %v14432_v63 }
 0x681   : > { %11046 = vmatprep.subr.bf16.mxu1 %v14435_v1 }
 0x683   : > { %11006 = vmatpush1.bf16.msra.mxu0 %v14430_v39 }
 0x684   : > { %11047 = vmatpush1.bf16.msra.mxu1 %v14433_v41  ;;  %11007 = vmatprep.subr.bf16.mxu0 %v14438_v58 }
 0x685   : > { %11048 = vmatprep.subr.bf16.mxu1 %v14441_v43  ;;  %v10703_v34 = vpop.f32.mrb[44].mxu0 }
 0x686   : > { %v10744_v4 = vpop.f32.mrb[44].mxu1  ;;  %v10704_v17 = vadd.f32 %v10703_v34, %v17338_v49  ;;  %v10705_v18 = vpop.f32.mrb[45].mxu0  ;;  %v14450_v49 = vld [vmem:[%s16125_s24 + $0x1cec] ss:$16 sps:$4 sm:$0xff]  }
 0x687   : > { %v10746_v57 = vpop.f32.mrb[45].mxu1  ;;  %v10706_v59 = vadd.f32 %v10705_v18, %v17342_v55  ;;  %v10707_v27 = vpop.f32.mrb[46].mxu0  ;;  %11008 = vmatpush1.bf16.msra.mxu0 %v14436_v50  ;;  %v14453_v55 = vld [vmem:[%s16125_s24 + $0x1eec] ss:$16 sps:$4 sm:$0xff]  }
 0x688   : > { %v10748_v28 = vpop.f32.mrb[46].mxu1  ;;  %11049 = vmatpush1.bf16.msra.mxu1 %v14439_v2  ;;  %v17412_v8 = vadd.f32 %v10744_v4, %v10704_v17  ;;  %v10708_v12 = vpop.f32.mrb[47].mxu0  ;;  %11009 = vmatprep.subr.bf16.mxu0 %v14444_v32 }
 0x689   : > { %v10749_v15 = vpop.f32.mrb[47].mxu1  ;;  %11050 = vmatprep.subr.bf16.mxu1 %v14447_v7  ;;  %v17416_v35 = vadd.f32 %v10746_v57, %v10706_v59 }
 0x68b   : > { %11010 = vmatpush1.bf16.msra.mxu0 %v14442_v11 }
 0x68c   : > { %11051 = vmatpush1.bf16.msra.mxu1 %v14445_v5  ;;  %11011 = vmatprep.subr.bf16.mxu0 %v14450_v49 }
 0x68d   : > { %11052 = vmatprep.subr.bf16.mxu1 %v14453_v55 }
 0x68f   : > { %11012 = vmatpush1.bf16.msra.mxu0 %v14448_v36 }
 0x690   : > { %11053 = vmatpush1.bf16.msra.mxu1 %v14451_v47  ;;  %11013 = vmatprep.subr.bf16.mxu0 %v14456_v48 }
 0x691   : > { %11054 = vmatprep.subr.bf16.mxu1 %v14459_v16 }
 0x693   : > { %11014 = vmatpush1.bf16.msra.mxu0 %v14454_v20 }
 0x694   : > { %11055 = vmatpush1.bf16.msra.mxu1 %v14457_v21  ;;  %11015 = vmatprep.subr.bf16.mxu0 %v14462_v45 }
 0x695   : > { %11056 = vmatprep.subr.bf16.mxu1 %v14465_v22 }
 0x697   : > { %11016 = vmatpush1.bf16.msra.mxu0 %v14460_v3 }
 0x698   : > { %11057 = vmatpush1.bf16.msra.mxu1 %v14463_v24  ;;  %11017 = vmatprep.subr.bf16.mxu0 %v14468_v25 }
 0x699   : > { %11058 = vmatprep.subr.bf16.mxu1 %v14471_v26  ;;  %v3493_v26 = vld [vmem:[#allocation2 + $0x10] sm:$0xff] }
 0x69b   : > { %11018 = vmatpush1.bf16.msra.mxu0 %v14466_v54 }
 0x69c   : > { %11059 = vmatpush1.bf16.msra.mxu1 %v14469_v56  ;;  %11019 = vmatprep.subr.bf16.mxu0 %v14474_v29 }
 0x69d   : > { %11060 = vmatprep.subr.bf16.mxu1 %v14477_v30 }
 0x69f   : > { %11020 = vmatpush1.bf16.msra.mxu0 %v14472_v23  ;;  %v3494_v23 = vld [vmem:[#allocation2 + $0x18] sm:$0xff] }
 0x6a0   : > { %11061 = vmatpush1.bf16.msra.mxu1 %v14475_v60  ;;  %11021 = vmatprep.subr.bf16.mxu0 %v14480_v61 }
 0x6a1   : > { %11062 = vmatprep.subr.bf16.mxu1 %v14483_v31 }
 0x6a3   : > { %11022 = vmatpush1.bf16.msra.mxu0 %v14478_v40 }
 0x6a4   : > { %11063 = vmatpush1.bf16.msra.mxu1 %v14481_v6  ;;  %11023 = vmatprep.subr.bf16.mxu0 %v14486_v62  ;;  %v11108_v62 = vld [vmem:[%s16133_s18 + $0x8] sm:$0xff] (!%p12641_p3) }
 0x6a5   : > { %11064 = vmatprep.subr.bf16.mxu1 %v14489_v33  ;;  %v11110_v33 = vld [vmem:[%s16133_s18 + $0x18] sm:$0xff] (!%p12641_p3) }
 0x6a7   : > { %11024 = vmatpush1.bf16.msra.mxu0 %v14484_v53  ;;  %v11172_v53 = vld [vmem:[%s16133_s18 + $0x208] sm:$0xff] (!%p12641_p3) }
 0x6a8   : > { %11065 = vmatpush1.bf16.msra.mxu1 %v14487_v9  ;;  %11025 = vmatprep.subr.bf16.mxu0 %v14492_v0  ;;  %v12653_v9 = vpack.c.bf16 (!%p12641_p3), %v11110_v33, %v11108_v62  ;;  %v11174_v0 = vld [vmem:[%s16133_s18 + $0x218] sm:$0xff] (!%p12641_p3)  ;;  %v11127_v33 = vld [vmem:[%s16133_s18 + $0xa0] sm:$0xff] (!%p12641_p3) }
 0x6a9   : > { %11066 = vmatprep.subr.bf16.mxu1 %v14495_v51  ;;  %v11107_v51 = vld [vmem:[%s16133_s18] sm:$0xff] (!%p12641_p3) }
 0x6ab   : > { %11026 = vmatpush1.bf16.msra.mxu0 %v14490_v52  ;;  %v11109_v52 = vld [vmem:[%s16133_s18 + $0x10] sm:$0xff] (!%p12641_p3) }
 0x6ac   : > { %11067 = vmatpush1.bf16.msra.mxu1 %v14493_v10  ;;  %11027 = vmatprep.subr.bf16.mxu0 %v14498_v13  ;;  %v12717_v10 = vpack.c.bf16 (!%p12641_p3), %v11174_v0, %v11172_v53  ;;  %v12655_v13 = vpack.c.bf16 (!%p12641_p3), %v11109_v52, %v11107_v51  ;;  %v11129_v53 = vld [vmem:[%s16133_s18 + $0xb0] sm:$0xff] (!%p12641_p3)  ;;  %v11132_v52 = vld [vmem:[%s16133_s18 + $0xc8] sm:$0xff] (!%p12641_p3) }
 0x6ad   : > { %11068 = vmatprep.subr.bf16.mxu1 %v14501_v14  ;;  %v11171_v14 = vld [vmem:[%s16133_s18 + $0x200] sm:$0xff] (!%p12641_p3)  ;;  %v11193_v51 = vld [vmem:[%s16133_s18 + $0x2b0] sm:$0xff] (!%p12641_p3) }
 0x6af   : > { %11028 = vmatpush1.bf16.msra.mxu0 %v14496_v42  ;;  %v11173_v42 = vld [vmem:[%s16133_s18 + $0x210] sm:$0xff] (!%p12641_p3) }
 0x6b0   : > { %11069 = vmatpush1.bf16.msra.mxu1 %v14499_v46  ;;  %v11112_v46 = vld [vmem:[%s16133_s18 + $0x28] sm:$0xff] (!%p12641_p3)  ;;  %12718 = vmatprep.subr.bf16.mxu0 (!%p12641_p3), %v12717_v10  ;;  %v11134_v10 = vld [vmem:[%s16133_s18 + $0xd8] sm:$0xff] (!%p12641_p3) }
 0x6b1   : > { %12654 = vmatprep.subr.bf16.mxu1 (!%p12641_p3), %v12653_v9  ;;  %v11191_v9 = vld [vmem:[%s16133_s18 + $0x2a0] sm:$0xff] (!%p12641_p3) }
 0x6b2   : > { %11030 = vmatmul.mubr.bf16.vlgmr.msra.gmra.mrb[60].mxu0 %v16864_v37 }
 0x6b3   : > { %11071 = vmatmul.mubr.bf16.vlgmr.msra.gmra.mrb[60].mxu1 %v16868_v38 }
 0x6b4   : > { %12656 = vmatpush1.bf16.msra.mxu1 (!%p12641_p3), %v12655_v13  ;;  %v11196_v13 = vld [vmem:[%s16133_s18 + $0x2c8] sm:$0xff] (!%p12641_p3) }
 0x6c5   : > { %v10785_v44 = vpop.f32.mrb[48].mxu0 }
 0x6c6   : > { %v10826_v19 = vpop.f32.mrb[48].mxu1  ;;  %v10786_v63 = vadd.f32 %v10785_v44, %v17412_v8  ;;  %v10787_v1 = vpop.f32.mrb[49].mxu0  ;;  %v12719_v44 = vpack.c.bf16 (!%p12641_p3), %v11173_v42, %v11171_v14  ;;  %v11198_v14 = vld [vmem:[%s16133_s18 + $0x2d8] sm:$0xff] (!%p12641_p3)  ;;  %v12675_v42 = vpack.c.bf16 (!%p12641_p3), %v11129_v53, %v11127_v33  ;;  %v11213_v33 = vld [vmem:[%s16133_s18 + $0x350] sm:$0xff] (!%p12641_p3)  ;;  %v11152_v53 = vld [vmem:[%s16133_s18 + $0x168] sm:$0xff] (!%p12641_p3) }
 0x6c7   : > { %v10828_v39 = vpop.f32.mrb[49].mxu1  ;;  %v10788_v41 = vadd.f32 %v10787_v1, %v17416_v35  ;;  %v10789_v58 = vpop.f32.mrb[50].mxu0  ;;  %v11178_v1 = vld [vmem:[%s16133_s18 + $0x238] sm:$0xff] (!%p12641_p3) }
 0x6c8   : > { %v10830_v43 = vpop.f32.mrb[50].mxu1  ;;  %v10827_v50 = vadd.f32 %v10826_v19, %v10786_v63  ;;  %v10790_v2 = vpop.f32.mrb[51].mxu0  ;;  %v11114_v19 = vld [vmem:[%s16133_s18 + $0x38] sm:$0xff] (!%p12641_p3)  ;;  %v11176_v63 = vld [vmem:[%s16133_s18 + $0x228] sm:$0xff] (!%p12641_p3)  ;;  %v11111_v58 = vld [vmem:[%s16133_s18 + $0x20] sm:$0xff] (!%p12641_p3)  ;;  %12720 = vmatpush1.bf16.msra.mxu0 (!%p12641_p3), %v12719_v44  ;;  %v12677_v44 = vpack.c.bf16 (!%p12641_p3), %v11134_v10, %v11132_v52 }
 0x6c9   : > { %v10831_v32 = vpop.f32.mrb[51].mxu1  ;;  %v10829_v7 = vadd.f32 %v10828_v39, %v10788_v41  ;;  %v12657_v39 = vpack.c.bf16 (!%p12641_p3), %v11114_v19, %v11112_v46  ;;  %v12721_v41 = vpack.c.bf16 (!%p12641_p3), %v11178_v1, %v11176_v63  ;;  %v11113_v43 = vld [vmem:[%s16133_s18 + $0x30] sm:$0xff] (!%p12641_p3)  ;;  %v12739_v46 = vpack.c.bf16 (!%p12641_p3), %v11193_v51, %v11191_v9  ;;  %v11131_v19 = vld [vmem:[%s16133_s18 + $0xc0] sm:$0xff] (!%p12641_p3)  ;;  %v11154_v9 = vld [vmem:[%s16133_s18 + $0x178] sm:$0xff] (!%p12641_p3) }
 0x6ca   : > { %v12659_v2 = vpack.c.bf16 (!%p12641_p3), %v11113_v43, %v11111_v58  ;;  %v11177_v32 = vld [vmem:[%s16133_s18 + $0x230] sm:$0xff] (!%p12641_p3)  ;;  %v11195_v1 = vld [vmem:[%s16133_s18 + $0x2c0] sm:$0xff] (!%p12641_p3)  ;;  %v11136_v58 = vld [vmem:[%s16133_s18 + $0xe8] sm:$0xff] (!%p12641_p3) }
 0x6cb   : > { %12658 = vmatprep.subr.bf16.mxu1 (!%p12641_p3), %v12657_v39  ;;  %12722 = vmatprep.subr.bf16.mxu0 (!%p12641_p3), %v12721_v41  ;;  %v11133_v63 = vld [vmem:[%s16133_s18 + $0xd0] sm:$0xff] (!%p12641_p3)  ;;  %v12741_v39 = vpack.c.bf16 (!%p12641_p3), %v11198_v14, %v11196_v13  ;;  %v11138_v43 = vld [vmem:[%s16133_s18 + $0xf8] sm:$0xff] (!%p12641_p3)  ;;  %v11151_v10 = vld [vmem:[%s16133_s18 + $0x160] sm:$0xff] (!%p12641_p3)  ;;  %v12697_v14 = vpack.c.bf16 (!%p12641_p3), %v11154_v9, %v11152_v53 }
 0x6cc   : > { %12660 = vmatpush1.bf16.msra.mxu1 (!%p12641_p3), %v12659_v2  ;;  %v11197_v41 = vld [vmem:[%s16133_s18 + $0x2d0] sm:$0xff] (!%p12641_p3)  ;;  %v11202_v2 = vld [vmem:[%s16133_s18 + $0x2f8] sm:$0xff] (!%p12641_p3)  ;;  %v11231_v9 = vld [vmem:[%s16133_s18 + $0x3e0] sm:$0xff] (!%p12641_p3) }
 0x6cd   : > { %v11218_v51 = vld [vmem:[%s16133_s18 + $0x378] sm:$0xff] (!%p12641_p3) }
 0x705   : > { %v10867_v34 = vpop.f32.mrb[52].mxu0 }
 0x706   : > { %v10908_v4 = vpop.f32.mrb[52].mxu1  ;;  %v10868_v17 = vadd.f32 %v10867_v34, %v10827_v50  ;;  %v10869_v37 = vpop.f32.mrb[53].mxu0  ;;  %v11175_v50 = vld [vmem:[%s16133_s18 + $0x220] sm:$0xff] (!%p12641_p3)  ;;  %v11118_v34 = vld [vmem:[%s16133_s18 + $0x58] sm:$0xff] (!%p12641_p3) }
 0x707   : > { %v10910_v18 = vpop.f32.mrb[53].mxu1  ;;  %v10870_v38 = vadd.f32 %v10869_v37, %v10829_v7  ;;  %v10871_v57 = vpop.f32.mrb[54].mxu0  ;;  %v11116_v7 = vld [vmem:[%s16133_s18 + $0x48] sm:$0xff] (!%p12641_p3) }
 0x708   : > { %v10912_v59 = vpop.f32.mrb[54].mxu1  ;;  %v10909_v27 = vadd.f32 %v10908_v4, %v10868_v17  ;;  %v10872_v28 = vpop.f32.mrb[55].mxu0  ;;  %v12723_v4 = vpack.c.bf16 (!%p12641_p3), %v11177_v32, %v11175_v50  ;;  %v12661_v17 = vpack.c.bf16 (!%p12641_p3), %v11118_v34, %v11116_v7  ;;  %v11180_v37 = vld [vmem:[%s16133_s18 + $0x248] sm:$0xff] (!%p12641_p3)  ;;  %v12679_v32 = vpack.c.bf16 (!%p12641_p3), %v11133_v63, %v11131_v19 }
 0x709   : > { %v10913_v11 = vpop.f32.mrb[55].mxu1  ;;  %v10911_v5 = vadd.f32 %v10910_v18, %v10870_v38  ;;  %v11182_v18 = vld [vmem:[%s16133_s18 + $0x258] sm:$0xff] (!%p12641_p3)  ;;  %v11115_v38 = vld [vmem:[%s16133_s18 + $0x40] sm:$0xff] (!%p12641_p3)  ;;  %v11117_v59 = vld [vmem:[%s16133_s18 + $0x50] sm:$0xff] (!%p12641_p3)  ;;  %v12743_v7 = vpack.c.bf16 (!%p12641_p3), %v11197_v41, %v11195_v1  ;;  %v12681_v34 = vpack.c.bf16 (!%p12641_p3), %v11138_v43, %v11136_v58 }
 0x70a   : > { %v12725_v57 = vpack.c.bf16 (!%p12641_p3), %v11182_v18, %v11180_v37  ;;  %v11181_v28 = vld [vmem:[%s16133_s18 + $0x250] sm:$0xff] (!%p12641_p3)  ;;  %v12663_v11 = vpack.c.bf16 (!%p12641_p3), %v11117_v59, %v11115_v38  ;;  %12724 = vmatpush1.bf16.msra.mxu0 (!%p12641_p3), %v12723_v4  ;;  %12662 = vmatprep.subr.bf16.mxu1 (!%p12641_p3), %v12661_v17  ;;  %v11200_v50 = vld [vmem:[%s16133_s18 + $0x2e8] sm:$0xff] (!%p12641_p3)  ;;  %v11135_v4 = vld [vmem:[%s16133_s18 + $0xe0] sm:$0xff] (!%p12641_p3) }
 0x70b   : > { %v11137_v17 = vld [vmem:[%s16133_s18 + $0xf0] sm:$0xff] (!%p12641_p3)  ;;  %v11199_v37 = vld [vmem:[%s16133_s18 + $0x2e0] sm:$0xff] (!%p12641_p3)  ;;  %v12745_v18 = vpack.c.bf16 (!%p12641_p3), %v11202_v2, %v11200_v50  ;;  %v11142_v59 = vld [vmem:[%s16133_s18 + $0x118] sm:$0xff] (!%p12641_p3) }
 0x70c   : > { %12726 = vmatprep.subr.bf16.mxu0 (!%p12641_p3), %v12725_v57  ;;  %12664 = vmatpush1.bf16.msra.mxu1 (!%p12641_p3), %v12663_v11  ;;  %v11201_v38 = vld [vmem:[%s16133_s18 + $0x2f0] sm:$0xff] (!%p12641_p3)  ;;  %v11140_v57 = vld [vmem:[%s16133_s18 + $0x108] sm:$0xff] (!%p12641_p3)  ;;  %v12683_v11 = vpack.c.bf16 (!%p12641_p3), %v11137_v17, %v11135_v4  ;;  %v11158_v1 = vld [vmem:[%s16133_s18 + $0x198] sm:$0xff] (!%p12641_p3) }
 0x70d   : > { %v11156_v63 = vld [vmem:[%s16133_s18 + $0x188] sm:$0xff] (!%p12641_p3)  ;;  %v11222_v58 = vld [vmem:[%s16133_s18 + $0x398] sm:$0xff] (!%p12641_p3)  ;;  %v11155_v4 = vld [vmem:[%s16133_s18 + $0x180] sm:$0xff] (!%p12641_p3) }
 0x70e   : > { %v11220_v41 = vld [vmem:[%s16133_s18 + $0x388] sm:$0xff] (!%p12641_p3)  ;;  %v11157_v17 = vld [vmem:[%s16133_s18 + $0x190] sm:$0xff] (!%p12641_p3) }
 0x745   : > { %v10949_v8 = vpop.f32.mrb[56].mxu0 }
 0x746   : > { %v10990_v12 = vpop.f32.mrb[56].mxu1  ;;  %v10950_v15 = vadd.f32 %v10949_v8, %v10909_v27  ;;  %v10951_v49 = vpop.f32.mrb[57].mxu0  ;;  %v11179_v27 = vld [vmem:[%s16133_s18 + $0x240] sm:$0xff] (!%p12641_p3)  ;;  %v11122_v8 = vld [vmem:[%s16133_s18 + $0x78] sm:$0xff] (!%p12641_p3) }
 0x747   : > { %v10992_v55 = vpop.f32.mrb[57].mxu1  ;;  %v10952_v35 = vadd.f32 %v10951_v49, %v10911_v5  ;;  %v10953_v36 = vpop.f32.mrb[58].mxu0  ;;  %v11120_v5 = vld [vmem:[%s16133_s18 + $0x68] sm:$0xff] (!%p12641_p3) }
 0x748   : > { %v10994_v47 = vpop.f32.mrb[58].mxu1  ;;  %v10991_v48 = vadd.f32 %v10990_v12, %v10950_v15  ;;  %v10954_v16 = vpop.f32.mrb[59].mxu0  ;;  %v11184_v12 = vld [vmem:[%s16133_s18 + $0x268] sm:$0xff] (!%p12641_p3)  ;;  %v12727_v15 = vpack.c.bf16 (!%p12641_p3), %v11181_v28, %v11179_v27  ;;  %v12665_v49 = vpack.c.bf16 (!%p12641_p3), %v11122_v8, %v11120_v5  ;;  %v11121_v36 = vld [vmem:[%s16133_s18 + $0x70] sm:$0xff] (!%p12641_p3)  ;;  %v11206_v28 = vld [vmem:[%s16133_s18 + $0x318] sm:$0xff] (!%p12641_p3)  ;;  %v12747_v5 = vpack.c.bf16 (!%p12641_p3), %v11201_v38, %v11199_v37 }
 0x749   : > { %v10995_v20 = vpop.f32.mrb[59].mxu1  ;;  %v10993_v21 = vadd.f32 %v10992_v55, %v10952_v35  ;;  %v11186_v55 = vld [vmem:[%s16133_s18 + $0x278] sm:$0xff] (!%p12641_p3)  ;;  %v11119_v35 = vld [vmem:[%s16133_s18 + $0x60] sm:$0xff] (!%p12641_p3)  ;;  %v11185_v16 = vld [vmem:[%s16133_s18 + $0x270] sm:$0xff] (!%p12641_p3)  ;;  %v12685_v8 = vpack.c.bf16 (!%p12641_p3), %v11142_v59, %v11140_v57  ;;  %v12765_v38 = vpack.c.bf16 (!%p12641_p3), %v11222_v58, %v11220_v41 }
 0x74a   : > { %v12729_v47 = vpack.c.bf16 (!%p12641_p3), %v11186_v55, %v11184_v12  ;;  %v11124_v20 = vld [vmem:[%s16133_s18 + $0x88] sm:$0xff] (!%p12641_p3)  ;;  %12728 = vmatpush1.bf16.msra.mxu0 (!%p12641_p3), %v12727_v15  ;;  %12666 = vmatprep.subr.bf16.mxu1 (!%p12641_p3), %v12665_v49  ;;  %v11139_v12 = vld [vmem:[%s16133_s18 + $0x100] sm:$0xff] (!%p12641_p3)  ;;  %v11141_v15 = vld [vmem:[%s16133_s18 + $0x110] sm:$0xff] (!%p12641_p3) }
 0x74b   : > { %v11204_v27 = vld [vmem:[%s16133_s18 + $0x308] sm:$0xff] (!%p12641_p3)  ;;  %v11203_v49 = vld [vmem:[%s16133_s18 + $0x300] sm:$0xff] (!%p12641_p3)  ;;  %v11221_v57 = vld [vmem:[%s16133_s18 + $0x390] sm:$0xff] (!%p12641_p3) }
 0x74c   : > { %12730 = vmatprep.subr.bf16.mxu0 (!%p12641_p3), %v12729_v47  ;;  %v12749_v55 = vpack.c.bf16 (!%p12641_p3), %v11206_v28, %v11204_v27  ;;  %v11146_v47 = vld [vmem:[%s16133_s18 + $0x138] sm:$0xff] (!%p12641_p3)  ;;  %v11219_v37 = vld [vmem:[%s16133_s18 + $0x380] sm:$0xff] (!%p12641_p3)  ;;  %v11160_v59 = vld [vmem:[%s16133_s18 + $0x1a8] sm:$0xff] (!%p12641_p3) }
 0x74d   : > { %v11162_v27 = vld [vmem:[%s16133_s18 + $0x1b8] sm:$0xff] (!%p12641_p3) }
 0x785   : > { %v11031_v45 = vpop.f32.mrb[60].mxu0 }
 0x786   : > { %v11072_v22 = vpop.f32.mrb[60].mxu1  ;;  %v11032_v3 = vadd.f32 %v11031_v45, %v10991_v48  ;;  %v11033_v24 = vpop.f32.mrb[61].mxu0  ;;  %v11183_v48 = vld [vmem:[%s16133_s18 + $0x260] sm:$0xff] (!%p12641_p3)  ;;  %v11188_v45 = vld [vmem:[%s16133_s18 + $0x288] sm:$0xff] (!%p12641_p3) }
 0x787   : > { %v11074_v25 = vpop.f32.mrb[61].mxu1  ;;  %v11034_v54 = vadd.f32 %v11033_v24, %v10993_v21  ;;  %v11035_v56 = vpop.f32.mrb[62].mxu0  ;;  %11090 = sbr.rel (%p12641_p3) target bundleno = 2198 (0x896), region = 93  ;;  %v11126_v21 = vld [vmem:[%s16133_s18 + $0x98] sm:$0xff] (!%p12641_p3)  ;;  %v12731_v24 = vpack.c.bf16 (!%p12641_p3), %v11185_v16, %v11183_v48  ;;  %v11208_v48 = vld [vmem:[%s16133_s18 + $0x328] sm:$0xff] (!%p12641_p3) }
 0x788   : > { %v11076_v29 = vpop.f32.mrb[62].mxu1  ;;  %v11073_v30 = vadd.f32 %v11072_v22, %v11032_v3  ;;  %v11036_v60 = vpop.f32.mrb[63].mxu0  ;;  %v11190_v22 = vld [vmem:[%s16133_s18 + $0x298] sm:$0xff] (!%p12641_p3)  ;;  %v12667_v3 = vpack.c.bf16 (!%p12641_p3), %v11121_v36, %v11119_v35  ;;  %v11187_v56 = vld [vmem:[%s16133_s18 + $0x280] sm:$0xff] (!%p12641_p3)  ;;  %v11205_v35 = vld [vmem:[%s16133_s18 + $0x310] sm:$0xff] (!%p12641_p3) }
 0x789   : > { %v11077_v61 = vpop.f32.mrb[63].mxu1  ;;  %v11075_v31 = vadd.f32 %v11074_v25, %v11034_v54  ;;  %v12669_v25 = vpack.c.bf16 (!%p12641_p3), %v11126_v21, %v11124_v20  ;;  %v11125_v54 = vld [vmem:[%s16133_s18 + $0x90] sm:$0xff] (!%p12641_p3)  ;;  %v12733_v29 = vpack.c.bf16 (!%p12641_p3), %v11190_v22, %v11188_v45  ;;  %v11130_v60 = vld [vmem:[%s16133_s18 + $0xb8] sm:$0xff] (!%p12641_p3)  ;;  %12732 = vmatpush1.bf16.msra.mxu0 (!%p12641_p3), %v12731_v24  ;;  %v11144_v36 = vld [vmem:[%s16133_s18 + $0x128] sm:$0xff] (!%p12641_p3)  ;;  %v12687_v20 = vpack.c.bf16 (!%p12641_p3), %v11141_v15, %v11139_v12 }
 0x78a   : > { %v11081_v40 = vadd.f32 %v11073_v30, %v3493_v26  ;;  %v11123_v26 = vld [vmem:[%s16133_s18 + $0x80] sm:$0xff] (!%p12641_p3)  ;;  %v11189_v30 = vld [vmem:[%s16133_s18 + $0x290] sm:$0xff] (!%p12641_p3)  ;;  %v11192_v61 = vld [vmem:[%s16133_s18 + $0x2a8] sm:$0xff] (!%p12641_p3)  ;;  %12668 = vmatpush1.bf16.msra.mxu1 (!%p12641_p3), %v12667_v3  ;;  %v12751_v21 = vpack.c.bf16 (!%p12641_p3), %v11205_v35, %v11203_v49  ;;  %v12689_v45 = vpack.c.bf16 (!%p12641_p3), %v11146_v47, %v11144_v36  ;;  %v12767_v12 = vpack.c.bf16 (!%p12641_p3), %v11221_v57, %v11219_v37 }
 0x78b   : > { %v11082_v6 = vadd.f32 %v11075_v31, %v3494_v23  ;;  %v11128_v23 = vld [vmem:[%s16133_s18 + $0xa8] sm:$0xff] (!%p12641_p3)  ;;  %v11194_v31 = vld [vmem:[%s16133_s18 + $0x2b8] sm:$0xff] (!%p12641_p3)  ;;  %12670 = vmatprep.subr.bf16.mxu1 (!%p12641_p3), %v12669_v25  ;;  %12734 = vmatprep.subr.bf16.mxu0 (!%p12641_p3), %v12733_v29  ;;  %v11143_v22 = vld [vmem:[%s16133_s18 + $0x120] sm:$0xff] (!%p12641_p3)  ;;  %v12705_v15 = vpack.c.bf16 (!%p12641_p3), %v11162_v27, %v11160_v59 }
 0x78c   : > { %11085 = vst [vmem:[#allocation2 + $0x10] sm:$0xff] %v11081_v40  ;;  %v12671_v40 = vpack.c.bf16 (!%p12641_p3), %v11125_v54, %v11123_v26  ;;  %v12673_v62 = vpack.c.bf16 (!%p12641_p3), %v11130_v60, %v11128_v23  ;;  %v12737_v0 = vpack.c.bf16 (!%p12641_p3), %v11194_v31, %v11192_v61  ;;  %v11210_v16 = vld [vmem:[%s16133_s18 + $0x338] sm:$0xff] (!%p12641_p3)  ;;  %v11145_v3 = vld [vmem:[%s16133_s18 + $0x130] sm:$0xff] (!%p12641_p3)  ;;  %v11207_v24 = vld [vmem:[%s16133_s18 + $0x320] sm:$0xff] (!%p12641_p3) }
 0x78d   : > { %11086 = vst [vmem:[#allocation2 + $0x18] sm:$0xff] %v11082_v6  ;;  %v12735_v6 = vpack.c.bf16 (!%p12641_p3), %v11189_v30, %v11187_v56  ;;  %v12753_v25 = vpack.c.bf16 (!%p12641_p3), %v11210_v16, %v11208_v48  ;;  %v11209_v26 = vld [vmem:[%s16133_s18 + $0x330] sm:$0xff] (!%p12641_p3)  ;;  %v11148_v54 = vld [vmem:[%s16133_s18 + $0x148] sm:$0xff] (!%p12641_p3)  ;;  %v11150_v56 = vld [vmem:[%s16133_s18 + $0x158] sm:$0xff] (!%p12641_p3)  ;;  %v12691_v23 = vpack.c.bf16 (!%p12641_p3), %v11145_v3, %v11143_v22 }
 0x78e   : > { %12672 = vmatpush1.bf16.msra.mxu1 %v12671_v40  ;;  %v11212_v29 = vld [vmem:[%s16133_s18 + $0x348] sm:$0xff]  ;;  %v11214_v30 = vld [vmem:[%s16133_s18 + $0x358] sm:$0xff]  ;;  %v12755_v60 = vpack.c.bf16 %v11209_v26, %v11207_v24  ;;  %v12693_v61 = vpack.c.bf16 %v11150_v56, %v11148_v54  ;;  %v11147_v31 = vld [vmem:[%s16133_s18 + $0x140] sm:$0xff] }
 0x78f   : > { %12736 = vmatpush1.bf16.msra.mxu0 %v12735_v6  ;;  %12674 = vmatprep.subr.bf16.mxu1 %v12673_v62  ;;  %v11149_v40 = vld [vmem:[%s16133_s18 + $0x150] sm:$0xff]  ;;  %v11211_v6 = vld [vmem:[%s16133_s18 + $0x340] sm:$0xff]  ;;  %v12757_v62 = vpack.c.bf16 %v11214_v30, %v11212_v29  ;;  %v11164_v48 = vld [vmem:[%s16133_s18 + $0x1c8] sm:$0xff] }
 0x790   : > { %12738 = vmatprep.subr.bf16.mxu0 %v12737_v0  ;;  %v11216_v0 = vld [vmem:[%s16133_s18 + $0x368] sm:$0xff]  ;;  %v12695_v52 = vpack.c.bf16 %v11149_v40, %v11147_v31  ;;  %v12759_v13 = vpack.c.bf16 %v11213_v33, %v11211_v6  ;;  %v11159_v49 = vld [vmem:[%s16133_s18 + $0x1a0] sm:$0xff]  ;;  %v11225_v47 = vld [vmem:[%s16133_s18 + $0x3b0] sm:$0xff] }
 0x791   : > { %v12761_v19 = vpack.c.bf16 %v11218_v51, %v11216_v0  ;;  %v11223_v35 = vld [vmem:[%s16133_s18 + $0x3a0] sm:$0xff]  ;;  %v11166_v16 = vld [vmem:[%s16133_s18 + $0x1d8] sm:$0xff]  ;;  %v11229_v56 = vld [vmem:[%s16133_s18 + $0x3d0] sm:$0xff] }
 0x792   : > { %12676 = vmatpush1.bf16.msra.mxu1 %v12675_v42  ;;  %v11153_v42 = vld [vmem:[%s16133_s18 + $0x170] sm:$0xff]  ;;  %v12771_v22 = vpack.c.bf16 %v11225_v47, %v11223_v35  ;;  %v12709_v3 = vpack.c.bf16 %v11166_v16, %v11164_v48  ;;  %v11163_v24 = vld [vmem:[%s16133_s18 + $0x1c0] sm:$0xff]  ;;  %v11168_v29 = vld [vmem:[%s16133_s18 + $0x1e8] sm:$0xff] }
 0x793   : > { %12740 = vmatpush1.bf16.msra.mxu0 %v12739_v46  ;;  %12678 = vmatprep.subr.bf16.mxu1 %v12677_v44  ;;  %v11215_v46 = vld [vmem:[%s16133_s18 + $0x360] sm:$0xff]  ;;  %v11217_v44 = vld [vmem:[%s16133_s18 + $0x370] sm:$0xff]  ;;  %v12699_v2 = vpack.c.bf16 %v11153_v42, %v11151_v10  ;;  %v11170_v30 = vld [vmem:[%s16133_s18 + $0x1f8] sm:$0xff] }
 0x794   : > { %12742 = vmatprep.subr.bf16.mxu0 %v12741_v39  ;;  %v11092_v39 = vld [vmem:[#allocation2 + $0x8] sm:$0xff]  ;;  %v11094_v50 = vld [vmem:[#allocation2 + $0x18] sm:$0xff]  ;;  %v12713_v40 = vpack.c.bf16 %v11170_v30, %v11168_v29  ;;  %v11091_v33 = vld [vmem:[#allocation2] sm:$0xff] }
 0x795   : > { %vm11096_vm0 = vcmp.gt.f32.partialorder %v11092_v39, 0.0  ;;  %v11100_v43 = vmul.f32 0.2, %v11092_v39  ;;  %vm11098_vm1 = vcmp.gt.f32.partialorder %v11094_v50, 0.0  ;;  %v11227_v26 = vld [vmem:[%s16133_s18 + $0x3c0] sm:$0xff]  ;;  %v11233_v0 = vld [vmem:[%s16133_s18 + $0x3f0] sm:$0xff] }
 0x796   : > { %12680 = vmatpush1.bf16.msra.mxu1 %v12679_v32  ;;  %v11102_v32 = vmul.f32 0.2, %v11094_v50  ;;  %v12775_v31 = vpack.c.bf16 %v11229_v56, %v11227_v26  ;;  %v11167_v6 = vld [vmem:[%s16133_s18 + $0x1e0] sm:$0xff]  ;;  %v11093_v51 = vld [vmem:[#allocation2 + $0x10] sm:$0xff]  ;;  %v11099_v10 = vmul.f32 0.2, %v11091_v33 }
 0x797   : > { %12744 = vmatpush1.bf16.msra.mxu0 %v12743_v7  ;;  %12682 = vmatprep.subr.bf16.mxu1 %v12681_v34  ;;  %v12763_v7 = vpack.c.bf16 %v11217_v44, %v11215_v46  ;;  %v12701_v34 = vpack.c.bf16 %v11158_v1, %v11156_v63  ;;  %vm11095_vm2 = vcmp.gt.f32.partialorder %v11091_v33, 0.0  ;;  %vm11097_vm3 = vcmp.gt.f32.partialorder %v11093_v51, 0.0 }
 0x798   : > { %12746 = vmatprep.subr.bf16.mxu0 %v12745_v18  ;;  %v11104_v18 = vsel %vm11096_vm0, %v11092_v39, %v11100_v43  ;;  %v11106_v28 = vsel %vm11098_vm1, %v11094_v50, %v11102_v32  ;;  %v11103_v42 = vsel %vm11095_vm2, %v11091_v33, %v11099_v10 }
 0x799   : > { %11299 = vmatprep.mubr.f32.mxu1 %v11104_v18  ;;  %11370 = vmatprep.mubr.f32.mxu0 %v11106_v28 }
 0x79a   : > { %12684 = vmatpush1.bf16.msra.mxu1 %v12683_v11  ;;  %v11224_v11 = vld [vmem:[%s16133_s18 + $0x3a8] sm:$0xff] }
 0x79b   : > { %12748 = vmatpush1.bf16.msra.mxu0 %v12747_v5  ;;  %12686 = vmatprep.subr.bf16.mxu1 %v12685_v8  ;;  %v11226_v5 = vld [vmem:[%s16133_s18 + $0x3b8] sm:$0xff]  ;;  %v12703_v8 = vpack.c.bf16 %v11157_v17, %v11155_v4 }
 0x79c   : > { %12750 = vmatprep.subr.bf16.mxu0 %v12749_v55  ;;  %v11161_v55 = vld [vmem:[%s16133_s18 + $0x1b0] sm:$0xff]  ;;  %v12769_v36 = vpack.c.bf16 %v11226_v5, %v11224_v11 }
 0x79e   : > { %12688 = vmatpush1.bf16.msra.mxu1 %v12687_v20  ;;  %v11228_v20 = vld [vmem:[%s16133_s18 + $0x3c8] sm:$0xff] }
 0x79f   : > { %12752 = vmatpush1.bf16.msra.mxu0 %v12751_v21  ;;  %12690 = vmatprep.subr.bf16.mxu1 %v12689_v45  ;;  %v11230_v21 = vld [vmem:[%s16133_s18 + $0x3d8] sm:$0xff]  ;;  %v12707_v45 = vpack.c.bf16 %v11161_v55, %v11159_v49 }
 0x7a0   : > { %12754 = vmatprep.subr.bf16.mxu0 %v12753_v25  ;;  %v11165_v25 = vld [vmem:[%s16133_s18 + $0x1d0] sm:$0xff]  ;;  %v12773_v54 = vpack.c.bf16 %v11230_v21, %v11228_v20 }
 0x7a2   : > { %12692 = vmatpush1.bf16.msra.mxu1 %v12691_v23  ;;  %v11232_v23 = vld [vmem:[%s16133_s18 + $0x3e8] sm:$0xff] }
 0x7a3   : > { %12756 = vmatpush1.bf16.msra.mxu0 %v12755_v60  ;;  %12694 = vmatprep.subr.bf16.mxu1 %v12693_v61  ;;  %v11234_v60 = vld [vmem:[%s16133_s18 + $0x3f8] sm:$0xff]  ;;  %v12711_v61 = vpack.c.bf16 %v11165_v25, %v11163_v24 }
 0x7a4   : > { %12758 = vmatprep.subr.bf16.mxu0 %v12757_v62  ;;  %v11169_v62 = vld [vmem:[%s16133_s18 + $0x1f0] sm:$0xff]  ;;  %v12777_v53 = vpack.c.bf16 %v11234_v60, %v11232_v23 }
 0x7a6   : > { %12696 = vmatpush1.bf16.msra.mxu1 %v12695_v52  ;;  %v12715_v52 = vpack.c.bf16 %v11169_v62, %v11167_v6 }
 0x7a7   : > { %12760 = vmatpush1.bf16.msra.mxu0 %v12759_v13  ;;  %12698 = vmatprep.subr.bf16.mxu1 %v12697_v14  ;;  %v12779_v13 = vpack.c.bf16 %v11233_v0, %v11231_v9  ;;  %v11101_v14 = vmul.f32 0.2, %v11093_v51 }
 0x7a8   : > { %12762 = vmatprep.subr.bf16.mxu0 %v12761_v19 }
 0x7a9   : > { %v11105_v46 = vsel %vm11097_vm3, %v11093_v51, %v11101_v14 }
 0x7aa   : > { %12700 = vmatpush1.bf16.msra.mxu1 %v12699_v2 }
 0x7ab   : > { %12764 = vmatpush1.bf16.msra.mxu0 %v12763_v7  ;;  %12702 = vmatprep.subr.bf16.mxu1 %v12701_v34 }
 0x7ac   : > { %12766 = vmatprep.subr.bf16.mxu0 %v12765_v38 }
 0x7ae   : > { %12704 = vmatpush1.bf16.msra.mxu1 %v12703_v8 }
 0x7af   : > { %12768 = vmatpush1.bf16.msra.mxu0 %v12767_v12  ;;  %12706 = vmatprep.subr.bf16.mxu1 %v12705_v15 }
 0x7b0   : > { %12770 = vmatprep.subr.bf16.mxu0 %v12769_v36 }
 0x7b2   : > { %12708 = vmatpush1.bf16.msra.mxu1 %v12707_v45 }
 0x7b3   : > { %12772 = vmatpush1.bf16.msra.mxu0 %v12771_v22  ;;  %12710 = vmatprep.subr.bf16.mxu1 %v12709_v3 }
 0x7b4   : > { %12774 = vmatprep.subr.bf16.mxu0 %v12773_v54 }
 0x7b6   : > { %12712 = vmatpush1.bf16.msra.mxu1 %v12711_v61 }
 0x7b7   : > { %12776 = vmatpush1.bf16.msra.mxu0 %v12775_v31  ;;  %12714 = vmatprep.subr.bf16.mxu1 %v12713_v40 }
 0x7b8   : > { %12778 = vmatprep.subr.bf16.mxu0 %v12777_v53 }
 0x7ba   : > { %12716 = vmatpush1.bf16.msra.mxu1 %v12715_v52 }
 0x7bb   : > { %12780 = vmatpush1.bf16.msra.mxu0 %v12779_v13 }
 0x7bd   : > { %11300 = vmatmul.mubr.f32.vlgmr.msra.gmra.mrb[0].mxu1 %v11103_v42 }
 0x7be   : > { %11371 = vmatmul.mubr.f32.vlgmr.msra.gmra.mrb[0].mxu0 %v11105_v46 }
 0x890   : > { %v11301_v44 = vpop.f32.mrb[0].mxu1 }
 0x891   : > { %v11372_v19 = vpop.f32.mrb[0].mxu0  ;;  %v11303_v63 = vpop.f32.mrb[1].mxu1 }
 0x892   : > { %v11373_v1 = vadd.f32 %v11372_v19, %v11301_v44  ;;  %v11374_v39 = vpop.f32.mrb[1].mxu0 }
 0x893   : > { %v11375_v41 = vadd.f32 %v11374_v39, %v11303_v63 }
 0x894   : > { %11377 = vst [vmem:[%s16135_s28] sm:$0xff] %v11373_v1 }
 0x895   : > { %11378 = vst [vmem:[%s16135_s28 + $0x8] sm:$0xff] %v11375_v41 }
 0x896 PF: > { %s17712_s23 = sld [smem:[#allocation17_spill]]  ;;  %s17713_s14 = sld [smem:[#allocation23_spill]] }
 0x897   : > { %s17714_s7 = sld [smem:[#allocation26_spill]]  ;;  %s11394_s30 = sshll.u32 %s16135_s28, 4  ;;  %s11395_s30 = int_to_ptr.vmem [resolvable:$true] %s11394_s30 }
 0x898   : > { %s11380_s8 = scalar_lea.sflag [#allocation5], %s16122_s6  ;;  %s14586_s4 = scalar_lea.vmem %s11395_s30, 256 }
 0x899   : > { %p14587_p8 = scmp.ne.s32.totalorder %s11395_s30, %s14586_s4  ;;  %s14767_s12 = smov [#allocation10]  }
 0x89a   : > { %s14590_s24 = sshll.u32 %s14767_s12, 4  ;;  %s14591_s24 = int_to_ptr.vmem [resolvable:$false] %s14590_s24 }
 0x89b   : > { %s14592_s9 = scalar_lea.vmem %s14591_s24, 512  ;;  %p14593_p10 = scmp.lt.s32.totalorder %s11395_s30, %s14591_s24 }
 0x89c   : > { %s12652_s0 = sshll.u32 %s17712_s23, 8  ;;  %p17715_p12 = scmp.ne.s32.totalorder %s17713_s14, 0 }
 0x89d   : > { %s17592_s22 = scalar_lea.hbm %s17714_s7, %s12652_s0  ;;  %p14594_p4 = scmp.lt.s32.totalorder %s14592_s9, %s14586_s4 }
 0x89e   : > { %p14588_p6 = pnand %p14587_p8, %p17715_p12 }
 0x89f   : > { %p14595_p2 = por %p14594_p4, %p14593_p10 }
 0x8a0   : > { %p14589_p13 = pneg %p14588_p6 }
 0x8a2   : > { %p14596_p5 = pnand %p14595_p2, %p14589_p13 }
 0x8a4   : > { %14599 = shalt.err (!%p14596_p5)
}
 0x8a5   : > { %s14600_s6 = scalar_lea.hbm %s17592_s22, 256  ;;  %s14604_s15 = scalar_lea.hbm %s17714_s7, 512 }
 0x8a6   : > { %p14601_p7 = scmp.ne.s32.totalorder %s17592_s22, %s14600_s6  ;;  %p14605_p0 = scmp.lt.u32.totalorder %s17592_s22, %s17714_s7 }
 0x8a7   : > { %p14606_p9 = scmp.lt.u32.totalorder %s14604_s15, %s14600_s6  ;;  %p14608_p8 = scmp.lt.u32.totalorder %s14600_s6, %s17592_s22 }
 0x8a8   : > { %p14602_p11 = pnand %p14601_p7, %p17715_p12 }
 0x8a9   : > { %p14607_p3 = por %p14606_p9, %p14605_p0 }
 0x8aa   : > { %p14603_p1 = pneg %p14602_p11 }
 0x8ab   : > { %p14609_p6 = por %p14608_p8, %p14607_p3 }
 0x8ad   : > { %p14610_p13 = pnand %p14609_p6, %p14603_p1 }
 0x8af   : > { %14613 = shalt.err (!%p14610_p13)
}
 0x8b0   : > { %12789 = dma.vmem_to_hbm [thread:$0]  (%p17715_p12), %s11395_s30, 256, %s17592_s22, %s11380_s8  }
 0x8b1 PF: > { %s17716_s5 = sld [smem:[#allocation14_spill]]  ;;  %s17717_s11 = sld [smem:[#allocation24_spill]] }
 0x8b2   : > { %p12795_p10 = scmp.ge.s32.totalorder %s14744_s27, 2 }
 0x8b7   : > { %s11406_s23 = sand.u32 1, %s17716_s5   ;;  %p17718_p4 = scmp.ne.s32.totalorder %s17717_s11, 0 }
 0x8b8   : > { %s11407_s0 = scalar_lea.sflag [#allocation5], %s11406_s23 }
 0x8b9   : > { %p12792_p2 = pnand %p12795_p10, %p17718_p4 }
 0x8bb   : > { %14691 = dma.done.wait (!%p12792_p2), %s11407_s0, 256  }
 0x8bc   : > { %14693 = vsyncadd (!%p12792_p2), %s11407_s0, 4294967040  ;;  %s23_s27 = sadd.s32 1, %s14744_s27   ;;  %s17720_s14 = sld [smem:[#allocation22_spill]] }
 0x8bd   : > { %p17618_p5 = scmp.ge.s32.totalorder %s23_s27, 10   ;;  %s17721_s13 = sld [smem:[#allocation21_spill]] }
 0x8be   : > { %s17722_s22 = sld [smem:[#allocation15_spill]]  ;;  %s17723_s30 = sld [smem:[#allocation20_spill]] }
 0x8bf   : > { %s17724_s8 = sld [smem:[#allocation18_spill]]  ;;  %s17725_s4 = sld [smem:[#allocation19_spill]] }
 0x8c0   : > { %s17726_s15 = smov %s14700_s16  ;;  %s17727_s16 = smov %s14704_s17 }
 0x8c1   : > { %s17729_s18 = smov %s14712_s19  ;;  %s17731_s20 = smov %s14720_s21 }
 0x8c2   : > { %s17728_s17 = smov %s17720_s14  ;;  %s17734_s23 = smov %s14736_s25 }
 0x8c3   : > { %s17730_s19 = smov %s17721_s13  ;;  %s17735_s24 = smov %s14740_s26 }
 0x8c4   : > { %s17732_s21 = smov %s17722_s22  ;;  %s17733_s22 = smov %s17723_s30 }
 0x8c5   : > { %s17736_s25 = smov %s17724_s8  ;;  %s17737_s26 = smov %s17725_s4 }
 0x8c6   :  { %22 = sbr.rel (!%p17618_p5) target bundleno = 15 (0xf), region = 171 }
 0x8cd   :  { %11412 = vsyncpa [#allocation4], 1 }
 0x8ce   :  { %11414 = vsyncpa [#allocation4 + $0x1], 1 }
 0x8cf   :  { %11415 = vsyncpa [#allocation8], 1 }
 0x8d0   :  { %11417 = vsyncpa [#allocation8 + $0x1], 1 }
 0x8d1   :  { %11418 = vsyncpa [#allocation5], 1 }
 0x8d2   :  { %11420 = vsyncpa [#allocation5 + $0x1], 1 }

</bundles_post_ra>
